<compile_context>
chip_gen: v7x
topology: tpu7x:2x2x1
jax: 0.10.0
libtpu: 0.0.40
codegen_flags: <defaults>
</compile_context>

<pallas_src>
import jax
import jax.numpy as jnp
from jax.experimental import pallas as pl
from jax.experimental.pallas import tpu as pltpu

# ----------------------------- config ---------------------------------------
NUM_FEATURES = 1        # node vocabulary size (Embedding rows)
NUM_CLASSES  = 6
NUM_LAYERS   = 5
EMB_DIM      = 128      # lane-friendly stand-in for 300
EDGE_DIM     = 7
HID_DIM      = EMB_DIM // 2
HID_PAD      = 128      # lane-dense classifier hidden width
OUT_PAD      = 128      # lane-dense classifier output slab width
BN_EPS       = 1e-5

N_NODES  = 128          # >=128 rows keeps the MXU M dimension filled
N_EDGES  = 256
N_GRAPHS = 8


# ----------------------------- kernel ---------------------------------------
def gine_kernel(x_ref, e_ref, s_ref, dt_ref, memb_ref, invn_ref,
                w_ref, vec_ref, cls_w_ref, cls_b_ref, eps_ref, out_ref):
    f32 = jnp.float32
    bf16 = jnp.bfloat16
    n = x_ref.shape[0]
    emb = x_ref.shape[1]

    # Hoisted once (not per-layer): column-mean row for BN stats on the MXU.
    mean_row = jnp.full((1, n), 1.0 / n, f32)

    def bn(h, gamma, beta):
        # Fused moments: single [1,n]@[n,2*emb] matmul -> [mu | E[h^2]].
        stats = jnp.dot(mean_row, jnp.concatenate([h, h * h], axis=1),
                        preferred_element_type=f32)
        mu = stats[:, :emb]
        var = jnp.maximum(stats[:, emb:] - mu * mu, 0.0)   # f32, clamp cancellation
        return gamma * (h - mu) * jax.lax.rsqrt(var + BN_EPS) + beta

    x = x_ref[...]            # [N, emb] f32 (loop carry)

    for i in range(NUM_LAYERS):                            # static unroll
        vecs = vec_ref[i]                                  # [8, emb] f32 slab
        b1, g1, bt1 = vecs[0:1], vecs[1:2], vecs[2:3]
        b2, go, bo = vecs[3:4], vecs[4:5], vecs[5:6]

        # GINEConv message + sum aggregation (bf16 MXU inputs, f32 accumulate).
        # s/dt/e read from VMEM refs per layer: short vreg live ranges.
        msg = jnp.maximum(
            jnp.dot(s_ref[...], x.astype(bf16), preferred_element_type=f32)
            + e_ref[...], 0.0)
        aggr = jnp.dot(dt_ref[...], msg.astype(bf16), preferred_element_type=f32)
        h = (1.0 + eps_ref[i]) * x + aggr

        # inner MLP: Linear -> BN -> ReLU -> Linear
        h = jnp.dot(h.astype(bf16), w_ref[i, 0], preferred_element_type=f32) + b1
        h = jnp.maximum(bn(h, g1, bt1), 0.0)
        h = jnp.dot(h.astype(bf16), w_ref[i, 1], preferred_element_type=f32) + b2

        # outer BatchNorm + ReLU (dropout p=0.0 -> identity)
        x = jnp.maximum(bn(h, go, bo), 0.0)

    # global mean pool: exact one-hot sum on the MXU, then f32 1/count scale.
    pooled = (jnp.dot(memb_ref[...], x.astype(bf16), preferred_element_type=f32)
              * invn_ref[...])
    # classifier (hidden and output lane-dense at 128)
    z = jnp.maximum(
        jnp.dot(pooled.astype(bf16), cls_w_ref[0], preferred_element_type=f32)
        + cls_b_ref[0:1, :], 0.0)
    out_ref[...] = (jnp.dot(z.astype(bf16), cls_w_ref[1], preferred_element_type=f32)
                    + cls_b_ref[1:2, :])


def gine_forward(params, x_emb, e_enc, S, DT, memb, invn):
    bf16 = jnp.bfloat16
    vmem = pl.BlockSpec(memory_space=pltpu.MemorySpace.VMEM)
    smem = pl.BlockSpec(memory_space=pltpu.MemorySpace.SMEM)

    # --- packed parameter slabs (fewer DMA descriptors, sublane aligned) ----
    w_slab = jnp.stack([params["W1"], params["W2"]], axis=1).astype(bf16)  # [L,2,emb,emb]

    vec_slab = jnp.zeros((NUM_LAYERS, 8, EMB_DIM), jnp.float32)
    for r, name in enumerate(("b1", "g1", "bt1", "b2", "go", "bo")):
        vec_slab = vec_slab.at[:, r, :].set(params[name][:, 0, :])         # [L,8,emb]

    # classifier: pad hidden 64->128 and classes 6->128, pack into two slabs
    wc1p = jnp.zeros((EMB_DIM, HID_PAD), jnp.float32).at[:, :HID_DIM].set(params["Wc1"])
    wc2p = jnp.zeros((HID_PAD, OUT_PAD), jnp.float32)
    wc2p = wc2p.at[:HID_DIM, :NUM_CLASSES].set(params["Wc2"])
    cls_w = jnp.stack([wc1p, wc2p]).astype(bf16)                           # [2,128,128]
    cls_b = jnp.zeros((8, OUT_PAD), jnp.float32)
    cls_b = cls_b.at[0, :HID_DIM].set(params["bc1"][0])
    cls_b = cls_b.at[1, :NUM_CLASSES].set(params["bc2"][0])                # [8,128]

    args = (x_emb, e_enc, S.astype(bf16), DT.astype(bf16), memb.astype(bf16),
            invn, w_slab, vec_slab, cls_w, cls_b, params["eps"])
    in_specs = [vmem] * (len(args) - 1) + [smem]

    n, emb = x_emb.shape
    e_cnt = e_enc.shape[0]
    g = memb.shape[0]
    flops = (NUM_LAYERS * (2 * e_cnt * n * emb          # S @ x
                           + 2 * n * e_cnt * emb        # DT @ msg
                           + 2 * 2 * n * emb * emb      # two MLP matmuls
                           + 2 * 2 * n * 2 * emb)       # two fused BN stat matmuls
             + 2 * g * n * emb                          # pool
             + 2 * g * emb * HID_PAD + 2 * g * HID_PAD * OUT_PAD)
    bytes_in = sum(int(a.size) * a.dtype.itemsize for a in args)
    bytes_accessed = bytes_in + g * OUT_PAD * 4
    cost = pl.CostEstimate(flops=int(flops),
                           transcendentals=int(NUM_LAYERS * 2 * emb),
                           bytes_accessed=int(bytes_accessed))

    # VMEM budget from actual footprint (+ headroom for in-kernel temporaries),
    # rather than a flat 32 MiB.
    vmem_limit = min(64 * 1024 * 1024, max(8 * 1024 * 1024, 4 * bytes_accessed))

    out = pl.pallas_call(
        gine_kernel,
        out_shape=jax.ShapeDtypeStruct((g, OUT_PAD), jnp.float32),
        in_specs=in_specs,
        out_specs=vmem,
        compiler_params=pltpu.CompilerParams(vmem_limit_bytes=int(vmem_limit)),
        cost_estimate=cost,
    )(*args)
    return out[:, :NUM_CLASSES]


# ----------------------------- references (pure JAX) -------------------------
def _bn_ref(h, g, b):
    mu = h.mean(0, keepdims=True)
    var = ((h - mu) ** 2).mean(0, keepdims=True)
    return g * (h - mu) / jnp.sqrt(var + BN_EPS) + b


def ref_forward_policy(params, x_emb, e_enc, S, DT, memb, invn):
    """Same bf16-input / f32-accumulate precision policy as the kernel."""
    bf16, f32 = jnp.bfloat16, jnp.float32
    dot = lambda a, b: jnp.dot(a.astype(bf16), b.astype(bf16),
                               preferred_element_type=f32)
    x = x_emb
    for i in range(NUM_LAYERS):
        msg = jax.nn.relu(dot(S, x) + e_enc)
        aggr = dot(DT, msg)
        h = (1.0 + params["eps"][i]) * x + aggr
        h = dot(h, params["W1"][i]) + params["b1"][i]
        h = jax.nn.relu(_bn_ref(h, params["g1"][i], params["bt1"][i]))
        h = dot(h, params["W2"][i]) + params["b2"][i]
        x = jax.nn.relu(_bn_ref(h, params["go"][i], params["bo"][i]))
    pooled = dot(memb, x) * invn
    z = jax.nn.relu(dot(pooled, params["Wc1"]) + params["bc1"])
    return dot(z, params["Wc2"]) + params["bc2"]


def ref_forward_f32(params, x_emb, e_enc, S, DT, memb, invn):
    """Full-f32 reference (semantics of the original PyTorch module)."""
    P = memb * invn
    x = x_emb
    for i in range(NUM_LAYERS):
        msg = jax.nn.relu(S @ x + e_enc)
        aggr = DT @ msg
        h = (1.0 + params["eps"][i]) * x + aggr
        h = h @ params["W1"][i] + params["b1"][i]
        h = jax.nn.relu(_bn_ref(h, params["g1"][i], params["bt1"][i]))
        h = h @ params["W2"][i] + params["b2"][i]
        x = jax.nn.relu(_bn_ref(h, params["go"][i], params["bo"][i]))
    pooled = P @ x
    z = jax.nn.relu(pooled @ params["Wc1"] + params["bc1"])
    return z @ params["Wc2"] + params["bc2"]


# ----------------------------- setup -----------------------------------------
def init_params(key):
    ks = iter(jax.random.split(key, 32))
    def lin(k, fan_in, shape):
        bound = 1.0 / jnp.sqrt(fan_in)
        return jax.random.uniform(k, shape, jnp.float32, -bound, bound)
    p = {}
    p["emb_table"] = jax.random.normal(next(ks), (NUM_FEATURES, EMB_DIM), jnp.float32)
    p["We"] = lin(next(ks), EDGE_DIM, (EDGE_DIM, EMB_DIM))
    p["be"] = lin(next(ks), EDGE_DIM, (1, EMB_DIM))
    p["W1"] = lin(next(ks), EMB_DIM, (NUM_LAYERS, EMB_DIM, EMB_DIM))
    p["b1"] = lin(next(ks), EMB_DIM, (NUM_LAYERS, 1, EMB_DIM))
    p["W2"] = lin(next(ks), EMB_DIM, (NUM_LAYERS, EMB_DIM, EMB_DIM))
    p["b2"] = lin(next(ks), EMB_DIM, (NUM_LAYERS, 1, EMB_DIM))
    p["g1"] = jnp.ones((NUM_LAYERS, 1, EMB_DIM), jnp.float32)      # BN affine init
    p["bt1"] = jnp.zeros((NUM_LAYERS, 1, EMB_DIM), jnp.float32)
    p["go"] = jnp.ones((NUM_LAYERS, 1, EMB_DIM), jnp.float32)
    p["bo"] = jnp.zeros((NUM_LAYERS, 1, EMB_DIM), jnp.float32)
    p["eps"] = jnp.zeros((NUM_LAYERS,), jnp.float32)               # GINEConv eps init
    p["Wc1"] = lin(next(ks), EMB_DIM, (EMB_DIM, HID_DIM))
    p["bc1"] = lin(next(ks), EMB_DIM, (1, HID_DIM))
    p["Wc2"] = lin(next(ks), HID_DIM, (HID_DIM, NUM_CLASSES))
    p["bc2"] = lin(next(ks), HID_DIM, (1, NUM_CLASSES))
    return p


if __name__ == "__main__":
    key = jax.random.PRNGKey(0)
    kp, kg, ke = jax.random.split(key, 3)
    params = init_params(kp)

    # synthetic graph batch: node indices (all < NUM_FEATURES=1), random edges,
    # edge attributes, and graph membership
    node_idx = jnp.zeros((N_NODES, 1), jnp.int32)                  # data.x
    src = jax.random.randint(kg, (N_EDGES,), 0, N_NODES)
    dst = jax.random.randint(jax.random.fold_in(kg, 1), (N_EDGES,), 0, N_NODES)
    edge_attr = jax.random.normal(ke, (N_EDGES, EDGE_DIM), jnp.float32)
    batch = jnp.repeat(jnp.arange(N_GRAPHS, dtype=jnp.int32), N_NODES // N_GRAPHS)

    # XLA-side glue: embedding lookup, edge encoder (K=7 wastes MXU lanes
    # in-kernel), dense incidence / membership matrices and 1/count scales.
    x_emb = params["emb_table"][node_idx[:, 0]]                    # node_encoder
    e_enc = edge_attr @ params["We"] + params["be"]                # edge_encoder
    S = jax.nn.one_hot(src, N_NODES, dtype=jnp.float32)            # [E, N] gather x_j
    DT = jax.nn.one_hot(dst, N_NODES, dtype=jnp.float32).T         # [N, E] scatter-sum
    memb = jax.nn.one_hot(batch, N_GRAPHS, dtype=jnp.float32).T    # [G, N]
    counts = memb.sum(axis=1, keepdims=True)
    invn = 1.0 / jnp.maximum(counts, 1.0)                          # [G, 1] f32 mean scale

    out = gine_forward(params, x_emb, e_enc, S, DT, memb, invn)
    out = jax.block_until_ready(out)
    assert out.shape == (N_GRAPHS, NUM_CLASSES)

    # strict check vs. a reference using the same bf16-input precision policy
    ref_p = ref_forward_policy(params, x_emb, e_enc, S, DT, memb, invn)
    assert jnp.allclose(out, ref_p, atol=2e-3, rtol=2e-3), (out, ref_p)

    # sanity check vs. the full-f32 module semantics (loose: bf16 MXU inputs)
    ref_f = ref_forward_f32(params, x_emb, e_enc, S, DT, memb, invn)
    assert jnp.allclose(out, ref_f, atol=1e-1, rtol=1e-1), (out, ref_f)

    print("KERNEL_OK")
</pallas_src>

<mosaic_0001>
module attributes {stable_mosaic.version = 11 : i64} {
  func.func @gine_kernel(%arg0: memref<128x128xf32, #tpu.memory_space<vmem>>, %arg1: memref<256x128xf32, #tpu.memory_space<vmem>>, %arg2: memref<256x128xbf16, #tpu.memory_space<vmem>>, %arg3: memref<128x256xbf16, #tpu.memory_space<vmem>>, %arg4: memref<8x128xbf16, #tpu.memory_space<vmem>>, %arg5: memref<8x1xf32, #tpu.memory_space<vmem>>, %arg6: memref<5x2x128x128xbf16, #tpu.memory_space<vmem>>, %arg7: memref<5x8x128xf32, #tpu.memory_space<vmem>>, %arg8: memref<2x128x128xbf16, #tpu.memory_space<vmem>>, %arg9: memref<8x128xf32, #tpu.memory_space<vmem>>, %arg10: memref<5xf32, #tpu.memory_space<smem>>, %arg11: memref<8x128xf32, #tpu.memory_space<vmem>>) attributes {dimension_semantics = [], scalar_prefetch = 0 : i64, scratch_operands = 0 : i64, tpu.core_type = #tpu.core_type<tc>} {
    %cst = arith.constant 7.812500e-03 : f32
    %0 = vector.broadcast %cst : f32 to vector<1x128xf32>
    %c0 = arith.constant 0 : index
    %c0_0 = arith.constant 0 : index
    %1 = vector.load %arg0[%c0, %c0_0] : memref<128x128xf32, #tpu.memory_space<vmem>>, vector<128x128xf32>
    %c0_1 = arith.constant 0 : index
    %c0_2 = arith.constant 0 : index
    %c0_3 = arith.constant 0 : index
    %2 = vector.load %arg7[%c0_1, %c0_2, %c0_3] : memref<5x8x128xf32, #tpu.memory_space<vmem>>, vector<1x8x128xf32>
    %3 = vector.shape_cast %2 : vector<1x8x128xf32> to vector<8x128xf32>
    %4 = vector.extract_strided_slice %3 {offsets = [0, 0], sizes = [1, 128], strides = [1, 1]} : vector<8x128xf32> to vector<1x128xf32>
    %5 = vector.extract_strided_slice %3 {offsets = [1, 0], sizes = [1, 128], strides = [1, 1]} : vector<8x128xf32> to vector<1x128xf32>
    %6 = vector.extract_strided_slice %3 {offsets = [2, 0], sizes = [1, 128], strides = [1, 1]} : vector<8x128xf32> to vector<1x128xf32>
    %7 = vector.extract_strided_slice %3 {offsets = [3, 0], sizes = [1, 128], strides = [1, 1]} : vector<8x128xf32> to vector<1x128xf32>
    %8 = vector.extract_strided_slice %3 {offsets = [4, 0], sizes = [1, 128], strides = [1, 1]} : vector<8x128xf32> to vector<1x128xf32>
    %9 = vector.extract_strided_slice %3 {offsets = [5, 0], sizes = [1, 128], strides = [1, 1]} : vector<8x128xf32> to vector<1x128xf32>
    %c0_4 = arith.constant 0 : index
    %c0_5 = arith.constant 0 : index
    %10 = vector.load %arg2[%c0_4, %c0_5] : memref<256x128xbf16, #tpu.memory_space<vmem>>, vector<256x128xbf16>
    %11 = arith.truncf %1 : vector<128x128xf32> to vector<128x128xbf16>
    %cst_6 = arith.constant dense<0.000000e+00> : vector<256x128xf32>
    %12 = tpu.matmul %10, %11, %cst_6 {dimension_numbers = #tpu.dot_dimension_numbers<[1], [0], [0], [1], [0, 0, 1, 1], [], []>} : vector<256x128xbf16>, vector<128x128xbf16>, vector<256x128xf32> -> vector<256x128xf32>
    %c0_7 = arith.constant 0 : index
    %c0_8 = arith.constant 0 : index
    %13 = vector.load %arg1[%c0_7, %c0_8] : memref<256x128xf32, #tpu.memory_space<vmem>>, vector<256x128xf32>
    %14 = arith.addf %12, %13 : vector<256x128xf32>
    %cst_9 = arith.constant 0.000000e+00 : f32
    %15 = vector.broadcast %cst_9 : f32 to vector<256x128xf32>
    %16 = arith.maximumf %14, %15 : vector<256x128xf32>
    %c0_10 = arith.constant 0 : index
    %c0_11 = arith.constant 0 : index
    %17 = vector.load %arg3[%c0_10, %c0_11] : memref<128x256xbf16, #tpu.memory_space<vmem>>, vector<128x256xbf16>
    %18 = arith.truncf %16 : vector<256x128xf32> to vector<256x128xbf16>
    %cst_12 = arith.constant dense<0.000000e+00> : vector<128x128xf32>
    %19 = tpu.matmul %17, %18, %cst_12 {dimension_numbers = #tpu.dot_dimension_numbers<[1], [0], [0], [1], [0, 0, 1, 1], [], []>} : vector<128x256xbf16>, vector<256x128xbf16>, vector<128x128xf32> -> vector<128x128xf32>
    %c0_13 = arith.constant 0 : index
    %20 = memref.load %arg10[%c0_13] : memref<5xf32, #tpu.memory_space<smem>>
    %cst_14 = arith.constant 1.000000e+00 : f32
    %21 = arith.addf %cst_14, %20 : f32
    %22 = vector.broadcast %21 : f32 to vector<128x128xf32>
    %23 = arith.mulf %22, %1 : vector<128x128xf32>
    %24 = arith.addf %23, %19 : vector<128x128xf32>
    %25 = arith.truncf %24 : vector<128x128xf32> to vector<128x128xbf16>
    %c0_15 = arith.constant 0 : index
    %c0_16 = arith.constant 0 : index
    %c0_17 = arith.constant 0 : index
    %c0_18 = arith.constant 0 : index
    %26 = vector.load %arg6[%c0_15, %c0_16, %c0_17, %c0_18] : memref<5x2x128x128xbf16, #tpu.memory_space<vmem>>, vector<1x1x128x128xbf16>
    %27 = vector.shape_cast %26 : vector<1x1x128x128xbf16> to vector<128x128xbf16>
    %cst_19 = arith.constant dense<0.000000e+00> : vector<128x128xf32>
    %28 = tpu.matmul %25, %27, %cst_19 {dimension_numbers = #tpu.dot_dimension_numbers<[1], [0], [0], [1], [0, 0, 1, 1], [], []>} : vector<128x128xbf16>, vector<128x128xbf16>, vector<128x128xf32> -> vector<128x128xf32>
    %29 = vector.broadcast %4 : vector<1x128xf32> to vector<128x128xf32>
    %30 = arith.addf %28, %29 : vector<128x128xf32>
    %31 = arith.mulf %30, %30 : vector<128x128xf32>
    %32 = tpu.concatenate %30, %31 in 1 : vector<128x128xf32>, vector<128x128xf32> -> vector<128x256xf32>
    %cst_20 = arith.constant dense<0.000000e+00> : vector<1x256xf32>
    %33 = tpu.matmul %0, %32, %cst_20 {dimension_numbers = #tpu.dot_dimension_numbers<[1], [0], [0], [1], [0, 0, 1, 1], [], []>} : vector<1x128xf32>, vector<128x256xf32>, vector<1x256xf32> -> vector<1x256xf32>
    %34 = vector.extract_strided_slice %33 {offsets = [0, 0], sizes = [1, 128], strides = [1, 1]} : vector<1x256xf32> to vector<1x128xf32>
    %35 = vector.extract_strided_slice %33 {offsets = [0, 128], sizes = [1, 128], strides = [1, 1]} : vector<1x256xf32> to vector<1x128xf32>
    %36 = arith.mulf %34, %34 : vector<1x128xf32>
    %37 = arith.subf %35, %36 : vector<1x128xf32>
    %cst_21 = arith.constant 0.000000e+00 : f32
    %38 = vector.broadcast %cst_21 : f32 to vector<1x128xf32>
    %39 = arith.maximumf %37, %38 : vector<1x128xf32>
    %40 = vector.broadcast %34 : vector<1x128xf32> to vector<128x128xf32>
    %41 = arith.subf %30, %40 : vector<128x128xf32>
    %42 = vector.broadcast %5 : vector<1x128xf32> to vector<128x128xf32>
    %43 = arith.mulf %42, %41 : vector<128x128xf32>
    %cst_22 = arith.constant 9.99999974E-6 : f32
    %44 = vector.broadcast %cst_22 : f32 to vector<1x128xf32>
    %45 = arith.addf %39, %44 : vector<1x128xf32>
    %46 = math.rsqrt %45 : vector<1x128xf32>
    %47 = vector.broadcast %46 : vector<1x128xf32> to vector<128x128xf32>
    %48 = arith.mulf %43, %47 : vector<128x128xf32>
    %49 = vector.broadcast %6 : vector<1x128xf32> to vector<128x128xf32>
    %50 = arith.addf %48, %49 : vector<128x128xf32>
    %cst_23 = arith.constant 0.000000e+00 : f32
    %51 = vector.broadcast %cst_23 : f32 to vector<128x128xf32>
    %52 = arith.maximumf %50, %51 : vector<128x128xf32>
    %53 = arith.truncf %52 : vector<128x128xf32> to vector<128x128xbf16>
    %c0_24 = arith.constant 0 : index
    %c1 = arith.constant 1 : index
    %c0_25 = arith.constant 0 : index
    %c0_26 = arith.constant 0 : index
    %54 = vector.load %arg6[%c0_24, %c1, %c0_25, %c0_26] : memref<5x2x128x128xbf16, #tpu.memory_space<vmem>>, vector<1x1x128x128xbf16>
    %55 = vector.shape_cast %54 : vector<1x1x128x128xbf16> to vector<128x128xbf16>
    %cst_27 = arith.constant dense<0.000000e+00> : vector<128x128xf32>
    %56 = tpu.matmul %53, %55, %cst_27 {dimension_numbers = #tpu.dot_dimension_numbers<[1], [0], [0], [1], [0, 0, 1, 1], [], []>} : vector<128x128xbf16>, vector<128x128xbf16>, vector<128x128xf32> -> vector<128x128xf32>
    %57 = vector.broadcast %7 : vector<1x128xf32> to vector<128x128xf32>
    %58 = arith.addf %56, %57 : vector<128x128xf32>
    %59 = arith.mulf %58, %58 : vector<128x128xf32>
    %60 = tpu.concatenate %58, %59 in 1 : vector<128x128xf32>, vector<128x128xf32> -> vector<128x256xf32>
    %cst_28 = arith.constant dense<0.000000e+00> : vector<1x256xf32>
    %61 = tpu.matmul %0, %60, %cst_28 {dimension_numbers = #tpu.dot_dimension_numbers<[1], [0], [0], [1], [0, 0, 1, 1], [], []>} : vector<1x128xf32>, vector<128x256xf32>, vector<1x256xf32> -> vector<1x256xf32>
    %62 = vector.extract_strided_slice %61 {offsets = [0, 0], sizes = [1, 128], strides = [1, 1]} : vector<1x256xf32> to vector<1x128xf32>
    %63 = vector.extract_strided_slice %61 {offsets = [0, 128], sizes = [1, 128], strides = [1, 1]} : vector<1x256xf32> to vector<1x128xf32>
    %64 = arith.mulf %62, %62 : vector<1x128xf32>
    %65 = arith.subf %63, %64 : vector<1x128xf32>
    %cst_29 = arith.constant 0.000000e+00 : f32
    %66 = vector.broadcast %cst_29 : f32 to vector<1x128xf32>
    %67 = arith.maximumf %65, %66 : vector<1x128xf32>
    %68 = vector.broadcast %62 : vector<1x128xf32> to vector<128x128xf32>
    %69 = arith.subf %58, %68 : vector<128x128xf32>
    %70 = vector.broadcast %8 : vector<1x128xf32> to vector<128x128xf32>
    %71 = arith.mulf %70, %69 : vector<128x128xf32>
    %cst_30 = arith.constant 9.99999974E-6 : f32
    %72 = vector.broadcast %cst_30 : f32 to vector<1x128xf32>
    %73 = arith.addf %67, %72 : vector<1x128xf32>
    %74 = math.rsqrt %73 : vector<1x128xf32>
    %75 = vector.broadcast %74 : vector<1x128xf32> to vector<128x128xf32>
    %76 = arith.mulf %71, %75 : vector<128x128xf32>
    %77 = vector.broadcast %9 : vector<1x128xf32> to vector<128x128xf32>
    %78 = arith.addf %76, %77 : vector<128x128xf32>
    %cst_31 = arith.constant 0.000000e+00 : f32
    %79 = vector.broadcast %cst_31 : f32 to vector<128x128xf32>
    %80 = arith.maximumf %78, %79 : vector<128x128xf32>
    %c1_32 = arith.constant 1 : index
    %c0_33 = arith.constant 0 : index
    %c0_34 = arith.constant 0 : index
    %81 = vector.load %arg7[%c1_32, %c0_33, %c0_34] : memref<5x8x128xf32, #tpu.memory_space<vmem>>, vector<1x8x128xf32>
    %82 = vector.shape_cast %81 : vector<1x8x128xf32> to vector<8x128xf32>
    %83 = vector.extract_strided_slice %82 {offsets = [0, 0], sizes = [1, 128], strides = [1, 1]} : vector<8x128xf32> to vector<1x128xf32>
    %84 = vector.extract_strided_slice %82 {offsets = [1, 0], sizes = [1, 128], strides = [1, 1]} : vector<8x128xf32> to vector<1x128xf32>
    %85 = vector.extract_strided_slice %82 {offsets = [2, 0], sizes = [1, 128], strides = [1, 1]} : vector<8x128xf32> to vector<1x128xf32>
    %86 = vector.extract_strided_slice %82 {offsets = [3, 0], sizes = [1, 128], strides = [1, 1]} : vector<8x128xf32> to vector<1x128xf32>
    %87 = vector.extract_strided_slice %82 {offsets = [4, 0], sizes = [1, 128], strides = [1, 1]} : vector<8x128xf32> to vector<1x128xf32>
    %88 = vector.extract_strided_slice %82 {offsets = [5, 0], sizes = [1, 128], strides = [1, 1]} : vector<8x128xf32> to vector<1x128xf32>
    %c0_35 = arith.constant 0 : index
    %c0_36 = arith.constant 0 : index
    %89 = vector.load %arg2[%c0_35, %c0_36] : memref<256x128xbf16, #tpu.memory_space<vmem>>, vector<256x128xbf16>
    %90 = arith.truncf %80 : vector<128x128xf32> to vector<128x128xbf16>
    %cst_37 = arith.constant dense<0.000000e+00> : vector<256x128xf32>
    %91 = tpu.matmul %89, %90, %cst_37 {dimension_numbers = #tpu.dot_dimension_numbers<[1], [0], [0], [1], [0, 0, 1, 1], [], []>} : vector<256x128xbf16>, vector<128x128xbf16>, vector<256x128xf32> -> vector<256x128xf32>
    %c0_38 = arith.constant 0 : index
    %c0_39 = arith.constant 0 : index
    %92 = vector.load %arg1[%c0_38, %c0_39] : memref<256x128xf32, #tpu.memory_space<vmem>>, vector<256x128xf32>
    %93 = arith.addf %91, %92 : vector<256x128xf32>
    %cst_40 = arith.constant 0.000000e+00 : f32
    %94 = vector.broadcast %cst_40 : f32 to vector<256x128xf32>
    %95 = arith.maximumf %93, %94 : vector<256x128xf32>
    %c0_41 = arith.constant 0 : index
    %c0_42 = arith.constant 0 : index
    %96 = vector.load %arg3[%c0_41, %c0_42] : memref<128x256xbf16, #tpu.memory_space<vmem>>, vector<128x256xbf16>
    %97 = arith.truncf %95 : vector<256x128xf32> to vector<256x128xbf16>
    %cst_43 = arith.constant dense<0.000000e+00> : vector<128x128xf32>
    %98 = tpu.matmul %96, %97, %cst_43 {dimension_numbers = #tpu.dot_dimension_numbers<[1], [0], [0], [1], [0, 0, 1, 1], [], []>} : vector<128x256xbf16>, vector<256x128xbf16>, vector<128x128xf32> -> vector<128x128xf32>
    %c1_44 = arith.constant 1 : index
    %99 = memref.load %arg10[%c1_44] : memref<5xf32, #tpu.memory_space<smem>>
    %cst_45 = arith.constant 1.000000e+00 : f32
    %100 = arith.addf %cst_45, %99 : f32
    %101 = vector.broadcast %100 : f32 to vector<128x128xf32>
    %102 = arith.mulf %101, %80 : vector<128x128xf32>
    %103 = arith.addf %102, %98 : vector<128x128xf32>
    %104 = arith.truncf %103 : vector<128x128xf32> to vector<128x128xbf16>
    %c1_46 = arith.constant 1 : index
    %c0_47 = arith.constant 0 : index
    %c0_48 = arith.constant 0 : index
    %c0_49 = arith.constant 0 : index
    %105 = vector.load %arg6[%c1_46, %c0_47, %c0_48, %c0_49] : memref<5x2x128x128xbf16, #tpu.memory_space<vmem>>, vector<1x1x128x128xbf16>
    %106 = vector.shape_cast %105 : vector<1x1x128x128xbf16> to vector<128x128xbf16>
    %cst_50 = arith.constant dense<0.000000e+00> : vector<128x128xf32>
    %107 = tpu.matmul %104, %106, %cst_50 {dimension_numbers = #tpu.dot_dimension_numbers<[1], [0], [0], [1], [0, 0, 1, 1], [], []>} : vector<128x128xbf16>, vector<128x128xbf16>, vector<128x128xf32> -> vector<128x128xf32>
    %108 = vector.broadcast %83 : vector<1x128xf32> to vector<128x128xf32>
    %109 = arith.addf %107, %108 : vector<128x128xf32>
    %110 = arith.mulf %109, %109 : vector<128x128xf32>
    %111 = tpu.concatenate %109, %110 in 1 : vector<128x128xf32>, vector<128x128xf32> -> vector<128x256xf32>
    %cst_51 = arith.constant dense<0.000000e+00> : vector<1x256xf32>
    %112 = tpu.matmul %0, %111, %cst_51 {dimension_numbers = #tpu.dot_dimension_numbers<[1], [0], [0], [1], [0, 0, 1, 1], [], []>} : vector<1x128xf32>, vector<128x256xf32>, vector<1x256xf32> -> vector<1x256xf32>
    %113 = vector.extract_strided_slice %112 {offsets = [0, 0], sizes = [1, 128], strides = [1, 1]} : vector<1x256xf32> to vector<1x128xf32>
    %114 = vector.extract_strided_slice %112 {offsets = [0, 128], sizes = [1, 128], strides = [1, 1]} : vector<1x256xf32> to vector<1x128xf32>
    %115 = arith.mulf %113, %113 : vector<1x128xf32>
    %116 = arith.subf %114, %115 : vector<1x128xf32>
    %cst_52 = arith.constant 0.000000e+00 : f32
    %117 = vector.broadcast %cst_52 : f32 to vector<1x128xf32>
    %118 = arith.maximumf %116, %117 : vector<1x128xf32>
    %119 = vector.broadcast %113 : vector<1x128xf32> to vector<128x128xf32>
    %120 = arith.subf %109, %119 : vector<128x128xf32>
    %121 = vector.broadcast %84 : vector<1x128xf32> to vector<128x128xf32>
    %122 = arith.mulf %121, %120 : vector<128x128xf32>
    %cst_53 = arith.constant 9.99999974E-6 : f32
    %123 = vector.broadcast %cst_53 : f32 to vector<1x128xf32>
    %124 = arith.addf %118, %123 : vector<1x128xf32>
    %125 = math.rsqrt %124 : vector<1x128xf32>
    %126 = vector.broadcast %125 : vector<1x128xf32> to vector<128x128xf32>
    %127 = arith.mulf %122, %126 : vector<128x128xf32>
    %128 = vector.broadcast %85 : vector<1x128xf32> to vector<128x128xf32>
    %129 = arith.addf %127, %128 : vector<128x128xf32>
    %cst_54 = arith.constant 0.000000e+00 : f32
    %130 = vector.broadcast %cst_54 : f32 to vector<128x128xf32>
    %131 = arith.maximumf %129, %130 : vector<128x128xf32>
    %132 = arith.truncf %131 : vector<128x128xf32> to vector<128x128xbf16>
    %c1_55 = arith.constant 1 : index
    %c1_56 = arith.constant 1 : index
    %c0_57 = arith.constant 0 : index
    %c0_58 = arith.constant 0 : index
    %133 = vector.load %arg6[%c1_55, %c1_56, %c0_57, %c0_58] : memref<5x2x128x128xbf16, #tpu.memory_space<vmem>>, vector<1x1x128x128xbf16>
    %134 = vector.shape_cast %133 : vector<1x1x128x128xbf16> to vector<128x128xbf16>
    %cst_59 = arith.constant dense<0.000000e+00> : vector<128x128xf32>
    %135 = tpu.matmul %132, %134, %cst_59 {dimension_numbers = #tpu.dot_dimension_numbers<[1], [0], [0], [1], [0, 0, 1, 1], [], []>} : vector<128x128xbf16>, vector<128x128xbf16>, vector<128x128xf32> -> vector<128x128xf32>
    %136 = vector.broadcast %86 : vector<1x128xf32> to vector<128x128xf32>
    %137 = arith.addf %135, %136 : vector<128x128xf32>
    %138 = arith.mulf %137, %137 : vector<128x128xf32>
    %139 = tpu.concatenate %137, %138 in 1 : vector<128x128xf32>, vector<128x128xf32> -> vector<128x256xf32>
    %cst_60 = arith.constant dense<0.000000e+00> : vector<1x256xf32>
    %140 = tpu.matmul %0, %139, %cst_60 {dimension_numbers = #tpu.dot_dimension_numbers<[1], [0], [0], [1], [0, 0, 1, 1], [], []>} : vector<1x128xf32>, vector<128x256xf32>, vector<1x256xf32> -> vector<1x256xf32>
    %141 = vector.extract_strided_slice %140 {offsets = [0, 0], sizes = [1, 128], strides = [1, 1]} : vector<1x256xf32> to vector<1x128xf32>
    %142 = vector.extract_strided_slice %140 {offsets = [0, 128], sizes = [1, 128], strides = [1, 1]} : vector<1x256xf32> to vector<1x128xf32>
    %143 = arith.mulf %141, %141 : vector<1x128xf32>
    %144 = arith.subf %142, %143 : vector<1x128xf32>
    %cst_61 = arith.constant 0.000000e+00 : f32
    %145 = vector.broadcast %cst_61 : f32 to vector<1x128xf32>
    %146 = arith.maximumf %144, %145 : vector<1x128xf32>
    %147 = vector.broadcast %141 : vector<1x128xf32> to vector<128x128xf32>
    %148 = arith.subf %137, %147 : vector<128x128xf32>
    %149 = vector.broadcast %87 : vector<1x128xf32> to vector<128x128xf32>
    %150 = arith.mulf %149, %148 : vector<128x128xf32>
    %cst_62 = arith.constant 9.99999974E-6 : f32
    %151 = vector.broadcast %cst_62 : f32 to vector<1x128xf32>
    %152 = arith.addf %146, %151 : vector<1x128xf32>
    %153 = math.rsqrt %152 : vector<1x128xf32>
    %154 = vector.broadcast %153 : vector<1x128xf32> to vector<128x128xf32>
    %155 = arith.mulf %150, %154 : vector<128x128xf32>
    %156 = vector.broadcast %88 : vector<1x128xf32> to vector<128x128xf32>
    %157 = arith.addf %155, %156 : vector<128x128xf32>
    %cst_63 = arith.constant 0.000000e+00 : f32
    %158 = vector.broadcast %cst_63 : f32 to vector<128x128xf32>
    %159 = arith.maximumf %157, %158 : vector<128x128xf32>
    %c2 = arith.constant 2 : index
    %c0_64 = arith.constant 0 : index
    %c0_65 = arith.constant 0 : index
    %160 = vector.load %arg7[%c2, %c0_64, %c0_65] : memref<5x8x128xf32, #tpu.memory_space<vmem>>, vector<1x8x128xf32>
    %161 = vector.shape_cast %160 : vector<1x8x128xf32> to vector<8x128xf32>
    %162 = vector.extract_strided_slice %161 {offsets = [0, 0], sizes = [1, 128], strides = [1, 1]} : vector<8x128xf32> to vector<1x128xf32>
    %163 = vector.extract_strided_slice %161 {offsets = [1, 0], sizes = [1, 128], strides = [1, 1]} : vector<8x128xf32> to vector<1x128xf32>
    %164 = vector.extract_strided_slice %161 {offsets = [2, 0], sizes = [1, 128], strides = [1, 1]} : vector<8x128xf32> to vector<1x128xf32>
    %165 = vector.extract_strided_slice %161 {offsets = [3, 0], sizes = [1, 128], strides = [1, 1]} : vector<8x128xf32> to vector<1x128xf32>
    %166 = vector.extract_strided_slice %161 {offsets = [4, 0], sizes = [1, 128], strides = [1, 1]} : vector<8x128xf32> to vector<1x128xf32>
    %167 = vector.extract_strided_slice %161 {offsets = [5, 0], sizes = [1, 128], strides = [1, 1]} : vector<8x128xf32> to vector<1x128xf32>
    %c0_66 = arith.constant 0 : index
    %c0_67 = arith.constant 0 : index
    %168 = vector.load %arg2[%c0_66, %c0_67] : memref<256x128xbf16, #tpu.memory_space<vmem>>, vector<256x128xbf16>
    %169 = arith.truncf %159 : vector<128x128xf32> to vector<128x128xbf16>
    %cst_68 = arith.constant dense<0.000000e+00> : vector<256x128xf32>
    %170 = tpu.matmul %168, %169, %cst_68 {dimension_numbers = #tpu.dot_dimension_numbers<[1], [0], [0], [1], [0, 0, 1, 1], [], []>} : vector<256x128xbf16>, vector<128x128xbf16>, vector<256x128xf32> -> vector<256x128xf32>
    %c0_69 = arith.constant 0 : index
    %c0_70 = arith.constant 0 : index
    %171 = vector.load %arg1[%c0_69, %c0_70] : memref<256x128xf32, #tpu.memory_space<vmem>>, vector<256x128xf32>
    %172 = arith.addf %170, %171 : vector<256x128xf32>
    %cst_71 = arith.constant 0.000000e+00 : f32
    %173 = vector.broadcast %cst_71 : f32 to vector<256x128xf32>
    %174 = arith.maximumf %172, %173 : vector<256x128xf32>
    %c0_72 = arith.constant 0 : index
    %c0_73 = arith.constant 0 : index
    %175 = vector.load %arg3[%c0_72, %c0_73] : memref<128x256xbf16, #tpu.memory_space<vmem>>, vector<128x256xbf16>
    %176 = arith.truncf %174 : vector<256x128xf32> to vector<256x128xbf16>
    %cst_74 = arith.constant dense<0.000000e+00> : vector<128x128xf32>
    %177 = tpu.matmul %175, %176, %cst_74 {dimension_numbers = #tpu.dot_dimension_numbers<[1], [0], [0], [1], [0, 0, 1, 1], [], []>} : vector<128x256xbf16>, vector<256x128xbf16>, vector<128x128xf32> -> vector<128x128xf32>
    %c2_75 = arith.constant 2 : index
    %178 = memref.load %arg10[%c2_75] : memref<5xf32, #tpu.memory_space<smem>>
    %cst_76 = arith.constant 1.000000e+00 : f32
    %179 = arith.addf %cst_76, %178 : f32
    %180 = vector.broadcast %179 : f32 to vector<128x128xf32>
    %181 = arith.mulf %180, %159 : vector<128x128xf32>
    %182 = arith.addf %181, %177 : vector<128x128xf32>
    %183 = arith.truncf %182 : vector<128x128xf32> to vector<128x128xbf16>
    %c2_77 = arith.constant 2 : index
    %c0_78 = arith.constant 0 : index
    %c0_79 = arith.constant 0 : index
    %c0_80 = arith.constant 0 : index
    %184 = vector.load %arg6[%c2_77, %c0_78, %c0_79, %c0_80] : memref<5x2x128x128xbf16, #tpu.memory_space<vmem>>, vector<1x1x128x128xbf16>
    %185 = vector.shape_cast %184 : vector<1x1x128x128xbf16> to vector<128x128xbf16>
    %cst_81 = arith.constant dense<0.000000e+00> : vector<128x128xf32>
    %186 = tpu.matmul %183, %185, %cst_81 {dimension_numbers = #tpu.dot_dimension_numbers<[1], [0], [0], [1], [0, 0, 1, 1], [], []>} : vector<128x128xbf16>, vector<128x128xbf16>, vector<128x128xf32> -> vector<128x128xf32>
    %187 = vector.broadcast %162 : vector<1x128xf32> to vector<128x128xf32>
    %188 = arith.addf %186, %187 : vector<128x128xf32>
    %189 = arith.mulf %188, %188 : vector<128x128xf32>
    %190 = tpu.concatenate %188, %189 in 1 : vector<128x128xf32>, vector<128x128xf32> -> vector<128x256xf32>
    %cst_82 = arith.constant dense<0.000000e+00> : vector<1x256xf32>
    %191 = tpu.matmul %0, %190, %cst_82 {dimension_numbers = #tpu.dot_dimension_numbers<[1], [0], [0], [1], [0, 0, 1, 1], [], []>} : vector<1x128xf32>, vector<128x256xf32>, vector<1x256xf32> -> vector<1x256xf32>
    %192 = vector.extract_strided_slice %191 {offsets = [0, 0], sizes = [1, 128], strides = [1, 1]} : vector<1x256xf32> to vector<1x128xf32>
    %193 = vector.extract_strided_slice %191 {offsets = [0, 128], sizes = [1, 128], strides = [1, 1]} : vector<1x256xf32> to vector<1x128xf32>
    %194 = arith.mulf %192, %192 : vector<1x128xf32>
    %195 = arith.subf %193, %194 : vector<1x128xf32>
    %cst_83 = arith.constant 0.000000e+00 : f32
    %196 = vector.broadcast %cst_83 : f32 to vector<1x128xf32>
    %197 = arith.maximumf %195, %196 : vector<1x128xf32>
    %198 = vector.broadcast %192 : vector<1x128xf32> to vector<128x128xf32>
    %199 = arith.subf %188, %198 : vector<128x128xf32>
    %200 = vector.broadcast %163 : vector<1x128xf32> to vector<128x128xf32>
    %201 = arith.mulf %200, %199 : vector<128x128xf32>
    %cst_84 = arith.constant 9.99999974E-6 : f32
    %202 = vector.broadcast %cst_84 : f32 to vector<1x128xf32>
    %203 = arith.addf %197, %202 : vector<1x128xf32>
    %204 = math.rsqrt %203 : vector<1x128xf32>
    %205 = vector.broadcast %204 : vector<1x128xf32> to vector<128x128xf32>
    %206 = arith.mulf %201, %205 : vector<128x128xf32>
    %207 = vector.broadcast %164 : vector<1x128xf32> to vector<128x128xf32>
    %208 = arith.addf %206, %207 : vector<128x128xf32>
    %cst_85 = arith.constant 0.000000e+00 : f32
    %209 = vector.broadcast %cst_85 : f32 to vector<128x128xf32>
    %210 = arith.maximumf %208, %209 : vector<128x128xf32>
    %211 = arith.truncf %210 : vector<128x128xf32> to vector<128x128xbf16>
    %c2_86 = arith.constant 2 : index
    %c1_87 = arith.constant 1 : index
    %c0_88 = arith.constant 0 : index
    %c0_89 = arith.constant 0 : index
    %212 = vector.load %arg6[%c2_86, %c1_87, %c0_88, %c0_89] : memref<5x2x128x128xbf16, #tpu.memory_space<vmem>>, vector<1x1x128x128xbf16>
    %213 = vector.shape_cast %212 : vector<1x1x128x128xbf16> to vector<128x128xbf16>
    %cst_90 = arith.constant dense<0.000000e+00> : vector<128x128xf32>
    %214 = tpu.matmul %211, %213, %cst_90 {dimension_numbers = #tpu.dot_dimension_numbers<[1], [0], [0], [1], [0, 0, 1, 1], [], []>} : vector<128x128xbf16>, vector<128x128xbf16>, vector<128x128xf32> -> vector<128x128xf32>
    %215 = vector.broadcast %165 : vector<1x128xf32> to vector<128x128xf32>
    %216 = arith.addf %214, %215 : vector<128x128xf32>
    %217 = arith.mulf %216, %216 : vector<128x128xf32>
    %218 = tpu.concatenate %216, %217 in 1 : vector<128x128xf32>, vector<128x128xf32> -> vector<128x256xf32>
    %cst_91 = arith.constant dense<0.000000e+00> : vector<1x256xf32>
    %219 = tpu.matmul %0, %218, %cst_91 {dimension_numbers = #tpu.dot_dimension_numbers<[1], [0], [0], [1], [0, 0, 1, 1], [], []>} : vector<1x128xf32>, vector<128x256xf32>, vector<1x256xf32> -> vector<1x256xf32>
    %220 = vector.extract_strided_slice %219 {offsets = [0, 0], sizes = [1, 128], strides = [1, 1]} : vector<1x256xf32> to vector<1x128xf32>
    %221 = vector.extract_strided_slice %219 {offsets = [0, 128], sizes = [1, 128], strides = [1, 1]} : vector<1x256xf32> to vector<1x128xf32>
    %222 = arith.mulf %220, %220 : vector<1x128xf32>
    %223 = arith.subf %221, %222 : vector<1x128xf32>
    %cst_92 = arith.constant 0.000000e+00 : f32
    %224 = vector.broadcast %cst_92 : f32 to vector<1x128xf32>
    %225 = arith.maximumf %223, %224 : vector<1x128xf32>
    %226 = vector.broadcast %220 : vector<1x128xf32> to vector<128x128xf32>
    %227 = arith.subf %216, %226 : vector<128x128xf32>
    %228 = vector.broadcast %166 : vector<1x128xf32> to vector<128x128xf32>
    %229 = arith.mulf %228, %227 : vector<128x128xf32>
    %cst_93 = arith.constant 9.99999974E-6 : f32
    %230 = vector.broadcast %cst_93 : f32 to vector<1x128xf32>
    %231 = arith.addf %225, %230 : vector<1x128xf32>
    %232 = math.rsqrt %231 : vector<1x128xf32>
    %233 = vector.broadcast %232 : vector<1x128xf32> to vector<128x128xf32>
    %234 = arith.mulf %229, %233 : vector<128x128xf32>
    %235 = vector.broadcast %167 : vector<1x128xf32> to vector<128x128xf32>
    %236 = arith.addf %234, %235 : vector<128x128xf32>
    %cst_94 = arith.constant 0.000000e+00 : f32
    %237 = vector.broadcast %cst_94 : f32 to vector<128x128xf32>
    %238 = arith.maximumf %236, %237 : vector<128x128xf32>
    %c3 = arith.constant 3 : index
    %c0_95 = arith.constant 0 : index
    %c0_96 = arith.constant 0 : index
    %239 = vector.load %arg7[%c3, %c0_95, %c0_96] : memref<5x8x128xf32, #tpu.memory_space<vmem>>, vector<1x8x128xf32>
    %240 = vector.shape_cast %239 : vector<1x8x128xf32> to vector<8x128xf32>
    %241 = vector.extract_strided_slice %240 {offsets = [0, 0], sizes = [1, 128], strides = [1, 1]} : vector<8x128xf32> to vector<1x128xf32>
    %242 = vector.extract_strided_slice %240 {offsets = [1, 0], sizes = [1, 128], strides = [1, 1]} : vector<8x128xf32> to vector<1x128xf32>
    %243 = vector.extract_strided_slice %240 {offsets = [2, 0], sizes = [1, 128], strides = [1, 1]} : vector<8x128xf32> to vector<1x128xf32>
    %244 = vector.extract_strided_slice %240 {offsets = [3, 0], sizes = [1, 128], strides = [1, 1]} : vector<8x128xf32> to vector<1x128xf32>
    %245 = vector.extract_strided_slice %240 {offsets = [4, 0], sizes = [1, 128], strides = [1, 1]} : vector<8x128xf32> to vector<1x128xf32>
    %246 = vector.extract_strided_slice %240 {offsets = [5, 0], sizes = [1, 128], strides = [1, 1]} : vector<8x128xf32> to vector<1x128xf32>
    %c0_97 = arith.constant 0 : index
    %c0_98 = arith.constant 0 : index
    %247 = vector.load %arg2[%c0_97, %c0_98] : memref<256x128xbf16, #tpu.memory_space<vmem>>, vector<256x128xbf16>
    %248 = arith.truncf %238 : vector<128x128xf32> to vector<128x128xbf16>
    %cst_99 = arith.constant dense<0.000000e+00> : vector<256x128xf32>
    %249 = tpu.matmul %247, %248, %cst_99 {dimension_numbers = #tpu.dot_dimension_numbers<[1], [0], [0], [1], [0, 0, 1, 1], [], []>} : vector<256x128xbf16>, vector<128x128xbf16>, vector<256x128xf32> -> vector<256x128xf32>
    %c0_100 = arith.constant 0 : index
    %c0_101 = arith.constant 0 : index
    %250 = vector.load %arg1[%c0_100, %c0_101] : memref<256x128xf32, #tpu.memory_space<vmem>>, vector<256x128xf32>
    %251 = arith.addf %249, %250 : vector<256x128xf32>
    %cst_102 = arith.constant 0.000000e+00 : f32
    %252 = vector.broadcast %cst_102 : f32 to vector<256x128xf32>
    %253 = arith.maximumf %251, %252 : vector<256x128xf32>
    %c0_103 = arith.constant 0 : index
    %c0_104 = arith.constant 0 : index
    %254 = vector.load %arg3[%c0_103, %c0_104] : memref<128x256xbf16, #tpu.memory_space<vmem>>, vector<128x256xbf16>
    %255 = arith.truncf %253 : vector<256x128xf32> to vector<256x128xbf16>
    %cst_105 = arith.constant dense<0.000000e+00> : vector<128x128xf32>
    %256 = tpu.matmul %254, %255, %cst_105 {dimension_numbers = #tpu.dot_dimension_numbers<[1], [0], [0], [1], [0, 0, 1, 1], [], []>} : vector<128x256xbf16>, vector<256x128xbf16>, vector<128x128xf32> -> vector<128x128xf32>
    %c3_106 = arith.constant 3 : index
    %257 = memref.load %arg10[%c3_106] : memref<5xf32, #tpu.memory_space<smem>>
    %cst_107 = arith.constant 1.000000e+00 : f32
    %258 = arith.addf %cst_107, %257 : f32
    %259 = vector.broadcast %258 : f32 to vector<128x128xf32>
    %260 = arith.mulf %259, %238 : vector<128x128xf32>
    %261 = arith.addf %260, %256 : vector<128x128xf32>
    %262 = arith.truncf %261 : vector<128x128xf32> to vector<128x128xbf16>
    %c3_108 = arith.constant 3 : index
    %c0_109 = arith.constant 0 : index
    %c0_110 = arith.constant 0 : index
    %c0_111 = arith.constant 0 : index
    %263 = vector.load %arg6[%c3_108, %c0_109, %c0_110, %c0_111] : memref<5x2x128x128xbf16, #tpu.memory_space<vmem>>, vector<1x1x128x128xbf16>
    %264 = vector.shape_cast %263 : vector<1x1x128x128xbf16> to vector<128x128xbf16>
    %cst_112 = arith.constant dense<0.000000e+00> : vector<128x128xf32>
    %265 = tpu.matmul %262, %264, %cst_112 {dimension_numbers = #tpu.dot_dimension_numbers<[1], [0], [0], [1], [0, 0, 1, 1], [], []>} : vector<128x128xbf16>, vector<128x128xbf16>, vector<128x128xf32> -> vector<128x128xf32>
    %266 = vector.broadcast %241 : vector<1x128xf32> to vector<128x128xf32>
    %267 = arith.addf %265, %266 : vector<128x128xf32>
    %268 = arith.mulf %267, %267 : vector<128x128xf32>
    %269 = tpu.concatenate %267, %268 in 1 : vector<128x128xf32>, vector<128x128xf32> -> vector<128x256xf32>
    %cst_113 = arith.constant dense<0.000000e+00> : vector<1x256xf32>
    %270 = tpu.matmul %0, %269, %cst_113 {dimension_numbers = #tpu.dot_dimension_numbers<[1], [0], [0], [1], [0, 0, 1, 1], [], []>} : vector<1x128xf32>, vector<128x256xf32>, vector<1x256xf32> -> vector<1x256xf32>
    %271 = vector.extract_strided_slice %270 {offsets = [0, 0], sizes = [1, 128], strides = [1, 1]} : vector<1x256xf32> to vector<1x128xf32>
    %272 = vector.extract_strided_slice %270 {offsets = [0, 128], sizes = [1, 128], strides = [1, 1]} : vector<1x256xf32> to vector<1x128xf32>
    %273 = arith.mulf %271, %271 : vector<1x128xf32>
    %274 = arith.subf %272, %273 : vector<1x128xf32>
    %cst_114 = arith.constant 0.000000e+00 : f32
    %275 = vector.broadcast %cst_114 : f32 to vector<1x128xf32>
    %276 = arith.maximumf %274, %275 : vector<1x128xf32>
    %277 = vector.broadcast %271 : vector<1x128xf32> to vector<128x128xf32>
    %278 = arith.subf %267, %277 : vector<128x128xf32>
    %279 = vector.broadcast %242 : vector<1x128xf32> to vector<128x128xf32>
    %280 = arith.mulf %279, %278 : vector<128x128xf32>
    %cst_115 = arith.constant 9.99999974E-6 : f32
    %281 = vector.broadcast %cst_115 : f32 to vector<1x128xf32>
    %282 = arith.addf %276, %281 : vector<1x128xf32>
    %283 = math.rsqrt %282 : vector<1x128xf32>
    %284 = vector.broadcast %283 : vector<1x128xf32> to vector<128x128xf32>
    %285 = arith.mulf %280, %284 : vector<128x128xf32>
    %286 = vector.broadcast %243 : vector<1x128xf32> to vector<128x128xf32>
    %287 = arith.addf %285, %286 : vector<128x128xf32>
    %cst_116 = arith.constant 0.000000e+00 : f32
    %288 = vector.broadcast %cst_116 : f32 to vector<128x128xf32>
    %289 = arith.maximumf %287, %288 : vector<128x128xf32>
    %290 = arith.truncf %289 : vector<128x128xf32> to vector<128x128xbf16>
    %c3_117 = arith.constant 3 : index
    %c1_118 = arith.constant 1 : index
    %c0_119 = arith.constant 0 : index
    %c0_120 = arith.constant 0 : index
    %291 = vector.load %arg6[%c3_117, %c1_118, %c0_119, %c0_120] : memref<5x2x128x128xbf16, #tpu.memory_space<vmem>>, vector<1x1x128x128xbf16>
    %292 = vector.shape_cast %291 : vector<1x1x128x128xbf16> to vector<128x128xbf16>
    %cst_121 = arith.constant dense<0.000000e+00> : vector<128x128xf32>
    %293 = tpu.matmul %290, %292, %cst_121 {dimension_numbers = #tpu.dot_dimension_numbers<[1], [0], [0], [1], [0, 0, 1, 1], [], []>} : vector<128x128xbf16>, vector<128x128xbf16>, vector<128x128xf32> -> vector<128x128xf32>
    %294 = vector.broadcast %244 : vector<1x128xf32> to vector<128x128xf32>
    %295 = arith.addf %293, %294 : vector<128x128xf32>
    %296 = arith.mulf %295, %295 : vector<128x128xf32>
    %297 = tpu.concatenate %295, %296 in 1 : vector<128x128xf32>, vector<128x128xf32> -> vector<128x256xf32>
    %cst_122 = arith.constant dense<0.000000e+00> : vector<1x256xf32>
    %298 = tpu.matmul %0, %297, %cst_122 {dimension_numbers = #tpu.dot_dimension_numbers<[1], [0], [0], [1], [0, 0, 1, 1], [], []>} : vector<1x128xf32>, vector<128x256xf32>, vector<1x256xf32> -> vector<1x256xf32>
    %299 = vector.extract_strided_slice %298 {offsets = [0, 0], sizes = [1, 128], strides = [1, 1]} : vector<1x256xf32> to vector<1x128xf32>
    %300 = vector.extract_strided_slice %298 {offsets = [0, 128], sizes = [1, 128], strides = [1, 1]} : vector<1x256xf32> to vector<1x128xf32>
    %301 = arith.mulf %299, %299 : vector<1x128xf32>
    %302 = arith.subf %300, %301 : vector<1x128xf32>
    %cst_123 = arith.constant 0.000000e+00 : f32
    %303 = vector.broadcast %cst_123 : f32 to vector<1x128xf32>
    %304 = arith.maximumf %302, %303 : vector<1x128xf32>
    %305 = vector.broadcast %299 : vector<1x128xf32> to vector<128x128xf32>
    %306 = arith.subf %295, %305 : vector<128x128xf32>
    %307 = vector.broadcast %245 : vector<1x128xf32> to vector<128x128xf32>
    %308 = arith.mulf %307, %306 : vector<128x128xf32>
    %cst_124 = arith.constant 9.99999974E-6 : f32
    %309 = vector.broadcast %cst_124 : f32 to vector<1x128xf32>
    %310 = arith.addf %304, %309 : vector<1x128xf32>
    %311 = math.rsqrt %310 : vector<1x128xf32>
    %312 = vector.broadcast %311 : vector<1x128xf32> to vector<128x128xf32>
    %313 = arith.mulf %308, %312 : vector<128x128xf32>
    %314 = vector.broadcast %246 : vector<1x128xf32> to vector<128x128xf32>
    %315 = arith.addf %313, %314 : vector<128x128xf32>
    %cst_125 = arith.constant 0.000000e+00 : f32
    %316 = vector.broadcast %cst_125 : f32 to vector<128x128xf32>
    %317 = arith.maximumf %315, %316 : vector<128x128xf32>
    %c4 = arith.constant 4 : index
    %c0_126 = arith.constant 0 : index
    %c0_127 = arith.constant 0 : index
    %318 = vector.load %arg7[%c4, %c0_126, %c0_127] : memref<5x8x128xf32, #tpu.memory_space<vmem>>, vector<1x8x128xf32>
    %319 = vector.shape_cast %318 : vector<1x8x128xf32> to vector<8x128xf32>
    %320 = vector.extract_strided_slice %319 {offsets = [0, 0], sizes = [1, 128], strides = [1, 1]} : vector<8x128xf32> to vector<1x128xf32>
    %321 = vector.extract_strided_slice %319 {offsets = [1, 0], sizes = [1, 128], strides = [1, 1]} : vector<8x128xf32> to vector<1x128xf32>
    %322 = vector.extract_strided_slice %319 {offsets = [2, 0], sizes = [1, 128], strides = [1, 1]} : vector<8x128xf32> to vector<1x128xf32>
    %323 = vector.extract_strided_slice %319 {offsets = [3, 0], sizes = [1, 128], strides = [1, 1]} : vector<8x128xf32> to vector<1x128xf32>
    %324 = vector.extract_strided_slice %319 {offsets = [4, 0], sizes = [1, 128], strides = [1, 1]} : vector<8x128xf32> to vector<1x128xf32>
    %325 = vector.extract_strided_slice %319 {offsets = [5, 0], sizes = [1, 128], strides = [1, 1]} : vector<8x128xf32> to vector<1x128xf32>
    %c0_128 = arith.constant 0 : index
    %c0_129 = arith.constant 0 : index
    %326 = vector.load %arg2[%c0_128, %c0_129] : memref<256x128xbf16, #tpu.memory_space<vmem>>, vector<256x128xbf16>
    %327 = arith.truncf %317 : vector<128x128xf32> to vector<128x128xbf16>
    %cst_130 = arith.constant dense<0.000000e+00> : vector<256x128xf32>
    %328 = tpu.matmul %326, %327, %cst_130 {dimension_numbers = #tpu.dot_dimension_numbers<[1], [0], [0], [1], [0, 0, 1, 1], [], []>} : vector<256x128xbf16>, vector<128x128xbf16>, vector<256x128xf32> -> vector<256x128xf32>
    %c0_131 = arith.constant 0 : index
    %c0_132 = arith.constant 0 : index
    %329 = vector.load %arg1[%c0_131, %c0_132] : memref<256x128xf32, #tpu.memory_space<vmem>>, vector<256x128xf32>
    %330 = arith.addf %328, %329 : vector<256x128xf32>
    %cst_133 = arith.constant 0.000000e+00 : f32
    %331 = vector.broadcast %cst_133 : f32 to vector<256x128xf32>
    %332 = arith.maximumf %330, %331 : vector<256x128xf32>
    %c0_134 = arith.constant 0 : index
    %c0_135 = arith.constant 0 : index
    %333 = vector.load %arg3[%c0_134, %c0_135] : memref<128x256xbf16, #tpu.memory_space<vmem>>, vector<128x256xbf16>
    %334 = arith.truncf %332 : vector<256x128xf32> to vector<256x128xbf16>
    %cst_136 = arith.constant dense<0.000000e+00> : vector<128x128xf32>
    %335 = tpu.matmul %333, %334, %cst_136 {dimension_numbers = #tpu.dot_dimension_numbers<[1], [0], [0], [1], [0, 0, 1, 1], [], []>} : vector<128x256xbf16>, vector<256x128xbf16>, vector<128x128xf32> -> vector<128x128xf32>
    %c4_137 = arith.constant 4 : index
    %336 = memref.load %arg10[%c4_137] : memref<5xf32, #tpu.memory_space<smem>>
    %cst_138 = arith.constant 1.000000e+00 : f32
    %337 = arith.addf %cst_138, %336 : f32
    %338 = vector.broadcast %337 : f32 to vector<128x128xf32>
    %339 = arith.mulf %338, %317 : vector<128x128xf32>
    %340 = arith.addf %339, %335 : vector<128x128xf32>
    %341 = arith.truncf %340 : vector<128x128xf32> to vector<128x128xbf16>
    %c4_139 = arith.constant 4 : index
    %c0_140 = arith.constant 0 : index
    %c0_141 = arith.constant 0 : index
    %c0_142 = arith.constant 0 : index
    %342 = vector.load %arg6[%c4_139, %c0_140, %c0_141, %c0_142] : memref<5x2x128x128xbf16, #tpu.memory_space<vmem>>, vector<1x1x128x128xbf16>
    %343 = vector.shape_cast %342 : vector<1x1x128x128xbf16> to vector<128x128xbf16>
    %cst_143 = arith.constant dense<0.000000e+00> : vector<128x128xf32>
    %344 = tpu.matmul %341, %343, %cst_143 {dimension_numbers = #tpu.dot_dimension_numbers<[1], [0], [0], [1], [0, 0, 1, 1], [], []>} : vector<128x128xbf16>, vector<128x128xbf16>, vector<128x128xf32> -> vector<128x128xf32>
    %345 = vector.broadcast %320 : vector<1x128xf32> to vector<128x128xf32>
    %346 = arith.addf %344, %345 : vector<128x128xf32>
    %347 = arith.mulf %346, %346 : vector<128x128xf32>
    %348 = tpu.concatenate %346, %347 in 1 : vector<128x128xf32>, vector<128x128xf32> -> vector<128x256xf32>
    %cst_144 = arith.constant dense<0.000000e+00> : vector<1x256xf32>
    %349 = tpu.matmul %0, %348, %cst_144 {dimension_numbers = #tpu.dot_dimension_numbers<[1], [0], [0], [1], [0, 0, 1, 1], [], []>} : vector<1x128xf32>, vector<128x256xf32>, vector<1x256xf32> -> vector<1x256xf32>
    %350 = vector.extract_strided_slice %349 {offsets = [0, 0], sizes = [1, 128], strides = [1, 1]} : vector<1x256xf32> to vector<1x128xf32>
    %351 = vector.extract_strided_slice %349 {offsets = [0, 128], sizes = [1, 128], strides = [1, 1]} : vector<1x256xf32> to vector<1x128xf32>
    %352 = arith.mulf %350, %350 : vector<1x128xf32>
    %353 = arith.subf %351, %352 : vector<1x128xf32>
    %cst_145 = arith.constant 0.000000e+00 : f32
    %354 = vector.broadcast %cst_145 : f32 to vector<1x128xf32>
    %355 = arith.maximumf %353, %354 : vector<1x128xf32>
    %356 = vector.broadcast %350 : vector<1x128xf32> to vector<128x128xf32>
    %357 = arith.subf %346, %356 : vector<128x128xf32>
    %358 = vector.broadcast %321 : vector<1x128xf32> to vector<128x128xf32>
    %359 = arith.mulf %358, %357 : vector<128x128xf32>
    %cst_146 = arith.constant 9.99999974E-6 : f32
    %360 = vector.broadcast %cst_146 : f32 to vector<1x128xf32>
    %361 = arith.addf %355, %360 : vector<1x128xf32>
    %362 = math.rsqrt %361 : vector<1x128xf32>
    %363 = vector.broadcast %362 : vector<1x128xf32> to vector<128x128xf32>
    %364 = arith.mulf %359, %363 : vector<128x128xf32>
    %365 = vector.broadcast %322 : vector<1x128xf32> to vector<128x128xf32>
    %366 = arith.addf %364, %365 : vector<128x128xf32>
    %cst_147 = arith.constant 0.000000e+00 : f32
    %367 = vector.broadcast %cst_147 : f32 to vector<128x128xf32>
    %368 = arith.maximumf %366, %367 : vector<128x128xf32>
    %369 = arith.truncf %368 : vector<128x128xf32> to vector<128x128xbf16>
    %c4_148 = arith.constant 4 : index
    %c1_149 = arith.constant 1 : index
    %c0_150 = arith.constant 0 : index
    %c0_151 = arith.constant 0 : index
    %370 = vector.load %arg6[%c4_148, %c1_149, %c0_150, %c0_151] : memref<5x2x128x128xbf16, #tpu.memory_space<vmem>>, vector<1x1x128x128xbf16>
    %371 = vector.shape_cast %370 : vector<1x1x128x128xbf16> to vector<128x128xbf16>
    %cst_152 = arith.constant dense<0.000000e+00> : vector<128x128xf32>
    %372 = tpu.matmul %369, %371, %cst_152 {dimension_numbers = #tpu.dot_dimension_numbers<[1], [0], [0], [1], [0, 0, 1, 1], [], []>} : vector<128x128xbf16>, vector<128x128xbf16>, vector<128x128xf32> -> vector<128x128xf32>
    %373 = vector.broadcast %323 : vector<1x128xf32> to vector<128x128xf32>
    %374 = arith.addf %372, %373 : vector<128x128xf32>
    %375 = arith.mulf %374, %374 : vector<128x128xf32>
    %376 = tpu.concatenate %374, %375 in 1 : vector<128x128xf32>, vector<128x128xf32> -> vector<128x256xf32>
    %cst_153 = arith.constant dense<0.000000e+00> : vector<1x256xf32>
    %377 = tpu.matmul %0, %376, %cst_153 {dimension_numbers = #tpu.dot_dimension_numbers<[1], [0], [0], [1], [0, 0, 1, 1], [], []>} : vector<1x128xf32>, vector<128x256xf32>, vector<1x256xf32> -> vector<1x256xf32>
    %378 = vector.extract_strided_slice %377 {offsets = [0, 0], sizes = [1, 128], strides = [1, 1]} : vector<1x256xf32> to vector<1x128xf32>
    %379 = vector.extract_strided_slice %377 {offsets = [0, 128], sizes = [1, 128], strides = [1, 1]} : vector<1x256xf32> to vector<1x128xf32>
    %380 = arith.mulf %378, %378 : vector<1x128xf32>
    %381 = arith.subf %379, %380 : vector<1x128xf32>
    %cst_154 = arith.constant 0.000000e+00 : f32
    %382 = vector.broadcast %cst_154 : f32 to vector<1x128xf32>
    %383 = arith.maximumf %381, %382 : vector<1x128xf32>
    %384 = vector.broadcast %378 : vector<1x128xf32> to vector<128x128xf32>
    %385 = arith.subf %374, %384 : vector<128x128xf32>
    %386 = vector.broadcast %324 : vector<1x128xf32> to vector<128x128xf32>
    %387 = arith.mulf %386, %385 : vector<128x128xf32>
    %cst_155 = arith.constant 9.99999974E-6 : f32
    %388 = vector.broadcast %cst_155 : f32 to vector<1x128xf32>
    %389 = arith.addf %383, %388 : vector<1x128xf32>
    %390 = math.rsqrt %389 : vector<1x128xf32>
    %391 = vector.broadcast %390 : vector<1x128xf32> to vector<128x128xf32>
    %392 = arith.mulf %387, %391 : vector<128x128xf32>
    %393 = vector.broadcast %325 : vector<1x128xf32> to vector<128x128xf32>
    %394 = arith.addf %392, %393 : vector<128x128xf32>
    %cst_156 = arith.constant 0.000000e+00 : f32
    %395 = vector.broadcast %cst_156 : f32 to vector<128x128xf32>
    %396 = arith.maximumf %394, %395 : vector<128x128xf32>
    %c0_157 = arith.constant 0 : index
    %c0_158 = arith.constant 0 : index
    %397 = vector.load %arg4[%c0_157, %c0_158] : memref<8x128xbf16, #tpu.memory_space<vmem>>, vector<8x128xbf16>
    %398 = arith.truncf %396 : vector<128x128xf32> to vector<128x128xbf16>
    %cst_159 = arith.constant dense<0.000000e+00> : vector<8x128xf32>
    %399 = tpu.matmul %397, %398, %cst_159 {dimension_numbers = #tpu.dot_dimension_numbers<[1], [0], [0], [1], [0, 0, 1, 1], [], []>} : vector<8x128xbf16>, vector<128x128xbf16>, vector<8x128xf32> -> vector<8x128xf32>
    %c0_160 = arith.constant 0 : index
    %c0_161 = arith.constant 0 : index
    %400 = vector.load %arg5[%c0_160, %c0_161] : memref<8x1xf32, #tpu.memory_space<vmem>>, vector<8x1xf32>
    %401 = vector.broadcast %400 : vector<8x1xf32> to vector<8x128xf32>
    %402 = arith.mulf %399, %401 : vector<8x128xf32>
    %403 = arith.truncf %402 : vector<8x128xf32> to vector<8x128xbf16>
    %c0_162 = arith.constant 0 : index
    %c0_163 = arith.constant 0 : index
    %c0_164 = arith.constant 0 : index
    %404 = vector.load %arg8[%c0_162, %c0_163, %c0_164] : memref<2x128x128xbf16, #tpu.memory_space<vmem>>, vector<1x128x128xbf16>
    %405 = vector.shape_cast %404 : vector<1x128x128xbf16> to vector<128x128xbf16>
    %cst_165 = arith.constant dense<0.000000e+00> : vector<8x128xf32>
    %406 = tpu.matmul %403, %405, %cst_165 {dimension_numbers = #tpu.dot_dimension_numbers<[1], [0], [0], [1], [0, 0, 1, 1], [], []>} : vector<8x128xbf16>, vector<128x128xbf16>, vector<8x128xf32> -> vector<8x128xf32>
    %c0_166 = arith.constant 0 : index
    %c0_167 = arith.constant 0 : index
    %407 = vector.load %arg9[%c0_166, %c0_167] : memref<8x128xf32, #tpu.memory_space<vmem>>, vector<1x128xf32>
    %408 = vector.broadcast %407 : vector<1x128xf32> to vector<8x128xf32>
    %409 = arith.addf %406, %408 : vector<8x128xf32>
    %cst_168 = arith.constant 0.000000e+00 : f32
    %410 = vector.broadcast %cst_168 : f32 to vector<8x128xf32>
    %411 = arith.maximumf %409, %410 : vector<8x128xf32>
    %412 = arith.truncf %411 : vector<8x128xf32> to vector<8x128xbf16>
    %c1_169 = arith.constant 1 : index
    %c0_170 = arith.constant 0 : index
    %c0_171 = arith.constant 0 : index
    %413 = vector.load %arg8[%c1_169, %c0_170, %c0_171] : memref<2x128x128xbf16, #tpu.memory_space<vmem>>, vector<1x128x128xbf16>
    %414 = vector.shape_cast %413 : vector<1x128x128xbf16> to vector<128x128xbf16>
    %cst_172 = arith.constant dense<0.000000e+00> : vector<8x128xf32>
    %415 = tpu.matmul %412, %414, %cst_172 {dimension_numbers = #tpu.dot_dimension_numbers<[1], [0], [0], [1], [0, 0, 1, 1], [], []>} : vector<8x128xbf16>, vector<128x128xbf16>, vector<8x128xf32> -> vector<8x128xf32>
    %c1_173 = arith.constant 1 : index
    %c0_174 = arith.constant 0 : index
    %416 = vector.load %arg9[%c1_173, %c0_174] : memref<8x128xf32, #tpu.memory_space<vmem>>, vector<1x128xf32>
    %417 = vector.broadcast %416 : vector<1x128xf32> to vector<8x128xf32>
    %418 = arith.addf %415, %417 : vector<8x128xf32>
    %c0_175 = arith.constant 0 : index
    %c0_176 = arith.constant 0 : index
    %419 = vector.load %arg11[%c0_175, %c0_176] : memref<8x128xf32, #tpu.memory_space<vmem>>, vector<8x128xf32>
    tpu.vector_store %arg11[%c0_175, %c0_176], %418 {strides = array<i32>} : memref<8x128xf32, #tpu.memory_space<vmem>>, vector<8x128xf32>,
    return
  }
}

</mosaic_0001>

<bundles_post_ra>
// kernel: tpu_custom_call.1
= control target key start
LH: loop header
LB: loop body
LE: loop exit
PB: predicated region body
PF: predicated region fallthrough
CT: control target
= control target key end

     0   :  { %16 = vsyncpa [#allocation3], 0  ;;  %s10781_s0 = inlined_call_operand.hbm [shape: f32[128,128], index: 0, kind: input, shape index: {}]   ;;  %s10782_s1 = inlined_call_operand.hbm [shape: f32[256,128], index: 1, kind: input, shape index: {}]   ;;  %s10783_s2 = inlined_call_operand.hbm [shape: bf16[256,128], index: 2, kind: input, shape index: {}]   ;;  %s10784_s3 = inlined_call_operand.hbm [shape: bf16[128,256], index: 3, kind: input, shape index: {}]   ;;  %s10785_s4 = inlined_call_operand.vmem [shape: bf16[8,128], index: 4, kind: input, shape index: {}]   ;;  %s10786_s5 = inlined_call_operand.vmem [shape: f32[8,1], index: 5, kind: input, shape index: {}]   ;;  %s10787_s6 = inlined_call_operand.hbm [shape: bf16[5,2,128,128], index: 6, kind: input, shape index: {}]   ;;  %s10788_s7 = inlined_call_operand.hbm [shape: f32[5,8,128], index: 7, kind: input, shape index: {}]   ;;  %s10789_s8 = inlined_call_operand.hbm [shape: bf16[2,128,128], index: 8, kind: input, shape index: {}]   ;;  %s10790_s9 = inlined_call_operand.vmem [shape: f32[8,128], index: 9, kind: input, shape index: {}]   ;;  %s10791_s10 = inlined_call_operand.vmem [shape: f32[5], index: 10, kind: input, shape index: {}]   ;;  %s10792_s11 = inlined_call_operand.hbm [shape: f32[8,128], index: 11, kind: output, shape index: {}]  }
   0x1   :  { %17 = vsyncpa [#allocation7], 0 }
   0x2   :  { %18 = vsyncpa [#allocation10], 0 }
   0x3   :  { %19 = vsyncpa [#allocation13], 0 }
   0x4   :  { %20 = vsyncpa [#allocation5], 0 }
   0x5   :  { %21 = vsyncpa [#allocation4], 0  ;;  %s8438_s17 = smov [#allocation6]   ;;  %s8439_s19 = smov [#allocation9]  }
   0x6   :  { %s39_s18 = sshll.u32 %s8438_s17, 4  ;;  %s63_s20 = sshll.u32 %s8439_s19, 4  ;;  %s40_s18 = int_to_ptr.vmem [resolvable:$true] %s39_s18  ;;  %s8515_s20 = int_to_ptr.vmem [resolvable:$true] %s63_s20 }
   0x7   :  { %s8238_s23 = scalar_lea.hbm %s10782_s1, 4096 }
   0x8   :  { %p8239_p0 = scmp.ne.s32.totalorder %s10782_s1, %s8238_s23  ;;  %p8242_p1 = scmp.lt.u32.totalorder %s8238_s23, %s10782_s1 }
   0xa   :  { %p8244_p2 = pnand %p8242_p1, %p8239_p0 }
   0xc   :  { %8247 = shalt.err (!%p8244_p2)
}
   0xd   :  { %s8248_s28 = scalar_lea.vmem %s40_s18, 4096  ;;  %p8253_p4 = scmp.lt.s32.totalorder %s40_s18, %s40_s18 }
   0xe   :  { %p8249_p3 = scmp.ne.s32.totalorder %s40_s18, %s8248_s28  ;;  %p8254_p5 = scmp.lt.s32.totalorder %s8248_s28, %s8248_s28 }
  0x10   :  { %p8255_p6 = por %p8254_p5, %p8253_p4 }
  0x12   :  { %p8256_p7 = pnand %p8255_p6, %p8249_p3 }
  0x14   :  { %8259 = shalt.err (!%p8256_p7)
}
  0x15   :  { %s8440_s29 = smov 128   ;;  %s8441_s30 = smov 8  }
  0x16   :  { %45 = dma.hbm_to_vmem [thread:$0]  %s10782_s1, 4096, %s40_s18, [#allocation7], %s8440_s29, %s8440_s29, %s8441_s30  }
  0x17   :  { %s8260_s16 = scalar_lea.hbm %s10784_s3, 2048 }
  0x18   :  { %p8261_p8 = scmp.ne.s32.totalorder %s10784_s3, %s8260_s16  ;;  %p8264_p9 = scmp.lt.u32.totalorder %s8260_s16, %s10784_s3 }
  0x1a   :  { %p8266_p10 = pnand %p8264_p9, %p8261_p8 }
  0x1c   :  { %8269 = shalt.err (!%p8266_p10)
}
  0x1d   :  { %s8270_s23 = scalar_lea.vmem %s8515_s20, 2048  ;;  %p8275_p12 = scmp.lt.s32.totalorder %s8515_s20, %s8515_s20 }
  0x1e   :  { %p8271_p11 = scmp.ne.s32.totalorder %s8515_s20, %s8270_s23  ;;  %p8276_p13 = scmp.lt.s32.totalorder %s8270_s23, %s8270_s23 }
  0x20   :  { %p8277_p0 = por %p8276_p13, %p8275_p12 }
  0x22   :  { %p8278_p1 = pnand %p8277_p0, %p8271_p11 }
  0x24   :  { %8281 = shalt.err (!%p8278_p1)
}
  0x25   :  { %69 = dma.hbm_to_vmem [thread:$0]  %s10784_s3, 2048, %s8515_s20, [#allocation10], %s8440_s29, %s8440_s29, %s8441_s30  }
  0x26   :  { %s8442_s24 = smov [#allocation12]   ;;  %s8443_s26 = smov [#allocation2]  }
  0x27   :  { %s91_s25 = sshll.u32 %s8442_s24, 4  ;;  %s27_s27 = sshll.u32 %s8443_s26, 4  ;;  %s92_s25 = int_to_ptr.vmem [resolvable:$true] %s91_s25  ;;  %s8552_s27 = int_to_ptr.vmem [resolvable:$true] %s27_s27 }
  0x28   :  { %s8282_s13 = scalar_lea.hbm %s10788_s7, 640 }
  0x29   :  { %p8283_p2 = scmp.ne.s32.totalorder %s10788_s7, %s8282_s13  ;;  %p8286_p3 = scmp.lt.u32.totalorder %s8282_s13, %s10788_s7 }
  0x2b   :  { %p8288_p4 = pnand %p8286_p3, %p8283_p2 }
  0x2d   :  { %8291 = shalt.err (!%p8288_p4)
}
  0x2e   :  { %s8292_s3 = scalar_lea.vmem %s92_s25, 640  ;;  %p8297_p6 = scmp.lt.s32.totalorder %s92_s25, %s92_s25 }
  0x2f   :  { %p8293_p5 = scmp.ne.s32.totalorder %s92_s25, %s8292_s3  ;;  %p8298_p7 = scmp.lt.s32.totalorder %s8292_s3, %s8292_s3 }
  0x31   :  { %p8299_p8 = por %p8298_p7, %p8297_p6 }
  0x33   :  { %p8300_p9 = pnand %p8299_p8, %p8293_p5 }
  0x35   :  { %8303 = shalt.err (!%p8300_p9)
}
  0x36   :  { %97 = dma.hbm_to_vmem [thread:$0]  %s10788_s7, 640, %s92_s25, [#allocation13], %s8440_s29, %s8440_s29, %s8441_s30  }
  0x37   :  { %s8304_s23 = scalar_lea.hbm %s10781_s0, 2048 }
  0x38   :  { %p8305_p10 = scmp.ne.s32.totalorder %s10781_s0, %s8304_s23  ;;  %p8308_p11 = scmp.lt.u32.totalorder %s8304_s23, %s10781_s0 }
  0x3a   :  { %p8310_p12 = pnand %p8308_p11, %p8305_p10 }
  0x3c   :  { %8313 = shalt.err (!%p8310_p12)
}
  0x3d   :  { %s8314_s28 = scalar_lea.vmem %s8552_s27, 2048  ;;  %p8319_p0 = scmp.lt.s32.totalorder %s8552_s27, %s8552_s27 }
  0x3e   :  { %p8315_p13 = scmp.ne.s32.totalorder %s8552_s27, %s8314_s28  ;;  %p8320_p1 = scmp.lt.s32.totalorder %s8314_s28, %s8314_s28 }
  0x40   :  { %p8321_p2 = por %p8320_p1, %p8319_p0 }
  0x42   :  { %p8322_p3 = pnand %p8321_p2, %p8315_p13 }
  0x44   :  { %8325 = shalt.err (!%p8322_p3)
}
  0x45   :  { %33 = dma.hbm_to_vmem [thread:$0]  %s10781_s0, 2048, %s8552_s27, [#allocation3], %s8440_s29, %s8440_s29, %s8441_s30  }
  0x46   :  { %s8444_s12 = smov [#allocation8]   ;;  %s8326_s16 = scalar_lea.hbm %s10783_s2, 2048 }
  0x47   :  { %s51_s13 = sshll.u32 %s8444_s12, 4  ;;  %p8327_p4 = scmp.ne.s32.totalorder %s10783_s2, %s8326_s16  ;;  %s52_s13 = int_to_ptr.vmem [resolvable:$true] %s51_s13 }
  0x48   :  { %p8330_p5 = scmp.lt.u32.totalorder %s8326_s16, %s10783_s2 }
  0x4a   :  { %p8332_p6 = pnand %p8330_p5, %p8327_p4 }
  0x4c   :  { %8335 = shalt.err (!%p8332_p6)
}
  0x4d   :  { %s8336_s21 = scalar_lea.vmem %s52_s13, 2048  ;;  %p8341_p8 = scmp.lt.s32.totalorder %s52_s13, %s52_s13 }
  0x4e   :  { %p8337_p7 = scmp.ne.s32.totalorder %s52_s13, %s8336_s21  ;;  %p8342_p9 = scmp.lt.s32.totalorder %s8336_s21, %s8336_s21 }
  0x50   :  { %p8343_p10 = por %p8342_p9, %p8341_p8 }
  0x52   :  { %p8344_p11 = pnand %p8343_p10, %p8337_p7 }
  0x54   :  { %8347 = shalt.err (!%p8344_p11)
}
  0x55   :  { %s8445_s0 = smov 64   ;;  %s8446_s29 = smov 4  }
  0x56   :  { %57 = dma.hbm_to_vmem [thread:$0]  %s10783_s2, 2048, %s52_s13, [#allocation7], %s8445_s0, %s8445_s0, %s8446_s29  }
  0x57   :  { %s8447_s22 = smov [#allocation11]   ;;  %s8448_s1 = smov [#allocation14]  }
  0x58   :  { %s79_s23 = sshll.u32 %s8447_s22, 4  ;;  %s103_s18 = sshll.u32 %s8448_s1, 4  ;;  %s80_s23 = int_to_ptr.vmem [resolvable:$true] %s79_s23  ;;  %s104_s18 = int_to_ptr.vmem [resolvable:$true] %s103_s18 }
  0x59   :  { %s8348_s28 = scalar_lea.hbm %s10787_s6, 10240 }
  0x5a   :  { %p8349_p12 = scmp.ne.s32.totalorder %s10787_s6, %s8348_s28  ;;  %p8352_p13 = scmp.lt.u32.totalorder %s8348_s28, %s10787_s6 }
  0x5c   :  { %p8354_p0 = pnand %p8352_p13, %p8349_p12 }
  0x5e   :  { %8357 = shalt.err (!%p8354_p0)
}
  0x5f   :  { %s8358_s2 = scalar_lea.vmem %s80_s23, 10240  ;;  %p8363_p2 = scmp.lt.s32.totalorder %s80_s23, %s80_s23 }
  0x60   :  { %p8359_p1 = scmp.ne.s32.totalorder %s80_s23, %s8358_s2  ;;  %p8364_p3 = scmp.lt.s32.totalorder %s8358_s2, %s8358_s2 }
  0x62   :  { %p8365_p4 = por %p8364_p3, %p8363_p2 }
  0x64   :  { %p8366_p5 = pnand %p8365_p4, %p8359_p1 }
  0x66   :  { %8369 = shalt.err (!%p8366_p5)
}
  0x67   :  { %85 = dma.hbm_to_vmem [thread:$0]  %s10787_s6, 10240, %s80_s23, [#allocation10], %s8445_s0, %s8445_s0, %s8446_s29  }
  0x68   :  { %s118_s3 = sshll.u32 %s10791_s10, 4  ;;  %s8370_s21 = scalar_lea.hbm %s10789_s8, 2048  ;;  %s119_s3 = int_to_ptr.vmem [resolvable:$true] %s118_s3 }
  0x69   :  { %p8371_p6 = scmp.ne.s32.totalorder %s10789_s8, %s8370_s21  ;;  %p8374_p7 = scmp.lt.u32.totalorder %s8370_s21, %s10789_s8 }
  0x6b   :  { %p8376_p8 = pnand %p8374_p7, %p8371_p6 }
  0x6d   :  { %8379 = shalt.err (!%p8376_p8)
}
  0x6e   :  { %s8380_s6 = scalar_lea.vmem %s104_s18, 2048  ;;  %p8385_p10 = scmp.lt.s32.totalorder %s104_s18, %s104_s18 }
  0x6f   :  { %p8381_p9 = scmp.ne.s32.totalorder %s104_s18, %s8380_s6  ;;  %p8386_p11 = scmp.lt.s32.totalorder %s8380_s6, %s8380_s6 }
  0x71   :  { %p8387_p12 = por %p8386_p11, %p8385_p10 }
  0x73   :  { %p8388_p13 = pnand %p8387_p12, %p8381_p9 }
  0x75   :  { %8391 = shalt.err (!%p8388_p13)
}
  0x76   :  { %109 = dma.hbm_to_vmem [thread:$0]  %s10789_s8, 2048, %s104_s18, [#allocation13], %s8445_s0, %s8445_s0, %s8446_s29  }
  0x77   :  { %s8392_s24 = scalar_lea.vmem %s119_s3, 16  ;;  %p8397_p1 = scmp.lt.s32.totalorder %s119_s3, %s119_s3 }
  0x78   :  { %p8393_p0 = scmp.ne.s32.totalorder %s119_s3, %s8392_s24  ;;  %p8398_p2 = scmp.lt.s32.totalorder %s8392_s24, %s8392_s24 }
  0x7a   :  { %p8399_p3 = por %p8398_p2, %p8397_p1 }
  0x7c   :  { %p8400_p4 = pnand %p8399_p3, %p8393_p0 }
  0x7e   :  { %8403 = shalt.err (!%p8400_p4)
}
  0x7f   :  { %s8449_s26 = smov [#allocation15]  }
  0x80   :  { %121 = dma.vmem_to_smem %s119_s3, 16, %s8449_s26, [#allocation5]  }
  0x81   :  { %8426 = dma.done.wait [#allocation3], 2048  }
  0x82   :  { %8427 = vsyncadd [#allocation3], 4294965248 }
  0x83   :  { %8428 = dma.done.wait [#allocation7], 6144  }
  0x84   :  { %8429 = vsyncadd [#allocation7], 4294961152 }
  0x85   :  { %8430 = dma.done.wait [#allocation10], 12288  }
  0x86   :  { %8431 = vsyncadd [#allocation10], 4294955008 }
  0x87   :  { %8432 = dma.done.wait [#allocation13], 2688  }
  0x88   :  { %8433 = vsyncadd [#allocation13], 4294964608 }
  0x89   :  { %8434 = dma.done.wait [#allocation5], 16  }
  0x8a   :  { %8435 = vsyncadd [#allocation5], 4294967280 }
  0x8b   :  { %146 = sfence }
  0x8c   :  { %v148_v0 = vld [vmem:[#allocation2] sm:$0xff]  ;;  %v149_v1 = vld [vmem:[#allocation2 + $0x8] sm:$0xff]  ;;  %v150_v2 = vld [vmem:[#allocation2 + $0x10] sm:$0xff]  ;;  %s735_s8 = sld [smem:[#allocation15]]  ;;  %s6139_s29 = sld [smem:[#allocation15 + $0x1]]  ;;  %vm8452_vm0 = vmmov 0  }
  0x8d   :  { %v197_v3 = vpack.c.bf16 %v149_v1, %v148_v0  ;;  %v151_v4 = vld [vmem:[#allocation2 + $0x18] sm:$0xff]  ;;  %v152_v6 = vld [vmem:[#allocation2 + $0x20] sm:$0xff]  ;;  %v153_v7 = vld [vmem:[#allocation2 + $0x28] sm:$0xff]  ;;  %s6156_s28 = sld [smem:[#allocation15 + $0x2]]  ;;  %s6173_s25 = sld [smem:[#allocation15 + $0x3]] }
  0x8e   :  { %v198_v5 = vpack.c.bf16 %v151_v4, %v150_v2  ;;  %v154_v8 = vld [vmem:[#allocation2 + $0x30] sm:$0xff]  ;;  %v199_v9 = vpack.c.bf16 %v153_v7, %v152_v6  ;;  %v155_v10 = vld [vmem:[#allocation2 + $0x38] sm:$0xff]  ;;  %v7810_v11 = vld [vmem:[#allocation8] sm:$0xff]   ;;  %s6190_s14 = sld [smem:[#allocation15 + $0x4]]  ;;  %s8454_s19 = smov [#allocation16]  }
  0x8f   :  { %6852 = vmatprep.subr.bf16.mxu0 %v197_v3  ;;  %6868 = vmatprep.mubr.bf16.mxu0 %v7810_v11  ;;  %v200_v12 = vpack.c.bf16 %v155_v10, %v154_v8  ;;  %v156_v13 = vld [vmem:[#allocation2 + $0x40] sm:$0xff]  ;;  %v157_v14 = vld [vmem:[#allocation2 + $0x48] sm:$0xff]  ;;  %v158_v16 = vld [vmem:[#allocation2 + $0x50] sm:$0xff]  ;;  %s6078_s21 = sshll.u32 %s8454_s19, 4  ;;  %s6079_s21 = int_to_ptr.vmem [resolvable:$true] %s6078_s21 }
  0x90   :  { %6853 = vmatpush3.bf16.msra.mxu0 %v197_v3  ;;  %v201_v15 = vpack.c.bf16 %v157_v14, %v156_v13  ;;  %v159_v17 = vld [vmem:[#allocation2 + $0x58] sm:$0xff]  ;;  %v160_v19 = vld [vmem:[#allocation2 + $0x60] sm:$0xff]  ;;  %v161_v20 = vld [vmem:[#allocation2 + $0x68] sm:$0xff]  ;;  %s8404_s30 = scalar_lea.vmem %s6079_s21, 128  ;;  %p8409_p6 = scmp.lt.s32.totalorder %s6079_s21, %s6079_s21 }
  0x91   :  { %6854 = vmatprep.subr.bf16.mxu0 %v198_v5  ;;  %v202_v18 = vpack.c.bf16 %v159_v17, %v158_v16  ;;  %v203_v21 = vpack.c.bf16 %v161_v20, %v160_v19  ;;  %v162_v22 = vld [vmem:[#allocation2 + $0x70] sm:$0xff]  ;;  %v163_v23 = vld [vmem:[#allocation2 + $0x78] sm:$0xff]  ;;  %v7811_v25 = vld [vmem:[#allocation8 + $0x8] sm:$0xff]   ;;  %p8405_p5 = scmp.ne.s32.totalorder %s6079_s21, %s8404_s30  ;;  %p8410_p7 = scmp.lt.s32.totalorder %s8404_s30, %s8404_s30 }
  0x92   :  { %v204_v24 = vpack.c.bf16 %v163_v23, %v162_v22  ;;  %v7812_v26 = vld [vmem:[#allocation8 + $0x10] sm:$0xff]   ;;  %v7813_v27 = vld [vmem:[#allocation8 + $0x18] sm:$0xff]   ;;  %v7814_v28 = vld [vmem:[#allocation8 + $0x20] sm:$0xff]   ;;  %s736_s0 = sadd.f32 1.0, %s735_s8 }
  0x93   :  { %v7815_v29 = vld [vmem:[#allocation8 + $0x28] sm:$0xff]   ;;  %v7816_v30 = vld [vmem:[#allocation8 + $0x30] sm:$0xff]   ;;  %v7817_v31 = vld [vmem:[#allocation8 + $0x38] sm:$0xff]   ;;  %s1810_s18 = sadd.f32 1.0, %s6139_s29  ;;  %p8411_p8 = por %p8410_p7, %p8409_p6 }
  0x94   :  { %6855 = vmatpush3.bf16.msra.mxu0 %v198_v5  ;;  %v7818_v32 = vld [vmem:[#allocation8 + $0x40] sm:$0xff]   ;;  %v7819_v33 = vld [vmem:[#allocation8 + $0x48] sm:$0xff]   ;;  %v7820_v34 = vld [vmem:[#allocation8 + $0x50] sm:$0xff]   ;;  %s2885_s7 = sadd.f32 1.0, %s6156_s28 }
  0x95   :  { %6856 = vmatprep.subr.bf16.mxu0 %v199_v9  ;;  %v7821_v35 = vld [vmem:[#allocation8 + $0x58] sm:$0xff]   ;;  %v7822_v36 = vld [vmem:[#allocation8 + $0x60] sm:$0xff]   ;;  %v7823_v37 = vld [vmem:[#allocation8 + $0x68] sm:$0xff]   ;;  %s3960_s12 = sadd.f32 1.0, %s6173_s25  ;;  %p8412_p9 = pnand %p8411_p8, %p8405_p5 }
  0x96   :  { %v7824_v38 = vld [vmem:[#allocation8 + $0x70] sm:$0xff]   ;;  %v7825_v39 = vld [vmem:[#allocation8 + $0x78] sm:$0xff]   ;;  %v7826_v40 = vld [vmem:[#allocation9 + $0x4] ss:$8 sps:$4 sm:$0xff]   ;;  %s5035_s2 = sadd.f32 1.0, %s6190_s14 }
  0x97   :  { %670 = vmatprep.mubr.bf16.mxu1 %v7826_v40  ;;  %v207_v41 = vld [vmem:[#allocation6 + $0x10] sm:$0xff]  ;;  %v205_v42 = vld [vmem:[#allocation6] sm:$0xff]  ;;  %v208_v44 = vld [vmem:[#allocation6 + $0x18] sm:$0xff] }
  0x98   :  { %6857 = vmatpush3.bf16.msra.mxu0 %v199_v9  ;;  %v206_v47 = vld [vmem:[#allocation6 + $0x8] sm:$0xff]  ;;  %v7850_v50 = vld [vmem:[#allocation11] sm:$0xff]   ;;  %v211_v57 = vld [vmem:[#allocation6 + $0x30] sm:$0xff] }
  0x99   :  { %6858 = vmatprep.subr.bf16.mxu0 %v200_v12  ;;  %v7851_v51 = vld [vmem:[#allocation11 + $0x8] sm:$0xff]   ;;  %v7852_v60 = vld [vmem:[#allocation11 + $0x10] sm:$0xff]   ;;  %v209_v61 = vld [vmem:[#allocation6 + $0x20] sm:$0xff] }
  0x9a   :  { %v212_v0 = vld [vmem:[#allocation6 + $0x38] sm:$0xff]  ;;  %v210_v4 = vld [vmem:[#allocation6 + $0x28] sm:$0xff]  ;;  %v213_v16 = vld [vmem:[#allocation6 + $0x40] sm:$0xff] }
  0x9b   :  { %v7853_v7 = vld [vmem:[#allocation11 + $0x18] sm:$0xff]   ;;  %v214_v23 = vld [vmem:[#allocation6 + $0x48] sm:$0xff] }
  0x9c   :  { %6859 = vmatpush3.bf16.msra.mxu0 %v200_v12  ;;  %v216_v19 = vld [vmem:[#allocation6 + $0x58] sm:$0xff] }
  0x9d   :  { %6860 = vmatprep.subr.bf16.mxu0 %v201_v15 }
  0xa0   :  { %6861 = vmatpush3.bf16.msra.mxu0 %v201_v15  ;;  %v215_v15 = vld [vmem:[#allocation6 + $0x50] sm:$0xff] }
  0xa1   :  { %6862 = vmatprep.subr.bf16.mxu0 %v202_v18 }
  0xa4   :  { %6863 = vmatpush3.bf16.msra.mxu0 %v202_v18 }
  0xa5   :  { %6864 = vmatprep.subr.bf16.mxu0 %v203_v21 }
  0xa8   :  { %6865 = vmatpush3.bf16.msra.mxu0 %v203_v21 }
  0xa9   :  { %6866 = vmatprep.subr.bf16.mxu0 %v204_v24 }
  0xac   :  { %6867 = vmatpush3.bf16.msra.mxu0 %v204_v24 }
  0xad   :  { %6900 = vmatprep.subr.bf16.mxu0 %v7850_v50 }
  0xaf   :  { %6869 = vmatmul.mubr.bf16.vlgmr.msra.gmra.mrb[0].mxu0 %v7811_v25 }
  0xb0   :  { %6872 = vmatprep.mubr.bf16.mxu0 %v7812_v26  ;;  %6901 = vmatpush3.bf16.msra.mxu0 %v7850_v50 }
  0xb1   :  { %6902 = vmatprep.subr.bf16.mxu0 %v7851_v51 }
  0xb4   :  { %6903 = vmatpush3.bf16.msra.mxu0 %v7851_v51  ;;  %v223_v51 = vld [vmem:[#allocation6 + $0x90] sm:$0xff] }
  0xb5   :  { %6904 = vmatprep.subr.bf16.mxu0 %v7852_v60 }
  0xb7   :  { %6873 = vmatmul.mubr.bf16.gmra.mrb[4].mxu0 %v7813_v27 }
  0xb8   :  { %6876 = vmatprep.mubr.bf16.mxu0 %v7814_v28  ;;  %6905 = vmatpush3.bf16.msra.mxu0 %v7852_v60 }
  0xb9   :  { %6906 = vmatprep.subr.bf16.mxu0 %v7853_v7 }
  0xbc   :  { %6907 = vmatpush3.bf16.msra.mxu0 %v7853_v7 }
  0xbf   :  { %6877 = vmatmul.mubr.bf16.gmra.mrb[8].mxu0 %v7815_v29 }
  0xc0   :  { %6880 = vmatprep.mubr.bf16.mxu0 %v7816_v30 }
  0xc7   :  { %6881 = vmatmul.mubr.bf16.gmra.mrb[12].mxu0 %v7817_v31 }
  0xc8   :  { %6884 = vmatprep.mubr.bf16.mxu0 %v7818_v32 }
  0xcf   :  { %6885 = vmatmul.mubr.bf16.gmra.mrb[16].mxu0 %v7819_v33  ;;  %v219_v33 = vld [vmem:[#allocation6 + $0x70] sm:$0xff] }
  0xd0   :  { %6888 = vmatprep.mubr.bf16.mxu0 %v7820_v34  ;;  %v217_v34 = vld [vmem:[#allocation6 + $0x60] sm:$0xff] }
  0xd7   :  { %6889 = vmatmul.mubr.bf16.gmra.mrb[20].mxu0 %v7821_v35 }
  0xd8   :  { %6892 = vmatprep.mubr.bf16.mxu0 %v7822_v36 }
  0xdf   :  { %6893 = vmatmul.mubr.bf16.gmra.mrb[24].mxu0 %v7823_v37  ;;  %v220_v37 = vld [vmem:[#allocation6 + $0x78] sm:$0xff] }
  0xe0   :  { %6896 = vmatprep.mubr.bf16.mxu0 %v7824_v38 }
  0xe7   :  { %6897 = vmatmul.mubr.bf16.gmra.mrb[28].mxu0 %v7825_v39 }
 0x182   :  { %v6870_v43 = vpop.f32.mrb[0].mxu0 }
 0x183   :  { %v376_v45 = vadd.f32 %v6870_v43, %v207_v41  ;;  %v367_v46 = vpop.f32.mrb[1].mxu0  ;;  %v218_v41 = vld [vmem:[#allocation6 + $0x68] sm:$0xff] }
 0x184   :  { %v368_v48 = vadd.f32 %v367_v46, %v205_v42  ;;  %v6871_v49 = vpop.f32.mrb[2].mxu0 }
 0x185   :  { %v379_v52 = vadd.f32 %v6871_v49, %v208_v44  ;;  %v370_v53 = vpop.f32.mrb[3].mxu0  ;;  %v496_v55 = vmax.f32 %v376_v45, 0.0 }
 0x186   :  { %v371_v54 = vadd.f32 %v370_v53, %v206_v47  ;;  %v494_v58 = vmax.f32 %v368_v48, 0.0 }
 0x187   :  { %v497_v56 = vmax.f32 %v379_v52, 0.0  ;;  %v221_v52 = vld [vmem:[#allocation6 + $0x80] sm:$0xff] }
 0x188   :  { %v495_v59 = vmax.f32 %v371_v54, 0.0 }
 0x189   :  { %v8637_v62 = vpack.c.bf16 %v497_v56, %v496_v55  ;;  %v224_v55 = vld [vmem:[#allocation6 + $0x98] sm:$0xff] }
 0x18a   :  { %v6874_v63 = vpop.f32.mrb[4].mxu0  ;;  %v8639_v1 = vpack.c.bf16 %v495_v59, %v494_v58  ;;  %v222_v59 = vld [vmem:[#allocation6 + $0x88] sm:$0xff] }
 0x18b   :  { %v392_v2 = vadd.f32 %v6874_v63, %v211_v57  ;;  %v383_v3 = vpop.f32.mrb[5].mxu0 }
 0x18c   :  { %v384_v5 = vadd.f32 %v383_v3, %v209_v61  ;;  %v6875_v6 = vpop.f32.mrb[6].mxu0 }
 0x18d   :  { %v395_v8 = vadd.f32 %v6875_v6, %v212_v0  ;;  %v386_v9 = vpop.f32.mrb[7].mxu0  ;;  %v500_v11 = vmax.f32 %v392_v2, 0.0 }
 0x18e   :  { %v387_v10 = vadd.f32 %v386_v9, %v210_v4  ;;  %v498_v13 = vmax.f32 %v384_v5, 0.0  ;;  %v227_v5 = vld [vmem:[#allocation6 + $0xb0] sm:$0xff] }
 0x18f   :  { %v501_v12 = vmax.f32 %v395_v8, 0.0  ;;  %v225_v8 = vld [vmem:[#allocation6 + $0xa0] sm:$0xff] }
 0x190   :  { %v499_v14 = vmax.f32 %v387_v10, 0.0 }
 0x191   :  { %v8641_v17 = vpack.c.bf16 %v501_v12, %v500_v11  ;;  %v228_v11 = vld [vmem:[#allocation6 + $0xb8] sm:$0xff] }
 0x192   :  { %v6878_v18 = vpop.f32.mrb[8].mxu0  ;;  %v8643_v20 = vpack.c.bf16 %v499_v14, %v498_v13 }
 0x193   :  { %v408_v21 = vadd.f32 %v6878_v18, %v215_v15  ;;  %v399_v22 = vpop.f32.mrb[9].mxu0  ;;  %v226_v15 = vld [vmem:[#allocation6 + $0xa8] sm:$0xff] }
 0x194   :  { %v400_v24 = vadd.f32 %v399_v22, %v213_v16  ;;  %v6879_v25 = vpop.f32.mrb[10].mxu0 }
 0x195   :  { %v411_v26 = vadd.f32 %v6879_v25, %v216_v19  ;;  %v402_v27 = vpop.f32.mrb[11].mxu0  ;;  %v504_v29 = vmax.f32 %v408_v21, 0.0 }
 0x196   :  { %v403_v28 = vadd.f32 %v402_v27, %v214_v23  ;;  %v502_v31 = vmax.f32 %v400_v24, 0.0  ;;  %v231_v27 = vld [vmem:[#allocation6 + $0xd0] sm:$0xff] }
 0x197   :  { %v505_v30 = vmax.f32 %v411_v26, 0.0 }
 0x198   :  { %v503_v32 = vmax.f32 %v403_v28, 0.0  ;;  %v229_v28 = vld [vmem:[#allocation6 + $0xc0] sm:$0xff] }
 0x199   :  { %v8645_v35 = vpack.c.bf16 %v505_v30, %v504_v29 }
 0x19a   :  { %v6882_v36 = vpop.f32.mrb[12].mxu0  ;;  %v8647_v38 = vpack.c.bf16 %v503_v32, %v502_v31  ;;  %v232_v31 = vld [vmem:[#allocation6 + $0xd8] sm:$0xff] }
 0x19b   :  { %v424_v39 = vadd.f32 %v6882_v36, %v219_v33  ;;  %v415_v40 = vpop.f32.mrb[13].mxu0  ;;  %v230_v36 = vld [vmem:[#allocation6 + $0xc8] sm:$0xff] }
 0x19c   :  { %v416_v42 = vadd.f32 %v415_v40, %v217_v34  ;;  %v6883_v43 = vpop.f32.mrb[14].mxu0 }
 0x19d   :  { %v427_v44 = vadd.f32 %v6883_v43, %v220_v37  ;;  %v418_v45 = vpop.f32.mrb[15].mxu0  ;;  %v508_v47 = vmax.f32 %v424_v39, 0.0 }
 0x19e   :  { %v419_v46 = vadd.f32 %v418_v45, %v218_v41  ;;  %v506_v49 = vmax.f32 %v416_v42, 0.0  ;;  %v235_v45 = vld [vmem:[#allocation6 + $0xf0] sm:$0xff] }
 0x19f   :  { %v509_v48 = vmax.f32 %v427_v44, 0.0 }
 0x1a0   :  { %v507_v50 = vmax.f32 %v419_v46, 0.0  ;;  %v233_v46 = vld [vmem:[#allocation6 + $0xe0] sm:$0xff] }
 0x1a1   :  { %v8649_v53 = vpack.c.bf16 %v509_v48, %v508_v47 }
 0x1a2   :  { %v6886_v54 = vpop.f32.mrb[16].mxu0  ;;  %v8651_v56 = vpack.c.bf16 %v507_v50, %v506_v49  ;;  %v236_v49 = vld [vmem:[#allocation6 + $0xf8] sm:$0xff] }
 0x1a3   :  { %v440_v57 = vadd.f32 %v6886_v54, %v223_v51  ;;  %v431_v58 = vpop.f32.mrb[17].mxu0  ;;  %v234_v54 = vld [vmem:[#allocation6 + $0xe8] sm:$0xff] }
 0x1a4   :  { %v6887_v60 = vpop.f32.mrb[18].mxu0  ;;  %v432_v61 = vadd.f32 %v431_v58, %v221_v52 }
 0x1a5   :  { %v443_v63 = vadd.f32 %v6887_v60, %v224_v55  ;;  %v434_v0 = vpop.f32.mrb[19].mxu0  ;;  %v512_v3 = vmax.f32 %v440_v57, 0.0 }
 0x1a6   :  { %v435_v2 = vadd.f32 %v434_v0, %v222_v59  ;;  %v510_v6 = vmax.f32 %v432_v61, 0.0 }
 0x1a7   :  { %v513_v4 = vmax.f32 %v443_v63, 0.0 }
 0x1a8   :  { %v511_v7 = vmax.f32 %v435_v2, 0.0 }
 0x1a9   :  { %v551_v9 = vpack.c.bf16 %v513_v4, %v512_v3  ;;  %v7828_v3 = vld [vmem:[#allocation9] ss:$8 sps:$4 sm:$0xff]   ;;  %v7829_v4 = vld [vmem:[#allocation9 + $0x14] ss:$8 sps:$4 sm:$0xff]  }
 0x1aa   :  { %v6890_v10 = vpop.f32.mrb[20].mxu0  ;;  %v550_v12 = vpack.c.bf16 %v511_v7, %v510_v6  ;;  %v7834_v6 = vld [vmem:[#allocation9 + $0x20] ss:$8 sps:$4 sm:$0xff]   ;;  %v7835_v7 = vld [vmem:[#allocation9 + $0x34] ss:$8 sps:$4 sm:$0xff]  }
 0x1ab   :  { %v456_v13 = vadd.f32 %v6890_v10, %v227_v5  ;;  %v447_v14 = vpop.f32.mrb[21].mxu0  ;;  %v7832_v5 = vld [vmem:[#allocation9 + $0x24] ss:$8 sps:$4 sm:$0xff]  }
 0x1ac   :  { %v448_v16 = vadd.f32 %v447_v14, %v225_v8  ;;  %v6891_v18 = vpop.f32.mrb[22].mxu0  ;;  %6249 = vmatprep.subr.bf16.mxu1 %v550_v12  ;;  %v7838_v8 = vld [vmem:[#allocation9 + $0x44] ss:$8 sps:$4 sm:$0xff]   ;;  %v7847_v12 = vld [vmem:[#allocation9 + $0x74] ss:$8 sps:$4 sm:$0xff]  }
 0x1ad   :  { %v459_v19 = vadd.f32 %v6891_v18, %v228_v11  ;;  %v450_v21 = vpop.f32.mrb[23].mxu0  ;;  %6250 = vmatpush3.bf16.msra.mxu1 %v8639_v1  ;;  %v516_v23 = vmax.f32 %v456_v13, 0.0  ;;  %v7844_v10 = vld [vmem:[#allocation9 + $0x64] ss:$8 sps:$4 sm:$0xff]   ;;  %v7846_v11 = vld [vmem:[#allocation9 + $0x60] ss:$8 sps:$4 sm:$0xff]  }
 0x1ae   :  { %v451_v22 = vadd.f32 %v450_v21, %v226_v15  ;;  %6251 = vmatprep.subr.bf16.mxu1 %v551_v9  ;;  %v514_v25 = vmax.f32 %v448_v16, 0.0  ;;  %v7841_v9 = vld [vmem:[#allocation9 + $0x54] ss:$8 sps:$4 sm:$0xff]   ;;  %v7849_v13 = vld [vmem:[#allocation9 + $0x70] ss:$8 sps:$4 sm:$0xff]   ;;  %v7854_v14 = vld [vmem:[#allocation11 + $0x20] sm:$0xff]  }
 0x1af   :  { %v517_v24 = vmax.f32 %v459_v19, 0.0  ;;  %6908 = vmatprep.subr.bf16.mxu0 %v7854_v14  ;;  %v7855_v15 = vld [vmem:[#allocation11 + $0x28] sm:$0xff]   ;;  %v7856_v16 = vld [vmem:[#allocation11 + $0x30] sm:$0xff]   ;;  %v7857_v18 = vld [vmem:[#allocation11 + $0x38] sm:$0xff]   ;;  %v8661_v19 = vstv %s736_s0 }
 0x1b0   :  { %v515_v26 = vmax.f32 %v451_v22, 0.0  ;;  %6909 = vmatpush3.bf16.msra.mxu0 %v7854_v14  ;;  %v7966_v21 = vld [vmem:[#allocation2] sm:$0xff] }
 0x1b1   :  { %6252 = vmatpush3.bf16.msra.mxu1 %v8637_v62  ;;  %v553_v29 = vpack.c.bf16 %v517_v24, %v516_v23  ;;  %6910 = vmatprep.subr.bf16.mxu0 %v7855_v15  ;;  %v738_v22 = vmul.f32 %v7966_v21, %v8661_v19 }
 0x1b2   :  { %v6894_v30 = vpop.f32.mrb[24].mxu0  ;;  %v552_v32 = vpack.c.bf16 %v515_v26, %v514_v25  ;;  %v7967_v25 = vld [vmem:[#allocation2 + $0x8] sm:$0xff] }
 0x1b3   :  { %v472_v33 = vadd.f32 %v6894_v30, %v231_v27  ;;  %v463_v34 = vpop.f32.mrb[25].mxu0  ;;  %v739_v26 = vmul.f32 %v7967_v25, %v8661_v19 }
 0x1b4   :  { %v464_v37 = vadd.f32 %v463_v34, %v229_v28  ;;  %v6895_v39 = vpop.f32.mrb[26].mxu0  ;;  %6253 = vmatprep.subr.bf16.mxu1 %v552_v32  ;;  %6911 = vmatpush3.bf16.msra.mxu0 %v7855_v15 }
 0x1b5   :  { %v475_v1 = vadd.f32 %v6895_v39, %v232_v31  ;;  %v466_v40 = vpop.f32.mrb[27].mxu0  ;;  %6254 = vmatpush3.bf16.msra.mxu1 %v8643_v20  ;;  %v520_v42 = vmax.f32 %v472_v33, 0.0  ;;  %6912 = vmatprep.subr.bf16.mxu0 %v7856_v16  ;;  %v7968_v39 = vld [vmem:[#allocation2 + $0x10] sm:$0xff] }
 0x1b6   :  { %v467_v41 = vadd.f32 %v466_v40, %v230_v36  ;;  %6255 = vmatprep.subr.bf16.mxu1 %v553_v29  ;;  %v518_v62 = vmax.f32 %v464_v37, 0.0 }
 0x1b7   :  { %v521_v43 = vmax.f32 %v475_v1, 0.0  ;;  %v740_v1 = vmul.f32 %v7968_v39, %v8661_v19 }
 0x1b8   :  { %v519_v44 = vmax.f32 %v467_v41, 0.0  ;;  %6913 = vmatpush3.bf16.msra.mxu0 %v7856_v16  ;;  %v7969_v41 = vld [vmem:[#allocation2 + $0x18] sm:$0xff] }
 0x1b9   :  { %6256 = vmatpush3.bf16.msra.mxu1 %v8641_v17  ;;  %v555_v47 = vpack.c.bf16 %v521_v43, %v520_v42  ;;  %6914 = vmatprep.subr.bf16.mxu0 %v7857_v18  ;;  %v741_v42 = vmul.f32 %v7969_v41, %v8661_v19 }
 0x1ba   :  { %v6898_v48 = vpop.f32.mrb[28].mxu0  ;;  %v554_v50 = vpack.c.bf16 %v519_v44, %v518_v62 }
 0x1bb   :  { %v488_v51 = vadd.f32 %v6898_v48, %v235_v45  ;;  %v479_v52 = vpop.f32.mrb[29].mxu0 }
 0x1bc   :  { %v480_v55 = vadd.f32 %v479_v52, %v233_v46  ;;  %v6899_v57 = vpop.f32.mrb[30].mxu0  ;;  %6257 = vmatprep.subr.bf16.mxu1 %v554_v50  ;;  %6915 = vmatpush3.bf16.msra.mxu0 %v7857_v18  ;;  %v7970_v50 = vld [vmem:[#allocation2 + $0x20] sm:$0xff] }
 0x1bd   :  { %v491_v20 = vadd.f32 %v6899_v57, %v236_v49  ;;  %v482_v58 = vpop.f32.mrb[31].mxu0  ;;  %6258 = vmatpush3.bf16.msra.mxu1 %v8647_v38  ;;  %v524_v60 = vmax.f32 %v488_v51, 0.0  ;;  %v7831_v38 = vld [vmem:[#allocation9 + $0x10] ss:$8 sps:$4 sm:$0xff]   ;;  %v742_v51 = vmul.f32 %v7970_v50, %v8661_v19 }
 0x1be   :  { %v483_v59 = vadd.f32 %v482_v58, %v234_v54  ;;  %6259 = vmatprep.subr.bf16.mxu1 %v555_v47  ;;  %v522_v17 = vmax.f32 %v480_v55, 0.0  ;;  %v7971_v54 = vld [vmem:[#allocation2 + $0x28] sm:$0xff] }
 0x1bf   :  { %v525_v61 = vmax.f32 %v491_v20, 0.0  ;;  %v743_v55 = vmul.f32 %v7971_v54, %v8661_v19 }
 0x1c0   :  { %v523_v63 = vmax.f32 %v483_v59, 0.0 }
 0x1c1   :  { %6260 = vmatpush3.bf16.msra.mxu1 %v8645_v35  ;;  %v557_v0 = vpack.c.bf16 %v525_v61, %v524_v60  ;;  %v7837_v35 = vld [vmem:[#allocation9 + $0x30] ss:$8 sps:$4 sm:$0xff]  }
 0x1c2   :  { %v556_v2 = vpack.c.bf16 %v523_v63, %v522_v17 }
 0x1c4   :  { %6261 = vmatprep.subr.bf16.mxu1 %v556_v2 }
 0x1c5   :  { %6262 = vmatpush3.bf16.msra.mxu1 %v8651_v56  ;;  %v7840_v56 = vld [vmem:[#allocation9 + $0x40] ss:$8 sps:$4 sm:$0xff]  }
 0x1c6   :  { %6263 = vmatprep.subr.bf16.mxu1 %v557_v0  ;;  %v7972_v0 = vld [vmem:[#allocation2 + $0x30] sm:$0xff] }
 0x1c7   :  { %v744_v2 = vmul.f32 %v7972_v0, %v8661_v19  ;;  %v7858_v0 = vld [vmem:[#allocation11 + $0x40] sm:$0xff]  }
 0x1c8   :  { %6932 = vmatprep.subr.bf16.mxu0 %v7858_v0 }
 0x1c9   :  { %6264 = vmatpush3.bf16.msra.mxu1 %v8649_v53  ;;  %v7843_v53 = vld [vmem:[#allocation9 + $0x50] ss:$8 sps:$4 sm:$0xff]  }
 0x1cc   :  { %671 = vmatmul.mubr.bf16.vlgmr.msra.gmra.mrb[0].mxu1 %v7828_v3 }
 0x1cd   :  { %678 = vmatprep.mubr.bf16.mxu1 %v7829_v4  ;;  %v7973_v4 = vld [vmem:[#allocation2 + $0x38] sm:$0xff] }
 0x1d4   :  { %679 = vmatmul.mubr.bf16.gmra.mrb[4].mxu1 %v7831_v38  ;;  %v745_v38 = vmul.f32 %v7973_v4, %v8661_v19 }
 0x1d5   :  { %686 = vmatprep.mubr.bf16.mxu1 %v7832_v5 }
 0x1dc   :  { %687 = vmatmul.mubr.bf16.gmra.mrb[8].mxu1 %v7834_v6 }
 0x1dd   :  { %694 = vmatprep.mubr.bf16.mxu1 %v7835_v7 }
 0x1e4   :  { %695 = vmatmul.mubr.bf16.gmra.mrb[12].mxu1 %v7837_v35 }
 0x1e5   :  { %702 = vmatprep.mubr.bf16.mxu1 %v7838_v8 }
 0x1ec   :  { %703 = vmatmul.mubr.bf16.gmra.mrb[16].mxu1 %v7840_v56 }
 0x1ed   :  { %710 = vmatprep.mubr.bf16.mxu1 %v7841_v9 }
 0x1f4   :  { %711 = vmatmul.mubr.bf16.gmra.mrb[20].mxu1 %v7843_v53 }
 0x1f5   :  { %718 = vmatprep.mubr.bf16.mxu1 %v7844_v10  ;;  %v7974_v10 = vld [vmem:[#allocation2 + $0x40] sm:$0xff] }
 0x1fc   :  { %719 = vmatmul.mubr.bf16.gmra.mrb[24].mxu1 %v7846_v11  ;;  %v746_v11 = vmul.f32 %v7974_v10, %v8661_v19 }
 0x1fd   :  { %726 = vmatprep.mubr.bf16.mxu1 %v7847_v12 }
 0x204   :  { %727 = vmatmul.mubr.bf16.gmra.mrb[28].mxu1 %v7849_v13  ;;  %v7975_v13 = vld [vmem:[#allocation2 + $0x48] sm:$0xff] }
 0x205   :  { %v747_v14 = vmul.f32 %v7975_v13, %v8661_v19 }
 0x29f   :  { %v6265_v23 = vpop.f32.mrb[0].mxu1 }
 0x2a0   :  { %v6266_v24 = vpop.f32.mrb[1].mxu1 }
 0x2a1   :  { %v6267_v27 = vadd.f32 %v6266_v24, %v6265_v23  ;;  %v6268_v28 = vpop.f32.mrb[2].mxu1 }
 0x2a2   :  { %v6269_v29 = vpop.f32.mrb[3].mxu1 }
 0x2a3   :  { %v754_v30 = vadd.f32 %v6267_v27, %v738_v22  ;;  %v6270_v31 = vadd.f32 %v6269_v29, %v6268_v28  ;;  %v7977_v29 = vld [vmem:[#allocation2 + $0x58] sm:$0xff] }
 0x2a5   :  { %v755_v32 = vadd.f32 %v6270_v31, %v739_v26  ;;  %v7976_v26 = vld [vmem:[#allocation2 + $0x50] sm:$0xff] }
 0x2a6   :  { %v748_v27 = vmul.f32 %v7976_v26, %v8661_v19 }
 0x2a7   :  { %v6271_v33 = vpop.f32.mrb[4].mxu1  ;;  %v770_v34 = vpack.c.bf16 %v755_v32, %v754_v30  ;;  %v749_v30 = vmul.f32 %v7977_v29, %v8661_v19 }
 0x2a8   :  { %v6272_v36 = vpop.f32.mrb[5].mxu1 }
 0x2a9   :  { %v6273_v37 = vadd.f32 %v6272_v36, %v6271_v33  ;;  %v6274_v40 = vpop.f32.mrb[6].mxu1  ;;  %6916 = vmatprep.mubr.bf16.mxu0 %v770_v34 }
 0x2aa   :  { %v6275_v43 = vpop.f32.mrb[7].mxu1 }
 0x2ab   :  { %v6276_v62 = vadd.f32 %v6275_v43, %v6274_v40  ;;  %v756_v44 = vadd.f32 %v6273_v37, %v740_v1  ;;  %v7978_v40 = vld [vmem:[#allocation2 + $0x60] sm:$0xff]  ;;  %v7979_v43 = vld [vmem:[#allocation2 + $0x68] sm:$0xff] }
 0x2ac   :  { %v750_v41 = vmul.f32 %v7978_v40, %v8661_v19 }
 0x2ad   :  { %v757_v45 = vadd.f32 %v6276_v62, %v741_v42  ;;  %v751_v62 = vmul.f32 %v7979_v43, %v8661_v19 }
 0x2af   :  { %v771_v46 = vpack.c.bf16 %v757_v45, %v756_v44  ;;  %v6277_v47 = vpop.f32.mrb[8].mxu1 }
 0x2b0   :  { %v6278_v48 = vpop.f32.mrb[9].mxu1 }
 0x2b1   :  { %v6279_v49 = vadd.f32 %v6278_v48, %v6277_v47  ;;  %v6280_v52 = vpop.f32.mrb[10].mxu1  ;;  %6917 = vmatmul.mubr.bf16.vlgmr.msra.gmra.mrb[32].mxu0 %v771_v46 }
 0x2b2   :  { %v6281_v57 = vpop.f32.mrb[11].mxu1  ;;  %6933 = vmatpush3.bf16.msra.mxu0 %v7858_v0 }
 0x2b3   :  { %v6282_v20 = vadd.f32 %v6281_v57, %v6280_v52  ;;  %v758_v58 = vadd.f32 %v6279_v49, %v742_v51  ;;  %v7980_v52 = vld [vmem:[#allocation2 + $0x70] sm:$0xff]  ;;  %v7981_v57 = vld [vmem:[#allocation2 + $0x78] sm:$0xff] }
 0x2b4   :  { %v752_v54 = vmul.f32 %v7980_v52, %v8661_v19 }
 0x2b5   :  { %v759_v59 = vadd.f32 %v6282_v20, %v743_v55  ;;  %v753_v20 = vmul.f32 %v7981_v57, %v8661_v19 }
 0x2b7   :  { %v6283_v60 = vpop.f32.mrb[12].mxu1  ;;  %v772_v61 = vpack.c.bf16 %v759_v59, %v758_v58 }
 0x2b8   :  { %v6284_v17 = vpop.f32.mrb[13].mxu1 }
 0x2b9   :  { %v6285_v63 = vadd.f32 %v6284_v17, %v6283_v60  ;;  %v6286_v3 = vpop.f32.mrb[14].mxu1  ;;  %6920 = vmatprep.mubr.bf16.mxu0 %v772_v61 }
 0x2ba   :  { %v6287_v5 = vpop.f32.mrb[15].mxu1 }
 0x2bb   :  { %v6288_v6 = vadd.f32 %v6287_v5, %v6286_v3  ;;  %v760_v7 = vadd.f32 %v6285_v63, %v744_v2  ;;  %v8450_v63 = vmov 0.0   ;;  %v794_v2 = vlaneseq }
 0x2bc   :  { %1023 = vmatprep.mubr.f32.mxu1 %v8450_v63 }
 0x2bd   :  { %v761_v35 = vadd.f32 %v6288_v6, %v745_v38  ;;  %v8680_v3 = vshrl.u32 %v794_v2, 7  ;;  %v8685_v38 = vld [vmem:[#allocation12] sm:$0xff] }
 0x2bf   :  { %v6289_v8 = vpop.f32.mrb[16].mxu1  ;;  %v773_v56 = vpack.c.bf16 %v761_v35, %v760_v7  ;;  %v8683_v4 = vsub.s32 0, %v8680_v3 }
 0x2c0   :  { %v6290_v9 = vpop.f32.mrb[17].mxu1 }
 0x2c1   :  { %v6291_v53 = vadd.f32 %v6290_v9, %v6289_v8  ;;  %v6292_v12 = vpop.f32.mrb[18].mxu1  ;;  %6921 = vmatmul.mubr.bf16.gmra.mrb[36].mxu0 %v773_v56  ;;  %v8689_v19 = vrot.slane %v8685_v38, %v8683_v4 }
 0x2c2   :  { %v6293_v15 = vpop.f32.mrb[19].mxu1 }
 0x2c3   :  { %v6294_v16 = vadd.f32 %v6293_v15, %v6292_v12  ;;  %v762_v18 = vadd.f32 %v6291_v53, %v746_v11 }
 0x2c5   :  { %v763_v21 = vadd.f32 %v6294_v16, %v747_v14 }
 0x2c7   :  { %v6295_v22 = vpop.f32.mrb[20].mxu1  ;;  %v774_v23 = vpack.c.bf16 %v763_v21, %v762_v18 }
 0x2c8   :  { %v6296_v24 = vpop.f32.mrb[21].mxu1 }
 0x2c9   :  { %v6297_v25 = vadd.f32 %v6296_v24, %v6295_v22  ;;  %v6298_v28 = vpop.f32.mrb[22].mxu1  ;;  %6924 = vmatprep.mubr.bf16.mxu0 %v774_v23 }
 0x2ca   :  { %v6299_v31 = vpop.f32.mrb[23].mxu1 }
 0x2cb   :  { %v6300_v32 = vadd.f32 %v6299_v31, %v6298_v28  ;;  %v764_v33 = vadd.f32 %v6297_v25, %v748_v27 }
 0x2cd   :  { %v765_v34 = vadd.f32 %v6300_v32, %v749_v30 }
 0x2cf   :  { %v6301_v36 = vpop.f32.mrb[24].mxu1  ;;  %v775_v37 = vpack.c.bf16 %v765_v34, %v764_v33 }
 0x2d0   :  { %v6302_v39 = vpop.f32.mrb[25].mxu1 }
 0x2d1   :  { %v6303_v1 = vadd.f32 %v6302_v39, %v6301_v36  ;;  %v6304_v42 = vpop.f32.mrb[26].mxu1  ;;  %6925 = vmatmul.mubr.bf16.gmra.mrb[40].mxu0 %v775_v37 }
 0x2d2   :  { %v6305_v44 = vpop.f32.mrb[27].mxu1 }
 0x2d3   :  { %v6306_v45 = vadd.f32 %v6305_v44, %v6304_v42  ;;  %v766_v46 = vadd.f32 %v6303_v1, %v750_v41 }
 0x2d5   :  { %v767_v47 = vadd.f32 %v6306_v45, %v751_v62 }
 0x2d7   :  { %v6307_v48 = vpop.f32.mrb[28].mxu1  ;;  %v776_v49 = vpack.c.bf16 %v767_v47, %v766_v46 }
 0x2d8   :  { %v6308_v50 = vpop.f32.mrb[29].mxu1 }
 0x2d9   :  { %v6309_v51 = vadd.f32 %v6308_v50, %v6307_v48  ;;  %v6310_v55 = vpop.f32.mrb[30].mxu1  ;;  %6928 = vmatprep.mubr.bf16.mxu0 %v776_v49 }
 0x2da   :  { %v6311_v58 = vpop.f32.mrb[31].mxu1 }
 0x2db   :  { %v6312_v59 = vadd.f32 %v6311_v58, %v6310_v55  ;;  %v768_v60 = vadd.f32 %v6309_v51, %v752_v54 }
 0x2dd   :  { %v769_v61 = vadd.f32 %v6312_v59, %v753_v20 }
 0x2df   :  { %v777_v17 = vpack.c.bf16 %v769_v61, %v768_v60 }
 0x2e1   :  { %6929 = vmatmul.mubr.bf16.gmra.mrb[44].mxu0 %v777_v17 }
 0x384   :  { %v6918_v5 = vpop.f32.mrb[32].mxu0 }
 0x385   :  { %v880_v6 = vpop.f32.mrb[33].mxu0  ;;  %v8698_v9 = vadd.f32 %v6918_v5, %v8689_v19 }
 0x386   :  { %v8692_v7 = vadd.f32 %v880_v6, %v8689_v19  ;;  %v6919_v35 = vpop.f32.mrb[34].mxu0 }
 0x387   :  { %v8695_v8 = vadd.f32 %v6919_v35, %v8689_v19  ;;  %v883_v56 = vpop.f32.mrb[35].mxu0  ;;  %v945_v14 = vmul.f32 %v8698_v9, %v8698_v9 }
 0x388   :  { %v8701_v53 = vadd.f32 %v883_v56, %v8689_v19  ;;  %v943_v10 = vmul.f32 %v8692_v7, %v8692_v7 }
 0x389   :  { %v946_v12 = vmul.f32 %v8695_v8, %v8695_v8  ;;  %v7478_v18 = vpack.c.bf16 %v8695_v8, %v8698_v9 }
 0x38a   :  { %v944_v11 = vmul.f32 %v8701_v53, %v8701_v53  ;;  %v7474_v15 = vpack.c.bf16 %v8701_v53, %v8692_v7 }
 0x38b   :  { %v7476_v16 = vpack.c.bf16 %v946_v12, %v945_v14  ;;  %v7860_v12 = vld [vmem:[#allocation11 + $0x50] sm:$0xff]   ;;  %v7862_v14 = vld [vmem:[#allocation11 + $0x60] sm:$0xff]  }
 0x38c   :  { %v7472_v13 = vpack.c.bf16 %v944_v11, %v943_v10  ;;  %v10793_v10 = vmov 0.0078125   ;;  %v7859_v11 = vld [vmem:[#allocation11 + $0x48] sm:$0xff]  }
 0x38d   :  { %6934 = vmatprep.subr.bf16.mxu0 %v7859_v11 }
 0x38e   :  { %7473 = vmatprep.subr.bf16.mxu1 %v7472_v13  ;;  %6935 = vmatpush3.bf16.msra.mxu0 %v7859_v11  ;;  %v7861_v13 = vld [vmem:[#allocation11 + $0x58] sm:$0xff]  }
 0x38f   :  { %7475 = vmatpush1.bf16.msra.mxu1 %v7474_v15  ;;  %6936 = vmatprep.subr.bf16.mxu0 %v7860_v12  ;;  %v7863_v15 = vld [vmem:[#allocation11 + $0x68] sm:$0xff]  }
 0x390   :  { %7477 = vmatprep.subr.bf16.mxu1 %v7476_v16  ;;  %v7864_v16 = vld [vmem:[#allocation11 + $0x70] sm:$0xff]  }
 0x392   :  { %6937 = vmatpush3.bf16.msra.mxu0 %v7860_v12 }
 0x393   :  { %7479 = vmatpush1.bf16.msra.mxu1 %v7478_v18  ;;  %6938 = vmatprep.subr.bf16.mxu0 %v7861_v13  ;;  %v7865_v18 = vld [vmem:[#allocation11 + $0x78] sm:$0xff]  }
 0x394   :  { %v6922_v21 = vpop.f32.mrb[36].mxu0 }
 0x395   :  { %v896_v22 = vpop.f32.mrb[37].mxu0  ;;  %v8722_v27 = vadd.f32 %v6922_v21, %v8689_v19 }
 0x396   :  { %v8716_v23 = vadd.f32 %v896_v22, %v8689_v19  ;;  %v6923_v24 = vpop.f32.mrb[38].mxu0  ;;  %6939 = vmatpush3.bf16.msra.mxu0 %v7861_v13 }
 0x397   :  { %v8719_v25 = vadd.f32 %v6923_v24, %v8689_v19  ;;  %v899_v26 = vpop.f32.mrb[39].mxu0  ;;  %v949_v33 = vmul.f32 %v8722_v27, %v8722_v27  ;;  %6940 = vmatprep.subr.bf16.mxu0 %v7862_v14 }
 0x398   :  { %v8725_v28 = vadd.f32 %v899_v26, %v8689_v19  ;;  %v947_v29 = vmul.f32 %v8716_v23, %v8716_v23 }
 0x399   :  { %v950_v31 = vmul.f32 %v8719_v25, %v8719_v25  ;;  %v7486_v37 = vpack.c.bf16 %v8719_v25, %v8722_v27 }
 0x39a   :  { %v948_v30 = vmul.f32 %v8725_v28, %v8725_v28  ;;  %v7482_v34 = vpack.c.bf16 %v8725_v28, %v8716_v23  ;;  %6941 = vmatpush3.bf16.msra.mxu0 %v7862_v14 }
 0x39b   :  { %v7484_v36 = vpack.c.bf16 %v950_v31, %v949_v33  ;;  %6942 = vmatprep.subr.bf16.mxu0 %v7863_v15  ;;  %v8794_v33 = vsub.s32 2, %v8680_v3 }
 0x39c   :  { %v7480_v32 = vpack.c.bf16 %v948_v30, %v947_v29 }
 0x39e   :  { %7481 = vmatprep.subr.bf16.mxu1 %v7480_v32  ;;  %6943 = vmatpush3.bf16.msra.mxu0 %v7863_v15  ;;  %v8791_v32 = vsub.s32 1, %v8680_v3 }
 0x39f   :  { %7483 = vmatpush1.bf16.msra.mxu1 %v7482_v34  ;;  %6944 = vmatprep.subr.bf16.mxu0 %v7864_v16 }
 0x3a0   :  { %7485 = vmatprep.subr.bf16.mxu1 %v7484_v36  ;;  %v1056_v36 = vrot.slane %v8685_v38, %v8791_v32 }
 0x3a2   :  { %6945 = vmatpush3.bf16.msra.mxu0 %v7864_v16 }
 0x3a3   :  { %7487 = vmatpush1.bf16.msra.mxu1 %v7486_v37  ;;  %6946 = vmatprep.subr.bf16.mxu0 %v7865_v18  ;;  %v8801_v37 = vrot.slane %v8685_v38, %v8794_v33 }
 0x3a4   :  { %v6926_v39 = vpop.f32.mrb[40].mxu0 }
 0x3a5   :  { %v912_v1 = vpop.f32.mrb[41].mxu0  ;;  %v8746_v62 = vadd.f32 %v6926_v39, %v8689_v19 }
 0x3a6   :  { %v8740_v40 = vadd.f32 %v912_v1, %v8689_v19  ;;  %v6927_v41 = vpop.f32.mrb[42].mxu0  ;;  %6947 = vmatpush3.bf16.msra.mxu0 %v7865_v18 }
 0x3a7   :  { %v8743_v42 = vadd.f32 %v6927_v41, %v8689_v19  ;;  %v915_v43 = vpop.f32.mrb[43].mxu0  ;;  %v953_v49 = vmul.f32 %v8746_v62, %v8746_v62 }
 0x3a8   :  { %v8749_v44 = vadd.f32 %v915_v43, %v8689_v19  ;;  %v951_v45 = vmul.f32 %v8740_v40, %v8740_v40 }
 0x3a9   :  { %v954_v47 = vmul.f32 %v8743_v42, %v8743_v42  ;;  %v7494_v52 = vpack.c.bf16 %v8743_v42, %v8746_v62 }
 0x3aa   :  { %v952_v46 = vmul.f32 %v8749_v44, %v8749_v44  ;;  %v7490_v50 = vpack.c.bf16 %v8749_v44, %v8740_v40 }
 0x3ab   :  { %v7492_v51 = vpack.c.bf16 %v954_v47, %v953_v49 }
 0x3ac   :  { %v7488_v48 = vpack.c.bf16 %v952_v46, %v951_v45 }
 0x3ae   :  { %7489 = vmatprep.subr.bf16.mxu1 %v7488_v48 }
 0x3af   :  { %7491 = vmatpush1.bf16.msra.mxu1 %v7490_v50 }
 0x3b0   :  { %7493 = vmatprep.subr.bf16.mxu1 %v7492_v51 }
 0x3b3   :  { %7495 = vmatpush1.bf16.msra.mxu1 %v7494_v52 }
 0x3b4   :  { %v6930_v54 = vpop.f32.mrb[44].mxu0 }
 0x3b5   :  { %v928_v55 = vpop.f32.mrb[45].mxu0  ;;  %v8770_v60 = vadd.f32 %v6930_v54, %v8689_v19 }
 0x3b6   :  { %v8764_v57 = vadd.f32 %v928_v55, %v8689_v19  ;;  %v6931_v20 = vpop.f32.mrb[46].mxu0 }
 0x3b7   :  { %v8767_v58 = vadd.f32 %v6931_v20, %v8689_v19  ;;  %v931_v59 = vpop.f32.mrb[47].mxu0  ;;  %v957_v6 = vmul.f32 %v8770_v60, %v8770_v60 }
 0x3b8   :  { %v8773_v61 = vadd.f32 %v931_v59, %v8689_v19  ;;  %v955_v17 = vmul.f32 %v8764_v57, %v8764_v57 }
 0x3b9   :  { %v958_v2 = vmul.f32 %v8767_v58, %v8767_v58  ;;  %v7502_v19 = vpack.c.bf16 %v8767_v58, %v8770_v60 }
 0x3ba   :  { %v956_v0 = vmul.f32 %v8773_v61, %v8773_v61  ;;  %v7498_v35 = vpack.c.bf16 %v8773_v61, %v8764_v57 }
 0x3bb   :  { %v7500_v56 = vpack.c.bf16 %v958_v2, %v957_v6 }
 0x3bc   :  { %v7496_v5 = vpack.c.bf16 %v956_v0, %v955_v17 }
 0x3be   :  { %7497 = vmatprep.subr.bf16.mxu1 %v7496_v5 }
 0x3bf   :  { %7499 = vmatpush1.bf16.msra.mxu1 %v7498_v35 }
 0x3c0   :  { %7501 = vmatprep.subr.bf16.mxu1 %v7500_v56 }
 0x3c3   :  { %7503 = vmatpush1.bf16.msra.mxu1 %v7502_v19 }
 0x3c6   :  { %1024 = vmatmul.mubr.f32.vlgmr.msra.gmra.mrb[32].mxu1 %v10793_v10 }
 0x3c7   :  { %1385 = vmatprep.mubr.f32.mxu1 %v8450_v63 }
 0x499   :  { %v1025_v21 = vpop.f32.mrb[32].mxu1 }
 0x49a   :  { %v1030_v22 = vmul.f32 %v1025_v21, %v1025_v21  ;;  %v1027_v24 = vpop.f32.mrb[33].mxu1  ;;  %v1036_v31 = vrot.slane %v1025_v21, %v8683_v4 }
 0x49c   :  { %v1031_v26 = vsub.f32 %v1027_v24, %v1030_v22  ;;  %v1037_v34 = vsub.f32 %v8692_v7, %v1036_v31  ;;  %v1038_v39 = vsub.f32 %v8701_v53, %v1036_v31  ;;  %v1039_v1 = vsub.f32 %v8698_v9, %v1036_v31 }
 0x49d   :  { %v1040_v41 = vsub.f32 %v8695_v8, %v1036_v31  ;;  %v1041_v43 = vsub.f32 %v8716_v23, %v1036_v31  ;;  %v1042_v45 = vsub.f32 %v8725_v28, %v1036_v31  ;;  %v1043_v46 = vsub.f32 %v8722_v27, %v1036_v31 }
 0x49e   :  { %v1032_v29 = vmax.f32 %v1031_v26, 0.0  ;;  %v1044_v7 = vsub.f32 %v8719_v25, %v1036_v31  ;;  %v1045_v47 = vsub.f32 %v8740_v40, %v1036_v31  ;;  %v1057_v48 = vmul.f32 %v1056_v36, %v1037_v34 }
 0x49f   :  { %v1046_v49 = vsub.f32 %v8749_v44, %v1036_v31  ;;  %v1047_v50 = vsub.f32 %v8746_v62, %v1036_v31  ;;  %v1048_v53 = vsub.f32 %v8743_v42, %v1036_v31  ;;  %v1049_v9 = vsub.f32 %v8764_v57, %v1036_v31 }
 0x4a0   :  { %v1073_v30 = vadd.f32 1e-05, %v1032_v29  ;;  %v1050_v8 = vsub.f32 %v8773_v61, %v1036_v31  ;;  %v1051_v23 = vsub.f32 %v8770_v60, %v1036_v31  ;;  %v1052_v28 = vsub.f32 %v8767_v58, %v1036_v31 }
 0x4a1   :  { %v1058_v27 = vmul.f32 %v1056_v36, %v1038_v39  ;;  %v1059_v51 = vmul.f32 %v1056_v36, %v1039_v1  ;;  %v1060_v25 = vmul.f32 %v1056_v36, %v1040_v41  ;;  %v1061_v52 = vmul.f32 %v1056_v36, %v1041_v43 }
 0x4a2   :  { %7946 = vrsqrt.f32 %v1073_v30  ;;  %v1062_v54 = vmul.f32 %v1056_v36, %v1042_v45  ;;  %v1063_v55 = vmul.f32 %v1056_v36, %v1043_v46  ;;  %v1064_v44 = vmul.f32 %v1056_v36, %v1044_v7 }
 0x4a3   :  { %v1065_v20 = vmul.f32 %v1056_v36, %v1045_v47  ;;  %v1066_v42 = vmul.f32 %v1056_v36, %v1046_v49  ;;  %v1067_v59 = vmul.f32 %v1056_v36, %v1047_v50  ;;  %v1068_v57 = vmul.f32 %v1056_v36, %v1048_v53 }
 0x4a4   :  { %v1069_v17 = vmul.f32 %v1056_v36, %v1049_v9  ;;  %v1070_v61 = vmul.f32 %v1056_v36, %v1050_v8  ;;  %v1071_v0 = vmul.f32 %v1056_v36, %v1051_v23  ;;  %v1072_v60 = vmul.f32 %v1056_v36, %v1052_v28 }
 0x4ac   :  { %v7947_v40 = vpop.eup %7946 }
 0x4ad   :  { %v1078_v62 = vrot.slane %v7947_v40, %v8683_v4 }
 0x4af   :  { %v1079_v2 = vmul.f32 %v1078_v62, %v1057_v48  ;;  %v1080_v58 = vmul.f32 %v1078_v62, %v1058_v27  ;;  %v1081_v5 = vmul.f32 %v1078_v62, %v1059_v51  ;;  %v1082_v6 = vmul.f32 %v1078_v62, %v1060_v25 }
 0x4b0   :  { %v1083_v35 = vmul.f32 %v1078_v62, %v1061_v52  ;;  %v1084_v56 = vmul.f32 %v1078_v62, %v1062_v54  ;;  %v1085_v19 = vmul.f32 %v1078_v62, %v1063_v55  ;;  %v1086_v11 = vmul.f32 %v1078_v62, %v1064_v44 }
 0x4b1   :  { %v1099_v12 = vadd.f32 %v8801_v37, %v1079_v2  ;;  %v1100_v13 = vadd.f32 %v8801_v37, %v1080_v58  ;;  %v1101_v14 = vadd.f32 %v8801_v37, %v1081_v5  ;;  %v1102_v15 = vadd.f32 %v8801_v37, %v1082_v6  ;;  %v7982_v2 = vld [vmem:[#allocation8] sm:$0xff]  }
 0x4b2   :  { %v1103_v16 = vadd.f32 %v8801_v37, %v1083_v35  ;;  %v1104_v18 = vadd.f32 %v8801_v37, %v1084_v56  ;;  %v1105_v21 = vadd.f32 %v8801_v37, %v1085_v19  ;;  %v1106_v22 = vadd.f32 %v8801_v37, %v1086_v11 }
 0x4b3   :  { %v1115_v24 = vmax.f32 %v1099_v12, 0.0  ;;  %v1116_v26 = vmax.f32 %v1100_v13, 0.0  ;;  %v1117_v29 = vmax.f32 %v1101_v14, 0.0  ;;  %v1118_v30 = vmax.f32 %v1102_v15, 0.0 }
 0x4b4   :  { %v1119_v31 = vmax.f32 %v1103_v16, 0.0  ;;  %v1120_v34 = vmax.f32 %v1104_v18, 0.0  ;;  %v1121_v36 = vmax.f32 %v1105_v21, 0.0  ;;  %v1122_v39 = vmax.f32 %v1106_v22, 0.0 }
 0x4b5   :  { %v1131_v1 = vpack.c.bf16 %v1116_v26, %v1115_v24  ;;  %v1132_v41 = vpack.c.bf16 %v1118_v30, %v1117_v29  ;;  %v1087_v43 = vmul.f32 %v1078_v62, %v1065_v20  ;;  %v1088_v45 = vmul.f32 %v1078_v62, %v1066_v42 }
 0x4b6   :  { %v1133_v46 = vpack.c.bf16 %v1120_v34, %v1119_v31  ;;  %v1134_v7 = vpack.c.bf16 %v1122_v39, %v1121_v36  ;;  %v1089_v47 = vmul.f32 %v1078_v62, %v1067_v59  ;;  %v1090_v48 = vmul.f32 %v1078_v62, %v1068_v57 }
 0x4b7   :  { %6948 = vmatprep.mubr.bf16.mxu0 %v1131_v1  ;;  %v1107_v49 = vadd.f32 %v8801_v37, %v1087_v43  ;;  %v1108_v50 = vadd.f32 %v8801_v37, %v1088_v45  ;;  %v1091_v53 = vmul.f32 %v1078_v62, %v1069_v17  ;;  %v1092_v9 = vmul.f32 %v1078_v62, %v1070_v61 }
 0x4b8   :  { %6949 = vmatmul.mubr.bf16.vlgmr.msra.gmra.mrb[48].mxu0 %v1132_v41  ;;  %v1109_v8 = vadd.f32 %v8801_v37, %v1089_v47  ;;  %v1110_v23 = vadd.f32 %v8801_v37, %v1090_v48  ;;  %v1093_v28 = vmul.f32 %v1078_v62, %v1071_v0  ;;  %v1094_v27 = vmul.f32 %v1078_v62, %v1072_v60 }
 0x4b9   :  { %6952 = vmatprep.mubr.bf16.mxu0 %v1133_v46  ;;  %v1123_v51 = vmax.f32 %v1107_v49, 0.0  ;;  %v1124_v25 = vmax.f32 %v1108_v50, 0.0  ;;  %v1111_v52 = vadd.f32 %v8801_v37, %v1091_v53  ;;  %v1112_v40 = vadd.f32 %v8801_v37, %v1092_v9 }
 0x4ba   :  { %v1125_v54 = vmax.f32 %v1109_v8, 0.0  ;;  %v1126_v55 = vmax.f32 %v1110_v23, 0.0  ;;  %v1113_v44 = vadd.f32 %v8801_v37, %v1093_v28  ;;  %v1114_v20 = vadd.f32 %v8801_v37, %v1094_v27 }
 0x4bb   :  { %v1135_v42 = vpack.c.bf16 %v1124_v25, %v1123_v51  ;;  %v1127_v59 = vmax.f32 %v1111_v52, 0.0  ;;  %v1128_v57 = vmax.f32 %v1112_v40, 0.0  ;;  %v8836_v58 = vsub.s32 3, %v8680_v3 }
 0x4bc   :  { %v1136_v17 = vpack.c.bf16 %v1126_v55, %v1125_v54  ;;  %v1129_v61 = vmax.f32 %v1113_v44, 0.0  ;;  %v1130_v0 = vmax.f32 %v1114_v20, 0.0 }
 0x4bd   :  { %v1137_v62 = vpack.c.bf16 %v1128_v57, %v1127_v59  ;;  %v8840_v37 = vrot.slane %v8685_v38, %v8836_v58 }
 0x4be   :  { %v1138_v60 = vpack.c.bf16 %v1130_v0, %v1129_v61 }
 0x4c0   :  { %6953 = vmatmul.mubr.bf16.gmra.mrb[52].mxu0 %v1134_v7 }
 0x4c1   :  { %6956 = vmatprep.mubr.bf16.mxu0 %v1135_v42 }
 0x4c8   :  { %6957 = vmatmul.mubr.bf16.gmra.mrb[56].mxu0 %v1136_v17 }
 0x4c9   :  { %6960 = vmatprep.mubr.bf16.mxu0 %v1137_v62 }
 0x4d0   :  { %6961 = vmatmul.mubr.bf16.gmra.mrb[60].mxu0 %v1138_v60 }
 0x4d1   :  { %6980 = vmatprep.mubr.bf16.mxu0 %v7982_v2 }
 0x58b   :  { %v6950_v5 = vpop.f32.mrb[48].mxu0 }
 0x58c   :  { %v1242_v6 = vpop.f32.mrb[49].mxu0  ;;  %v8849_v12 = vadd.f32 %v6950_v5, %v8840_v37 }
 0x58d   :  { %v8843_v35 = vadd.f32 %v1242_v6, %v8840_v37  ;;  %v6951_v56 = vpop.f32.mrb[50].mxu0 }
 0x58e   :  { %v8846_v19 = vadd.f32 %v6951_v56, %v8840_v37  ;;  %v1245_v11 = vpop.f32.mrb[51].mxu0  ;;  %v1307_v22 = vmul.f32 %v8849_v12, %v8849_v12 }
 0x58f   :  { %v8852_v13 = vadd.f32 %v1245_v11, %v8840_v37  ;;  %v1305_v14 = vmul.f32 %v8843_v35, %v8843_v35 }
 0x590   :  { %v1308_v16 = vmul.f32 %v8846_v19, %v8846_v19  ;;  %v7510_v41 = vpack.c.bf16 %v8846_v19, %v8849_v12 }
 0x591   :  { %v1306_v15 = vmul.f32 %v8852_v13, %v8852_v13  ;;  %v7506_v26 = vpack.c.bf16 %v8852_v13, %v8843_v35 }
 0x592   :  { %v7508_v31 = vpack.c.bf16 %v1308_v16, %v1307_v22 }
 0x593   :  { %v6954_v18 = vpop.f32.mrb[52].mxu0  ;;  %v7504_v21 = vpack.c.bf16 %v1306_v15, %v1305_v14 }
 0x594   :  { %v1258_v24 = vpop.f32.mrb[53].mxu0  ;;  %v8871_v39 = vadd.f32 %v6954_v18, %v8840_v37 }
 0x595   :  { %v8865_v29 = vadd.f32 %v1258_v24, %v8840_v37  ;;  %v6955_v30 = vpop.f32.mrb[54].mxu0  ;;  %7505 = vmatprep.subr.bf16.mxu1 %v7504_v21  ;;  %v7983_v21 = vld [vmem:[#allocation9 + $0x4] ss:$8 sps:$4 sm:$0xff]  }
 0x596   :  { %v8868_v34 = vadd.f32 %v6955_v30, %v8840_v37  ;;  %v1261_v36 = vpop.f32.mrb[55].mxu0  ;;  %7507 = vmatpush1.bf16.msra.mxu1 %v7506_v26  ;;  %v1311_v48 = vmul.f32 %v8871_v39, %v8871_v39 }
 0x597   :  { %v8874_v1 = vadd.f32 %v1261_v36, %v8840_v37  ;;  %7509 = vmatprep.subr.bf16.mxu1 %v7508_v31  ;;  %v1309_v43 = vmul.f32 %v8865_v29, %v8865_v29 }
 0x598   :  { %v1312_v46 = vmul.f32 %v8868_v34, %v8868_v34  ;;  %v7518_v25 = vpack.c.bf16 %v8868_v34, %v8871_v39 }
 0x599   :  { %v1310_v45 = vmul.f32 %v8874_v1, %v8874_v1  ;;  %v7514_v50 = vpack.c.bf16 %v8874_v1, %v8865_v29 }
 0x59a   :  { %7511 = vmatpush1.bf16.msra.mxu1 %v7510_v41  ;;  %v7516_v8 = vpack.c.bf16 %v1312_v46, %v1311_v48 }
 0x59b   :  { %v6958_v7 = vpop.f32.mrb[56].mxu0  ;;  %v7512_v47 = vpack.c.bf16 %v1310_v45, %v1309_v43  ;;  %v8941_v43 = vsub.s32 4, %v8680_v3  ;;  %v8944_v45 = vsub.s32 5, %v8680_v3 }
 0x59c   :  { %v1274_v49 = vpop.f32.mrb[57].mxu0  ;;  %v8895_v27 = vadd.f32 %v6958_v7, %v8840_v37 }
 0x59d   :  { %v8889_v53 = vadd.f32 %v1274_v49, %v8840_v37  ;;  %v6959_v9 = vpop.f32.mrb[58].mxu0  ;;  %7513 = vmatprep.subr.bf16.mxu1 %v7512_v47  ;;  %v1418_v7 = vrot.slane %v8685_v38, %v8941_v43  ;;  %v8951_v47 = vrot.slane %v8685_v38, %v8944_v45 }
 0x59e   :  { %v8892_v23 = vadd.f32 %v6959_v9, %v8840_v37  ;;  %v1277_v28 = vpop.f32.mrb[59].mxu0  ;;  %7515 = vmatpush1.bf16.msra.mxu1 %v7514_v50  ;;  %v1315_v20 = vmul.f32 %v8895_v27, %v8895_v27 }
 0x59f   :  { %v8898_v51 = vadd.f32 %v1277_v28, %v8840_v37  ;;  %7517 = vmatprep.subr.bf16.mxu1 %v7516_v8  ;;  %v1313_v52 = vmul.f32 %v8889_v53, %v8889_v53 }
 0x5a0   :  { %v1316_v54 = vmul.f32 %v8892_v23, %v8892_v23  ;;  %v7526_v5 = vpack.c.bf16 %v8892_v23, %v8895_v27 }
 0x5a1   :  { %v1314_v40 = vmul.f32 %v8898_v51, %v8898_v51  ;;  %v7522_v59 = vpack.c.bf16 %v8898_v51, %v8889_v53 }
 0x5a2   :  { %7519 = vmatpush1.bf16.msra.mxu1 %v7518_v25  ;;  %v7524_v61 = vpack.c.bf16 %v1316_v54, %v1315_v20 }
 0x5a3   :  { %v6962_v55 = vpop.f32.mrb[60].mxu0  ;;  %v7520_v44 = vpack.c.bf16 %v1314_v40, %v1313_v52 }
 0x5a4   :  { %v1290_v42 = vpop.f32.mrb[61].mxu0  ;;  %v8919_v60 = vadd.f32 %v6962_v55, %v8840_v37 }
 0x5a5   :  { %v8913_v57 = vadd.f32 %v1290_v42, %v8840_v37  ;;  %v6963_v17 = vpop.f32.mrb[62].mxu0  ;;  %7521 = vmatprep.subr.bf16.mxu1 %v7520_v44 }
 0x5a6   :  { %v8916_v0 = vadd.f32 %v6963_v17, %v8840_v37  ;;  %v1293_v62 = vpop.f32.mrb[63].mxu0  ;;  %7523 = vmatpush1.bf16.msra.mxu1 %v7522_v59  ;;  %v1319_v15 = vmul.f32 %v8919_v60, %v8919_v60 }
 0x5a7   :  { %v8922_v2 = vadd.f32 %v1293_v62, %v8840_v37  ;;  %7525 = vmatprep.subr.bf16.mxu1 %v7524_v61  ;;  %v1317_v6 = vmul.f32 %v8913_v57, %v8913_v57 }
 0x5a8   :  { %v1320_v11 = vmul.f32 %v8916_v0, %v8916_v0  ;;  %v7534_v18 = vpack.c.bf16 %v8916_v0, %v8919_v60 }
 0x5a9   :  { %v1318_v56 = vmul.f32 %v8922_v2, %v8922_v2  ;;  %v7530_v37 = vpack.c.bf16 %v8922_v2, %v8913_v57 }
 0x5aa   :  { %7527 = vmatpush1.bf16.msra.mxu1 %v7526_v5  ;;  %v7532_v16 = vpack.c.bf16 %v1320_v11, %v1319_v15 }
 0x5ab   :  { %v7528_v14 = vpack.c.bf16 %v1318_v56, %v1317_v6 }
 0x5ad   :  { %7529 = vmatprep.subr.bf16.mxu1 %v7528_v14 }
 0x5ae   :  { %7531 = vmatpush1.bf16.msra.mxu1 %v7530_v37 }
 0x5af   :  { %7533 = vmatprep.subr.bf16.mxu1 %v7532_v16 }
 0x5b2   :  { %7535 = vmatpush1.bf16.msra.mxu1 %v7534_v18 }
 0x5b5   :  { %1386 = vmatmul.mubr.f32.vlgmr.msra.gmra.mrb[34].mxu1 %v10793_v10  ;;  %v8012_v10 = vld [vmem:[#allocation6 + $0x60] sm:$0xff] }
 0x5b6   :  { %1744 = vmatprep.mubr.bf16.mxu1 %v7983_v21 }
 0x688   :  { %v1387_v22 = vpop.f32.mrb[34].mxu1 }
 0x689   :  { %v1392_v24 = vmul.f32 %v1387_v22, %v1387_v22  ;;  %v1389_v26 = vpop.f32.mrb[35].mxu1  ;;  %v1398_v41 = vrot.slane %v1387_v22, %v8683_v4 }
 0x68b   :  { %v1393_v30 = vsub.f32 %v1389_v26, %v1392_v24  ;;  %v1399_v46 = vsub.f32 %v8843_v35, %v1398_v41  ;;  %v1400_v48 = vsub.f32 %v8852_v13, %v1398_v41  ;;  %v1401_v49 = vsub.f32 %v8849_v12, %v1398_v41 }
 0x68c   :  { %v1402_v50 = vsub.f32 %v8846_v19, %v1398_v41  ;;  %v1403_v9 = vsub.f32 %v8865_v29, %v1398_v41  ;;  %v1404_v3 = vsub.f32 %v8874_v1, %v1398_v41  ;;  %v1405_v8 = vsub.f32 %v8871_v39, %v1398_v41 }
 0x68d   :  { %v1394_v31 = vmax.f32 %v1393_v30, 0.0  ;;  %v1406_v35 = vsub.f32 %v8868_v34, %v1398_v41  ;;  %v1407_v28 = vsub.f32 %v8889_v53, %v1398_v41  ;;  %v1419_v25 = vmul.f32 %v1418_v7, %v1399_v46 }
 0x68e   :  { %v1408_v38 = vsub.f32 %v8898_v51, %v1398_v41  ;;  %v1409_v52 = vsub.f32 %v8895_v27, %v1398_v41  ;;  %v1410_v13 = vsub.f32 %v8892_v23, %v1398_v41  ;;  %v1411_v12 = vsub.f32 %v8913_v57, %v1398_v41 }
 0x68f   :  { %v1435_v36 = vadd.f32 1e-05, %v1394_v31  ;;  %v1412_v19 = vsub.f32 %v8922_v2, %v1398_v41  ;;  %v1413_v29 = vsub.f32 %v8919_v60, %v1398_v41  ;;  %v1414_v1 = vsub.f32 %v8916_v0, %v1398_v41 }
 0x690   :  { %v1420_v39 = vmul.f32 %v1418_v7, %v1400_v48  ;;  %v1421_v40 = vmul.f32 %v1418_v7, %v1401_v49  ;;  %v1422_v34 = vmul.f32 %v1418_v7, %v1402_v50  ;;  %v1423_v54 = vmul.f32 %v1418_v7, %v1403_v9 }
 0x691   :  { %7948 = vrsqrt.f32 %v1435_v36  ;;  %v1424_v55 = vmul.f32 %v1418_v7, %v1404_v3  ;;  %v1425_v44 = vmul.f32 %v1418_v7, %v1405_v8  ;;  %v1426_v51 = vmul.f32 %v1418_v7, %v1406_v35 }
 0x692   :  { %v1427_v20 = vmul.f32 %v1418_v7, %v1407_v28  ;;  %v1428_v23 = vmul.f32 %v1418_v7, %v1408_v38  ;;  %v1429_v42 = vmul.f32 %v1418_v7, %v1409_v52  ;;  %v1430_v59 = vmul.f32 %v1418_v7, %v1410_v13 }
 0x693   :  { %v1431_v57 = vmul.f32 %v1418_v7, %v1411_v12  ;;  %v1432_v17 = vmul.f32 %v1418_v7, %v1412_v19  ;;  %v1433_v61 = vmul.f32 %v1418_v7, %v1413_v29  ;;  %v1434_v62 = vmul.f32 %v1418_v7, %v1414_v1 }
 0x69b   :  { %v7949_v53 = vpop.eup %7948 }
 0x69c   :  { %v1440_v27 = vrot.slane %v7949_v53, %v8683_v4 }
 0x69e   :  { %v1441_v60 = vmul.f32 %v1440_v27, %v1419_v25  ;;  %v1442_v0 = vmul.f32 %v1440_v27, %v1420_v39  ;;  %v1443_v2 = vmul.f32 %v1440_v27, %v1421_v40  ;;  %v1444_v5 = vmul.f32 %v1440_v27, %v1422_v34 }
 0x69f   :  { %v1445_v6 = vmul.f32 %v1440_v27, %v1423_v54  ;;  %v1446_v56 = vmul.f32 %v1440_v27, %v1424_v55  ;;  %v1447_v11 = vmul.f32 %v1440_v27, %v1425_v44  ;;  %v1448_v14 = vmul.f32 %v1440_v27, %v1426_v51 }
 0x6a0   :  { %v8970_v15 = vadd.f32 %v8951_v47, %v1441_v60  ;;  %v8973_v37 = vadd.f32 %v8951_v47, %v1442_v0  ;;  %v8976_v16 = vadd.f32 %v8951_v47, %v1443_v2  ;;  %v8979_v18 = vadd.f32 %v8951_v47, %v1444_v5  ;;  %v7984_v60 = vld [vmem:[#allocation8 + $0x8] sm:$0xff]   ;;  %v7985_v0 = vld [vmem:[#allocation8 + $0x10] sm:$0xff]   ;;  %v7986_v2 = vld [vmem:[#allocation8 + $0x18] sm:$0xff]  }
 0x6a1   :  { %v8982_v21 = vadd.f32 %v8951_v47, %v1445_v6  ;;  %v8985_v22 = vadd.f32 %v8951_v47, %v1446_v56  ;;  %v8988_v24 = vadd.f32 %v8951_v47, %v1447_v11  ;;  %v8991_v26 = vadd.f32 %v8951_v47, %v1448_v14  ;;  %v7987_v5 = vld [vmem:[#allocation8 + $0x20] sm:$0xff]   ;;  %v7988_v6 = vld [vmem:[#allocation8 + $0x28] sm:$0xff]   ;;  %v7989_v56 = vld [vmem:[#allocation8 + $0x30] sm:$0xff]  }
 0x6a2   :  { %v1477_v30 = vmax.f32 %v8970_v15, 0.0  ;;  %v1478_v31 = vmax.f32 %v8973_v37, 0.0  ;;  %v1479_v36 = vmax.f32 %v8976_v16, 0.0  ;;  %v1480_v41 = vmax.f32 %v8979_v18, 0.0  ;;  %v7990_v11 = vld [vmem:[#allocation8 + $0x38] sm:$0xff]   ;;  %v7991_v14 = vld [vmem:[#allocation8 + $0x40] sm:$0xff]  }
 0x6a3   :  { %v1481_v46 = vmax.f32 %v8982_v21, 0.0  ;;  %v1482_v7 = vmax.f32 %v8985_v22, 0.0  ;;  %v1483_v48 = vmax.f32 %v8988_v24, 0.0  ;;  %v1484_v49 = vmax.f32 %v8991_v26, 0.0 }
 0x6a4   :  { %v1495_v50 = vpack.c.bf16 %v1478_v31, %v1477_v30  ;;  %v1496_v9 = vpack.c.bf16 %v1480_v41, %v1479_v36  ;;  %v1449_v3 = vmul.f32 %v1440_v27, %v1427_v20  ;;  %v1450_v8 = vmul.f32 %v1440_v27, %v1428_v23 }
 0x6a5   :  { %v1497_v35 = vpack.c.bf16 %v1482_v7, %v1481_v46  ;;  %v1498_v28 = vpack.c.bf16 %v1484_v49, %v1483_v48  ;;  %v1451_v25 = vmul.f32 %v1440_v27, %v1429_v42  ;;  %v1452_v38 = vmul.f32 %v1440_v27, %v1430_v59 }
 0x6a6   :  { %6964 = vmatprep.subr.bf16.mxu0 %v1495_v50  ;;  %v9018_v52 = vadd.f32 %v8951_v47, %v1449_v3  ;;  %v9021_v13 = vadd.f32 %v8951_v47, %v1450_v8  ;;  %v1453_v12 = vmul.f32 %v1440_v27, %v1431_v57  ;;  %v1454_v19 = vmul.f32 %v1440_v27, %v1432_v17  ;;  %v7994_v3 = vld [vmem:[#allocation8 + $0x58] sm:$0xff]   ;;  %v7995_v8 = vld [vmem:[#allocation8 + $0x60] sm:$0xff]  }
 0x6a7   :  { %6965 = vmatpush3.bf16.msra.mxu0 %v1495_v50  ;;  %v9024_v29 = vadd.f32 %v8951_v47, %v1451_v25  ;;  %v9027_v1 = vadd.f32 %v8951_v47, %v1452_v38  ;;  %v1455_v39 = vmul.f32 %v1440_v27, %v1433_v61  ;;  %v1456_v40 = vmul.f32 %v1440_v27, %v1434_v62  ;;  %v7992_v50 = vld [vmem:[#allocation8 + $0x48] sm:$0xff]   ;;  %v7998_v25 = vld [vmem:[#allocation8 + $0x78] sm:$0xff]  }
 0x6a8   :  { %6966 = vmatprep.subr.bf16.mxu0 %v1496_v9  ;;  %v1485_v34 = vmax.f32 %v9018_v52, 0.0  ;;  %v1486_v54 = vmax.f32 %v9021_v13, 0.0  ;;  %v9032_v53 = vadd.f32 %v8951_v47, %v1453_v12  ;;  %v9035_v55 = vadd.f32 %v8951_v47, %v1454_v19  ;;  %v7999_v12 = vld [vmem:[#allocation6 + $0x10] sm:$0xff] }
 0x6a9   :  { %v10800_v44 = vmax.f32 %v9024_v29, 0.0  ;;  %v10799_v51 = vmax.f32 %v9027_v1, 0.0  ;;  %v9040_v20 = vadd.f32 %v8951_v47, %v1455_v39  ;;  %v9043_v27 = vadd.f32 %v8951_v47, %v1456_v40  ;;  %v8000_v40 = vld [vmem:[#allocation6] sm:$0xff] }
 0x6aa   :  { %v1499_v23 = vpack.c.bf16 %v1486_v54, %v1485_v34  ;;  %v10798_v42 = vmax.f32 %v9032_v53, 0.0  ;;  %v10797_v59 = vmax.f32 %v9035_v55, 0.0 }
 0x6ab   :  { %6967 = vmatpush3.bf16.msra.mxu0 %v1496_v9  ;;  %v1500_v57 = vpack.c.bf16 %v10799_v51, %v10800_v44  ;;  %v10796_v17 = vmax.f32 %v9040_v20, 0.0  ;;  %v10795_v47 = vmax.f32 %v9043_v27, 0.0  ;;  %v7993_v9 = vld [vmem:[#allocation8 + $0x50] sm:$0xff]  }
 0x6ac   :  { %6968 = vmatprep.subr.bf16.mxu0 %v1497_v35  ;;  %v1501_v61 = vpack.c.bf16 %v10797_v59, %v10798_v42  ;;  %v8017_v59 = vld [vmem:[#allocation6 + $0x98] sm:$0xff]  ;;  %v8018_v42 = vld [vmem:[#allocation6 + $0x88] sm:$0xff] }
 0x6ad   :  { %v1502_v62 = vpack.c.bf16 %v10795_v47, %v10796_v17  ;;  %v8013_v47 = vld [vmem:[#allocation6 + $0x78] sm:$0xff]  ;;  %v8014_v17 = vld [vmem:[#allocation6 + $0x68] sm:$0xff] }
 0x6af   :  { %6969 = vmatpush3.bf16.msra.mxu0 %v1497_v35  ;;  %v7996_v35 = vld [vmem:[#allocation8 + $0x68] sm:$0xff]  }
 0x6b0   :  { %6970 = vmatprep.subr.bf16.mxu0 %v1498_v28 }
 0x6b3   :  { %6971 = vmatpush3.bf16.msra.mxu0 %v1498_v28  ;;  %v7997_v28 = vld [vmem:[#allocation8 + $0x70] sm:$0xff]  }
 0x6b4   :  { %6972 = vmatprep.subr.bf16.mxu0 %v1499_v23 }
 0x6b7   :  { %6973 = vmatpush3.bf16.msra.mxu0 %v1499_v23 }
 0x6b8   :  { %6974 = vmatprep.subr.bf16.mxu0 %v1500_v57 }
 0x6bb   :  { %6975 = vmatpush3.bf16.msra.mxu0 %v1500_v57 }
 0x6bc   :  { %6976 = vmatprep.subr.bf16.mxu0 %v1501_v61 }
 0x6bf   :  { %6977 = vmatpush3.bf16.msra.mxu0 %v1501_v61  ;;  %v7866_v61 = vld [vmem:[#allocation11 + $0x80] sm:$0xff]  }
 0x6c0   :  { %6978 = vmatprep.subr.bf16.mxu0 %v1502_v62 }
 0x6c3   :  { %6979 = vmatpush3.bf16.msra.mxu0 %v1502_v62  ;;  %v7867_v62 = vld [vmem:[#allocation11 + $0x88] sm:$0xff]  }
 0x6c4   :  { %7012 = vmatprep.subr.bf16.mxu0 %v7866_v61 }
 0x6c6   :  { %6981 = vmatmul.mubr.bf16.vlgmr.msra.gmra.mrb[64].mxu0 %v7984_v60  ;;  %v8001_v60 = vld [vmem:[#allocation6 + $0x18] sm:$0xff] }
 0x6c7   :  { %6984 = vmatprep.mubr.bf16.mxu0 %v7985_v0  ;;  %7013 = vmatpush3.bf16.msra.mxu0 %v7866_v61 }
 0x6c8   :  { %7014 = vmatprep.subr.bf16.mxu0 %v7867_v62 }
 0x6cb   :  { %7015 = vmatpush3.bf16.msra.mxu0 %v7867_v62 }
 0x6ce   :  { %6985 = vmatmul.mubr.bf16.gmra.mrb[68].mxu0 %v7986_v2 }
 0x6cf   :  { %6988 = vmatprep.mubr.bf16.mxu0 %v7987_v5  ;;  %v8002_v5 = vld [vmem:[#allocation6 + $0x8] sm:$0xff] }
 0x6d6   :  { %6989 = vmatmul.mubr.bf16.gmra.mrb[72].mxu0 %v7988_v6 }
 0x6d7   :  { %6992 = vmatprep.mubr.bf16.mxu0 %v7989_v56 }
 0x6de   :  { %6993 = vmatmul.mubr.bf16.gmra.mrb[76].mxu0 %v7990_v11 }
 0x6df   :  { %6996 = vmatprep.mubr.bf16.mxu0 %v7991_v14 }
 0x6e6   :  { %6997 = vmatmul.mubr.bf16.gmra.mrb[80].mxu0 %v7992_v50 }
 0x6e7   :  { %7000 = vmatprep.mubr.bf16.mxu0 %v7993_v9  ;;  %v7868_v9 = vld [vmem:[#allocation11 + $0x90] sm:$0xff]  }
 0x6e8   :  { %7016 = vmatprep.subr.bf16.mxu0 %v7868_v9 }
 0x6e9   :  { %7017 = vmatpush3.bf16.msra.mxu0 %v7868_v9 }
 0x6ee   :  { %7001 = vmatmul.mubr.bf16.gmra.mrb[84].mxu0 %v7994_v3 }
 0x6ef   :  { %7004 = vmatprep.mubr.bf16.mxu0 %v7995_v8 }
 0x6f6   :  { %7005 = vmatmul.mubr.bf16.gmra.mrb[88].mxu0 %v7996_v35 }
 0x6f7   :  { %7008 = vmatprep.mubr.bf16.mxu0 %v7997_v28  ;;  %v8003_v28 = vld [vmem:[#allocation6 + $0x30] sm:$0xff] }
 0x6fe   :  { %7009 = vmatmul.mubr.bf16.gmra.mrb[92].mxu0 %v7998_v25 }
 0x799   :  { %v6982_v38 = vpop.f32.mrb[64].mxu0 }
 0x79a   :  { %v1546_v19 = vadd.f32 %v7999_v12, %v6982_v38  ;;  %v1537_v39 = vpop.f32.mrb[65].mxu0  ;;  %v8004_v12 = vld [vmem:[#allocation6 + $0x20] sm:$0xff] }
 0x79b   :  { %v1538_v23 = vadd.f32 %v8000_v40, %v1537_v39  ;;  %v6983_v57 = vpop.f32.mrb[66].mxu0 }
 0x79c   :  { %v1549_v0 = vadd.f32 %v8001_v60, %v6983_v57  ;;  %v1540_v2 = vpop.f32.mrb[67].mxu0  ;;  %v1666_v56 = vmax.f32 %v1546_v19, 0.0  ;;  %v7869_v19 = vld [vmem:[#allocation11 + $0x98] sm:$0xff]   ;;  %v8006_v60 = vld [vmem:[#allocation6 + $0x28] sm:$0xff] }
 0x79d   :  { %v1541_v6 = vadd.f32 %v8002_v5, %v1540_v2  ;;  %v1664_v14 = vmax.f32 %v1538_v23, 0.0  ;;  %v8005_v57 = vld [vmem:[#allocation6 + $0x38] sm:$0xff]  ;;  %7018 = vmatprep.subr.bf16.mxu0 %v7869_v19 }
 0x79e   :  { %v1667_v11 = vmax.f32 %v1549_v0, 0.0  ;;  %7019 = vmatpush3.bf16.msra.mxu0 %v7869_v19 }
 0x79f   :  { %v1665_v50 = vmax.f32 %v1541_v6, 0.0 }
 0x7a0   :  { %v9065_v3 = vpack.c.bf16 %v1667_v11, %v1666_v56 }
 0x7a1   :  { %v9067_v8 = vpack.c.bf16 %v1665_v50, %v1664_v14  ;;  %v6986_v35 = vpop.f32.mrb[68].mxu0  ;;  %v8007_v50 = vld [vmem:[#allocation6 + $0x50] sm:$0xff] }
 0x7a2   :  { %v1562_v25 = vadd.f32 %v8003_v28, %v6986_v35  ;;  %v1553_v38 = vpop.f32.mrb[69].mxu0 }
 0x7a3   :  { %v1554_v39 = vadd.f32 %v8004_v12, %v1553_v38  ;;  %v6987_v40 = vpop.f32.mrb[70].mxu0  ;;  %v8008_v38 = vld [vmem:[#allocation6 + $0x40] sm:$0xff] }
 0x7a4   :  { %v1565_v61 = vadd.f32 %v8005_v57, %v6987_v40  ;;  %v1556_v23 = vpop.f32.mrb[71].mxu0  ;;  %v1670_v2 = vmax.f32 %v1562_v25, 0.0  ;;  %v8009_v57 = vld [vmem:[#allocation6 + $0x58] sm:$0xff] }
 0x7a5   :  { %v1557_v0 = vadd.f32 %v8006_v60, %v1556_v23  ;;  %v1668_v6 = vmax.f32 %v1554_v39, 0.0 }
 0x7a6   :  { %v1671_v5 = vmax.f32 %v1565_v61, 0.0  ;;  %v8010_v61 = vld [vmem:[#allocation6 + $0x48] sm:$0xff] }
 0x7a7   :  { %v1669_v56 = vmax.f32 %v1557_v0, 0.0 }
 0x7a8   :  { %v9069_v11 = vpack.c.bf16 %v1671_v5, %v1670_v2 }
 0x7a9   :  { %v9071_v14 = vpack.c.bf16 %v1669_v56, %v1668_v6  ;;  %v6990_v62 = vpop.f32.mrb[72].mxu0 }
 0x7aa   :  { %v1578_v35 = vadd.f32 %v8007_v50, %v6990_v62  ;;  %v1569_v28 = vpop.f32.mrb[73].mxu0  ;;  %v8011_v62 = vld [vmem:[#allocation6 + $0x70] sm:$0xff] }
 0x7ab   :  { %v1570_v12 = vadd.f32 %v8008_v38, %v1569_v28  ;;  %v6991_v40 = vpop.f32.mrb[74].mxu0 }
 0x7ac   :  { %v1581_v23 = vadd.f32 %v8009_v57, %v6991_v40  ;;  %v1572_v25 = vpop.f32.mrb[75].mxu0  ;;  %v1674_v39 = vmax.f32 %v1578_v35, 0.0 }
 0x7ad   :  { %v1573_v9 = vadd.f32 %v8010_v61, %v1572_v25  ;;  %v1672_v0 = vmax.f32 %v1570_v12, 0.0 }
 0x7ae   :  { %v1675_v60 = vmax.f32 %v1581_v23, 0.0 }
 0x7af   :  { %v1673_v2 = vmax.f32 %v1573_v9, 0.0 }
 0x7b0   :  { %v9073_v5 = vpack.c.bf16 %v1675_v60, %v1674_v39 }
 0x7b1   :  { %v9075_v6 = vpack.c.bf16 %v1673_v2, %v1672_v0  ;;  %v6994_v56 = vpop.f32.mrb[76].mxu0  ;;  %v8015_v0 = vld [vmem:[#allocation6 + $0x90] sm:$0xff] }
 0x7b2   :  { %v1594_v50 = vadd.f32 %v8011_v62, %v6994_v56  ;;  %v1585_v19 = vpop.f32.mrb[77].mxu0  ;;  %v8016_v62 = vld [vmem:[#allocation6 + $0x80] sm:$0xff] }
 0x7b3   :  { %v1586_v28 = vadd.f32 %v8012_v10, %v1585_v19  ;;  %v6995_v38 = vpop.f32.mrb[78].mxu0 }
 0x7b4   :  { %v1597_v40 = vadd.f32 %v8013_v47, %v6995_v38  ;;  %v1588_v57 = vpop.f32.mrb[79].mxu0  ;;  %v1678_v35 = vmax.f32 %v1594_v50, 0.0 }
 0x7b5   :  { %v1589_v25 = vadd.f32 %v8014_v17, %v1588_v57  ;;  %v1676_v12 = vmax.f32 %v1586_v28, 0.0 }
 0x7b6   :  { %v1679_v23 = vmax.f32 %v1597_v40, 0.0 }
 0x7b7   :  { %v1677_v61 = vmax.f32 %v1589_v25, 0.0 }
 0x7b8   :  { %v9077_v9 = vpack.c.bf16 %v1679_v23, %v1678_v35 }
 0x7b9   :  { %v9079_v39 = vpack.c.bf16 %v1677_v61, %v1676_v12  ;;  %v6998_v60 = vpop.f32.mrb[80].mxu0  ;;  %v8019_v12 = vld [vmem:[#allocation6 + $0xb0] sm:$0xff] }
 0x7ba   :  { %v1610_v2 = vadd.f32 %v8015_v0, %v6998_v60  ;;  %v1601_v56 = vpop.f32.mrb[81].mxu0  ;;  %v8020_v60 = vld [vmem:[#allocation6 + $0xa0] sm:$0xff] }
 0x7bb   :  { %v1602_v10 = vadd.f32 %v8016_v62, %v1601_v56  ;;  %v6999_v19 = vpop.f32.mrb[82].mxu0  ;;  %v8021_v56 = vld [vmem:[#allocation6 + $0xb8] sm:$0xff] }
 0x7bc   :  { %v1613_v47 = vadd.f32 %v8017_v59, %v6999_v19  ;;  %v1604_v38 = vpop.f32.mrb[83].mxu0  ;;  %v1682_v50 = vmax.f32 %v1610_v2, 0.0 }
 0x7bd   :  { %v1605_v17 = vadd.f32 %v8018_v42, %v1604_v38  ;;  %v1680_v28 = vmax.f32 %v1602_v10, 0.0  ;;  %v8022_v42 = vld [vmem:[#allocation6 + $0xa8] sm:$0xff] }
 0x7be   :  { %v1683_v40 = vmax.f32 %v1613_v47, 0.0 }
 0x7bf   :  { %v1681_v57 = vmax.f32 %v1605_v17, 0.0 }
 0x7c0   :  { %v1705_v25 = vpack.c.bf16 %v1683_v40, %v1682_v50 }
 0x7c1   :  { %v1704_v35 = vpack.c.bf16 %v1681_v57, %v1680_v28  ;;  %v7002_v23 = vpop.f32.mrb[84].mxu0 }
 0x7c2   :  { %v1626_v61 = vadd.f32 %v8019_v12, %v7002_v23  ;;  %v1617_v51 = vpop.f32.mrb[85].mxu0 }
 0x7c3   :  { %v1618_v0 = vadd.f32 %v8020_v60, %v1617_v51  ;;  %v7003_v44 = vpop.f32.mrb[86].mxu0  ;;  %6369 = vmatprep.subr.bf16.mxu1 %v1704_v35  ;;  %v8023_v51 = vld [vmem:[#allocation6 + $0xd0] sm:$0xff]  ;;  %v8024_v35 = vld [vmem:[#allocation6 + $0xc0] sm:$0xff] }
 0x7c4   :  { %v1629_v62 = vadd.f32 %v8021_v56, %v7003_v44  ;;  %v1620_v59 = vpop.f32.mrb[87].mxu0  ;;  %6370 = vmatpush3.bf16.msra.mxu1 %v9067_v8  ;;  %v1686_v10 = vmax.f32 %v1626_v61, 0.0  ;;  %v8025_v8 = vld [vmem:[#allocation6 + $0xd8] sm:$0xff] }
 0x7c5   :  { %v1621_v2 = vadd.f32 %v8022_v42, %v1620_v59  ;;  %6371 = vmatprep.subr.bf16.mxu1 %v1705_v25  ;;  %v1684_v47 = vmax.f32 %v1618_v0, 0.0  ;;  %v8026_v25 = vld [vmem:[#allocation6 + $0xc8] sm:$0xff] }
 0x7c6   :  { %v1687_v19 = vmax.f32 %v1629_v62, 0.0 }
 0x7c7   :  { %v1685_v38 = vmax.f32 %v1621_v2, 0.0 }
 0x7c8   :  { %v1707_v17 = vpack.c.bf16 %v1687_v19, %v1686_v10  ;;  %6372 = vmatpush3.bf16.msra.mxu1 %v9065_v3  ;;  %v8027_v10 = vld [vmem:[#allocation6 + $0xf0] sm:$0xff] }
 0x7c9   :  { %v1706_v50 = vpack.c.bf16 %v1685_v38, %v1684_v47  ;;  %v7006_v40 = vpop.f32.mrb[88].mxu0  ;;  %v8028_v38 = vld [vmem:[#allocation6 + $0xe0] sm:$0xff] }
 0x7ca   :  { %v1642_v28 = vadd.f32 %v8023_v51, %v7006_v40  ;;  %v1633_v57 = vpop.f32.mrb[89].mxu0 }
 0x7cb   :  { %v1634_v44 = vadd.f32 %v8024_v35, %v1633_v57  ;;  %v7007_v23 = vpop.f32.mrb[90].mxu0  ;;  %6373 = vmatprep.subr.bf16.mxu1 %v1706_v50 }
 0x7cc   :  { %v1645_v12 = vadd.f32 %v8025_v8, %v7007_v23  ;;  %v1636_v60 = vpop.f32.mrb[91].mxu0  ;;  %6374 = vmatpush3.bf16.msra.mxu1 %v9071_v14  ;;  %v1690_v0 = vmax.f32 %v1642_v28, 0.0  ;;  %v8029_v14 = vld [vmem:[#allocation6 + $0xf8] sm:$0xff] }
 0x7cd   :  { %v1637_v61 = vadd.f32 %v8026_v25, %v1636_v60  ;;  %6375 = vmatprep.subr.bf16.mxu1 %v1707_v17  ;;  %v1688_v3 = vmax.f32 %v1634_v44, 0.0  ;;  %v8030_v17 = vld [vmem:[#allocation6 + $0xe8] sm:$0xff]  ;;  %v8033_v25 = vld [vmem:[#allocation9 + $0x10] ss:$8 sps:$4 sm:$0xff]  }
 0x7ce   :  { %v1691_v56 = vmax.f32 %v1645_v12, 0.0  ;;  %v8031_v60 = vld [vmem:[#allocation9] ss:$8 sps:$4 sm:$0xff]  }
 0x7cf   :  { %v1689_v62 = vmax.f32 %v1637_v61, 0.0  ;;  %v8034_v61 = vld [vmem:[#allocation9 + $0x24] ss:$8 sps:$4 sm:$0xff]  }
 0x7d0   :  { %v1709_v59 = vpack.c.bf16 %v1691_v56, %v1690_v0  ;;  %6376 = vmatpush3.bf16.msra.mxu1 %v9069_v11  ;;  %v8035_v0 = vld [vmem:[#allocation9 + $0x20] ss:$8 sps:$4 sm:$0xff]   ;;  %v8036_v56 = vld [vmem:[#allocation9 + $0x34] ss:$8 sps:$4 sm:$0xff]  }
 0x7d1   :  { %v1708_v42 = vpack.c.bf16 %v1689_v62, %v1688_v3  ;;  %v7010_v2 = vpop.f32.mrb[92].mxu0  ;;  %v8038_v3 = vld [vmem:[#allocation9 + $0x44] ss:$8 sps:$4 sm:$0xff]   ;;  %v8040_v62 = vld [vmem:[#allocation9 + $0x54] ss:$8 sps:$4 sm:$0xff]  }
 0x7d2   :  { %v1658_v19 = vadd.f32 %v8027_v10, %v7010_v2  ;;  %v1649_v47 = vpop.f32.mrb[93].mxu0  ;;  %v8044_v2 = vld [vmem:[#allocation9 + $0x74] ss:$8 sps:$4 sm:$0xff]   ;;  %v8045_v10 = vld [vmem:[#allocation9 + $0x70] ss:$8 sps:$4 sm:$0xff]  }
 0x7d3   :  { %v1650_v50 = vadd.f32 %v8028_v38, %v1649_v47  ;;  %v7011_v40 = vpop.f32.mrb[94].mxu0  ;;  %6377 = vmatprep.subr.bf16.mxu1 %v1708_v42  ;;  %v8043_v42 = vld [vmem:[#allocation9 + $0x60] ss:$8 sps:$4 sm:$0xff]   ;;  %v7872_v38 = vld [vmem:[#allocation11 + $0xb0] sm:$0xff]  }
 0x7d4   :  { %v1661_v51 = vadd.f32 %v8029_v14, %v7011_v40  ;;  %v1652_v57 = vpop.f32.mrb[95].mxu0  ;;  %6378 = vmatpush3.bf16.msra.mxu1 %v9075_v6  ;;  %v1694_v35 = vmax.f32 %v1658_v19, 0.0  ;;  %v8032_v6 = vld [vmem:[#allocation9 + $0x14] ss:$8 sps:$4 sm:$0xff]   ;;  %v7870_v19 = vld [vmem:[#allocation11 + $0xa0] sm:$0xff]   ;;  %v7871_v47 = vld [vmem:[#allocation11 + $0xa8] sm:$0xff]   ;;  %v9090_v40 = vstv %s1810_s18 }
 0x7d5   :  { %v1653_v28 = vadd.f32 %v8030_v17, %v1652_v57  ;;  %6379 = vmatprep.subr.bf16.mxu1 %v1709_v59  ;;  %v1692_v11 = vmax.f32 %v1650_v50, 0.0  ;;  %v8042_v59 = vld [vmem:[#allocation9 + $0x64] ss:$8 sps:$4 sm:$0xff]   ;;  %7020 = vmatprep.subr.bf16.mxu0 %v7870_v19  ;;  %v7873_v50 = vld [vmem:[#allocation11 + $0xb8] sm:$0xff]   ;;  %v1812_v17 = vmul.f32 %v9090_v40, %v1477_v30  ;;  %v1815_v37 = vmul.f32 %v9090_v40, %v1480_v41 }
 0x7d6   :  { %v1695_v44 = vmax.f32 %v1661_v51, 0.0  ;;  %7021 = vmatpush3.bf16.msra.mxu0 %v7870_v19  ;;  %v1816_v16 = vmul.f32 %v9090_v40, %v1481_v46  ;;  %v1817_v18 = vmul.f32 %v9090_v40, %v1482_v7  ;;  %v1818_v21 = vmul.f32 %v9090_v40, %v1483_v48 }
 0x7d7   :  { %v1693_v23 = vmax.f32 %v1653_v28, 0.0  ;;  %7022 = vmatprep.subr.bf16.mxu0 %v7871_v47  ;;  %v1819_v22 = vmul.f32 %v9090_v40, %v1484_v49  ;;  %v1820_v24 = vmul.f32 %v9090_v40, %v1485_v34  ;;  %v1821_v26 = vmul.f32 %v9090_v40, %v1486_v54 }
 0x7d8   :  { %v1711_v8 = vpack.c.bf16 %v1695_v44, %v1694_v35  ;;  %6380 = vmatpush3.bf16.msra.mxu1 %v9073_v5  ;;  %v8037_v5 = vld [vmem:[#allocation9 + $0x30] ss:$8 sps:$4 sm:$0xff]  }
 0x7d9   :  { %v1710_v12 = vpack.c.bf16 %v1693_v23, %v1692_v11  ;;  %v1813_v23 = vmul.f32 %v9090_v40, %v1478_v31 }
 0x7da   :  { %7023 = vmatpush3.bf16.msra.mxu0 %v7871_v47 }
 0x7db   :  { %6381 = vmatprep.subr.bf16.mxu1 %v1710_v12  ;;  %7024 = vmatprep.subr.bf16.mxu0 %v7872_v38 }
 0x7dc   :  { %6382 = vmatpush3.bf16.msra.mxu1 %v9079_v39  ;;  %v8039_v39 = vld [vmem:[#allocation9 + $0x40] ss:$8 sps:$4 sm:$0xff]  }
 0x7dd   :  { %6383 = vmatprep.subr.bf16.mxu1 %v1711_v8 }
 0x7de   :  { %7025 = vmatpush3.bf16.msra.mxu0 %v7872_v38 }
 0x7df   :  { %7026 = vmatprep.subr.bf16.mxu0 %v7873_v50 }
 0x7e0   :  { %6384 = vmatpush3.bf16.msra.mxu1 %v9077_v9  ;;  %v8041_v9 = vld [vmem:[#allocation9 + $0x50] ss:$8 sps:$4 sm:$0xff]  }
 0x7e2   :  { %7027 = vmatpush3.bf16.msra.mxu0 %v7873_v50 }
 0x7e3   :  { %1745 = vmatmul.mubr.bf16.vlgmr.msra.gmra.mrb[36].mxu1 %v8031_v60 }
 0x7e4   :  { %1752 = vmatprep.mubr.bf16.mxu1 %v8032_v6 }
 0x7eb   :  { %1753 = vmatmul.mubr.bf16.gmra.mrb[40].mxu1 %v8033_v25 }
 0x7ec   :  { %1760 = vmatprep.mubr.bf16.mxu1 %v8034_v61  ;;  %v1814_v61 = vmul.f32 %v9090_v40, %v1479_v36 }
 0x7f3   :  { %1761 = vmatmul.mubr.bf16.gmra.mrb[44].mxu1 %v8035_v0 }
 0x7f4   :  { %1768 = vmatprep.mubr.bf16.mxu1 %v8036_v56 }
 0x7fb   :  { %1769 = vmatmul.mubr.bf16.gmra.mrb[48].mxu1 %v8037_v5 }
 0x7fc   :  { %1776 = vmatprep.mubr.bf16.mxu1 %v8038_v3 }
 0x803   :  { %1777 = vmatmul.mubr.bf16.gmra.mrb[52].mxu1 %v8039_v39 }
 0x804   :  { %1784 = vmatprep.mubr.bf16.mxu1 %v8040_v62 }
 0x80b   :  { %1785 = vmatmul.mubr.bf16.gmra.mrb[56].mxu1 %v8041_v9 }
 0x80c   :  { %1792 = vmatprep.mubr.bf16.mxu1 %v8042_v59 }
 0x813   :  { %1793 = vmatmul.mubr.bf16.gmra.mrb[60].mxu1 %v8043_v42 }
 0x814   :  { %1800 = vmatprep.mubr.bf16.mxu1 %v8044_v2 }
 0x81b   :  { %1801 = vmatmul.mubr.bf16.gmra.mrb[64].mxu1 %v8045_v10 }
 0x81c   :  { %2098 = vmatprep.mubr.f32.mxu1 %v8450_v63 }
 0x8b6   :  { %v6385_v14 = vpop.f32.mrb[36].mxu1 }
 0x8b7   :  { %v6386_v51 = vpop.f32.mrb[37].mxu1 }
 0x8b8   :  { %v6387_v57 = vadd.f32 %v6386_v51, %v6385_v14  ;;  %v6388_v28 = vpop.f32.mrb[38].mxu1 }
 0x8b9   :  { %v6389_v35 = vpop.f32.mrb[39].mxu1 }
 0x8ba   :  { %v1828_v44 = vadd.f32 %v6387_v57, %v1812_v17  ;;  %v6390_v11 = vadd.f32 %v6389_v35, %v6388_v28 }
 0x8bc   :  { %v1829_v8 = vadd.f32 %v6390_v11, %v1813_v23 }
 0x8be   :  { %v6391_v12 = vpop.f32.mrb[40].mxu1  ;;  %v1844_v60 = vpack.c.bf16 %v1829_v8, %v1828_v44 }
 0x8bf   :  { %v6392_v6 = vpop.f32.mrb[41].mxu1 }
 0x8c0   :  { %v6393_v25 = vadd.f32 %v6392_v6, %v6391_v12  ;;  %v6394_v15 = vpop.f32.mrb[42].mxu1  ;;  %7028 = vmatprep.mubr.bf16.mxu0 %v1844_v60  ;;  %v10822_v6 = vmax.f32 %v9024_v29, 0.0 }
 0x8c1   :  { %v6395_v30 = vpop.f32.mrb[43].mxu1 }
 0x8c2   :  { %v1830_v0 = vadd.f32 %v6393_v25, %v1814_v61  ;;  %v6396_v56 = vadd.f32 %v6395_v30, %v6394_v15  ;;  %v1822_v52 = vmul.f32 %v9090_v40, %v10822_v6  ;;  %v10823_v30 = vmax.f32 %v9027_v1, 0.0 }
 0x8c4   :  { %v1831_v5 = vadd.f32 %v6396_v56, %v1815_v37  ;;  %v1823_v13 = vmul.f32 %v9090_v40, %v10823_v30 }
 0x8c6   :  { %v1845_v31 = vpack.c.bf16 %v1831_v5, %v1830_v0  ;;  %v6397_v3 = vpop.f32.mrb[44].mxu1 }
 0x8c7   :  { %v6398_v39 = vpop.f32.mrb[45].mxu1 }
 0x8c8   :  { %v6399_v62 = vadd.f32 %v6398_v39, %v6397_v3  ;;  %v6400_v9 = vpop.f32.mrb[46].mxu1  ;;  %7029 = vmatmul.mubr.bf16.vlgmr.msra.gmra.mrb[96].mxu0 %v1845_v31  ;;  %v10824_v31 = vmax.f32 %v9032_v53, 0.0 }
 0x8c9   :  { %v6401_v36 = vpop.f32.mrb[47].mxu1 }
 0x8ca   :  { %v1832_v59 = vadd.f32 %v6399_v62, %v1816_v16  ;;  %v6402_v42 = vadd.f32 %v6401_v36, %v6400_v9  ;;  %v1824_v29 = vmul.f32 %v9090_v40, %v10824_v31  ;;  %v10825_v9 = vmax.f32 %v9035_v55, 0.0 }
 0x8cc   :  { %v1833_v2 = vadd.f32 %v6402_v42, %v1817_v18  ;;  %v1825_v1 = vmul.f32 %v9090_v40, %v10825_v9 }
 0x8ce   :  { %v6403_v41 = vpop.f32.mrb[48].mxu1  ;;  %v1846_v10 = vpack.c.bf16 %v1833_v2, %v1832_v59 }
 0x8cf   :  { %v6404_v19 = vpop.f32.mrb[49].mxu1 }
 0x8d0   :  { %v6405_v47 = vadd.f32 %v6404_v19, %v6403_v41  ;;  %v6406_v38 = vpop.f32.mrb[50].mxu1  ;;  %7032 = vmatprep.mubr.bf16.mxu0 %v1846_v10  ;;  %v10826_v41 = vmax.f32 %v9040_v20, 0.0 }
 0x8d1   :  { %v6407_v46 = vpop.f32.mrb[51].mxu1 }
 0x8d2   :  { %v1834_v50 = vadd.f32 %v6405_v47, %v1818_v21  ;;  %v6408_v14 = vadd.f32 %v6407_v46, %v6406_v38  ;;  %v1826_v53 = vmul.f32 %v9090_v40, %v10826_v41  ;;  %v10827_v38 = vmax.f32 %v9043_v27, 0.0 }
 0x8d4   :  { %v1835_v51 = vadd.f32 %v6408_v14, %v1819_v22  ;;  %v1827_v55 = vmul.f32 %v9090_v40, %v10827_v38  ;;  %v7874_v14 = vld [vmem:[#allocation11 + $0xc0] sm:$0xff]   ;;  %v9140_v22 = vld [vmem:[#allocation12 + $0x8] sm:$0xff] }
 0x8d5   :  { %7044 = vmatprep.subr.bf16.mxu0 %v7874_v14  ;;  %v9144_v20 = vrot.slane %v9140_v22, %v8683_v4 }
 0x8d6   :  { %v6409_v7 = vpop.f32.mrb[52].mxu1  ;;  %v1847_v57 = vpack.c.bf16 %v1835_v51, %v1834_v50  ;;  %7045 = vmatpush3.bf16.msra.mxu0 %v7874_v14 }
 0x8d7   :  { %v6410_v17 = vpop.f32.mrb[53].mxu1 }
 0x8d8   :  { %v6411_v28 = vadd.f32 %v6410_v17, %v6409_v7  ;;  %v6412_v35 = vpop.f32.mrb[54].mxu1  ;;  %7033 = vmatmul.mubr.bf16.gmra.mrb[100].mxu0 %v1847_v57 }
 0x8d9   :  { %v6413_v48 = vpop.f32.mrb[55].mxu1 }
 0x8da   :  { %v1836_v44 = vadd.f32 %v6411_v28, %v1820_v24  ;;  %v6414_v11 = vadd.f32 %v6413_v48, %v6412_v35 }
 0x8dc   :  { %v1837_v23 = vadd.f32 %v6414_v11, %v1821_v26 }
 0x8de   :  { %v6415_v49 = vpop.f32.mrb[56].mxu1  ;;  %v1848_v8 = vpack.c.bf16 %v1837_v23, %v1836_v44 }
 0x8df   :  { %v6416_v12 = vpop.f32.mrb[57].mxu1 }
 0x8e0   :  { %v6417_v60 = vadd.f32 %v6416_v12, %v6415_v49  ;;  %v6418_v25 = vpop.f32.mrb[58].mxu1  ;;  %7036 = vmatprep.mubr.bf16.mxu0 %v1848_v8 }
 0x8e1   :  { %v6419_v34 = vpop.f32.mrb[59].mxu1 }
 0x8e2   :  { %v1838_v61 = vadd.f32 %v6417_v60, %v1822_v52  ;;  %v6420_v15 = vadd.f32 %v6419_v34, %v6418_v25 }
 0x8e4   :  { %v1839_v0 = vadd.f32 %v6420_v15, %v1823_v13 }
 0x8e6   :  { %v6421_v54 = vpop.f32.mrb[60].mxu1  ;;  %v1849_v56 = vpack.c.bf16 %v1839_v0, %v1838_v61 }
 0x8e7   :  { %v6422_v37 = vpop.f32.mrb[61].mxu1 }
 0x8e8   :  { %v6423_v5 = vadd.f32 %v6422_v37, %v6421_v54  ;;  %v6424_v3 = vpop.f32.mrb[62].mxu1  ;;  %7037 = vmatmul.mubr.bf16.gmra.mrb[104].mxu0 %v1849_v56 }
 0x8e9   :  { %v6425_v39 = vpop.f32.mrb[63].mxu1 }
 0x8ea   :  { %v1840_v62 = vadd.f32 %v6423_v5, %v1824_v29  ;;  %v6426_v16 = vadd.f32 %v6425_v39, %v6424_v3 }
 0x8ec   :  { %v1841_v36 = vadd.f32 %v6426_v16, %v1825_v1 }
 0x8ee   :  { %v6427_v59 = vpop.f32.mrb[64].mxu1  ;;  %v1850_v42 = vpack.c.bf16 %v1841_v36, %v1840_v62 }
 0x8ef   :  { %v6428_v18 = vpop.f32.mrb[65].mxu1 }
 0x8f0   :  { %v6429_v2 = vadd.f32 %v6428_v18, %v6427_v59  ;;  %v6430_v10 = vpop.f32.mrb[66].mxu1  ;;  %7040 = vmatprep.mubr.bf16.mxu0 %v1850_v42 }
 0x8f1   :  { %v6431_v19 = vpop.f32.mrb[67].mxu1 }
 0x8f2   :  { %v1842_v47 = vadd.f32 %v6429_v2, %v1826_v53  ;;  %v6432_v21 = vadd.f32 %v6431_v19, %v6430_v10 }
 0x8f4   :  { %v1843_v46 = vadd.f32 %v6432_v21, %v1827_v55 }
 0x8f6   :  { %v1851_v50 = vpack.c.bf16 %v1843_v46, %v1842_v47 }
 0x8f8   :  { %7041 = vmatmul.mubr.bf16.gmra.mrb[108].mxu0 %v1851_v50 }
 0x99b   :  { %v7030_v51 = vpop.f32.mrb[96].mxu0 }
 0x99c   :  { %v1955_v7 = vpop.f32.mrb[97].mxu0  ;;  %v9153_v28 = vadd.f32 %v7030_v51, %v9144_v20 }
 0x99d   :  { %v9147_v57 = vadd.f32 %v1955_v7, %v9144_v20  ;;  %v7031_v27 = vpop.f32.mrb[98].mxu0 }
 0x99e   :  { %v9150_v40 = vadd.f32 %v7031_v27, %v9144_v20  ;;  %v1958_v17 = vpop.f32.mrb[99].mxu0  ;;  %v2020_v11 = vmul.f32 %v9153_v28, %v9153_v28 }
 0x99f   :  { %v9156_v24 = vadd.f32 %v1958_v17, %v9144_v20  ;;  %v2018_v35 = vmul.f32 %v9147_v57, %v9147_v57 }
 0x9a0   :  { %v2021_v48 = vmul.f32 %v9150_v40, %v9150_v40  ;;  %v7542_v8 = vpack.c.bf16 %v9150_v40, %v9153_v28 }
 0x9a1   :  { %v2019_v44 = vmul.f32 %v9156_v24, %v9156_v24  ;;  %v7538_v23 = vpack.c.bf16 %v9156_v24, %v9147_v57 }
 0x9a2   :  { %v7540_v49 = vpack.c.bf16 %v2021_v48, %v2020_v11 }
 0x9a3   :  { %v7536_v26 = vpack.c.bf16 %v2019_v44, %v2018_v35 }
 0x9a5   :  { %7537 = vmatprep.subr.bf16.mxu1 %v7536_v26  ;;  %v10828_v26 = vmov 0.0078125  }
 0x9a6   :  { %7539 = vmatpush1.bf16.msra.mxu1 %v7538_v23  ;;  %v7875_v23 = vld [vmem:[#allocation11 + $0xc8] sm:$0xff]  }
 0x9a7   :  { %7541 = vmatprep.subr.bf16.mxu1 %v7540_v49  ;;  %7046 = vmatprep.subr.bf16.mxu0 %v7875_v23  ;;  %v7876_v49 = vld [vmem:[#allocation11 + $0xd0] sm:$0xff]  }
 0x9a8   :  { %7047 = vmatpush3.bf16.msra.mxu0 %v7875_v23 }
 0x9a9   :  { %7048 = vmatprep.subr.bf16.mxu0 %v7876_v49 }
 0x9aa   :  { %7543 = vmatpush1.bf16.msra.mxu1 %v7542_v8  ;;  %v7877_v8 = vld [vmem:[#allocation11 + $0xd8] sm:$0xff]  }
 0x9ab   :  { %v7034_v12 = vpop.f32.mrb[100].mxu0 }
 0x9ac   :  { %v1971_v60 = vpop.f32.mrb[101].mxu0  ;;  %v9177_v61 = vadd.f32 %v7034_v12, %v9144_v20  ;;  %7049 = vmatpush3.bf16.msra.mxu0 %v7876_v49  ;;  %v7878_v12 = vld [vmem:[#allocation11 + $0xe0] sm:$0xff]  }
 0x9ad   :  { %v9171_v6 = vadd.f32 %v1971_v60, %v9144_v20  ;;  %v7035_v52 = vpop.f32.mrb[102].mxu0  ;;  %7050 = vmatprep.subr.bf16.mxu0 %v7877_v8  ;;  %v7879_v60 = vld [vmem:[#allocation11 + $0xe8] sm:$0xff]  }
 0x9ae   :  { %v9174_v25 = vadd.f32 %v7035_v52, %v9144_v20  ;;  %v1974_v34 = vpop.f32.mrb[103].mxu0  ;;  %v2024_v54 = vmul.f32 %v9177_v61, %v9177_v61  ;;  %v7880_v52 = vld [vmem:[#allocation11 + $0xf0] sm:$0xff]  }
 0x9af   :  { %v9180_v15 = vadd.f32 %v1974_v34, %v9144_v20  ;;  %v2022_v30 = vmul.f32 %v9171_v6, %v9171_v6  ;;  %v7881_v34 = vld [vmem:[#allocation11 + $0xf8] sm:$0xff]  }
 0x9b0   :  { %v2025_v13 = vmul.f32 %v9174_v25, %v9174_v25  ;;  %v7550_v31 = vpack.c.bf16 %v9174_v25, %v9177_v61  ;;  %7051 = vmatpush3.bf16.msra.mxu0 %v7877_v8 }
 0x9b1   :  { %v2023_v0 = vmul.f32 %v9180_v15, %v9180_v15  ;;  %v7546_v37 = vpack.c.bf16 %v9180_v15, %v9171_v6  ;;  %7052 = vmatprep.subr.bf16.mxu0 %v7878_v12 }
 0x9b2   :  { %v7548_v5 = vpack.c.bf16 %v2025_v13, %v2024_v54 }
 0x9b3   :  { %v7544_v56 = vpack.c.bf16 %v2023_v0, %v2022_v30 }
 0x9b4   :  { %7053 = vmatpush3.bf16.msra.mxu0 %v7878_v12 }
 0x9b5   :  { %7545 = vmatprep.subr.bf16.mxu1 %v7544_v56  ;;  %7054 = vmatprep.subr.bf16.mxu0 %v7879_v60 }
 0x9b6   :  { %7547 = vmatpush1.bf16.msra.mxu1 %v7546_v37 }
 0x9b7   :  { %7549 = vmatprep.subr.bf16.mxu1 %v7548_v5 }
 0x9b8   :  { %7055 = vmatpush3.bf16.msra.mxu0 %v7879_v60 }
 0x9b9   :  { %7056 = vmatprep.subr.bf16.mxu0 %v7880_v52 }
 0x9ba   :  { %7551 = vmatpush1.bf16.msra.mxu1 %v7550_v31 }
 0x9bb   :  { %v7038_v29 = vpop.f32.mrb[104].mxu0 }
 0x9bc   :  { %v1987_v3 = vpop.f32.mrb[105].mxu0  ;;  %v9201_v1 = vadd.f32 %v7038_v29, %v9144_v20  ;;  %7057 = vmatpush3.bf16.msra.mxu0 %v7880_v52  ;;  %v2131_v29 = vrot.slane %v9140_v22, %v8791_v32 }
 0x9bd   :  { %v9195_v39 = vadd.f32 %v1987_v3, %v9144_v20  ;;  %v7039_v62 = vpop.f32.mrb[106].mxu0  ;;  %7058 = vmatprep.subr.bf16.mxu0 %v7881_v34  ;;  %v9250_v3 = vrot.slane %v9140_v22, %v8794_v33 }
 0x9be   :  { %v9198_v16 = vadd.f32 %v7039_v62, %v9144_v20  ;;  %v1990_v9 = vpop.f32.mrb[107].mxu0  ;;  %v2028_v2 = vmul.f32 %v9201_v1, %v9201_v1 }
 0x9bf   :  { %v9204_v36 = vadd.f32 %v1990_v9, %v9144_v20  ;;  %v2026_v59 = vmul.f32 %v9195_v39, %v9195_v39 }
 0x9c0   :  { %v2029_v42 = vmul.f32 %v9198_v16, %v9198_v16  ;;  %v7558_v19 = vpack.c.bf16 %v9198_v16, %v9201_v1  ;;  %7059 = vmatpush3.bf16.msra.mxu0 %v7881_v34 }
 0x9c1   :  { %v2027_v18 = vmul.f32 %v9204_v36, %v9204_v36  ;;  %v7554_v53 = vpack.c.bf16 %v9204_v36, %v9195_v39 }
 0x9c2   :  { %v7556_v10 = vpack.c.bf16 %v2029_v42, %v2028_v2 }
 0x9c3   :  { %v7552_v41 = vpack.c.bf16 %v2027_v18, %v2026_v59 }
 0x9c5   :  { %7553 = vmatprep.subr.bf16.mxu1 %v7552_v41 }
 0x9c6   :  { %7555 = vmatpush1.bf16.msra.mxu1 %v7554_v53 }
 0x9c7   :  { %7557 = vmatprep.subr.bf16.mxu1 %v7556_v10 }
 0x9ca   :  { %7559 = vmatpush1.bf16.msra.mxu1 %v7558_v19 }
 0x9cb   :  { %v7042_v47 = vpop.f32.mrb[108].mxu0 }
 0x9cc   :  { %v2003_v21 = vpop.f32.mrb[109].mxu0  ;;  %v9225_v14 = vadd.f32 %v7042_v47, %v9144_v20 }
 0x9cd   :  { %v9219_v38 = vadd.f32 %v2003_v21, %v9144_v20  ;;  %v7043_v55 = vpop.f32.mrb[110].mxu0 }
 0x9ce   :  { %v9222_v46 = vadd.f32 %v7043_v55, %v9144_v20  ;;  %v2006_v50 = vpop.f32.mrb[111].mxu0  ;;  %v2032_v35 = vmul.f32 %v9225_v14, %v9225_v14 }
 0x9cf   :  { %v9228_v51 = vadd.f32 %v2006_v50, %v9144_v20  ;;  %v2030_v7 = vmul.f32 %v9219_v38, %v9219_v38 }
 0x9d0   :  { %v2033_v27 = vmul.f32 %v9222_v46, %v9222_v46  ;;  %v7566_v20 = vpack.c.bf16 %v9222_v46, %v9225_v14 }
 0x9d1   :  { %v2031_v17 = vmul.f32 %v9228_v51, %v9228_v51  ;;  %v7562_v44 = vpack.c.bf16 %v9228_v51, %v9219_v38 }
 0x9d2   :  { %v7564_v11 = vpack.c.bf16 %v2033_v27, %v2032_v35 }
 0x9d3   :  { %v7560_v48 = vpack.c.bf16 %v2031_v17, %v2030_v7 }
 0x9d5   :  { %7561 = vmatprep.subr.bf16.mxu1 %v7560_v48 }
 0x9d6   :  { %7563 = vmatpush1.bf16.msra.mxu1 %v7562_v44 }
 0x9d7   :  { %7565 = vmatprep.subr.bf16.mxu1 %v7564_v11 }
 0x9da   :  { %7567 = vmatpush1.bf16.msra.mxu1 %v7566_v20 }
 0x9dd   :  { %2099 = vmatmul.mubr.f32.vlgmr.msra.gmra.mrb[68].mxu1 %v10828_v26 }
 0x9de   :  { %2460 = vmatprep.mubr.f32.mxu1 %v8450_v63 }
 0xab0   :  { %v2100_v30 = vpop.f32.mrb[68].mxu1 }
 0xab1   :  { %v2105_v13 = vmul.f32 %v2100_v30, %v2100_v30  ;;  %v2102_v0 = vpop.f32.mrb[69].mxu1  ;;  %v2111_v5 = vrot.slane %v2100_v30, %v8683_v4 }
 0xab3   :  { %v2106_v54 = vsub.f32 %v2102_v0, %v2105_v13  ;;  %v2112_v31 = vsub.f32 %v9147_v57, %v2111_v5  ;;  %v2113_v62 = vsub.f32 %v9156_v24, %v2111_v5  ;;  %v2114_v9 = vsub.f32 %v9153_v28, %v2111_v5 }
 0xab4   :  { %v2115_v59 = vsub.f32 %v9150_v40, %v2111_v5  ;;  %v2116_v42 = vsub.f32 %v9171_v6, %v2111_v5  ;;  %v2117_v18 = vsub.f32 %v9180_v15, %v2111_v5  ;;  %v2118_v2 = vsub.f32 %v9177_v61, %v2111_v5 }
 0xab5   :  { %v2107_v56 = vmax.f32 %v2106_v54, 0.0  ;;  %v2119_v57 = vsub.f32 %v9174_v25, %v2111_v5  ;;  %v2120_v41 = vsub.f32 %v9195_v39, %v2111_v5  ;;  %v2132_v53 = vmul.f32 %v2131_v29, %v2112_v31 }
 0xab6   :  { %v2121_v10 = vsub.f32 %v9204_v36, %v2111_v5  ;;  %v2122_v19 = vsub.f32 %v9201_v1, %v2111_v5  ;;  %v2123_v24 = vsub.f32 %v9198_v16, %v2111_v5  ;;  %v2124_v28 = vsub.f32 %v9219_v38, %v2111_v5 }
 0xab7   :  { %v2148_v37 = vadd.f32 1e-05, %v2107_v56  ;;  %v2125_v40 = vsub.f32 %v9228_v51, %v2111_v5  ;;  %v2126_v6 = vsub.f32 %v9225_v14, %v2111_v5  ;;  %v2127_v15 = vsub.f32 %v9222_v46, %v2111_v5 }
 0xab8   :  { %v2133_v61 = vmul.f32 %v2131_v29, %v2113_v62  ;;  %v2134_v47 = vmul.f32 %v2131_v29, %v2114_v9  ;;  %v2135_v25 = vmul.f32 %v2131_v29, %v2115_v59  ;;  %v2136_v21 = vmul.f32 %v2131_v29, %v2116_v42 }
 0xab9   :  { %7950 = vrsqrt.f32 %v2148_v37  ;;  %v2137_v55 = vmul.f32 %v2131_v29, %v2117_v18  ;;  %v2138_v50 = vmul.f32 %v2131_v29, %v2118_v2  ;;  %v2139_v36 = vmul.f32 %v2131_v29, %v2119_v57 }
 0xaba   :  { %v2140_v7 = vmul.f32 %v2131_v29, %v2120_v41  ;;  %v2141_v16 = vmul.f32 %v2131_v29, %v2121_v10  ;;  %v2142_v27 = vmul.f32 %v2131_v29, %v2122_v19  ;;  %v2143_v38 = vmul.f32 %v2131_v29, %v2123_v24 }
 0xabb   :  { %v2144_v17 = vmul.f32 %v2131_v29, %v2124_v28  ;;  %v2145_v51 = vmul.f32 %v2131_v29, %v2125_v40  ;;  %v2146_v35 = vmul.f32 %v2131_v29, %v2126_v6  ;;  %v2147_v14 = vmul.f32 %v2131_v29, %v2127_v15 }
 0xac3   :  { %v7951_v39 = vpop.eup %7950 }
 0xac4   :  { %v2153_v1 = vrot.slane %v7951_v39, %v8683_v4 }
 0xac6   :  { %v2154_v48 = vmul.f32 %v2153_v1, %v2132_v53  ;;  %v2155_v46 = vmul.f32 %v2153_v1, %v2133_v61  ;;  %v2156_v44 = vmul.f32 %v2153_v1, %v2134_v47  ;;  %v2157_v11 = vmul.f32 %v2153_v1, %v2135_v25 }
 0xac7   :  { %v2158_v20 = vmul.f32 %v2153_v1, %v2136_v21  ;;  %v2159_v23 = vmul.f32 %v2153_v1, %v2137_v55  ;;  %v2160_v49 = vmul.f32 %v2153_v1, %v2138_v50  ;;  %v2161_v8 = vmul.f32 %v2153_v1, %v2139_v36 }
 0xac8   :  { %v2174_v12 = vadd.f32 %v9250_v3, %v2154_v48  ;;  %v2175_v60 = vadd.f32 %v9250_v3, %v2155_v46  ;;  %v2176_v52 = vadd.f32 %v9250_v3, %v2156_v44  ;;  %v2177_v34 = vadd.f32 %v9250_v3, %v2157_v11  ;;  %v8046_v44 = vld [vmem:[#allocation8] sm:$0xff]  }
 0xac9   :  { %v2178_v30 = vadd.f32 %v9250_v3, %v2158_v20  ;;  %v2179_v13 = vadd.f32 %v9250_v3, %v2159_v23  ;;  %v2180_v0 = vadd.f32 %v9250_v3, %v2160_v49  ;;  %v2181_v54 = vadd.f32 %v9250_v3, %v2161_v8 }
 0xaca   :  { %v2190_v56 = vmax.f32 %v2174_v12, 0.0  ;;  %v2191_v37 = vmax.f32 %v2175_v60, 0.0  ;;  %v2192_v5 = vmax.f32 %v2176_v52, 0.0  ;;  %v2193_v31 = vmax.f32 %v2177_v34, 0.0 }
 0xacb   :  { %v2194_v29 = vmax.f32 %v2178_v30, 0.0  ;;  %v2195_v62 = vmax.f32 %v2179_v13, 0.0  ;;  %v2196_v9 = vmax.f32 %v2180_v0, 0.0  ;;  %v2197_v59 = vmax.f32 %v2181_v54, 0.0 }
 0xacc   :  { %v2206_v42 = vpack.c.bf16 %v2191_v37, %v2190_v56  ;;  %v2207_v18 = vpack.c.bf16 %v2193_v31, %v2192_v5  ;;  %v2162_v2 = vmul.f32 %v2153_v1, %v2140_v7  ;;  %v2163_v57 = vmul.f32 %v2153_v1, %v2141_v16 }
 0xacd   :  { %v2208_v41 = vpack.c.bf16 %v2195_v62, %v2194_v29  ;;  %v2209_v53 = vpack.c.bf16 %v2197_v59, %v2196_v9  ;;  %v2164_v10 = vmul.f32 %v2153_v1, %v2142_v27  ;;  %v2165_v19 = vmul.f32 %v2153_v1, %v2143_v38 }
 0xace   :  { %7060 = vmatprep.mubr.bf16.mxu0 %v2206_v42  ;;  %v2182_v24 = vadd.f32 %v9250_v3, %v2162_v2  ;;  %v2183_v28 = vadd.f32 %v9250_v3, %v2163_v57  ;;  %v2166_v40 = vmul.f32 %v2153_v1, %v2144_v17  ;;  %v2167_v6 = vmul.f32 %v2153_v1, %v2145_v51 }
 0xacf   :  { %7061 = vmatmul.mubr.bf16.vlgmr.msra.gmra.mrb[112].mxu0 %v2207_v18  ;;  %v2184_v15 = vadd.f32 %v9250_v3, %v2164_v10  ;;  %v2185_v61 = vadd.f32 %v9250_v3, %v2165_v19  ;;  %v2168_v47 = vmul.f32 %v2153_v1, %v2146_v35  ;;  %v2169_v25 = vmul.f32 %v2153_v1, %v2147_v14 }
 0xad0   :  { %7064 = vmatprep.mubr.bf16.mxu0 %v2208_v41  ;;  %v2198_v21 = vmax.f32 %v2182_v24, 0.0  ;;  %v2199_v39 = vmax.f32 %v2183_v28, 0.0  ;;  %v2186_v55 = vadd.f32 %v9250_v3, %v2166_v40  ;;  %v2187_v50 = vadd.f32 %v9250_v3, %v2167_v6 }
 0xad1   :  { %v2200_v36 = vmax.f32 %v2184_v15, 0.0  ;;  %v2201_v7 = vmax.f32 %v2185_v61, 0.0  ;;  %v2188_v16 = vadd.f32 %v9250_v3, %v2168_v47  ;;  %v2189_v27 = vadd.f32 %v9250_v3, %v2169_v25 }
 0xad2   :  { %v2210_v38 = vpack.c.bf16 %v2199_v39, %v2198_v21  ;;  %v2202_v17 = vmax.f32 %v2186_v55, 0.0  ;;  %v2203_v51 = vmax.f32 %v2187_v50, 0.0  ;;  %v9286_v11 = vrot.slane %v9140_v22, %v8836_v58 }
 0xad3   :  { %v2211_v48 = vpack.c.bf16 %v2201_v7, %v2200_v36  ;;  %v2204_v46 = vmax.f32 %v2188_v16, 0.0  ;;  %v2205_v35 = vmax.f32 %v2189_v27, 0.0 }
 0xad4   :  { %v2212_v1 = vpack.c.bf16 %v2203_v51, %v2202_v17 }
 0xad5   :  { %v2213_v14 = vpack.c.bf16 %v2205_v35, %v2204_v46 }
 0xad7   :  { %7065 = vmatmul.mubr.bf16.gmra.mrb[116].mxu0 %v2209_v53 }
 0xad8   :  { %7068 = vmatprep.mubr.bf16.mxu0 %v2210_v38 }
 0xadf   :  { %7069 = vmatmul.mubr.bf16.gmra.mrb[120].mxu0 %v2211_v48 }
 0xae0   :  { %7072 = vmatprep.mubr.bf16.mxu0 %v2212_v1 }
 0xae7   :  { %7073 = vmatmul.mubr.bf16.gmra.mrb[124].mxu0 %v2213_v14 }
 0xae8   :  { %7092 = vmatprep.mubr.bf16.mxu0 %v8046_v44 }
 0xba2   :  { %v7062_v3 = vpop.f32.mrb[112].mxu0 }
 0xba3   :  { %v2317_v20 = vpop.f32.mrb[113].mxu0  ;;  %v9295_v60 = vadd.f32 %v7062_v3, %v9286_v11 }
 0xba4   :  { %v9289_v23 = vadd.f32 %v2317_v20, %v9286_v11  ;;  %v7063_v49 = vpop.f32.mrb[114].mxu0 }
 0xba5   :  { %v9292_v8 = vadd.f32 %v7063_v49, %v9286_v11  ;;  %v2320_v12 = vpop.f32.mrb[115].mxu0  ;;  %v2382_v0 = vmul.f32 %v9295_v60, %v9295_v60 }
 0xba6   :  { %v9298_v52 = vadd.f32 %v2320_v12, %v9286_v11  ;;  %v2380_v34 = vmul.f32 %v9289_v23, %v9289_v23 }
 0xba7   :  { %v2383_v30 = vmul.f32 %v9292_v8, %v9292_v8  ;;  %v7574_v2 = vpack.c.bf16 %v9292_v8, %v9295_v60 }
 0xba8   :  { %v2381_v13 = vmul.f32 %v9298_v52, %v9298_v52  ;;  %v7570_v37 = vpack.c.bf16 %v9298_v52, %v9289_v23 }
 0xba9   :  { %v7572_v62 = vpack.c.bf16 %v2383_v30, %v2382_v0 }
 0xbaa   :  { %v7066_v54 = vpop.f32.mrb[116].mxu0  ;;  %v7568_v56 = vpack.c.bf16 %v2381_v13, %v2380_v34 }
 0xbab   :  { %v2333_v5 = vpop.f32.mrb[117].mxu0  ;;  %v9317_v42 = vadd.f32 %v7066_v54, %v9286_v11 }
 0xbac   :  { %v9311_v31 = vadd.f32 %v2333_v5, %v9286_v11  ;;  %v7067_v29 = vpop.f32.mrb[118].mxu0  ;;  %7569 = vmatprep.subr.bf16.mxu1 %v7568_v56  ;;  %v8047_v56 = vld [vmem:[#allocation9 + $0x4] ss:$8 sps:$4 sm:$0xff]  }
 0xbad   :  { %v9314_v9 = vadd.f32 %v7067_v29, %v9286_v11  ;;  %v2336_v59 = vpop.f32.mrb[119].mxu0  ;;  %7571 = vmatpush1.bf16.msra.mxu1 %v7570_v37  ;;  %v2386_v10 = vmul.f32 %v9317_v42, %v9317_v42 }
 0xbae   :  { %v9320_v18 = vadd.f32 %v2336_v59, %v9286_v11  ;;  %7573 = vmatprep.subr.bf16.mxu1 %v7572_v62  ;;  %v2384_v57 = vmul.f32 %v9311_v31, %v9311_v31 }
 0xbaf   :  { %v2387_v41 = vmul.f32 %v9314_v9, %v9314_v9  ;;  %v7582_v55 = vpack.c.bf16 %v9314_v9, %v9317_v42 }
 0xbb0   :  { %v2385_v53 = vmul.f32 %v9320_v18, %v9320_v18  ;;  %v7578_v28 = vpack.c.bf16 %v9320_v18, %v9311_v31 }
 0xbb1   :  { %7575 = vmatpush1.bf16.msra.mxu1 %v7574_v2  ;;  %v7580_v61 = vpack.c.bf16 %v2387_v41, %v2386_v10  ;;  %v9386_v10 = vrot.slane %v9140_v22, %v8944_v45 }
 0xbb2   :  { %v7070_v19 = vpop.f32.mrb[120].mxu0  ;;  %v7576_v24 = vpack.c.bf16 %v2385_v53, %v2384_v57  ;;  %v2493_v53 = vrot.slane %v9140_v22, %v8941_v43 }
 0xbb3   :  { %v2349_v40 = vpop.f32.mrb[121].mxu0  ;;  %v9341_v21 = vadd.f32 %v7070_v19, %v9286_v11 }
 0xbb4   :  { %v9335_v6 = vadd.f32 %v2349_v40, %v9286_v11  ;;  %v7071_v15 = vpop.f32.mrb[122].mxu0  ;;  %7577 = vmatprep.subr.bf16.mxu1 %v7576_v24 }
 0xbb5   :  { %v9338_v47 = vadd.f32 %v7071_v15, %v9286_v11  ;;  %v2352_v25 = vpop.f32.mrb[123].mxu0  ;;  %7579 = vmatpush1.bf16.msra.mxu1 %v7578_v28  ;;  %v2390_v16 = vmul.f32 %v9341_v21, %v9341_v21 }
 0xbb6   :  { %v9344_v39 = vadd.f32 %v2352_v25, %v9286_v11  ;;  %7581 = vmatprep.subr.bf16.mxu1 %v7580_v61  ;;  %v2388_v50 = vmul.f32 %v9335_v6, %v9335_v6 }
 0xbb7   :  { %v2391_v36 = vmul.f32 %v9338_v47, %v9338_v47  ;;  %v7590_v20 = vpack.c.bf16 %v9338_v47, %v9341_v21 }
 0xbb8   :  { %v2389_v7 = vmul.f32 %v9344_v39, %v9344_v39  ;;  %v7586_v17 = vpack.c.bf16 %v9344_v39, %v9335_v6 }
 0xbb9   :  { %7583 = vmatpush1.bf16.msra.mxu1 %v7582_v55  ;;  %v7588_v35 = vpack.c.bf16 %v2391_v36, %v2390_v16 }
 0xbba   :  { %v7074_v27 = vpop.f32.mrb[124].mxu0  ;;  %v7584_v38 = vpack.c.bf16 %v2389_v7, %v2388_v50 }
 0xbbb   :  { %v2365_v51 = vpop.f32.mrb[125].mxu0  ;;  %v9365_v44 = vadd.f32 %v7074_v27, %v9286_v11 }
 0xbbc   :  { %v9359_v48 = vadd.f32 %v2365_v51, %v9286_v11  ;;  %v7075_v46 = vpop.f32.mrb[126].mxu0  ;;  %7585 = vmatprep.subr.bf16.mxu1 %v7584_v38 }
 0xbbd   :  { %v9362_v1 = vadd.f32 %v7075_v46, %v9286_v11  ;;  %v2368_v14 = vpop.f32.mrb[127].mxu0  ;;  %7587 = vmatpush1.bf16.msra.mxu1 %v7586_v17  ;;  %v2394_v30 = vmul.f32 %v9365_v44, %v9365_v44 }
 0xbbe   :  { %v2369_v3 = vadd.f32 %v2368_v14, %v9286_v11  ;;  %7589 = vmatprep.subr.bf16.mxu1 %v7588_v35  ;;  %v2392_v49 = vmul.f32 %v9359_v48, %v9359_v48 }
 0xbbf   :  { %v2395_v12 = vmul.f32 %v9362_v1, %v9362_v1  ;;  %v7598_v54 = vpack.c.bf16 %v9362_v1, %v9365_v44 }
 0xbc0   :  { %v2393_v34 = vmul.f32 %v2369_v3, %v2369_v3  ;;  %v7594_v0 = vpack.c.bf16 %v2369_v3, %v9359_v48 }
 0xbc1   :  { %7591 = vmatpush1.bf16.msra.mxu1 %v7590_v20  ;;  %v7596_v11 = vpack.c.bf16 %v2395_v12, %v2394_v30 }
 0xbc2   :  { %v7592_v13 = vpack.c.bf16 %v2393_v34, %v2392_v49 }
 0xbc4   :  { %7593 = vmatprep.subr.bf16.mxu1 %v7592_v13 }
 0xbc5   :  { %7595 = vmatpush1.bf16.msra.mxu1 %v7594_v0 }
 0xbc6   :  { %7597 = vmatprep.subr.bf16.mxu1 %v7596_v11 }
 0xbc9   :  { %7599 = vmatpush1.bf16.msra.mxu1 %v7598_v54 }
 0xbcc   :  { %2461 = vmatmul.mubr.f32.vlgmr.msra.gmra.mrb[70].mxu1 %v10828_v26 }
 0xbcd   :  { %2819 = vmatprep.mubr.bf16.mxu1 %v8047_v56 }
 0xc9f   :  { %v2462_v37 = vpop.f32.mrb[70].mxu1 }
 0xca0   :  { %v2467_v5 = vmul.f32 %v2462_v37, %v2462_v37  ;;  %v2464_v29 = vpop.f32.mrb[71].mxu1  ;;  %v2473_v57 = vrot.slane %v2462_v37, %v8683_v4 }
 0xca2   :  { %v2468_v62 = vsub.f32 %v2464_v29, %v2467_v5  ;;  %v2474_v41 = vsub.f32 %v9289_v23, %v2473_v57  ;;  %v2475_v19 = vsub.f32 %v9298_v52, %v2473_v57  ;;  %v2476_v24 = vsub.f32 %v9295_v60, %v2473_v57 }
 0xca3   :  { %v2477_v28 = vsub.f32 %v9292_v8, %v2473_v57  ;;  %v2478_v40 = vsub.f32 %v9311_v31, %v2473_v57  ;;  %v2479_v15 = vsub.f32 %v9320_v18, %v2473_v57  ;;  %v2480_v61 = vsub.f32 %v9317_v42, %v2473_v57 }
 0xca4   :  { %v2469_v59 = vmax.f32 %v2468_v62, 0.0  ;;  %v2481_v23 = vsub.f32 %v9314_v9, %v2473_v57  ;;  %v2482_v25 = vsub.f32 %v9335_v6, %v2473_v57  ;;  %v2494_v55 = vmul.f32 %v2493_v53, %v2474_v41 }
 0xca5   :  { %v2483_v22 = vsub.f32 %v9344_v39, %v2473_v57  ;;  %v2484_v50 = vsub.f32 %v9341_v21, %v2473_v57  ;;  %v2485_v52 = vsub.f32 %v9338_v47, %v2473_v57  ;;  %v2486_v60 = vsub.f32 %v9359_v48, %v2473_v57 }
 0xca6   :  { %v2510_v2 = vadd.f32 1e-05, %v2469_v59  ;;  %v2487_v8 = vsub.f32 %v2369_v3, %v2473_v57  ;;  %v2488_v31 = vsub.f32 %v9365_v44, %v2473_v57  ;;  %v2489_v18 = vsub.f32 %v9362_v1, %v2473_v57 }
 0xca7   :  { %v2495_v36 = vmul.f32 %v2493_v53, %v2475_v19  ;;  %v2496_v42 = vmul.f32 %v2493_v53, %v2476_v24  ;;  %v2497_v7 = vmul.f32 %v2493_v53, %v2477_v28  ;;  %v2498_v9 = vmul.f32 %v2493_v53, %v2478_v40 }
 0xca8   :  { %7952 = vrsqrt.f32 %v2510_v2  ;;  %v2499_v6 = vmul.f32 %v2493_v53, %v2479_v15  ;;  %v2500_v27 = vmul.f32 %v2493_v53, %v2480_v61  ;;  %v2501_v38 = vmul.f32 %v2493_v53, %v2481_v23 }
 0xca9   :  { %v2502_v39 = vmul.f32 %v2493_v53, %v2482_v25  ;;  %v2503_v17 = vmul.f32 %v2493_v53, %v2483_v22  ;;  %v2504_v47 = vmul.f32 %v2493_v53, %v2484_v50  ;;  %v2505_v51 = vmul.f32 %v2493_v53, %v2485_v52 }
 0xcaa   :  { %v2506_v48 = vmul.f32 %v2493_v53, %v2486_v60  ;;  %v2507_v46 = vmul.f32 %v2493_v53, %v2487_v8  ;;  %v2508_v35 = vmul.f32 %v2493_v53, %v2488_v31  ;;  %v2509_v14 = vmul.f32 %v2493_v53, %v2489_v18 }
 0xcb2   :  { %v7953_v16 = vpop.eup %7952 }
 0xcb3   :  { %v2515_v21 = vrot.slane %v7953_v16, %v8683_v4 }
 0xcb5   :  { %v2516_v44 = vmul.f32 %v2515_v21, %v2494_v55  ;;  %v2517_v1 = vmul.f32 %v2515_v21, %v2495_v36  ;;  %v2518_v3 = vmul.f32 %v2515_v21, %v2496_v42  ;;  %v2519_v20 = vmul.f32 %v2515_v21, %v2497_v7 }
 0xcb6   :  { %v2520_v49 = vmul.f32 %v2515_v21, %v2498_v9  ;;  %v2521_v12 = vmul.f32 %v2515_v21, %v2499_v6  ;;  %v2522_v34 = vmul.f32 %v2515_v21, %v2500_v27  ;;  %v2523_v30 = vmul.f32 %v2515_v21, %v2501_v38 }
 0xcb7   :  { %v9404_v13 = vadd.f32 %v9386_v10, %v2516_v44  ;;  %v9407_v0 = vadd.f32 %v9386_v10, %v2517_v1  ;;  %v9410_v11 = vadd.f32 %v9386_v10, %v2518_v3  ;;  %v9413_v54 = vadd.f32 %v9386_v10, %v2519_v20  ;;  %v8048_v44 = vld [vmem:[#allocation8 + $0x8] sm:$0xff]   ;;  %v8049_v1 = vld [vmem:[#allocation8 + $0x10] sm:$0xff]   ;;  %v8050_v3 = vld [vmem:[#allocation8 + $0x18] sm:$0xff]  }
 0xcb8   :  { %v9416_v56 = vadd.f32 %v9386_v10, %v2520_v49  ;;  %v9419_v37 = vadd.f32 %v9386_v10, %v2521_v12  ;;  %v9422_v5 = vadd.f32 %v9386_v10, %v2522_v34  ;;  %v9425_v29 = vadd.f32 %v9386_v10, %v2523_v30  ;;  %v8051_v20 = vld [vmem:[#allocation8 + $0x20] sm:$0xff]   ;;  %v8052_v49 = vld [vmem:[#allocation8 + $0x28] sm:$0xff]   ;;  %v8053_v12 = vld [vmem:[#allocation8 + $0x30] sm:$0xff]  }
 0xcb9   :  { %v2552_v62 = vmax.f32 %v9404_v13, 0.0  ;;  %v2553_v59 = vmax.f32 %v9407_v0, 0.0  ;;  %v2554_v2 = vmax.f32 %v9410_v11, 0.0  ;;  %v2555_v57 = vmax.f32 %v9413_v54, 0.0  ;;  %v8054_v34 = vld [vmem:[#allocation8 + $0x38] sm:$0xff]   ;;  %v8055_v30 = vld [vmem:[#allocation8 + $0x40] sm:$0xff]  }
 0xcba   :  { %v2556_v41 = vmax.f32 %v9416_v56, 0.0  ;;  %v2557_v53 = vmax.f32 %v9419_v37, 0.0  ;;  %v2558_v19 = vmax.f32 %v9422_v5, 0.0  ;;  %v2559_v24 = vmax.f32 %v9425_v29, 0.0 }
 0xcbb   :  { %v2570_v28 = vpack.c.bf16 %v2553_v59, %v2552_v62  ;;  %v2571_v40 = vpack.c.bf16 %v2555_v57, %v2554_v2  ;;  %v2524_v15 = vmul.f32 %v2515_v21, %v2502_v39  ;;  %v2525_v61 = vmul.f32 %v2515_v21, %v2503_v17 }
 0xcbc   :  { %v2572_v23 = vpack.c.bf16 %v2557_v53, %v2556_v41  ;;  %v2573_v25 = vpack.c.bf16 %v2559_v24, %v2558_v19  ;;  %v2526_v55 = vmul.f32 %v2515_v21, %v2504_v47  ;;  %v2527_v22 = vmul.f32 %v2515_v21, %v2505_v51 }
 0xcbd   :  { %7076 = vmatprep.subr.bf16.mxu0 %v2570_v28  ;;  %v9452_v50 = vadd.f32 %v9386_v10, %v2524_v15  ;;  %v9455_v52 = vadd.f32 %v9386_v10, %v2525_v61  ;;  %v2528_v60 = vmul.f32 %v2515_v21, %v2506_v48  ;;  %v2529_v8 = vmul.f32 %v2515_v21, %v2507_v46  ;;  %v8058_v15 = vld [vmem:[#allocation8 + $0x58] sm:$0xff]   ;;  %v8059_v61 = vld [vmem:[#allocation8 + $0x60] sm:$0xff]  }
 0xcbe   :  { %7077 = vmatpush3.bf16.msra.mxu0 %v2570_v28  ;;  %v9458_v31 = vadd.f32 %v9386_v10, %v2526_v55  ;;  %v9461_v18 = vadd.f32 %v9386_v10, %v2527_v22  ;;  %v2530_v36 = vmul.f32 %v2515_v21, %v2508_v35  ;;  %v2531_v42 = vmul.f32 %v2515_v21, %v2509_v14  ;;  %v8056_v28 = vld [vmem:[#allocation8 + $0x48] sm:$0xff]   ;;  %v8062_v55 = vld [vmem:[#allocation8 + $0x78] sm:$0xff]  }
 0xcbf   :  { %7078 = vmatprep.subr.bf16.mxu0 %v2571_v40  ;;  %v2560_v7 = vmax.f32 %v9452_v50, 0.0  ;;  %v10807_v9 = vmax.f32 %v9455_v52, 0.0  ;;  %v9466_v16 = vadd.f32 %v9386_v10, %v2528_v60  ;;  %v9469_v6 = vadd.f32 %v9386_v10, %v2529_v8  ;;  %v8063_v60 = vld [vmem:[#allocation6 + $0x10] sm:$0xff] }
 0xcc0   :  { %v10806_v27 = vmax.f32 %v9458_v31, 0.0  ;;  %v10805_v38 = vmax.f32 %v9461_v18, 0.0  ;;  %v9474_v39 = vadd.f32 %v9386_v10, %v2530_v36  ;;  %v9477_v21 = vadd.f32 %v9386_v10, %v2531_v42  ;;  %v8064_v42 = vld [vmem:[#allocation6] sm:$0xff] }
 0xcc1   :  { %v2574_v17 = vpack.c.bf16 %v10807_v9, %v2560_v7  ;;  %v10804_v47 = vmax.f32 %v9466_v16, 0.0  ;;  %v10803_v51 = vmax.f32 %v9469_v6, 0.0 }
 0xcc2   :  { %7079 = vmatpush3.bf16.msra.mxu0 %v2571_v40  ;;  %v2575_v48 = vpack.c.bf16 %v10805_v38, %v10806_v27  ;;  %v10802_v46 = vmax.f32 %v9474_v39, 0.0  ;;  %v10801_v10 = vmax.f32 %v9477_v21, 0.0  ;;  %v8057_v40 = vld [vmem:[#allocation8 + $0x50] sm:$0xff]   ;;  %v8082_v38 = vld [vmem:[#allocation6 + $0x88] sm:$0xff] }
 0xcc3   :  { %7080 = vmatprep.subr.bf16.mxu0 %v2572_v23  ;;  %v2576_v35 = vpack.c.bf16 %v10803_v51, %v10804_v47  ;;  %v8078_v51 = vld [vmem:[#allocation6 + $0x68] sm:$0xff]  ;;  %v8081_v47 = vld [vmem:[#allocation6 + $0x98] sm:$0xff] }
 0xcc4   :  { %v2577_v14 = vpack.c.bf16 %v10801_v10, %v10802_v46  ;;  %v8076_v10 = vld [vmem:[#allocation6 + $0x60] sm:$0xff]  ;;  %v8077_v46 = vld [vmem:[#allocation6 + $0x78] sm:$0xff] }
 0xcc6   :  { %7081 = vmatpush3.bf16.msra.mxu0 %v2572_v23  ;;  %v8060_v23 = vld [vmem:[#allocation8 + $0x68] sm:$0xff]  }
 0xcc7   :  { %7082 = vmatprep.subr.bf16.mxu0 %v2573_v25 }
 0xcca   :  { %7083 = vmatpush3.bf16.msra.mxu0 %v2573_v25  ;;  %v8061_v25 = vld [vmem:[#allocation8 + $0x70] sm:$0xff]  }
 0xccb   :  { %7084 = vmatprep.subr.bf16.mxu0 %v2574_v17 }
 0xcce   :  { %7085 = vmatpush3.bf16.msra.mxu0 %v2574_v17 }
 0xccf   :  { %7086 = vmatprep.subr.bf16.mxu0 %v2575_v48 }
 0xcd2   :  { %7087 = vmatpush3.bf16.msra.mxu0 %v2575_v48 }
 0xcd3   :  { %7088 = vmatprep.subr.bf16.mxu0 %v2576_v35 }
 0xcd6   :  { %7089 = vmatpush3.bf16.msra.mxu0 %v2576_v35  ;;  %v7882_v35 = vld [vmem:[#allocation11 + $0x100] sm:$0xff]  }
 0xcd7   :  { %7090 = vmatprep.subr.bf16.mxu0 %v2577_v14 }
 0xcda   :  { %7091 = vmatpush3.bf16.msra.mxu0 %v2577_v14  ;;  %v7883_v14 = vld [vmem:[#allocation11 + $0x108] sm:$0xff]  }
 0xcdb   :  { %7124 = vmatprep.subr.bf16.mxu0 %v7882_v35 }
 0xcdd   :  { %7093 = vmatmul.mubr.bf16.vlgmr.msra.gmra.mrb[128].mxu0 %v8048_v44  ;;  %v8065_v44 = vld [vmem:[#allocation6 + $0x18] sm:$0xff] }
 0xcde   :  { %7096 = vmatprep.mubr.bf16.mxu0 %v8049_v1  ;;  %7125 = vmatpush3.bf16.msra.mxu0 %v7882_v35 }
 0xcdf   :  { %7126 = vmatprep.subr.bf16.mxu0 %v7883_v14 }
 0xce2   :  { %7127 = vmatpush3.bf16.msra.mxu0 %v7883_v14 }
 0xce5   :  { %7097 = vmatmul.mubr.bf16.gmra.mrb[132].mxu0 %v8050_v3 }
 0xce6   :  { %7100 = vmatprep.mubr.bf16.mxu0 %v8051_v20  ;;  %v8066_v20 = vld [vmem:[#allocation6 + $0x8] sm:$0xff] }
 0xced   :  { %7101 = vmatmul.mubr.bf16.gmra.mrb[136].mxu0 %v8052_v49 }
 0xcee   :  { %7104 = vmatprep.mubr.bf16.mxu0 %v8053_v12 }
 0xcf5   :  { %7105 = vmatmul.mubr.bf16.gmra.mrb[140].mxu0 %v8054_v34 }
 0xcf6   :  { %7108 = vmatprep.mubr.bf16.mxu0 %v8055_v30 }
 0xcfd   :  { %7109 = vmatmul.mubr.bf16.gmra.mrb[144].mxu0 %v8056_v28 }
 0xcfe   :  { %7112 = vmatprep.mubr.bf16.mxu0 %v8057_v40  ;;  %v7884_v40 = vld [vmem:[#allocation11 + $0x110] sm:$0xff]  }
 0xcff   :  { %7128 = vmatprep.subr.bf16.mxu0 %v7884_v40 }
 0xd00   :  { %7129 = vmatpush3.bf16.msra.mxu0 %v7884_v40 }
 0xd05   :  { %7113 = vmatmul.mubr.bf16.gmra.mrb[148].mxu0 %v8058_v15 }
 0xd06   :  { %7116 = vmatprep.mubr.bf16.mxu0 %v8059_v61 }
 0xd0d   :  { %7117 = vmatmul.mubr.bf16.gmra.mrb[152].mxu0 %v8060_v23 }
 0xd0e   :  { %7120 = vmatprep.mubr.bf16.mxu0 %v8061_v25  ;;  %v8067_v25 = vld [vmem:[#allocation6 + $0x30] sm:$0xff] }
 0xd15   :  { %7121 = vmatmul.mubr.bf16.gmra.mrb[156].mxu0 %v8062_v55 }
 0xdb0   :  { %v7094_v22 = vpop.f32.mrb[128].mxu0 }
 0xdb1   :  { %v2621_v8 = vadd.f32 %v8063_v60, %v7094_v22  ;;  %v2612_v36 = vpop.f32.mrb[129].mxu0  ;;  %v8068_v60 = vld [vmem:[#allocation6 + $0x20] sm:$0xff] }
 0xdb2   :  { %v2613_v17 = vadd.f32 %v8064_v42, %v2612_v36  ;;  %v7095_v48 = vpop.f32.mrb[130].mxu0 }
 0xdb3   :  { %v2624_v1 = vadd.f32 %v8065_v44, %v7095_v48  ;;  %v2615_v3 = vpop.f32.mrb[131].mxu0  ;;  %v2741_v12 = vmax.f32 %v2621_v8, 0.0  ;;  %v7885_v8 = vld [vmem:[#allocation11 + $0x118] sm:$0xff]   ;;  %v8070_v44 = vld [vmem:[#allocation6 + $0x28] sm:$0xff] }
 0xdb4   :  { %v2616_v49 = vadd.f32 %v8066_v20, %v2615_v3  ;;  %v2739_v30 = vmax.f32 %v2613_v17, 0.0  ;;  %v8069_v48 = vld [vmem:[#allocation6 + $0x38] sm:$0xff]  ;;  %7130 = vmatprep.subr.bf16.mxu0 %v7885_v8 }
 0xdb5   :  { %v2742_v34 = vmax.f32 %v2624_v1, 0.0  ;;  %7131 = vmatpush3.bf16.msra.mxu0 %v7885_v8 }
 0xdb6   :  { %v2740_v28 = vmax.f32 %v2616_v49, 0.0 }
 0xdb7   :  { %v9499_v15 = vpack.c.bf16 %v2742_v34, %v2741_v12 }
 0xdb8   :  { %v9501_v61 = vpack.c.bf16 %v2740_v28, %v2739_v30  ;;  %v7098_v23 = vpop.f32.mrb[132].mxu0  ;;  %v8071_v28 = vld [vmem:[#allocation6 + $0x50] sm:$0xff] }
 0xdb9   :  { %v2637_v55 = vadd.f32 %v8067_v25, %v7098_v23  ;;  %v2628_v22 = vpop.f32.mrb[133].mxu0 }
 0xdba   :  { %v2629_v36 = vadd.f32 %v8068_v60, %v2628_v22  ;;  %v7099_v42 = vpop.f32.mrb[134].mxu0  ;;  %v8072_v22 = vld [vmem:[#allocation6 + $0x40] sm:$0xff] }
 0xdbb   :  { %v2640_v35 = vadd.f32 %v8069_v48, %v7099_v42  ;;  %v2631_v17 = vpop.f32.mrb[135].mxu0  ;;  %v2745_v3 = vmax.f32 %v2637_v55, 0.0  ;;  %v8073_v48 = vld [vmem:[#allocation6 + $0x58] sm:$0xff] }
 0xdbc   :  { %v2632_v1 = vadd.f32 %v8070_v44, %v2631_v17  ;;  %v2743_v49 = vmax.f32 %v2629_v36, 0.0 }
 0xdbd   :  { %v2746_v20 = vmax.f32 %v2640_v35, 0.0  ;;  %v8074_v35 = vld [vmem:[#allocation6 + $0x48] sm:$0xff] }
 0xdbe   :  { %v2744_v12 = vmax.f32 %v2632_v1, 0.0 }
 0xdbf   :  { %v9503_v34 = vpack.c.bf16 %v2746_v20, %v2745_v3 }
 0xdc0   :  { %v9505_v30 = vpack.c.bf16 %v2744_v12, %v2743_v49  ;;  %v7102_v14 = vpop.f32.mrb[136].mxu0 }
 0xdc1   :  { %v2653_v23 = vadd.f32 %v8071_v28, %v7102_v14  ;;  %v2644_v25 = vpop.f32.mrb[137].mxu0  ;;  %v8075_v14 = vld [vmem:[#allocation6 + $0x70] sm:$0xff] }
 0xdc2   :  { %v2645_v60 = vadd.f32 %v8072_v22, %v2644_v25  ;;  %v7103_v42 = vpop.f32.mrb[138].mxu0 }
 0xdc3   :  { %v2656_v17 = vadd.f32 %v8073_v48, %v7103_v42  ;;  %v2647_v55 = vpop.f32.mrb[139].mxu0  ;;  %v2749_v36 = vmax.f32 %v2653_v23, 0.0 }
 0xdc4   :  { %v2648_v40 = vadd.f32 %v8074_v35, %v2647_v55  ;;  %v2747_v1 = vmax.f32 %v2645_v60, 0.0 }
 0xdc5   :  { %v2750_v44 = vmax.f32 %v2656_v17, 0.0 }
 0xdc6   :  { %v2748_v3 = vmax.f32 %v2648_v40, 0.0 }
 0xdc7   :  { %v9507_v20 = vpack.c.bf16 %v2750_v44, %v2749_v36 }
 0xdc8   :  { %v9509_v49 = vpack.c.bf16 %v2748_v3, %v2747_v1  ;;  %v7106_v12 = vpop.f32.mrb[140].mxu0  ;;  %v8079_v1 = vld [vmem:[#allocation6 + $0x90] sm:$0xff] }
 0xdc9   :  { %v2669_v28 = vadd.f32 %v8075_v14, %v7106_v12  ;;  %v2660_v8 = vpop.f32.mrb[141].mxu0  ;;  %v8080_v14 = vld [vmem:[#allocation6 + $0x80] sm:$0xff] }
 0xdca   :  { %v2661_v25 = vadd.f32 %v8076_v10, %v2660_v8  ;;  %v7107_v22 = vpop.f32.mrb[142].mxu0 }
 0xdcb   :  { %v2672_v42 = vadd.f32 %v8077_v46, %v7107_v22  ;;  %v2663_v48 = vpop.f32.mrb[143].mxu0  ;;  %v2753_v23 = vmax.f32 %v2669_v28, 0.0 }
 0xdcc   :  { %v2664_v55 = vadd.f32 %v8078_v51, %v2663_v48  ;;  %v2751_v60 = vmax.f32 %v2661_v25, 0.0 }
 0xdcd   :  { %v2754_v17 = vmax.f32 %v2672_v42, 0.0 }
 0xdce   :  { %v2752_v35 = vmax.f32 %v2664_v55, 0.0 }
 0xdcf   :  { %v9511_v40 = vpack.c.bf16 %v2754_v17, %v2753_v23 }
 0xdd0   :  { %v9513_v36 = vpack.c.bf16 %v2752_v35, %v2751_v60  ;;  %v7110_v44 = vpop.f32.mrb[144].mxu0  ;;  %v8083_v60 = vld [vmem:[#allocation6 + $0xb0] sm:$0xff] }
 0xdd1   :  { %v2685_v3 = vadd.f32 %v8079_v1, %v7110_v44  ;;  %v2676_v12 = vpop.f32.mrb[145].mxu0  ;;  %v8084_v44 = vld [vmem:[#allocation6 + $0xa0] sm:$0xff] }
 0xdd2   :  { %v2677_v10 = vadd.f32 %v8080_v14, %v2676_v12  ;;  %v7111_v8 = vpop.f32.mrb[146].mxu0  ;;  %v8085_v12 = vld [vmem:[#allocation6 + $0xb8] sm:$0xff] }
 0xdd3   :  { %v2688_v46 = vadd.f32 %v8081_v47, %v7111_v8  ;;  %v2679_v22 = vpop.f32.mrb[147].mxu0  ;;  %v2757_v28 = vmax.f32 %v2685_v3, 0.0 }
 0xdd4   :  { %v2680_v51 = vadd.f32 %v8082_v38, %v2679_v22  ;;  %v2755_v25 = vmax.f32 %v2677_v10, 0.0  ;;  %v8086_v38 = vld [vmem:[#allocation6 + $0xa8] sm:$0xff] }
 0xdd5   :  { %v2758_v42 = vmax.f32 %v2688_v46, 0.0 }
 0xdd6   :  { %v2756_v48 = vmax.f32 %v2680_v51, 0.0 }
 0xdd7   :  { %v2780_v55 = vpack.c.bf16 %v2758_v42, %v2757_v28 }
 0xdd8   :  { %v2779_v23 = vpack.c.bf16 %v2756_v48, %v2755_v25  ;;  %v7114_v17 = vpop.f32.mrb[148].mxu0 }
 0xdd9   :  { %v2701_v35 = vadd.f32 %v8083_v60, %v7114_v17  ;;  %v2692_v27 = vpop.f32.mrb[149].mxu0 }
 0xdda   :  { %v2693_v1 = vadd.f32 %v8084_v44, %v2692_v27  ;;  %v7115_v9 = vpop.f32.mrb[150].mxu0  ;;  %6489 = vmatprep.subr.bf16.mxu1 %v2779_v23  ;;  %v8087_v27 = vld [vmem:[#allocation6 + $0xd0] sm:$0xff]  ;;  %v8088_v23 = vld [vmem:[#allocation6 + $0xc0] sm:$0xff] }
 0xddb   :  { %v2704_v14 = vadd.f32 %v8085_v12, %v7115_v9  ;;  %v2695_v47 = vpop.f32.mrb[151].mxu0  ;;  %6490 = vmatpush3.bf16.msra.mxu1 %v9501_v61  ;;  %v2761_v10 = vmax.f32 %v2701_v35, 0.0  ;;  %v8089_v61 = vld [vmem:[#allocation6 + $0xd8] sm:$0xff] }
 0xddc   :  { %v2696_v3 = vadd.f32 %v8086_v38, %v2695_v47  ;;  %6491 = vmatprep.subr.bf16.mxu1 %v2780_v55  ;;  %v2759_v46 = vmax.f32 %v2693_v1, 0.0  ;;  %v8090_v55 = vld [vmem:[#allocation6 + $0xc8] sm:$0xff] }
 0xddd   :  { %v2762_v8 = vmax.f32 %v2704_v14, 0.0 }
 0xdde   :  { %v2760_v22 = vmax.f32 %v2696_v3, 0.0 }
 0xddf   :  { %v2782_v51 = vpack.c.bf16 %v2762_v8, %v2761_v10  ;;  %6492 = vmatpush3.bf16.msra.mxu1 %v9499_v15  ;;  %v8091_v10 = vld [vmem:[#allocation6 + $0xf0] sm:$0xff] }
 0xde0   :  { %v2781_v28 = vpack.c.bf16 %v2760_v22, %v2759_v46  ;;  %v7118_v42 = vpop.f32.mrb[152].mxu0  ;;  %v8092_v22 = vld [vmem:[#allocation6 + $0xe0] sm:$0xff] }
 0xde1   :  { %v2717_v25 = vadd.f32 %v8087_v27, %v7118_v42  ;;  %v2708_v48 = vpop.f32.mrb[153].mxu0 }
 0xde2   :  { %v2709_v9 = vadd.f32 %v8088_v23, %v2708_v48  ;;  %v7119_v17 = vpop.f32.mrb[154].mxu0  ;;  %6493 = vmatprep.subr.bf16.mxu1 %v2781_v28 }
 0xde3   :  { %v2720_v60 = vadd.f32 %v8089_v61, %v7119_v17  ;;  %v2711_v44 = vpop.f32.mrb[155].mxu0  ;;  %6494 = vmatpush3.bf16.msra.mxu1 %v9505_v30  ;;  %v2765_v1 = vmax.f32 %v2717_v25, 0.0  ;;  %v8093_v30 = vld [vmem:[#allocation6 + $0xf8] sm:$0xff] }
 0xde4   :  { %v2712_v35 = vadd.f32 %v8090_v55, %v2711_v44  ;;  %6495 = vmatprep.subr.bf16.mxu1 %v2782_v51  ;;  %v2763_v15 = vmax.f32 %v2709_v9, 0.0  ;;  %v8094_v51 = vld [vmem:[#allocation6 + $0xe8] sm:$0xff]  ;;  %v8097_v55 = vld [vmem:[#allocation9 + $0x10] ss:$8 sps:$4 sm:$0xff]  }
 0xde5   :  { %v2766_v12 = vmax.f32 %v2720_v60, 0.0  ;;  %v8095_v44 = vld [vmem:[#allocation9] ss:$8 sps:$4 sm:$0xff]  }
 0xde6   :  { %v2764_v14 = vmax.f32 %v2712_v35, 0.0  ;;  %v8098_v35 = vld [vmem:[#allocation9 + $0x24] ss:$8 sps:$4 sm:$0xff]  }
 0xde7   :  { %v2784_v47 = vpack.c.bf16 %v2766_v12, %v2765_v1  ;;  %6496 = vmatpush3.bf16.msra.mxu1 %v9503_v34  ;;  %v8099_v1 = vld [vmem:[#allocation9 + $0x20] ss:$8 sps:$4 sm:$0xff]   ;;  %v8100_v12 = vld [vmem:[#allocation9 + $0x34] ss:$8 sps:$4 sm:$0xff]  }
 0xde8   :  { %v2783_v38 = vpack.c.bf16 %v2764_v14, %v2763_v15  ;;  %v7122_v3 = vpop.f32.mrb[156].mxu0  ;;  %v8102_v15 = vld [vmem:[#allocation9 + $0x44] ss:$8 sps:$4 sm:$0xff]   ;;  %v8104_v14 = vld [vmem:[#allocation9 + $0x54] ss:$8 sps:$4 sm:$0xff]  }
 0xde9   :  { %v2733_v8 = vadd.f32 %v8091_v10, %v7122_v3  ;;  %v2724_v46 = vpop.f32.mrb[157].mxu0  ;;  %v8108_v3 = vld [vmem:[#allocation9 + $0x74] ss:$8 sps:$4 sm:$0xff]   ;;  %v8109_v10 = vld [vmem:[#allocation9 + $0x70] ss:$8 sps:$4 sm:$0xff]  }
 0xdea   :  { %v2725_v28 = vadd.f32 %v8092_v22, %v2724_v46  ;;  %v7123_v42 = vpop.f32.mrb[158].mxu0  ;;  %6497 = vmatprep.subr.bf16.mxu1 %v2783_v38  ;;  %v8107_v38 = vld [vmem:[#allocation9 + $0x60] ss:$8 sps:$4 sm:$0xff]   ;;  %v7888_v22 = vld [vmem:[#allocation11 + $0x130] sm:$0xff]  }
 0xdeb   :  { %v2736_v27 = vadd.f32 %v8093_v30, %v7123_v42  ;;  %v2727_v48 = vpop.f32.mrb[159].mxu0  ;;  %6498 = vmatpush3.bf16.msra.mxu1 %v9509_v49  ;;  %v2769_v23 = vmax.f32 %v2733_v8, 0.0  ;;  %v8096_v49 = vld [vmem:[#allocation9 + $0x14] ss:$8 sps:$4 sm:$0xff]   ;;  %v7886_v8 = vld [vmem:[#allocation11 + $0x120] sm:$0xff]   ;;  %v7887_v46 = vld [vmem:[#allocation11 + $0x128] sm:$0xff]   ;;  %v9524_v42 = vstv %s2885_s7 }
 0xdec   :  { %v2728_v25 = vadd.f32 %v8094_v51, %v2727_v48  ;;  %6499 = vmatprep.subr.bf16.mxu1 %v2784_v47  ;;  %v2767_v34 = vmax.f32 %v2725_v28, 0.0  ;;  %v8106_v47 = vld [vmem:[#allocation9 + $0x64] ss:$8 sps:$4 sm:$0xff]   ;;  %7132 = vmatprep.subr.bf16.mxu0 %v7886_v8  ;;  %v7889_v28 = vld [vmem:[#allocation11 + $0x138] sm:$0xff]   ;;  %v2887_v51 = vmul.f32 %v9524_v42, %v2552_v62  ;;  %v2890_v0 = vmul.f32 %v9524_v42, %v2555_v57 }
 0xded   :  { %v2770_v9 = vmax.f32 %v2736_v27, 0.0  ;;  %7133 = vmatpush3.bf16.msra.mxu0 %v7886_v8  ;;  %v2891_v11 = vmul.f32 %v9524_v42, %v2556_v41  ;;  %v2892_v54 = vmul.f32 %v9524_v42, %v2557_v53  ;;  %v2893_v56 = vmul.f32 %v9524_v42, %v2558_v19 }
 0xdee   :  { %v2768_v17 = vmax.f32 %v2728_v25, 0.0  ;;  %7134 = vmatprep.subr.bf16.mxu0 %v7887_v46  ;;  %v2894_v37 = vmul.f32 %v9524_v42, %v2559_v24  ;;  %v2895_v5 = vmul.f32 %v9524_v42, %v2560_v7 }
 0xdef   :  { %v2786_v61 = vpack.c.bf16 %v2770_v9, %v2769_v23  ;;  %6500 = vmatpush3.bf16.msra.mxu1 %v9507_v20  ;;  %v8101_v20 = vld [vmem:[#allocation9 + $0x30] ss:$8 sps:$4 sm:$0xff]  }
 0xdf0   :  { %v2785_v60 = vpack.c.bf16 %v2768_v17, %v2767_v34  ;;  %v2888_v17 = vmul.f32 %v9524_v42, %v2553_v59 }
 0xdf1   :  { %7135 = vmatpush3.bf16.msra.mxu0 %v7887_v46 }
 0xdf2   :  { %6501 = vmatprep.subr.bf16.mxu1 %v2785_v60  ;;  %7136 = vmatprep.subr.bf16.mxu0 %v7888_v22 }
 0xdf3   :  { %6502 = vmatpush3.bf16.msra.mxu1 %v9513_v36  ;;  %v8103_v36 = vld [vmem:[#allocation9 + $0x40] ss:$8 sps:$4 sm:$0xff]  }
 0xdf4   :  { %6503 = vmatprep.subr.bf16.mxu1 %v2786_v61 }
 0xdf5   :  { %7137 = vmatpush3.bf16.msra.mxu0 %v7888_v22 }
 0xdf6   :  { %7138 = vmatprep.subr.bf16.mxu0 %v7889_v28 }
 0xdf7   :  { %6504 = vmatpush3.bf16.msra.mxu1 %v9511_v40  ;;  %v8105_v40 = vld [vmem:[#allocation9 + $0x50] ss:$8 sps:$4 sm:$0xff]  }
 0xdf9   :  { %7139 = vmatpush3.bf16.msra.mxu0 %v7889_v28 }
 0xdfa   :  { %2820 = vmatmul.mubr.bf16.vlgmr.msra.gmra.mrb[72].mxu1 %v8095_v44 }
 0xdfb   :  { %2827 = vmatprep.mubr.bf16.mxu1 %v8096_v49 }
 0xe02   :  { %2828 = vmatmul.mubr.bf16.gmra.mrb[76].mxu1 %v8097_v55 }
 0xe03   :  { %2835 = vmatprep.mubr.bf16.mxu1 %v8098_v35  ;;  %v2889_v35 = vmul.f32 %v9524_v42, %v2554_v2 }
 0xe0a   :  { %2836 = vmatmul.mubr.bf16.gmra.mrb[80].mxu1 %v8099_v1 }
 0xe0b   :  { %2843 = vmatprep.mubr.bf16.mxu1 %v8100_v12 }
 0xe12   :  { %2844 = vmatmul.mubr.bf16.gmra.mrb[84].mxu1 %v8101_v20 }
 0xe13   :  { %2851 = vmatprep.mubr.bf16.mxu1 %v8102_v15 }
 0xe1a   :  { %2852 = vmatmul.mubr.bf16.gmra.mrb[88].mxu1 %v8103_v36 }
 0xe1b   :  { %2859 = vmatprep.mubr.bf16.mxu1 %v8104_v14 }
 0xe22   :  { %2860 = vmatmul.mubr.bf16.gmra.mrb[92].mxu1 %v8105_v40 }
 0xe23   :  { %2867 = vmatprep.mubr.bf16.mxu1 %v8106_v47 }
 0xe2a   :  { %2868 = vmatmul.mubr.bf16.gmra.mrb[96].mxu1 %v8107_v38 }
 0xe2b   :  { %2875 = vmatprep.mubr.bf16.mxu1 %v8108_v3 }
 0xe32   :  { %2876 = vmatmul.mubr.bf16.gmra.mrb[100].mxu1 %v8109_v10 }
 0xe33   :  { %3173 = vmatprep.mubr.f32.mxu1 %v8450_v63 }
 0xecd   :  { %v6505_v30 = vpop.f32.mrb[72].mxu1 }
 0xece   :  { %v6506_v27 = vpop.f32.mrb[73].mxu1 }
 0xecf   :  { %v6507_v48 = vadd.f32 %v6506_v27, %v6505_v30  ;;  %v6508_v25 = vpop.f32.mrb[74].mxu1 }
 0xed0   :  { %v6509_v23 = vpop.f32.mrb[75].mxu1 }
 0xed1   :  { %v2903_v9 = vadd.f32 %v6507_v48, %v2887_v51  ;;  %v6510_v34 = vadd.f32 %v6509_v23, %v6508_v25 }
 0xed3   :  { %v2904_v61 = vadd.f32 %v6510_v34, %v2888_v17  ;;  %v10829_v17 = vmax.f32 %v9455_v52, 0.0 }
 0xed5   :  { %v6511_v60 = vpop.f32.mrb[76].mxu1  ;;  %v2919_v44 = vpack.c.bf16 %v2904_v61, %v2903_v9  ;;  %v2896_v29 = vmul.f32 %v9524_v42, %v10829_v17 }
 0xed6   :  { %v6512_v49 = vpop.f32.mrb[77].mxu1 }
 0xed7   :  { %v6513_v55 = vadd.f32 %v6512_v49, %v6511_v60  ;;  %v6514_v13 = vpop.f32.mrb[78].mxu1  ;;  %7140 = vmatprep.mubr.bf16.mxu0 %v2919_v44 }
 0xed8   :  { %v6515_v62 = vpop.f32.mrb[79].mxu1 }
 0xed9   :  { %v2905_v1 = vadd.f32 %v6513_v55, %v2889_v35  ;;  %v6516_v12 = vadd.f32 %v6515_v62, %v6514_v13  ;;  %v10830_v55 = vmax.f32 %v9458_v31, 0.0 }
 0xedb   :  { %v2906_v20 = vadd.f32 %v6516_v12, %v2890_v0  ;;  %v2897_v50 = vmul.f32 %v9524_v42, %v10830_v55 }
 0xedd   :  { %v2920_v59 = vpack.c.bf16 %v2906_v20, %v2905_v1  ;;  %v6517_v15 = vpop.f32.mrb[80].mxu1  ;;  %v10831_v1 = vmax.f32 %v9461_v18, 0.0 }
 0xede   :  { %v6518_v36 = vpop.f32.mrb[81].mxu1 }
 0xedf   :  { %v6519_v14 = vadd.f32 %v6518_v36, %v6517_v15  ;;  %v6520_v40 = vpop.f32.mrb[82].mxu1  ;;  %7141 = vmatmul.mubr.bf16.vlgmr.msra.gmra.mrb[160].mxu0 %v2920_v59  ;;  %v2898_v52 = vmul.f32 %v9524_v42, %v10831_v1  ;;  %v10832_v36 = vmax.f32 %v9466_v16, 0.0 }
 0xee0   :  { %v6521_v2 = vpop.f32.mrb[83].mxu1 }
 0xee1   :  { %v2907_v47 = vadd.f32 %v6519_v14, %v2891_v11  ;;  %v6522_v38 = vadd.f32 %v6521_v2, %v6520_v40  ;;  %v2899_v31 = vmul.f32 %v9524_v42, %v10832_v36 }
 0xee3   :  { %v2908_v3 = vadd.f32 %v6522_v38, %v2892_v54 }
 0xee5   :  { %v6523_v57 = vpop.f32.mrb[84].mxu1  ;;  %v2921_v10 = vpack.c.bf16 %v2908_v3, %v2907_v47  ;;  %v10833_v47 = vmax.f32 %v9469_v6, 0.0 }
 0xee6   :  { %v6524_v8 = vpop.f32.mrb[85].mxu1 }
 0xee7   :  { %v6525_v46 = vadd.f32 %v6524_v8, %v6523_v57  ;;  %v6526_v22 = vpop.f32.mrb[86].mxu1  ;;  %7144 = vmatprep.mubr.bf16.mxu0 %v2921_v10  ;;  %v2900_v18 = vmul.f32 %v9524_v42, %v10833_v47  ;;  %v10834_v8 = vmax.f32 %v9474_v39, 0.0 }
 0xee8   :  { %v6527_v41 = vpop.f32.mrb[87].mxu1 }
 0xee9   :  { %v2909_v28 = vadd.f32 %v6525_v46, %v2893_v56  ;;  %v6528_v30 = vadd.f32 %v6527_v41, %v6526_v22  ;;  %v2901_v16 = vmul.f32 %v9524_v42, %v10834_v8 }
 0xeeb   :  { %v2910_v27 = vadd.f32 %v6528_v30, %v2894_v37 }
 0xeed   :  { %v6529_v53 = vpop.f32.mrb[88].mxu1  ;;  %v2922_v48 = vpack.c.bf16 %v2910_v27, %v2909_v28  ;;  %v10835_v28 = vmax.f32 %v9477_v21, 0.0  ;;  %v7890_v27 = vld [vmem:[#allocation11 + $0x140] sm:$0xff]  }
 0xeee   :  { %v6530_v51 = vpop.f32.mrb[89].mxu1  ;;  %7156 = vmatprep.subr.bf16.mxu0 %v7890_v27 }
 0xeef   :  { %v6531_v25 = vadd.f32 %v6530_v51, %v6529_v53  ;;  %v6532_v23 = vpop.f32.mrb[90].mxu1  ;;  %7145 = vmatmul.mubr.bf16.gmra.mrb[164].mxu0 %v2922_v48  ;;  %v2902_v6 = vmul.f32 %v9524_v42, %v10835_v28  ;;  %v9574_v53 = vld [vmem:[#allocation12 + $0x10] sm:$0xff] }
 0xef0   :  { %v6533_v19 = vpop.f32.mrb[91].mxu1  ;;  %7157 = vmatpush3.bf16.msra.mxu0 %v7890_v27  ;;  %v9578_v39 = vrot.slane %v9574_v53, %v8683_v4 }
 0xef1   :  { %v2911_v9 = vadd.f32 %v6531_v25, %v2895_v5  ;;  %v6534_v34 = vadd.f32 %v6533_v19, %v6532_v23 }
 0xef3   :  { %v2912_v61 = vadd.f32 %v6534_v34, %v2896_v29 }
 0xef5   :  { %v6535_v24 = vpop.f32.mrb[92].mxu1  ;;  %v2923_v60 = vpack.c.bf16 %v2912_v61, %v2911_v9 }
 0xef6   :  { %v6536_v44 = vpop.f32.mrb[93].mxu1 }
 0xef7   :  { %v6537_v49 = vadd.f32 %v6536_v44, %v6535_v24  ;;  %v6538_v35 = vpop.f32.mrb[94].mxu1  ;;  %7148 = vmatprep.mubr.bf16.mxu0 %v2923_v60 }
 0xef8   :  { %v6539_v7 = vpop.f32.mrb[95].mxu1 }
 0xef9   :  { %v2913_v13 = vadd.f32 %v6537_v49, %v2897_v50  ;;  %v6540_v62 = vadd.f32 %v6539_v7, %v6538_v35 }
 0xefb   :  { %v2914_v12 = vadd.f32 %v6540_v62, %v2898_v52 }
 0xefd   :  { %v6541_v0 = vpop.f32.mrb[96].mxu1  ;;  %v2924_v20 = vpack.c.bf16 %v2914_v12, %v2913_v13 }
 0xefe   :  { %v6542_v59 = vpop.f32.mrb[97].mxu1 }
 0xeff   :  { %v6543_v15 = vadd.f32 %v6542_v59, %v6541_v0  ;;  %v6544_v14 = vpop.f32.mrb[98].mxu1  ;;  %7149 = vmatmul.mubr.bf16.gmra.mrb[168].mxu0 %v2924_v20 }
 0xf00   :  { %v6545_v11 = vpop.f32.mrb[99].mxu1 }
 0xf01   :  { %v2915_v40 = vadd.f32 %v6543_v15, %v2899_v31  ;;  %v6546_v2 = vadd.f32 %v6545_v11, %v6544_v14 }
 0xf03   :  { %v2916_v38 = vadd.f32 %v6546_v2, %v2900_v18 }
 0xf05   :  { %v6547_v54 = vpop.f32.mrb[100].mxu1  ;;  %v2925_v3 = vpack.c.bf16 %v2916_v38, %v2915_v40 }
 0xf06   :  { %v6548_v57 = vpop.f32.mrb[101].mxu1 }
 0xf07   :  { %v6549_v10 = vadd.f32 %v6548_v57, %v6547_v54  ;;  %v6550_v46 = vpop.f32.mrb[102].mxu1  ;;  %7152 = vmatprep.mubr.bf16.mxu0 %v2925_v3 }
 0xf08   :  { %v6551_v56 = vpop.f32.mrb[103].mxu1 }
 0xf09   :  { %v2917_v22 = vadd.f32 %v6549_v10, %v2901_v16  ;;  %v6552_v41 = vadd.f32 %v6551_v56, %v6550_v46 }
 0xf0b   :  { %v2918_v30 = vadd.f32 %v6552_v41, %v2902_v6 }
 0xf0d   :  { %v2926_v37 = vpack.c.bf16 %v2918_v30, %v2917_v22 }
 0xf0f   :  { %7153 = vmatmul.mubr.bf16.gmra.mrb[172].mxu0 %v2926_v37 }
 0xfb2   :  { %v7142_v48 = vpop.f32.mrb[160].mxu0 }
 0xfb3   :  { %v3030_v51 = vpop.f32.mrb[161].mxu0  ;;  %v9587_v23 = vadd.f32 %v7142_v48, %v9578_v39 }
 0xfb4   :  { %v9581_v25 = vadd.f32 %v3030_v51, %v9578_v39  ;;  %v7143_v21 = vpop.f32.mrb[162].mxu0 }
 0xfb5   :  { %v9584_v42 = vadd.f32 %v7143_v21, %v9578_v39  ;;  %v3033_v5 = vpop.f32.mrb[163].mxu0  ;;  %v3095_v29 = vmul.f32 %v9587_v23, %v9587_v23 }
 0xfb6   :  { %v9590_v19 = vadd.f32 %v3033_v5, %v9578_v39  ;;  %v3093_v9 = vmul.f32 %v9581_v25, %v9581_v25 }
 0xfb7   :  { %v3096_v34 = vmul.f32 %v9584_v42, %v9584_v42  ;;  %v7606_v44 = vpack.c.bf16 %v9584_v42, %v9587_v23 }
 0xfb8   :  { %v3094_v17 = vmul.f32 %v9590_v19, %v9590_v19  ;;  %v7602_v24 = vpack.c.bf16 %v9590_v19, %v9581_v25 }
 0xfb9   :  { %v7604_v60 = vpack.c.bf16 %v3096_v34, %v3095_v29 }
 0xfba   :  { %v7600_v61 = vpack.c.bf16 %v3094_v17, %v3093_v9 }
 0xfbc   :  { %7601 = vmatprep.subr.bf16.mxu1 %v7600_v61 }
 0xfbd   :  { %7603 = vmatpush1.bf16.msra.mxu1 %v7602_v24  ;;  %v7891_v24 = vld [vmem:[#allocation11 + $0x148] sm:$0xff]  }
 0xfbe   :  { %7605 = vmatprep.subr.bf16.mxu1 %v7604_v60  ;;  %7158 = vmatprep.subr.bf16.mxu0 %v7891_v24  ;;  %v7892_v60 = vld [vmem:[#allocation11 + $0x150] sm:$0xff]  }
 0xfbf   :  { %7159 = vmatpush3.bf16.msra.mxu0 %v7891_v24 }
 0xfc0   :  { %7160 = vmatprep.subr.bf16.mxu0 %v7892_v60 }
 0xfc1   :  { %7607 = vmatpush1.bf16.msra.mxu1 %v7606_v44  ;;  %v7893_v44 = vld [vmem:[#allocation11 + $0x158] sm:$0xff]  }
 0xfc2   :  { %v7146_v49 = vpop.f32.mrb[164].mxu0 }
 0xfc3   :  { %v3046_v55 = vpop.f32.mrb[165].mxu0  ;;  %v9611_v62 = vadd.f32 %v7146_v49, %v9578_v39  ;;  %7161 = vmatpush3.bf16.msra.mxu0 %v7892_v60  ;;  %v7894_v49 = vld [vmem:[#allocation11 + $0x160] sm:$0xff]  }
 0xfc4   :  { %v9605_v50 = vadd.f32 %v3046_v55, %v9578_v39  ;;  %v7147_v35 = vpop.f32.mrb[166].mxu0  ;;  %7162 = vmatprep.subr.bf16.mxu0 %v7893_v44  ;;  %v7895_v55 = vld [vmem:[#allocation11 + $0x168] sm:$0xff]  }
 0xfc5   :  { %v9608_v7 = vadd.f32 %v7147_v35, %v9578_v39  ;;  %v3049_v13 = vpop.f32.mrb[167].mxu0  ;;  %v3099_v20 = vmul.f32 %v9611_v62, %v9611_v62  ;;  %v7896_v35 = vld [vmem:[#allocation11 + $0x170] sm:$0xff]  }
 0xfc6   :  { %v9614_v1 = vadd.f32 %v3049_v13, %v9578_v39  ;;  %v3097_v52 = vmul.f32 %v9605_v50, %v9605_v50  ;;  %v7897_v13 = vld [vmem:[#allocation11 + $0x178] sm:$0xff]  }
 0xfc7   :  { %v3100_v12 = vmul.f32 %v9608_v7, %v9608_v7  ;;  %v7614_v31 = vpack.c.bf16 %v9608_v7, %v9611_v62  ;;  %7163 = vmatpush3.bf16.msra.mxu0 %v7893_v44 }
 0xfc8   :  { %v3098_v0 = vmul.f32 %v9614_v1, %v9614_v1  ;;  %v7610_v15 = vpack.c.bf16 %v9614_v1, %v9605_v50  ;;  %7164 = vmatprep.subr.bf16.mxu0 %v7894_v49 }
 0xfc9   :  { %v7612_v36 = vpack.c.bf16 %v3100_v12, %v3099_v20 }
 0xfca   :  { %v7608_v59 = vpack.c.bf16 %v3098_v0, %v3097_v52 }
 0xfcb   :  { %7165 = vmatpush3.bf16.msra.mxu0 %v7894_v49 }
 0xfcc   :  { %7609 = vmatprep.subr.bf16.mxu1 %v7608_v59  ;;  %7166 = vmatprep.subr.bf16.mxu0 %v7895_v55 }
 0xfcd   :  { %7611 = vmatpush1.bf16.msra.mxu1 %v7610_v15 }
 0xfce   :  { %7613 = vmatprep.subr.bf16.mxu1 %v7612_v36 }
 0xfcf   :  { %7167 = vmatpush3.bf16.msra.mxu0 %v7895_v55 }
 0xfd0   :  { %7168 = vmatprep.subr.bf16.mxu0 %v7896_v35 }
 0xfd1   :  { %7615 = vmatpush1.bf16.msra.mxu1 %v7614_v31 }
 0xfd2   :  { %v7150_v14 = vpop.f32.mrb[168].mxu0 }
 0xfd3   :  { %v3062_v11 = vpop.f32.mrb[169].mxu0  ;;  %v9635_v38 = vadd.f32 %v7150_v14, %v9578_v39  ;;  %7169 = vmatpush3.bf16.msra.mxu0 %v7896_v35  ;;  %v3206_v14 = vrot.slane %v9574_v53, %v8791_v32 }
 0xfd4   :  { %v9629_v40 = vadd.f32 %v3062_v11, %v9578_v39  ;;  %v7151_v2 = vpop.f32.mrb[170].mxu0  ;;  %7170 = vmatprep.subr.bf16.mxu0 %v7897_v13  ;;  %v9684_v11 = vrot.slane %v9574_v53, %v8794_v33 }
 0xfd5   :  { %v9632_v47 = vadd.f32 %v7151_v2, %v9578_v39  ;;  %v3065_v18 = vpop.f32.mrb[171].mxu0  ;;  %v3103_v8 = vmul.f32 %v9635_v38, %v9635_v38 }
 0xfd6   :  { %v9638_v54 = vadd.f32 %v3065_v18, %v9578_v39  ;;  %v3101_v3 = vmul.f32 %v9629_v40, %v9629_v40 }
 0xfd7   :  { %v3104_v57 = vmul.f32 %v9632_v47, %v9632_v47  ;;  %v7622_v22 = vpack.c.bf16 %v9632_v47, %v9635_v38  ;;  %7171 = vmatpush3.bf16.msra.mxu0 %v7897_v13 }
 0xfd8   :  { %v3102_v10 = vmul.f32 %v9638_v54, %v9638_v54  ;;  %v7618_v46 = vpack.c.bf16 %v9638_v54, %v9629_v40 }
 0xfd9   :  { %v7620_v56 = vpack.c.bf16 %v3104_v57, %v3103_v8 }
 0xfda   :  { %v7616_v16 = vpack.c.bf16 %v3102_v10, %v3101_v3 }
 0xfdc   :  { %7617 = vmatprep.subr.bf16.mxu1 %v7616_v16 }
 0xfdd   :  { %7619 = vmatpush1.bf16.msra.mxu1 %v7618_v46 }
 0xfde   :  { %7621 = vmatprep.subr.bf16.mxu1 %v7620_v56 }
 0xfe1   :  { %7623 = vmatpush1.bf16.msra.mxu1 %v7622_v22 }
 0xfe2   :  { %v7154_v41 = vpop.f32.mrb[172].mxu0 }
 0xfe3   :  { %v3078_v28 = vpop.f32.mrb[173].mxu0  ;;  %v9659_v48 = vadd.f32 %v7154_v41, %v9578_v39 }
 0xfe4   :  { %v9653_v6 = vadd.f32 %v3078_v28, %v9578_v39  ;;  %v7155_v30 = vpop.f32.mrb[174].mxu0 }
 0xfe5   :  { %v9656_v37 = vadd.f32 %v7155_v30, %v9578_v39  ;;  %v3081_v27 = vpop.f32.mrb[175].mxu0  ;;  %v3107_v34 = vmul.f32 %v9659_v48, %v9659_v48 }
 0xfe6   :  { %v9662_v51 = vadd.f32 %v3081_v27, %v9578_v39  ;;  %v3105_v21 = vmul.f32 %v9653_v6, %v9653_v6 }
 0xfe7   :  { %v3108_v5 = vmul.f32 %v9656_v37, %v9656_v37  ;;  %v7630_v39 = vpack.c.bf16 %v9656_v37, %v9659_v48 }
 0xfe8   :  { %v3106_v9 = vmul.f32 %v9662_v51, %v9662_v51  ;;  %v7626_v29 = vpack.c.bf16 %v9662_v51, %v9653_v6 }
 0xfe9   :  { %v7628_v61 = vpack.c.bf16 %v3108_v5, %v3107_v34 }
 0xfea   :  { %v7624_v17 = vpack.c.bf16 %v3106_v9, %v3105_v21 }
 0xfec   :  { %7625 = vmatprep.subr.bf16.mxu1 %v7624_v17 }
 0xfed   :  { %7627 = vmatpush1.bf16.msra.mxu1 %v7626_v29 }
 0xfee   :  { %7629 = vmatprep.subr.bf16.mxu1 %v7628_v61 }
 0xff1   :  { %7631 = vmatpush1.bf16.msra.mxu1 %v7630_v39 }
 0xff4   :  { %3174 = vmatmul.mubr.f32.vlgmr.msra.gmra.mrb[104].mxu1 %v10828_v26 }
 0xff5   :  { %3535 = vmatprep.mubr.f32.mxu1 %v8450_v63 }
0x10c7   :  { %v3175_v52 = vpop.f32.mrb[104].mxu1 }
0x10c8   :  { %v3180_v12 = vmul.f32 %v3175_v52, %v3175_v52  ;;  %v3177_v0 = vpop.f32.mrb[105].mxu1  ;;  %v3186_v36 = vrot.slane %v3175_v52, %v8683_v4 }
0x10ca   :  { %v3181_v20 = vsub.f32 %v3177_v0, %v3180_v12  ;;  %v3187_v31 = vsub.f32 %v9581_v25, %v3186_v36  ;;  %v3188_v2 = vsub.f32 %v9590_v19, %v3186_v36  ;;  %v3189_v18 = vsub.f32 %v9587_v23, %v3186_v36 }
0x10cb   :  { %v3190_v3 = vsub.f32 %v9584_v42, %v3186_v36  ;;  %v3191_v57 = vsub.f32 %v9605_v50, %v3186_v36  ;;  %v3192_v10 = vsub.f32 %v9614_v1, %v3186_v36  ;;  %v3193_v8 = vsub.f32 %v9611_v62, %v3186_v36 }
0x10cc   :  { %v3182_v59 = vmax.f32 %v3181_v20, 0.0  ;;  %v3194_v25 = vsub.f32 %v9608_v7, %v3186_v36  ;;  %v3195_v16 = vsub.f32 %v9629_v40, %v3186_v36  ;;  %v3207_v46 = vmul.f32 %v3206_v14, %v3187_v31 }
0x10cd   :  { %v3196_v56 = vsub.f32 %v9638_v54, %v3186_v36  ;;  %v3197_v22 = vsub.f32 %v9635_v38, %v3186_v36  ;;  %v3198_v19 = vsub.f32 %v9632_v47, %v3186_v36  ;;  %v3199_v23 = vsub.f32 %v9653_v6, %v3186_v36 }
0x10ce   :  { %v3223_v15 = vadd.f32 1e-05, %v3182_v59  ;;  %v3200_v42 = vsub.f32 %v9662_v51, %v3186_v36  ;;  %v3201_v50 = vsub.f32 %v9659_v48, %v3186_v36  ;;  %v3202_v1 = vsub.f32 %v9656_v37, %v3186_v36 }
0x10cf   :  { %v3208_v62 = vmul.f32 %v3206_v14, %v3188_v2  ;;  %v3209_v41 = vmul.f32 %v3206_v14, %v3189_v18  ;;  %v3210_v7 = vmul.f32 %v3206_v14, %v3190_v3  ;;  %v3211_v28 = vmul.f32 %v3206_v14, %v3191_v57 }
0x10d0   :  { %7954 = vrsqrt.f32 %v3223_v15  ;;  %v3212_v30 = vmul.f32 %v3206_v14, %v3192_v10  ;;  %v3213_v27 = vmul.f32 %v3206_v14, %v3193_v8  ;;  %v3214_v54 = vmul.f32 %v3206_v14, %v3194_v25 }
0x10d1   :  { %v3215_v21 = vmul.f32 %v3206_v14, %v3195_v16  ;;  %v3216_v47 = vmul.f32 %v3206_v14, %v3196_v56  ;;  %v3217_v5 = vmul.f32 %v3206_v14, %v3197_v22  ;;  %v3218_v6 = vmul.f32 %v3206_v14, %v3198_v19 }
0x10d2   :  { %v3219_v9 = vmul.f32 %v3206_v14, %v3199_v23  ;;  %v3220_v51 = vmul.f32 %v3206_v14, %v3200_v42  ;;  %v3221_v34 = vmul.f32 %v3206_v14, %v3201_v50  ;;  %v3222_v48 = vmul.f32 %v3206_v14, %v3202_v1 }
0x10da   :  { %v7955_v40 = vpop.eup %7954 }
0x10db   :  { %v3228_v38 = vrot.slane %v7955_v40, %v8683_v4 }
0x10dd   :  { %v3229_v17 = vmul.f32 %v3228_v38, %v3207_v46  ;;  %v3230_v37 = vmul.f32 %v3228_v38, %v3208_v62  ;;  %v3231_v29 = vmul.f32 %v3228_v38, %v3209_v41  ;;  %v3232_v61 = vmul.f32 %v3228_v38, %v3210_v7 }
0x10de   :  { %v3233_v39 = vmul.f32 %v3228_v38, %v3211_v28  ;;  %v3234_v24 = vmul.f32 %v3228_v38, %v3212_v30  ;;  %v3235_v60 = vmul.f32 %v3228_v38, %v3213_v27  ;;  %v3236_v44 = vmul.f32 %v3228_v38, %v3214_v54 }
0x10df   :  { %v3249_v49 = vadd.f32 %v9684_v11, %v3229_v17  ;;  %v3250_v55 = vadd.f32 %v9684_v11, %v3230_v37  ;;  %v3251_v35 = vadd.f32 %v9684_v11, %v3231_v29  ;;  %v3252_v13 = vadd.f32 %v9684_v11, %v3232_v61  ;;  %v8110_v29 = vld [vmem:[#allocation8] sm:$0xff]  }
0x10e0   :  { %v3253_v52 = vadd.f32 %v9684_v11, %v3233_v39  ;;  %v3254_v12 = vadd.f32 %v9684_v11, %v3234_v24  ;;  %v3255_v0 = vadd.f32 %v9684_v11, %v3235_v60  ;;  %v3256_v20 = vadd.f32 %v9684_v11, %v3236_v44 }
0x10e1   :  { %v3265_v59 = vmax.f32 %v3249_v49, 0.0  ;;  %v3266_v15 = vmax.f32 %v3250_v55, 0.0  ;;  %v3267_v36 = vmax.f32 %v3251_v35, 0.0  ;;  %v3268_v31 = vmax.f32 %v3252_v13, 0.0 }
0x10e2   :  { %v3269_v14 = vmax.f32 %v3253_v52, 0.0  ;;  %v3270_v2 = vmax.f32 %v3254_v12, 0.0  ;;  %v3271_v18 = vmax.f32 %v3255_v0, 0.0  ;;  %v3272_v3 = vmax.f32 %v3256_v20, 0.0 }
0x10e3   :  { %v3281_v57 = vpack.c.bf16 %v3266_v15, %v3265_v59  ;;  %v3282_v10 = vpack.c.bf16 %v3268_v31, %v3267_v36  ;;  %v3237_v8 = vmul.f32 %v3228_v38, %v3215_v21  ;;  %v3238_v25 = vmul.f32 %v3228_v38, %v3216_v47 }
0x10e4   :  { %v3283_v16 = vpack.c.bf16 %v3270_v2, %v3269_v14  ;;  %v3284_v46 = vpack.c.bf16 %v3272_v3, %v3271_v18  ;;  %v3239_v56 = vmul.f32 %v3228_v38, %v3217_v5  ;;  %v3240_v22 = vmul.f32 %v3228_v38, %v3218_v6 }
0x10e5   :  { %7172 = vmatprep.mubr.bf16.mxu0 %v3281_v57  ;;  %v3257_v19 = vadd.f32 %v9684_v11, %v3237_v8  ;;  %v3258_v23 = vadd.f32 %v9684_v11, %v3238_v25  ;;  %v3241_v42 = vmul.f32 %v3228_v38, %v3219_v9  ;;  %v3242_v50 = vmul.f32 %v3228_v38, %v3220_v51 }
0x10e6   :  { %7173 = vmatmul.mubr.bf16.vlgmr.msra.gmra.mrb[176].mxu0 %v3282_v10  ;;  %v3259_v1 = vadd.f32 %v9684_v11, %v3239_v56  ;;  %v3260_v62 = vadd.f32 %v9684_v11, %v3240_v22  ;;  %v3243_v41 = vmul.f32 %v3228_v38, %v3221_v34  ;;  %v3244_v7 = vmul.f32 %v3228_v38, %v3222_v48 }
0x10e7   :  { %7176 = vmatprep.mubr.bf16.mxu0 %v3283_v16  ;;  %v3273_v28 = vmax.f32 %v3257_v19, 0.0  ;;  %v3274_v40 = vmax.f32 %v3258_v23, 0.0  ;;  %v3261_v30 = vadd.f32 %v9684_v11, %v3241_v42  ;;  %v3262_v27 = vadd.f32 %v9684_v11, %v3242_v50 }
0x10e8   :  { %v3275_v54 = vmax.f32 %v3259_v1, 0.0  ;;  %v3276_v21 = vmax.f32 %v3260_v62, 0.0  ;;  %v3263_v47 = vadd.f32 %v9684_v11, %v3243_v41  ;;  %v3264_v5 = vadd.f32 %v9684_v11, %v3244_v7 }
0x10e9   :  { %v3285_v6 = vpack.c.bf16 %v3274_v40, %v3273_v28  ;;  %v3277_v9 = vmax.f32 %v3261_v30, 0.0  ;;  %v3278_v51 = vmax.f32 %v3262_v27, 0.0  ;;  %v9720_v61 = vrot.slane %v9574_v53, %v8836_v58 }
0x10ea   :  { %v3286_v17 = vpack.c.bf16 %v3276_v21, %v3275_v54  ;;  %v3279_v37 = vmax.f32 %v3263_v47, 0.0  ;;  %v3280_v34 = vmax.f32 %v3264_v5, 0.0 }
0x10eb   :  { %v3287_v38 = vpack.c.bf16 %v3278_v51, %v3277_v9 }
0x10ec   :  { %v3288_v48 = vpack.c.bf16 %v3280_v34, %v3279_v37 }
0x10ee   :  { %7177 = vmatmul.mubr.bf16.gmra.mrb[180].mxu0 %v3284_v46 }
0x10ef   :  { %7180 = vmatprep.mubr.bf16.mxu0 %v3285_v6 }
0x10f6   :  { %7181 = vmatmul.mubr.bf16.gmra.mrb[184].mxu0 %v3286_v17 }
0x10f7   :  { %7184 = vmatprep.mubr.bf16.mxu0 %v3287_v38 }
0x10fe   :  { %7185 = vmatmul.mubr.bf16.gmra.mrb[188].mxu0 %v3288_v48 }
0x10ff   :  { %7204 = vmatprep.mubr.bf16.mxu0 %v8110_v29 }
0x11b9   :  { %v7174_v11 = vpop.f32.mrb[176].mxu0 }
0x11ba   :  { %v3392_v39 = vpop.f32.mrb[177].mxu0  ;;  %v9729_v55 = vadd.f32 %v7174_v11, %v9720_v61 }
0x11bb   :  { %v9723_v24 = vadd.f32 %v3392_v39, %v9720_v61  ;;  %v7175_v60 = vpop.f32.mrb[178].mxu0 }
0x11bc   :  { %v9726_v44 = vadd.f32 %v7175_v60, %v9720_v61  ;;  %v3395_v49 = vpop.f32.mrb[179].mxu0  ;;  %v3457_v0 = vmul.f32 %v9729_v55, %v9729_v55 }
0x11bd   :  { %v9732_v35 = vadd.f32 %v3395_v49, %v9720_v61  ;;  %v3455_v13 = vmul.f32 %v9723_v24, %v9723_v24 }
0x11be   :  { %v3458_v52 = vmul.f32 %v9726_v44, %v9726_v44  ;;  %v7638_v8 = vpack.c.bf16 %v9726_v44, %v9729_v55 }
0x11bf   :  { %v3456_v12 = vmul.f32 %v9732_v35, %v9732_v35  ;;  %v7634_v15 = vpack.c.bf16 %v9732_v35, %v9723_v24 }
0x11c0   :  { %v7636_v2 = vpack.c.bf16 %v3458_v52, %v3457_v0 }
0x11c1   :  { %v7178_v20 = vpop.f32.mrb[180].mxu0  ;;  %v7632_v59 = vpack.c.bf16 %v3456_v12, %v3455_v13 }
0x11c2   :  { %v3408_v36 = vpop.f32.mrb[181].mxu0  ;;  %v9751_v57 = vadd.f32 %v7178_v20, %v9720_v61 }
0x11c3   :  { %v9745_v31 = vadd.f32 %v3408_v36, %v9720_v61  ;;  %v7179_v14 = vpop.f32.mrb[182].mxu0  ;;  %7633 = vmatprep.subr.bf16.mxu1 %v7632_v59  ;;  %v8111_v59 = vld [vmem:[#allocation9 + $0x4] ss:$8 sps:$4 sm:$0xff]  }
0x11c4   :  { %v9748_v18 = vadd.f32 %v7179_v14, %v9720_v61  ;;  %v3411_v3 = vpop.f32.mrb[183].mxu0  ;;  %7635 = vmatpush1.bf16.msra.mxu1 %v7634_v15  ;;  %v3461_v56 = vmul.f32 %v9751_v57, %v9751_v57 }
0x11c5   :  { %v9754_v10 = vadd.f32 %v3411_v3, %v9720_v61  ;;  %7637 = vmatprep.subr.bf16.mxu1 %v7636_v2  ;;  %v3459_v25 = vmul.f32 %v9745_v31, %v9745_v31 }
0x11c6   :  { %v3462_v16 = vmul.f32 %v9748_v18, %v9748_v18  ;;  %v7646_v30 = vpack.c.bf16 %v9748_v18, %v9751_v57 }
0x11c7   :  { %v3460_v46 = vmul.f32 %v9754_v10, %v9754_v10  ;;  %v7642_v23 = vpack.c.bf16 %v9754_v10, %v9745_v31 }
0x11c8   :  { %7639 = vmatpush1.bf16.msra.mxu1 %v7638_v8  ;;  %v7644_v62 = vpack.c.bf16 %v3462_v16, %v3461_v56  ;;  %v9820_v56 = vrot.slane %v9574_v53, %v8944_v45 }
0x11c9   :  { %v7182_v22 = vpop.f32.mrb[184].mxu0  ;;  %v7640_v19 = vpack.c.bf16 %v3460_v46, %v3459_v25  ;;  %v3568_v46 = vrot.slane %v9574_v53, %v8941_v43 }
0x11ca   :  { %v3424_v42 = vpop.f32.mrb[185].mxu0  ;;  %v9775_v28 = vadd.f32 %v7182_v22, %v9720_v61 }
0x11cb   :  { %v9769_v50 = vadd.f32 %v3424_v42, %v9720_v61  ;;  %v7183_v1 = vpop.f32.mrb[186].mxu0  ;;  %7641 = vmatprep.subr.bf16.mxu1 %v7640_v19 }
0x11cc   :  { %v9772_v41 = vadd.f32 %v7183_v1, %v9720_v61  ;;  %v3427_v7 = vpop.f32.mrb[187].mxu0  ;;  %7643 = vmatpush1.bf16.msra.mxu1 %v7642_v23  ;;  %v3465_v47 = vmul.f32 %v9775_v28, %v9775_v28 }
0x11cd   :  { %v9778_v40 = vadd.f32 %v3427_v7, %v9720_v61  ;;  %7645 = vmatprep.subr.bf16.mxu1 %v7644_v62  ;;  %v3463_v27 = vmul.f32 %v9769_v50, %v9769_v50 }
0x11ce   :  { %v3466_v54 = vmul.f32 %v9772_v41, %v9772_v41  ;;  %v7654_v39 = vpack.c.bf16 %v9772_v41, %v9775_v28 }
0x11cf   :  { %v3464_v21 = vmul.f32 %v9778_v40, %v9778_v40  ;;  %v7650_v9 = vpack.c.bf16 %v9778_v40, %v9769_v50 }
0x11d0   :  { %7647 = vmatpush1.bf16.msra.mxu1 %v7646_v30  ;;  %v7652_v34 = vpack.c.bf16 %v3466_v54, %v3465_v47 }
0x11d1   :  { %v7186_v5 = vpop.f32.mrb[188].mxu0  ;;  %v7648_v6 = vpack.c.bf16 %v3464_v21, %v3463_v27 }
0x11d2   :  { %v3440_v51 = vpop.f32.mrb[189].mxu0  ;;  %v9799_v29 = vadd.f32 %v7186_v5, %v9720_v61 }
0x11d3   :  { %v9793_v17 = vadd.f32 %v3440_v51, %v9720_v61  ;;  %v7187_v37 = vpop.f32.mrb[190].mxu0  ;;  %7649 = vmatprep.subr.bf16.mxu1 %v7648_v6 }
0x11d4   :  { %v9796_v38 = vadd.f32 %v7187_v37, %v9720_v61  ;;  %v3443_v48 = vpop.f32.mrb[191].mxu0  ;;  %7651 = vmatpush1.bf16.msra.mxu1 %v7650_v9  ;;  %v3469_v52 = vmul.f32 %v9799_v29, %v9799_v29 }
0x11d5   :  { %v3444_v11 = vadd.f32 %v3443_v48, %v9720_v61  ;;  %7653 = vmatprep.subr.bf16.mxu1 %v7652_v34  ;;  %v3467_v60 = vmul.f32 %v9793_v17, %v9793_v17 }
0x11d6   :  { %v3470_v49 = vmul.f32 %v9796_v38, %v9796_v38  ;;  %v7662_v20 = vpack.c.bf16 %v9796_v38, %v9799_v29 }
0x11d7   :  { %v3468_v13 = vmul.f32 %v3444_v11, %v3444_v11  ;;  %v7658_v0 = vpack.c.bf16 %v3444_v11, %v9793_v17 }
0x11d8   :  { %7655 = vmatpush1.bf16.msra.mxu1 %v7654_v39  ;;  %v7660_v61 = vpack.c.bf16 %v3470_v49, %v3469_v52 }
0x11d9   :  { %v7656_v12 = vpack.c.bf16 %v3468_v13, %v3467_v60 }
0x11db   :  { %7657 = vmatprep.subr.bf16.mxu1 %v7656_v12 }
0x11dc   :  { %7659 = vmatpush1.bf16.msra.mxu1 %v7658_v0 }
0x11dd   :  { %7661 = vmatprep.subr.bf16.mxu1 %v7660_v61 }
0x11e0   :  { %7663 = vmatpush1.bf16.msra.mxu1 %v7662_v20 }
0x11e3   :  { %3536 = vmatmul.mubr.f32.vlgmr.msra.gmra.mrb[106].mxu1 %v10828_v26 }
0x11e4   :  { %3894 = vmatprep.mubr.bf16.mxu1 %v8111_v59 }
0x12b6   :  { %v3537_v15 = vpop.f32.mrb[106].mxu1 }
0x12b7   :  { %v3542_v36 = vmul.f32 %v3537_v15, %v3537_v15  ;;  %v3539_v14 = vpop.f32.mrb[107].mxu1  ;;  %v3548_v25 = vrot.slane %v3537_v15, %v8683_v4 }
0x12b9   :  { %v3543_v2 = vsub.f32 %v3539_v14, %v3542_v36  ;;  %v3549_v16 = vsub.f32 %v9723_v24, %v3548_v25  ;;  %v3550_v22 = vsub.f32 %v9732_v35, %v3548_v25  ;;  %v3551_v19 = vsub.f32 %v9729_v55, %v3548_v25 }
0x12ba   :  { %v3552_v23 = vsub.f32 %v9726_v44, %v3548_v25  ;;  %v3553_v42 = vsub.f32 %v9745_v31, %v3548_v25  ;;  %v3554_v1 = vsub.f32 %v9754_v10, %v3548_v25  ;;  %v3555_v62 = vsub.f32 %v9751_v57, %v3548_v25 }
0x12bb   :  { %v3544_v3 = vmax.f32 %v3543_v2, 0.0  ;;  %v3556_v24 = vsub.f32 %v9748_v18, %v3548_v25  ;;  %v3557_v7 = vsub.f32 %v9769_v50, %v3548_v25  ;;  %v3569_v30 = vmul.f32 %v3568_v46, %v3549_v16 }
0x12bc   :  { %v3558_v53 = vsub.f32 %v9778_v40, %v3548_v25  ;;  %v3559_v27 = vsub.f32 %v9775_v28, %v3548_v25  ;;  %v3560_v35 = vsub.f32 %v9772_v41, %v3548_v25  ;;  %v3561_v55 = vsub.f32 %v9793_v17, %v3548_v25 }
0x12bd   :  { %v3585_v8 = vadd.f32 1e-05, %v3544_v3  ;;  %v3562_v44 = vsub.f32 %v3444_v11, %v3548_v25  ;;  %v3563_v31 = vsub.f32 %v9799_v29, %v3548_v25  ;;  %v3564_v10 = vsub.f32 %v9796_v38, %v3548_v25 }
0x12be   :  { %v3570_v54 = vmul.f32 %v3568_v46, %v3550_v22  ;;  %v3571_v57 = vmul.f32 %v3568_v46, %v3551_v19  ;;  %v3572_v21 = vmul.f32 %v3568_v46, %v3552_v23  ;;  %v3573_v18 = vmul.f32 %v3568_v46, %v3553_v42 }
0x12bf   :  { %7956 = vrsqrt.f32 %v3585_v8  ;;  %v3574_v50 = vmul.f32 %v3568_v46, %v3554_v1  ;;  %v3575_v5 = vmul.f32 %v3568_v46, %v3555_v62  ;;  %v3576_v6 = vmul.f32 %v3568_v46, %v3556_v24 }
0x12c0   :  { %v3577_v40 = vmul.f32 %v3568_v46, %v3557_v7  ;;  %v3578_v9 = vmul.f32 %v3568_v46, %v3558_v53  ;;  %v3579_v41 = vmul.f32 %v3568_v46, %v3559_v27  ;;  %v3580_v51 = vmul.f32 %v3568_v46, %v3560_v35 }
0x12c1   :  { %v3581_v17 = vmul.f32 %v3568_v46, %v3561_v55  ;;  %v3582_v37 = vmul.f32 %v3568_v46, %v3562_v44  ;;  %v3583_v34 = vmul.f32 %v3568_v46, %v3563_v31  ;;  %v3584_v48 = vmul.f32 %v3568_v46, %v3564_v10 }
0x12c9   :  { %v7957_v47 = vpop.eup %7956 }
0x12ca   :  { %v3590_v28 = vrot.slane %v7957_v47, %v8683_v4 }
0x12cc   :  { %v3591_v29 = vmul.f32 %v3590_v28, %v3569_v30  ;;  %v3592_v38 = vmul.f32 %v3590_v28, %v3570_v54  ;;  %v3593_v11 = vmul.f32 %v3590_v28, %v3571_v57  ;;  %v3594_v39 = vmul.f32 %v3590_v28, %v3572_v21 }
0x12cd   :  { %v3595_v60 = vmul.f32 %v3590_v28, %v3573_v18  ;;  %v3596_v49 = vmul.f32 %v3590_v28, %v3574_v50  ;;  %v3597_v13 = vmul.f32 %v3590_v28, %v3575_v5  ;;  %v3598_v52 = vmul.f32 %v3590_v28, %v3576_v6 }
0x12ce   :  { %v9838_v12 = vadd.f32 %v9820_v56, %v3591_v29  ;;  %v9841_v0 = vadd.f32 %v9820_v56, %v3592_v38  ;;  %v9844_v61 = vadd.f32 %v9820_v56, %v3593_v11  ;;  %v9847_v20 = vadd.f32 %v9820_v56, %v3594_v39  ;;  %v8112_v29 = vld [vmem:[#allocation8 + $0x8] sm:$0xff]   ;;  %v8113_v38 = vld [vmem:[#allocation8 + $0x10] sm:$0xff]   ;;  %v8114_v11 = vld [vmem:[#allocation8 + $0x18] sm:$0xff]  }
0x12cf   :  { %v9850_v59 = vadd.f32 %v9820_v56, %v3595_v60  ;;  %v9853_v15 = vadd.f32 %v9820_v56, %v3596_v49  ;;  %v9856_v36 = vadd.f32 %v9820_v56, %v3597_v13  ;;  %v9859_v14 = vadd.f32 %v9820_v56, %v3598_v52  ;;  %v8115_v39 = vld [vmem:[#allocation8 + $0x20] sm:$0xff]   ;;  %v8116_v60 = vld [vmem:[#allocation8 + $0x28] sm:$0xff]   ;;  %v8117_v49 = vld [vmem:[#allocation8 + $0x30] sm:$0xff]  }
0x12d0   :  { %v3627_v2 = vmax.f32 %v9838_v12, 0.0  ;;  %v3628_v3 = vmax.f32 %v9841_v0, 0.0  ;;  %v3629_v8 = vmax.f32 %v9844_v61, 0.0  ;;  %v3630_v25 = vmax.f32 %v9847_v20, 0.0  ;;  %v8118_v13 = vld [vmem:[#allocation8 + $0x38] sm:$0xff]   ;;  %v8119_v52 = vld [vmem:[#allocation8 + $0x40] sm:$0xff]  }
0x12d1   :  { %v3631_v16 = vmax.f32 %v9850_v59, 0.0  ;;  %v3632_v46 = vmax.f32 %v9853_v15, 0.0  ;;  %v3633_v22 = vmax.f32 %v9856_v36, 0.0  ;;  %v3634_v19 = vmax.f32 %v9859_v14, 0.0 }
0x12d2   :  { %v3645_v23 = vpack.c.bf16 %v3628_v3, %v3627_v2  ;;  %v3646_v42 = vpack.c.bf16 %v3630_v25, %v3629_v8  ;;  %v3599_v1 = vmul.f32 %v3590_v28, %v3577_v40  ;;  %v3600_v62 = vmul.f32 %v3590_v28, %v3578_v9 }
0x12d3   :  { %v3647_v24 = vpack.c.bf16 %v3632_v46, %v3631_v16  ;;  %v3648_v7 = vpack.c.bf16 %v3634_v19, %v3633_v22  ;;  %v3601_v30 = vmul.f32 %v3590_v28, %v3579_v41  ;;  %v3602_v53 = vmul.f32 %v3590_v28, %v3580_v51 }
0x12d4   :  { %7188 = vmatprep.subr.bf16.mxu0 %v3645_v23  ;;  %v9886_v27 = vadd.f32 %v9820_v56, %v3599_v1  ;;  %v9889_v35 = vadd.f32 %v9820_v56, %v3600_v62  ;;  %v3603_v55 = vmul.f32 %v3590_v28, %v3581_v17  ;;  %v3604_v44 = vmul.f32 %v3590_v28, %v3582_v37  ;;  %v8122_v1 = vld [vmem:[#allocation8 + $0x58] sm:$0xff]   ;;  %v8123_v62 = vld [vmem:[#allocation8 + $0x60] sm:$0xff]  }
0x12d5   :  { %7189 = vmatpush3.bf16.msra.mxu0 %v3645_v23  ;;  %v9892_v31 = vadd.f32 %v9820_v56, %v3601_v30  ;;  %v9895_v10 = vadd.f32 %v9820_v56, %v3602_v53  ;;  %v3605_v54 = vmul.f32 %v3590_v28, %v3583_v34  ;;  %v3606_v57 = vmul.f32 %v3590_v28, %v3584_v48  ;;  %v8120_v23 = vld [vmem:[#allocation8 + $0x48] sm:$0xff]   ;;  %v8126_v30 = vld [vmem:[#allocation8 + $0x78] sm:$0xff]  }
0x12d6   :  { %7190 = vmatprep.subr.bf16.mxu0 %v3646_v42  ;;  %v3635_v21 = vmax.f32 %v9886_v27, 0.0  ;;  %v10814_v18 = vmax.f32 %v9889_v35, 0.0  ;;  %v9900_v47 = vadd.f32 %v9820_v56, %v3603_v55  ;;  %v9903_v50 = vadd.f32 %v9820_v56, %v3604_v44  ;;  %v8127_v55 = vld [vmem:[#allocation6 + $0x10] sm:$0xff] }
0x12d7   :  { %v10813_v5 = vmax.f32 %v9892_v31, 0.0  ;;  %v10812_v6 = vmax.f32 %v9895_v10, 0.0  ;;  %v9908_v40 = vadd.f32 %v9820_v56, %v3605_v54  ;;  %v9911_v28 = vadd.f32 %v9820_v56, %v3606_v57  ;;  %v8128_v57 = vld [vmem:[#allocation6] sm:$0xff] }
0x12d8   :  { %v3649_v9 = vpack.c.bf16 %v10814_v18, %v3635_v21  ;;  %v10811_v41 = vmax.f32 %v9900_v47, 0.0  ;;  %v10810_v51 = vmax.f32 %v9903_v50, 0.0 }
0x12d9   :  { %7191 = vmatpush3.bf16.msra.mxu0 %v3646_v42  ;;  %v3650_v17 = vpack.c.bf16 %v10812_v6, %v10813_v5  ;;  %v10809_v37 = vmax.f32 %v9908_v40, 0.0  ;;  %v10808_v56 = vmax.f32 %v9911_v28, 0.0  ;;  %v8121_v42 = vld [vmem:[#allocation8 + $0x50] sm:$0xff]   ;;  %v8146_v6 = vld [vmem:[#allocation6 + $0x88] sm:$0xff] }
0x12da   :  { %7192 = vmatprep.subr.bf16.mxu0 %v3647_v24  ;;  %v3651_v34 = vpack.c.bf16 %v10810_v51, %v10811_v41  ;;  %v8142_v51 = vld [vmem:[#allocation6 + $0x68] sm:$0xff]  ;;  %v8145_v41 = vld [vmem:[#allocation6 + $0x98] sm:$0xff] }
0x12db   :  { %v3652_v48 = vpack.c.bf16 %v10808_v56, %v10809_v37  ;;  %v8140_v56 = vld [vmem:[#allocation6 + $0x60] sm:$0xff]  ;;  %v8141_v37 = vld [vmem:[#allocation6 + $0x78] sm:$0xff] }
0x12dd   :  { %7193 = vmatpush3.bf16.msra.mxu0 %v3647_v24  ;;  %v8124_v24 = vld [vmem:[#allocation8 + $0x68] sm:$0xff]  }
0x12de   :  { %7194 = vmatprep.subr.bf16.mxu0 %v3648_v7 }
0x12e1   :  { %7195 = vmatpush3.bf16.msra.mxu0 %v3648_v7  ;;  %v8125_v7 = vld [vmem:[#allocation8 + $0x70] sm:$0xff]  }
0x12e2   :  { %7196 = vmatprep.subr.bf16.mxu0 %v3649_v9 }
0x12e5   :  { %7197 = vmatpush3.bf16.msra.mxu0 %v3649_v9 }
0x12e6   :  { %7198 = vmatprep.subr.bf16.mxu0 %v3650_v17 }
0x12e9   :  { %7199 = vmatpush3.bf16.msra.mxu0 %v3650_v17 }
0x12ea   :  { %7200 = vmatprep.subr.bf16.mxu0 %v3651_v34 }
0x12ed   :  { %7201 = vmatpush3.bf16.msra.mxu0 %v3651_v34  ;;  %v7898_v34 = vld [vmem:[#allocation11 + $0x180] sm:$0xff]  }
0x12ee   :  { %7202 = vmatprep.subr.bf16.mxu0 %v3652_v48 }
0x12f1   :  { %7203 = vmatpush3.bf16.msra.mxu0 %v3652_v48  ;;  %v7899_v48 = vld [vmem:[#allocation11 + $0x188] sm:$0xff]  }
0x12f2   :  { %7236 = vmatprep.subr.bf16.mxu0 %v7898_v34 }
0x12f4   :  { %7205 = vmatmul.mubr.bf16.vlgmr.msra.gmra.mrb[192].mxu0 %v8112_v29  ;;  %v8129_v29 = vld [vmem:[#allocation6 + $0x18] sm:$0xff] }
0x12f5   :  { %7208 = vmatprep.mubr.bf16.mxu0 %v8113_v38  ;;  %7237 = vmatpush3.bf16.msra.mxu0 %v7898_v34 }
0x12f6   :  { %7238 = vmatprep.subr.bf16.mxu0 %v7899_v48 }
0x12f9   :  { %7239 = vmatpush3.bf16.msra.mxu0 %v7899_v48 }
0x12fc   :  { %7209 = vmatmul.mubr.bf16.gmra.mrb[196].mxu0 %v8114_v11 }
0x12fd   :  { %7212 = vmatprep.mubr.bf16.mxu0 %v8115_v39  ;;  %v8130_v39 = vld [vmem:[#allocation6 + $0x8] sm:$0xff] }
0x1304   :  { %7213 = vmatmul.mubr.bf16.gmra.mrb[200].mxu0 %v8116_v60 }
0x1305   :  { %7216 = vmatprep.mubr.bf16.mxu0 %v8117_v49 }
0x130c   :  { %7217 = vmatmul.mubr.bf16.gmra.mrb[204].mxu0 %v8118_v13 }
0x130d   :  { %7220 = vmatprep.mubr.bf16.mxu0 %v8119_v52 }
0x1314   :  { %7221 = vmatmul.mubr.bf16.gmra.mrb[208].mxu0 %v8120_v23 }
0x1315   :  { %7224 = vmatprep.mubr.bf16.mxu0 %v8121_v42  ;;  %v7900_v42 = vld [vmem:[#allocation11 + $0x190] sm:$0xff]  }
0x1316   :  { %7240 = vmatprep.subr.bf16.mxu0 %v7900_v42 }
0x1317   :  { %7241 = vmatpush3.bf16.msra.mxu0 %v7900_v42 }
0x131c   :  { %7225 = vmatmul.mubr.bf16.gmra.mrb[212].mxu0 %v8122_v1 }
0x131d   :  { %7228 = vmatprep.mubr.bf16.mxu0 %v8123_v62 }
0x1324   :  { %7229 = vmatmul.mubr.bf16.gmra.mrb[216].mxu0 %v8124_v24 }
0x1325   :  { %7232 = vmatprep.mubr.bf16.mxu0 %v8125_v7  ;;  %v8131_v7 = vld [vmem:[#allocation6 + $0x30] sm:$0xff] }
0x132c   :  { %7233 = vmatmul.mubr.bf16.gmra.mrb[220].mxu0 %v8126_v30 }
0x13c7   :  { %v7206_v53 = vpop.f32.mrb[192].mxu0 }
0x13c8   :  { %v3696_v44 = vadd.f32 %v8127_v55, %v7206_v53  ;;  %v3687_v54 = vpop.f32.mrb[193].mxu0  ;;  %v8132_v55 = vld [vmem:[#allocation6 + $0x20] sm:$0xff] }
0x13c9   :  { %v3688_v9 = vadd.f32 %v8128_v57, %v3687_v54  ;;  %v7207_v17 = vpop.f32.mrb[194].mxu0 }
0x13ca   :  { %v3699_v38 = vadd.f32 %v8129_v29, %v7207_v17  ;;  %v3690_v11 = vpop.f32.mrb[195].mxu0  ;;  %v3816_v49 = vmax.f32 %v3696_v44, 0.0  ;;  %v7901_v44 = vld [vmem:[#allocation11 + $0x198] sm:$0xff]   ;;  %v8134_v29 = vld [vmem:[#allocation6 + $0x28] sm:$0xff] }
0x13cb   :  { %v3691_v60 = vadd.f32 %v8130_v39, %v3690_v11  ;;  %v3814_v52 = vmax.f32 %v3688_v9, 0.0  ;;  %v8133_v17 = vld [vmem:[#allocation6 + $0x38] sm:$0xff]  ;;  %7242 = vmatprep.subr.bf16.mxu0 %v7901_v44 }
0x13cc   :  { %v3817_v13 = vmax.f32 %v3699_v38, 0.0  ;;  %7243 = vmatpush3.bf16.msra.mxu0 %v7901_v44 }
0x13cd   :  { %v3815_v23 = vmax.f32 %v3691_v60, 0.0 }
0x13ce   :  { %v9933_v1 = vpack.c.bf16 %v3817_v13, %v3816_v49 }
0x13cf   :  { %v9935_v62 = vpack.c.bf16 %v3815_v23, %v3814_v52  ;;  %v7210_v24 = vpop.f32.mrb[196].mxu0  ;;  %v8135_v23 = vld [vmem:[#allocation6 + $0x50] sm:$0xff] }
0x13d0   :  { %v3712_v30 = vadd.f32 %v8131_v7, %v7210_v24  ;;  %v3703_v53 = vpop.f32.mrb[197].mxu0 }
0x13d1   :  { %v3704_v54 = vadd.f32 %v8132_v55, %v3703_v53  ;;  %v7211_v57 = vpop.f32.mrb[198].mxu0  ;;  %v8136_v53 = vld [vmem:[#allocation6 + $0x40] sm:$0xff] }
0x13d2   :  { %v3715_v34 = vadd.f32 %v8133_v17, %v7211_v57  ;;  %v3706_v9 = vpop.f32.mrb[199].mxu0  ;;  %v3820_v11 = vmax.f32 %v3712_v30, 0.0  ;;  %v8137_v17 = vld [vmem:[#allocation6 + $0x58] sm:$0xff] }
0x13d3   :  { %v3707_v38 = vadd.f32 %v8134_v29, %v3706_v9  ;;  %v3818_v60 = vmax.f32 %v3704_v54, 0.0 }
0x13d4   :  { %v3821_v39 = vmax.f32 %v3715_v34, 0.0  ;;  %v8138_v34 = vld [vmem:[#allocation6 + $0x48] sm:$0xff] }
0x13d5   :  { %v3819_v49 = vmax.f32 %v3707_v38, 0.0 }
0x13d6   :  { %v9937_v13 = vpack.c.bf16 %v3821_v39, %v3820_v11 }
0x13d7   :  { %v9939_v52 = vpack.c.bf16 %v3819_v49, %v3818_v60  ;;  %v7214_v48 = vpop.f32.mrb[200].mxu0 }
0x13d8   :  { %v3728_v24 = vadd.f32 %v8135_v23, %v7214_v48  ;;  %v3719_v7 = vpop.f32.mrb[201].mxu0  ;;  %v8139_v48 = vld [vmem:[#allocation6 + $0x70] sm:$0xff] }
0x13d9   :  { %v3720_v55 = vadd.f32 %v8136_v53, %v3719_v7  ;;  %v7215_v57 = vpop.f32.mrb[202].mxu0 }
0x13da   :  { %v3731_v9 = vadd.f32 %v8137_v17, %v7215_v57  ;;  %v3722_v30 = vpop.f32.mrb[203].mxu0  ;;  %v3824_v54 = vmax.f32 %v3728_v24, 0.0 }
0x13db   :  { %v3723_v42 = vadd.f32 %v8138_v34, %v3722_v30  ;;  %v3822_v38 = vmax.f32 %v3720_v55, 0.0 }
0x13dc   :  { %v3825_v29 = vmax.f32 %v3731_v9, 0.0 }
0x13dd   :  { %v3823_v11 = vmax.f32 %v3723_v42, 0.0 }
0x13de   :  { %v9941_v39 = vpack.c.bf16 %v3825_v29, %v3824_v54 }
0x13df   :  { %v9943_v60 = vpack.c.bf16 %v3823_v11, %v3822_v38  ;;  %v7218_v49 = vpop.f32.mrb[204].mxu0  ;;  %v8143_v38 = vld [vmem:[#allocation6 + $0x90] sm:$0xff] }
0x13e0   :  { %v3744_v23 = vadd.f32 %v8139_v48, %v7218_v49  ;;  %v3735_v44 = vpop.f32.mrb[205].mxu0  ;;  %v8144_v48 = vld [vmem:[#allocation6 + $0x80] sm:$0xff] }
0x13e1   :  { %v3736_v7 = vadd.f32 %v8140_v56, %v3735_v44  ;;  %v7219_v53 = vpop.f32.mrb[206].mxu0 }
0x13e2   :  { %v3747_v57 = vadd.f32 %v8141_v37, %v7219_v53  ;;  %v3738_v17 = vpop.f32.mrb[207].mxu0  ;;  %v3828_v24 = vmax.f32 %v3744_v23, 0.0 }
0x13e3   :  { %v3739_v30 = vadd.f32 %v8142_v51, %v3738_v17  ;;  %v3826_v55 = vmax.f32 %v3736_v7, 0.0 }
0x13e4   :  { %v3829_v9 = vmax.f32 %v3747_v57, 0.0 }
0x13e5   :  { %v3827_v34 = vmax.f32 %v3739_v30, 0.0 }
0x13e6   :  { %v9945_v42 = vpack.c.bf16 %v3829_v9, %v3828_v24 }
0x13e7   :  { %v9947_v54 = vpack.c.bf16 %v3827_v34, %v3826_v55  ;;  %v7222_v29 = vpop.f32.mrb[208].mxu0  ;;  %v8147_v55 = vld [vmem:[#allocation6 + $0xb0] sm:$0xff] }
0x13e8   :  { %v3760_v11 = vadd.f32 %v8143_v38, %v7222_v29  ;;  %v3751_v49 = vpop.f32.mrb[209].mxu0  ;;  %v8148_v29 = vld [vmem:[#allocation6 + $0xa0] sm:$0xff] }
0x13e9   :  { %v3752_v56 = vadd.f32 %v8144_v48, %v3751_v49  ;;  %v7223_v44 = vpop.f32.mrb[210].mxu0  ;;  %v8149_v49 = vld [vmem:[#allocation6 + $0xb8] sm:$0xff] }
0x13ea   :  { %v3763_v37 = vadd.f32 %v8145_v41, %v7223_v44  ;;  %v3754_v53 = vpop.f32.mrb[211].mxu0  ;;  %v3832_v23 = vmax.f32 %v3760_v11, 0.0 }
0x13eb   :  { %v3755_v51 = vadd.f32 %v8146_v6, %v3754_v53  ;;  %v3830_v7 = vmax.f32 %v3752_v56, 0.0  ;;  %v8150_v6 = vld [vmem:[#allocation6 + $0xa8] sm:$0xff] }
0x13ec   :  { %v3833_v57 = vmax.f32 %v3763_v37, 0.0 }
0x13ed   :  { %v3831_v17 = vmax.f32 %v3755_v51, 0.0 }
0x13ee   :  { %v3855_v30 = vpack.c.bf16 %v3833_v57, %v3832_v23 }
0x13ef   :  { %v3854_v24 = vpack.c.bf16 %v3831_v17, %v3830_v7  ;;  %v7226_v9 = vpop.f32.mrb[212].mxu0 }
0x13f0   :  { %v3776_v34 = vadd.f32 %v8147_v55, %v7226_v9  ;;  %v3767_v5 = vpop.f32.mrb[213].mxu0 }
0x13f1   :  { %v3768_v38 = vadd.f32 %v8148_v29, %v3767_v5  ;;  %v7227_v18 = vpop.f32.mrb[214].mxu0  ;;  %6609 = vmatprep.subr.bf16.mxu1 %v3854_v24  ;;  %v8151_v5 = vld [vmem:[#allocation6 + $0xd0] sm:$0xff]  ;;  %v8152_v24 = vld [vmem:[#allocation6 + $0xc0] sm:$0xff] }
0x13f2   :  { %v3779_v48 = vadd.f32 %v8149_v49, %v7227_v18  ;;  %v3770_v41 = vpop.f32.mrb[215].mxu0  ;;  %6610 = vmatpush3.bf16.msra.mxu1 %v9935_v62  ;;  %v3836_v56 = vmax.f32 %v3776_v34, 0.0  ;;  %v8153_v62 = vld [vmem:[#allocation6 + $0xd8] sm:$0xff] }
0x13f3   :  { %v3771_v11 = vadd.f32 %v8150_v6, %v3770_v41  ;;  %6611 = vmatprep.subr.bf16.mxu1 %v3855_v30  ;;  %v3834_v37 = vmax.f32 %v3768_v38, 0.0  ;;  %v8154_v30 = vld [vmem:[#allocation6 + $0xc8] sm:$0xff] }
0x13f4   :  { %v3837_v44 = vmax.f32 %v3779_v48, 0.0 }
0x13f5   :  { %v3835_v53 = vmax.f32 %v3771_v11, 0.0 }
0x13f6   :  { %v3857_v51 = vpack.c.bf16 %v3837_v44, %v3836_v56  ;;  %6612 = vmatpush3.bf16.msra.mxu1 %v9933_v1  ;;  %v8155_v56 = vld [vmem:[#allocation6 + $0xf0] sm:$0xff] }
0x13f7   :  { %v3856_v23 = vpack.c.bf16 %v3835_v53, %v3834_v37  ;;  %v7230_v57 = vpop.f32.mrb[216].mxu0  ;;  %v8156_v53 = vld [vmem:[#allocation6 + $0xe0] sm:$0xff] }
0x13f8   :  { %v3792_v7 = vadd.f32 %v8151_v5, %v7230_v57  ;;  %v3783_v17 = vpop.f32.mrb[217].mxu0 }
0x13f9   :  { %v3784_v18 = vadd.f32 %v8152_v24, %v3783_v17  ;;  %v7231_v9 = vpop.f32.mrb[218].mxu0  ;;  %6613 = vmatprep.subr.bf16.mxu1 %v3856_v23 }
0x13fa   :  { %v3795_v55 = vadd.f32 %v8153_v62, %v7231_v9  ;;  %v3786_v29 = vpop.f32.mrb[219].mxu0  ;;  %6614 = vmatpush3.bf16.msra.mxu1 %v9939_v52  ;;  %v3840_v38 = vmax.f32 %v3792_v7, 0.0  ;;  %v8157_v52 = vld [vmem:[#allocation6 + $0xf8] sm:$0xff] }
0x13fb   :  { %v3787_v34 = vadd.f32 %v8154_v30, %v3786_v29  ;;  %6615 = vmatprep.subr.bf16.mxu1 %v3857_v51  ;;  %v3838_v1 = vmax.f32 %v3784_v18, 0.0  ;;  %v8158_v51 = vld [vmem:[#allocation6 + $0xe8] sm:$0xff]  ;;  %v8161_v30 = vld [vmem:[#allocation9 + $0x10] ss:$8 sps:$4 sm:$0xff]  }
0x13fc   :  { %v3841_v49 = vmax.f32 %v3795_v55, 0.0  ;;  %v8159_v29 = vld [vmem:[#allocation9] ss:$8 sps:$4 sm:$0xff]  }
0x13fd   :  { %v3839_v48 = vmax.f32 %v3787_v34, 0.0  ;;  %v8162_v34 = vld [vmem:[#allocation9 + $0x24] ss:$8 sps:$4 sm:$0xff]  }
0x13fe   :  { %v3859_v41 = vpack.c.bf16 %v3841_v49, %v3840_v38  ;;  %6616 = vmatpush3.bf16.msra.mxu1 %v9937_v13  ;;  %v8163_v38 = vld [vmem:[#allocation9 + $0x20] ss:$8 sps:$4 sm:$0xff]   ;;  %v8164_v49 = vld [vmem:[#allocation9 + $0x34] ss:$8 sps:$4 sm:$0xff]  }
0x13ff   :  { %v3858_v6 = vpack.c.bf16 %v3839_v48, %v3838_v1  ;;  %v7234_v11 = vpop.f32.mrb[220].mxu0  ;;  %v8166_v1 = vld [vmem:[#allocation9 + $0x44] ss:$8 sps:$4 sm:$0xff]   ;;  %v8168_v48 = vld [vmem:[#allocation9 + $0x54] ss:$8 sps:$4 sm:$0xff]  }
0x1400   :  { %v3808_v44 = vadd.f32 %v8155_v56, %v7234_v11  ;;  %v3799_v37 = vpop.f32.mrb[221].mxu0  ;;  %v8172_v11 = vld [vmem:[#allocation9 + $0x74] ss:$8 sps:$4 sm:$0xff]   ;;  %v8173_v56 = vld [vmem:[#allocation9 + $0x70] ss:$8 sps:$4 sm:$0xff]  }
0x1401   :  { %v3800_v23 = vadd.f32 %v8156_v53, %v3799_v37  ;;  %v7235_v57 = vpop.f32.mrb[222].mxu0  ;;  %6617 = vmatprep.subr.bf16.mxu1 %v3858_v6  ;;  %v8171_v6 = vld [vmem:[#allocation9 + $0x60] ss:$8 sps:$4 sm:$0xff]   ;;  %v7904_v53 = vld [vmem:[#allocation11 + $0x1b0] sm:$0xff]  }
0x1402   :  { %v3811_v5 = vadd.f32 %v8157_v52, %v7235_v57  ;;  %v3802_v17 = vpop.f32.mrb[223].mxu0  ;;  %6618 = vmatpush3.bf16.msra.mxu1 %v9943_v60  ;;  %v3844_v24 = vmax.f32 %v3808_v44, 0.0  ;;  %v8160_v60 = vld [vmem:[#allocation9 + $0x14] ss:$8 sps:$4 sm:$0xff]   ;;  %v7902_v44 = vld [vmem:[#allocation11 + $0x1a0] sm:$0xff]   ;;  %v7903_v37 = vld [vmem:[#allocation11 + $0x1a8] sm:$0xff]   ;;  %v9958_v57 = vstv %s3960_s12 }
0x1403   :  { %v3803_v7 = vadd.f32 %v8158_v51, %v3802_v17  ;;  %6619 = vmatprep.subr.bf16.mxu1 %v3859_v41  ;;  %v3842_v13 = vmax.f32 %v3800_v23, 0.0  ;;  %v8170_v41 = vld [vmem:[#allocation9 + $0x64] ss:$8 sps:$4 sm:$0xff]   ;;  %7244 = vmatprep.subr.bf16.mxu0 %v7902_v44  ;;  %v7905_v23 = vld [vmem:[#allocation11 + $0x1b8] sm:$0xff]   ;;  %v3962_v51 = vmul.f32 %v9958_v57, %v3627_v2  ;;  %v3965_v0 = vmul.f32 %v9958_v57, %v3630_v25 }
0x1404   :  { %v3845_v18 = vmax.f32 %v3811_v5, 0.0  ;;  %7245 = vmatpush3.bf16.msra.mxu0 %v7902_v44  ;;  %v3966_v61 = vmul.f32 %v9958_v57, %v3631_v16  ;;  %v3967_v20 = vmul.f32 %v9958_v57, %v3632_v46  ;;  %v3968_v59 = vmul.f32 %v9958_v57, %v3633_v22 }
0x1405   :  { %v3843_v9 = vmax.f32 %v3803_v7, 0.0  ;;  %7246 = vmatprep.subr.bf16.mxu0 %v7903_v37  ;;  %v3969_v15 = vmul.f32 %v9958_v57, %v3634_v19  ;;  %v3970_v36 = vmul.f32 %v9958_v57, %v3635_v21 }
0x1406   :  { %v3861_v62 = vpack.c.bf16 %v3845_v18, %v3844_v24  ;;  %6620 = vmatpush3.bf16.msra.mxu1 %v9941_v39  ;;  %v8165_v39 = vld [vmem:[#allocation9 + $0x30] ss:$8 sps:$4 sm:$0xff]  }
0x1407   :  { %v3860_v55 = vpack.c.bf16 %v3843_v9, %v3842_v13  ;;  %v3963_v9 = vmul.f32 %v9958_v57, %v3628_v3 }
0x1408   :  { %7247 = vmatpush3.bf16.msra.mxu0 %v7903_v37 }
0x1409   :  { %6621 = vmatprep.subr.bf16.mxu1 %v3860_v55  ;;  %7248 = vmatprep.subr.bf16.mxu0 %v7904_v53 }
0x140a   :  { %6622 = vmatpush3.bf16.msra.mxu1 %v9947_v54  ;;  %v8167_v54 = vld [vmem:[#allocation9 + $0x40] ss:$8 sps:$4 sm:$0xff]  }
0x140b   :  { %6623 = vmatprep.subr.bf16.mxu1 %v3861_v62 }
0x140c   :  { %7249 = vmatpush3.bf16.msra.mxu0 %v7904_v53 }
0x140d   :  { %7250 = vmatprep.subr.bf16.mxu0 %v7905_v23 }
0x140e   :  { %6624 = vmatpush3.bf16.msra.mxu1 %v9945_v42  ;;  %v8169_v42 = vld [vmem:[#allocation9 + $0x50] ss:$8 sps:$4 sm:$0xff]  }
0x1410   :  { %7251 = vmatpush3.bf16.msra.mxu0 %v7905_v23 }
0x1411   :  { %3895 = vmatmul.mubr.bf16.vlgmr.msra.gmra.mrb[108].mxu1 %v8159_v29 }
0x1412   :  { %3902 = vmatprep.mubr.bf16.mxu1 %v8160_v60 }
0x1419   :  { %3903 = vmatmul.mubr.bf16.gmra.mrb[112].mxu1 %v8161_v30 }
0x141a   :  { %3910 = vmatprep.mubr.bf16.mxu1 %v8162_v34  ;;  %v3964_v34 = vmul.f32 %v9958_v57, %v3629_v8 }
0x1421   :  { %3911 = vmatmul.mubr.bf16.gmra.mrb[116].mxu1 %v8163_v38 }
0x1422   :  { %3918 = vmatprep.mubr.bf16.mxu1 %v8164_v49 }
0x1429   :  { %3919 = vmatmul.mubr.bf16.gmra.mrb[120].mxu1 %v8165_v39 }
0x142a   :  { %3926 = vmatprep.mubr.bf16.mxu1 %v8166_v1 }
0x1431   :  { %3927 = vmatmul.mubr.bf16.gmra.mrb[124].mxu1 %v8167_v54 }
0x1432   :  { %3934 = vmatprep.mubr.bf16.mxu1 %v8168_v48 }
0x1439   :  { %3935 = vmatmul.mubr.bf16.gmra.mrb[128].mxu1 %v8169_v42 }
0x143a   :  { %3942 = vmatprep.mubr.bf16.mxu1 %v8170_v41 }
0x1441   :  { %3943 = vmatmul.mubr.bf16.gmra.mrb[132].mxu1 %v8171_v6 }
0x1442   :  { %3950 = vmatprep.mubr.bf16.mxu1 %v8172_v11 }
0x1449   :  { %3951 = vmatmul.mubr.bf16.gmra.mrb[136].mxu1 %v8173_v56 }
0x144a   :  { %4248 = vmatprep.mubr.f32.mxu1 %v8450_v63 }
0x14e4   :  { %v6625_v52 = vpop.f32.mrb[108].mxu1 }
0x14e5   :  { %v6626_v5 = vpop.f32.mrb[109].mxu1 }
0x14e6   :  { %v6627_v17 = vadd.f32 %v6626_v5, %v6625_v52  ;;  %v6628_v7 = vpop.f32.mrb[110].mxu1 }
0x14e7   :  { %v6629_v24 = vpop.f32.mrb[111].mxu1 }
0x14e8   :  { %v3978_v18 = vadd.f32 %v6627_v17, %v3962_v51  ;;  %v6630_v13 = vadd.f32 %v6629_v24, %v6628_v7 }
0x14ea   :  { %v3979_v62 = vadd.f32 %v6630_v13, %v3963_v9  ;;  %v10836_v9 = vmax.f32 %v9889_v35, 0.0 }
0x14ec   :  { %v6631_v55 = vpop.f32.mrb[112].mxu1  ;;  %v3994_v29 = vpack.c.bf16 %v3979_v62, %v3978_v18  ;;  %v3971_v14 = vmul.f32 %v9958_v57, %v10836_v9 }
0x14ed   :  { %v6632_v60 = vpop.f32.mrb[113].mxu1 }
0x14ee   :  { %v6633_v30 = vadd.f32 %v6632_v60, %v6631_v55  ;;  %v6634_v12 = vpop.f32.mrb[114].mxu1  ;;  %7252 = vmatprep.mubr.bf16.mxu0 %v3994_v29 }
0x14ef   :  { %v6635_v2 = vpop.f32.mrb[115].mxu1 }
0x14f0   :  { %v3980_v38 = vadd.f32 %v6633_v30, %v3964_v34  ;;  %v6636_v49 = vadd.f32 %v6635_v2, %v6634_v12  ;;  %v10837_v30 = vmax.f32 %v9892_v31, 0.0 }
0x14f2   :  { %v3981_v39 = vadd.f32 %v6636_v49, %v3965_v0  ;;  %v3972_v27 = vmul.f32 %v9958_v57, %v10837_v30 }
0x14f4   :  { %v3995_v3 = vpack.c.bf16 %v3981_v39, %v3980_v38  ;;  %v6637_v1 = vpop.f32.mrb[116].mxu1  ;;  %v10838_v38 = vmax.f32 %v9895_v10, 0.0 }
0x14f5   :  { %v6638_v54 = vpop.f32.mrb[117].mxu1 }
0x14f6   :  { %v6639_v48 = vadd.f32 %v6638_v54, %v6637_v1  ;;  %v6640_v42 = vpop.f32.mrb[118].mxu1  ;;  %7253 = vmatmul.mubr.bf16.vlgmr.msra.gmra.mrb[224].mxu0 %v3995_v3  ;;  %v3973_v35 = vmul.f32 %v9958_v57, %v10838_v38  ;;  %v10839_v54 = vmax.f32 %v9900_v47, 0.0 }
0x14f7   :  { %v6641_v8 = vpop.f32.mrb[119].mxu1 }
0x14f8   :  { %v3982_v41 = vadd.f32 %v6639_v48, %v3966_v61  ;;  %v6642_v6 = vadd.f32 %v6641_v8, %v6640_v42  ;;  %v3974_v31 = vmul.f32 %v9958_v57, %v10839_v54 }
0x14fa   :  { %v3983_v11 = vadd.f32 %v6642_v6, %v3967_v20 }
0x14fc   :  { %v6643_v25 = vpop.f32.mrb[120].mxu1  ;;  %v3996_v56 = vpack.c.bf16 %v3983_v11, %v3982_v41  ;;  %v10840_v41 = vmax.f32 %v9903_v50, 0.0 }
0x14fd   :  { %v6644_v44 = vpop.f32.mrb[121].mxu1 }
0x14fe   :  { %v6645_v37 = vadd.f32 %v6644_v44, %v6643_v25  ;;  %v6646_v53 = vpop.f32.mrb[122].mxu1  ;;  %7256 = vmatprep.mubr.bf16.mxu0 %v3996_v56  ;;  %v3975_v10 = vmul.f32 %v9958_v57, %v10840_v41  ;;  %v10841_v44 = vmax.f32 %v9908_v40, 0.0 }
0x14ff   :  { %v6647_v16 = vpop.f32.mrb[123].mxu1 }
0x1500   :  { %v3984_v23 = vadd.f32 %v6645_v37, %v3968_v59  ;;  %v6648_v52 = vadd.f32 %v6647_v16, %v6646_v53  ;;  %v3976_v47 = vmul.f32 %v9958_v57, %v10841_v44 }
0x1502   :  { %v3985_v5 = vadd.f32 %v6648_v52, %v3969_v15 }
0x1504   :  { %v6649_v46 = vpop.f32.mrb[124].mxu1  ;;  %v3997_v17 = vpack.c.bf16 %v3985_v5, %v3984_v23  ;;  %v10842_v23 = vmax.f32 %v9911_v28, 0.0  ;;  %v7906_v5 = vld [vmem:[#allocation11 + $0x1c0] sm:$0xff]  }
0x1505   :  { %v6650_v51 = vpop.f32.mrb[125].mxu1  ;;  %7268 = vmatprep.subr.bf16.mxu0 %v7906_v5 }
0x1506   :  { %v6651_v7 = vadd.f32 %v6650_v51, %v6649_v46  ;;  %v6652_v24 = vpop.f32.mrb[126].mxu1  ;;  %7257 = vmatmul.mubr.bf16.gmra.mrb[228].mxu0 %v3997_v17  ;;  %v3977_v50 = vmul.f32 %v9958_v57, %v10842_v23  ;;  %v10008_v46 = vld [vmem:[#allocation12 + $0x18] sm:$0xff] }
0x1507   :  { %v6653_v22 = vpop.f32.mrb[127].mxu1  ;;  %7269 = vmatpush3.bf16.msra.mxu0 %v7906_v5  ;;  %v10012_v40 = vrot.slane %v10008_v46, %v8683_v4 }
0x1508   :  { %v3986_v18 = vadd.f32 %v6651_v7, %v3970_v36  ;;  %v6654_v13 = vadd.f32 %v6653_v22, %v6652_v24 }
0x150a   :  { %v3987_v62 = vadd.f32 %v6654_v13, %v3971_v14 }
0x150c   :  { %v6655_v19 = vpop.f32.mrb[128].mxu1  ;;  %v3998_v55 = vpack.c.bf16 %v3987_v62, %v3986_v18 }
0x150d   :  { %v6656_v29 = vpop.f32.mrb[129].mxu1 }
0x150e   :  { %v6657_v60 = vadd.f32 %v6656_v29, %v6655_v19  ;;  %v6658_v34 = vpop.f32.mrb[130].mxu1  ;;  %7260 = vmatprep.mubr.bf16.mxu0 %v3998_v55 }
0x150f   :  { %v6659_v21 = vpop.f32.mrb[131].mxu1 }
0x1510   :  { %v3988_v12 = vadd.f32 %v6657_v60, %v3972_v27  ;;  %v6660_v2 = vadd.f32 %v6659_v21, %v6658_v34 }
0x1512   :  { %v3989_v49 = vadd.f32 %v6660_v2, %v3973_v35 }
0x1514   :  { %v6661_v0 = vpop.f32.mrb[132].mxu1  ;;  %v3999_v39 = vpack.c.bf16 %v3989_v49, %v3988_v12 }
0x1515   :  { %v6662_v3 = vpop.f32.mrb[133].mxu1 }
0x1516   :  { %v6663_v1 = vadd.f32 %v6662_v3, %v6661_v0  ;;  %v6664_v48 = vpop.f32.mrb[134].mxu1  ;;  %7261 = vmatmul.mubr.bf16.gmra.mrb[232].mxu0 %v3999_v39 }
0x1517   :  { %v6665_v61 = vpop.f32.mrb[135].mxu1 }
0x1518   :  { %v3990_v42 = vadd.f32 %v6663_v1, %v3974_v31  ;;  %v6666_v8 = vadd.f32 %v6665_v61, %v6664_v48 }
0x151a   :  { %v3991_v6 = vadd.f32 %v6666_v8, %v3975_v10 }
0x151c   :  { %v6667_v20 = vpop.f32.mrb[136].mxu1  ;;  %v4000_v11 = vpack.c.bf16 %v3991_v6, %v3990_v42 }
0x151d   :  { %v6668_v25 = vpop.f32.mrb[137].mxu1 }
0x151e   :  { %v6669_v56 = vadd.f32 %v6668_v25, %v6667_v20  ;;  %v6670_v37 = vpop.f32.mrb[138].mxu1  ;;  %7264 = vmatprep.mubr.bf16.mxu0 %v4000_v11 }
0x151f   :  { %v6671_v59 = vpop.f32.mrb[139].mxu1 }
0x1520   :  { %v3992_v53 = vadd.f32 %v6669_v56, %v3976_v47  ;;  %v6672_v16 = vadd.f32 %v6671_v59, %v6670_v37 }
0x1522   :  { %v3993_v52 = vadd.f32 %v6672_v16, %v3977_v50 }
0x1524   :  { %v4001_v15 = vpack.c.bf16 %v3993_v52, %v3992_v53 }
0x1526   :  { %7265 = vmatmul.mubr.bf16.gmra.mrb[236].mxu0 %v4001_v15 }
0x15c9   :  { %v7254_v17 = vpop.f32.mrb[224].mxu0 }
0x15ca   :  { %v4105_v51 = vpop.f32.mrb[225].mxu0  ;;  %v10021_v24 = vadd.f32 %v7254_v17, %v10012_v40 }
0x15cb   :  { %v10015_v7 = vadd.f32 %v4105_v51, %v10012_v40  ;;  %v7255_v28 = vpop.f32.mrb[226].mxu0 }
0x15cc   :  { %v10018_v57 = vadd.f32 %v7255_v28, %v10012_v40  ;;  %v4108_v36 = vpop.f32.mrb[227].mxu0  ;;  %v4170_v14 = vmul.f32 %v10021_v24, %v10021_v24 }
0x15cd   :  { %v10024_v22 = vadd.f32 %v4108_v36, %v10012_v40  ;;  %v4168_v18 = vmul.f32 %v10015_v7, %v10015_v7 }
0x15ce   :  { %v4171_v13 = vmul.f32 %v10018_v57, %v10018_v57  ;;  %v7670_v29 = vpack.c.bf16 %v10018_v57, %v10021_v24 }
0x15cf   :  { %v4169_v9 = vmul.f32 %v10024_v22, %v10024_v22  ;;  %v7666_v19 = vpack.c.bf16 %v10024_v22, %v10015_v7 }
0x15d0   :  { %v7668_v55 = vpack.c.bf16 %v4171_v13, %v4170_v14 }
0x15d1   :  { %v7664_v62 = vpack.c.bf16 %v4169_v9, %v4168_v18 }
0x15d3   :  { %7665 = vmatprep.subr.bf16.mxu1 %v7664_v62 }
0x15d4   :  { %7667 = vmatpush1.bf16.msra.mxu1 %v7666_v19  ;;  %v7907_v19 = vld [vmem:[#allocation11 + $0x1c8] sm:$0xff]  }
0x15d5   :  { %7669 = vmatprep.subr.bf16.mxu1 %v7668_v55  ;;  %7270 = vmatprep.subr.bf16.mxu0 %v7907_v19  ;;  %v7908_v55 = vld [vmem:[#allocation11 + $0x1d0] sm:$0xff]  }
0x15d6   :  { %7271 = vmatpush3.bf16.msra.mxu0 %v7907_v19 }
0x15d7   :  { %7272 = vmatprep.subr.bf16.mxu0 %v7908_v55 }
0x15d8   :  { %7671 = vmatpush1.bf16.msra.mxu1 %v7670_v29  ;;  %v7909_v29 = vld [vmem:[#allocation11 + $0x1d8] sm:$0xff]  }
0x15d9   :  { %v7258_v60 = vpop.f32.mrb[228].mxu0 }
0x15da   :  { %v4121_v30 = vpop.f32.mrb[229].mxu0  ;;  %v10045_v2 = vadd.f32 %v7258_v60, %v10012_v40  ;;  %7273 = vmatpush3.bf16.msra.mxu0 %v7908_v55  ;;  %v7910_v60 = vld [vmem:[#allocation11 + $0x1e0] sm:$0xff]  }
0x15db   :  { %v10039_v27 = vadd.f32 %v4121_v30, %v10012_v40  ;;  %v7259_v34 = vpop.f32.mrb[230].mxu0  ;;  %7274 = vmatprep.subr.bf16.mxu0 %v7909_v29  ;;  %v7911_v30 = vld [vmem:[#allocation11 + $0x1e8] sm:$0xff]  }
0x15dc   :  { %v10042_v21 = vadd.f32 %v7259_v34, %v10012_v40  ;;  %v4124_v12 = vpop.f32.mrb[231].mxu0  ;;  %v4174_v39 = vmul.f32 %v10045_v2, %v10045_v2  ;;  %v7912_v34 = vld [vmem:[#allocation11 + $0x1f0] sm:$0xff]  }
0x15dd   :  { %v10048_v38 = vadd.f32 %v4124_v12, %v10012_v40  ;;  %v4172_v35 = vmul.f32 %v10039_v27, %v10039_v27  ;;  %v7913_v12 = vld [vmem:[#allocation11 + $0x1f8] sm:$0xff]  }
0x15de   :  { %v4175_v49 = vmul.f32 %v10042_v21, %v10042_v21  ;;  %v7678_v31 = vpack.c.bf16 %v10042_v21, %v10045_v2  ;;  %7275 = vmatpush3.bf16.msra.mxu0 %v7909_v29 }
0x15df   :  { %v4173_v0 = vmul.f32 %v10048_v38, %v10048_v38  ;;  %v7674_v1 = vpack.c.bf16 %v10048_v38, %v10039_v27  ;;  %7276 = vmatprep.subr.bf16.mxu0 %v7910_v60 }
0x15e0   :  { %v7676_v54 = vpack.c.bf16 %v4175_v49, %v4174_v39 }
0x15e1   :  { %v7672_v3 = vpack.c.bf16 %v4173_v0, %v4172_v35 }
0x15e2   :  { %7277 = vmatpush3.bf16.msra.mxu0 %v7910_v60 }
0x15e3   :  { %7673 = vmatprep.subr.bf16.mxu1 %v7672_v3  ;;  %7278 = vmatprep.subr.bf16.mxu0 %v7911_v30 }
0x15e4   :  { %7675 = vmatpush1.bf16.msra.mxu1 %v7674_v1 }
0x15e5   :  { %7677 = vmatprep.subr.bf16.mxu1 %v7676_v54 }
0x15e6   :  { %7279 = vmatpush3.bf16.msra.mxu0 %v7911_v30 }
0x15e7   :  { %7280 = vmatprep.subr.bf16.mxu0 %v7912_v34 }
0x15e8   :  { %7679 = vmatpush1.bf16.msra.mxu1 %v7678_v31 }
0x15e9   :  { %v7262_v48 = vpop.f32.mrb[232].mxu0 }
0x15ea   :  { %v4137_v61 = vpop.f32.mrb[233].mxu0  ;;  %v10069_v6 = vadd.f32 %v7262_v48, %v10012_v40  ;;  %7281 = vmatpush3.bf16.msra.mxu0 %v7912_v34  ;;  %v4281_v48 = vrot.slane %v10008_v46, %v8791_v32 }
0x15eb   :  { %v10063_v42 = vadd.f32 %v4137_v61, %v10012_v40  ;;  %v7263_v8 = vpop.f32.mrb[234].mxu0  ;;  %7282 = vmatprep.subr.bf16.mxu0 %v7913_v12  ;;  %v10118_v61 = vrot.slane %v10008_v46, %v8794_v33 }
0x15ec   :  { %v10066_v41 = vadd.f32 %v7263_v8, %v10012_v40  ;;  %v4140_v10 = vpop.f32.mrb[235].mxu0  ;;  %v4178_v44 = vmul.f32 %v10069_v6, %v10069_v6 }
0x15ed   :  { %v10072_v20 = vadd.f32 %v4140_v10, %v10012_v40  ;;  %v4176_v11 = vmul.f32 %v10063_v42, %v10063_v42 }
0x15ee   :  { %v4179_v25 = vmul.f32 %v10066_v41, %v10066_v41  ;;  %v7686_v53 = vpack.c.bf16 %v10066_v41, %v10069_v6  ;;  %7283 = vmatpush3.bf16.msra.mxu0 %v7913_v12 }
0x15ef   :  { %v4177_v56 = vmul.f32 %v10072_v20, %v10072_v20  ;;  %v7682_v37 = vpack.c.bf16 %v10072_v20, %v10063_v42 }
0x15f0   :  { %v7684_v59 = vpack.c.bf16 %v4179_v25, %v4178_v44 }
0x15f1   :  { %v7680_v47 = vpack.c.bf16 %v4177_v56, %v4176_v11 }
0x15f3   :  { %7681 = vmatprep.subr.bf16.mxu1 %v7680_v47 }
0x15f4   :  { %7683 = vmatpush1.bf16.msra.mxu1 %v7682_v37 }
0x15f5   :  { %7685 = vmatprep.subr.bf16.mxu1 %v7684_v59 }
0x15f8   :  { %7687 = vmatpush1.bf16.msra.mxu1 %v7686_v53 }
0x15f9   :  { %v7266_v16 = vpop.f32.mrb[236].mxu0 }
0x15fa   :  { %v4153_v23 = vpop.f32.mrb[237].mxu0  ;;  %v10093_v17 = vadd.f32 %v7266_v16, %v10012_v40 }
0x15fb   :  { %v10087_v50 = vadd.f32 %v4153_v23, %v10012_v40  ;;  %v7267_v52 = vpop.f32.mrb[238].mxu0 }
0x15fc   :  { %v10090_v15 = vadd.f32 %v7267_v52, %v10012_v40  ;;  %v4156_v5 = vpop.f32.mrb[239].mxu0  ;;  %v4182_v13 = vmul.f32 %v10093_v17, %v10093_v17 }
0x15fd   :  { %v10096_v51 = vadd.f32 %v4156_v5, %v10012_v40  ;;  %v4180_v28 = vmul.f32 %v10087_v50, %v10087_v50 }
0x15fe   :  { %v4183_v36 = vmul.f32 %v10090_v15, %v10090_v15  ;;  %v7694_v40 = vpack.c.bf16 %v10090_v15, %v10093_v17 }
0x15ff   :  { %v4181_v18 = vmul.f32 %v10096_v51, %v10096_v51  ;;  %v7690_v14 = vpack.c.bf16 %v10096_v51, %v10087_v50 }
0x1600   :  { %v7692_v62 = vpack.c.bf16 %v4183_v36, %v4182_v13 }
0x1601   :  { %v7688_v9 = vpack.c.bf16 %v4181_v18, %v4180_v28 }
0x1603   :  { %7689 = vmatprep.subr.bf16.mxu1 %v7688_v9 }
0x1604   :  { %7691 = vmatpush1.bf16.msra.mxu1 %v7690_v14 }
0x1605   :  { %7693 = vmatprep.subr.bf16.mxu1 %v7692_v62 }
0x1608   :  { %7695 = vmatpush1.bf16.msra.mxu1 %v7694_v40 }
0x160b   :  { %4249 = vmatmul.mubr.f32.vlgmr.msra.gmra.mrb[140].mxu1 %v10828_v26 }
0x160c   :  { %4610 = vmatprep.mubr.f32.mxu1 %v8450_v63 }
0x16de   :  { %v4250_v35 = vpop.f32.mrb[140].mxu1 }
0x16df   :  { %v4255_v49 = vmul.f32 %v4250_v35, %v4250_v35  ;;  %v4252_v0 = vpop.f32.mrb[141].mxu1  ;;  %v4261_v54 = vrot.slane %v4250_v35, %v8683_v4 }
0x16e1   :  { %v4256_v39 = vsub.f32 %v4252_v0, %v4255_v49  ;;  %v4262_v31 = vsub.f32 %v10015_v7, %v4261_v54  ;;  %v4263_v8 = vsub.f32 %v10024_v22, %v4261_v54  ;;  %v4264_v10 = vsub.f32 %v10021_v24, %v4261_v54 }
0x16e2   :  { %v4265_v11 = vsub.f32 %v10018_v57, %v4261_v54  ;;  %v4266_v25 = vsub.f32 %v10039_v27, %v4261_v54  ;;  %v4267_v56 = vsub.f32 %v10048_v38, %v4261_v54  ;;  %v4268_v44 = vsub.f32 %v10045_v2, %v4261_v54 }
0x16e3   :  { %v4257_v3 = vmax.f32 %v4256_v39, 0.0  ;;  %v4269_v7 = vsub.f32 %v10042_v21, %v4261_v54  ;;  %v4270_v47 = vsub.f32 %v10063_v42, %v4261_v54  ;;  %v4282_v37 = vmul.f32 %v4281_v48, %v4262_v31 }
0x16e4   :  { %v4271_v59 = vsub.f32 %v10072_v20, %v4261_v54  ;;  %v4272_v53 = vsub.f32 %v10069_v6, %v4261_v54  ;;  %v4273_v22 = vsub.f32 %v10066_v41, %v4261_v54  ;;  %v4274_v24 = vsub.f32 %v10087_v50, %v4261_v54 }
0x16e5   :  { %v4298_v1 = vadd.f32 1e-05, %v4257_v3  ;;  %v4275_v57 = vsub.f32 %v10096_v51, %v4261_v54  ;;  %v4276_v27 = vsub.f32 %v10093_v17, %v4261_v54  ;;  %v4277_v38 = vsub.f32 %v10090_v15, %v4261_v54 }
0x16e6   :  { %v4283_v2 = vmul.f32 %v4281_v48, %v4263_v8  ;;  %v4284_v16 = vmul.f32 %v4281_v48, %v4264_v10  ;;  %v4285_v21 = vmul.f32 %v4281_v48, %v4265_v11  ;;  %v4286_v23 = vmul.f32 %v4281_v48, %v4266_v25 }
0x16e7   :  { %7958 = vrsqrt.f32 %v4298_v1  ;;  %v4287_v52 = vmul.f32 %v4281_v48, %v4267_v56  ;;  %v4288_v5 = vmul.f32 %v4281_v48, %v4268_v44  ;;  %v4289_v20 = vmul.f32 %v4281_v48, %v4269_v7 }
0x16e8   :  { %v4290_v28 = vmul.f32 %v4281_v48, %v4270_v47  ;;  %v4291_v41 = vmul.f32 %v4281_v48, %v4271_v59  ;;  %v4292_v36 = vmul.f32 %v4281_v48, %v4272_v53  ;;  %v4293_v50 = vmul.f32 %v4281_v48, %v4273_v22 }
0x16e9   :  { %v4294_v18 = vmul.f32 %v4281_v48, %v4274_v24  ;;  %v4295_v51 = vmul.f32 %v4281_v48, %v4275_v57  ;;  %v4296_v13 = vmul.f32 %v4281_v48, %v4276_v27  ;;  %v4297_v17 = vmul.f32 %v4281_v48, %v4277_v38 }
0x16f1   :  { %v7959_v42 = vpop.eup %7958 }
0x16f2   :  { %v4303_v6 = vrot.slane %v7959_v42, %v8683_v4 }
0x16f4   :  { %v4304_v9 = vmul.f32 %v4303_v6, %v4282_v37  ;;  %v4305_v15 = vmul.f32 %v4303_v6, %v4283_v2  ;;  %v4306_v14 = vmul.f32 %v4303_v6, %v4284_v16  ;;  %v4307_v62 = vmul.f32 %v4303_v6, %v4285_v21 }
0x16f5   :  { %v4308_v40 = vmul.f32 %v4303_v6, %v4286_v23  ;;  %v4309_v19 = vmul.f32 %v4303_v6, %v4287_v52  ;;  %v4310_v55 = vmul.f32 %v4303_v6, %v4288_v5  ;;  %v4311_v29 = vmul.f32 %v4303_v6, %v4289_v20 }
0x16f6   :  { %v4324_v60 = vadd.f32 %v10118_v61, %v4304_v9  ;;  %v4325_v30 = vadd.f32 %v10118_v61, %v4305_v15  ;;  %v4326_v34 = vadd.f32 %v10118_v61, %v4306_v14  ;;  %v4327_v12 = vadd.f32 %v10118_v61, %v4307_v62  ;;  %v8174_v14 = vld [vmem:[#allocation8] sm:$0xff]  }
0x16f7   :  { %v4328_v35 = vadd.f32 %v10118_v61, %v4308_v40  ;;  %v4329_v49 = vadd.f32 %v10118_v61, %v4309_v19  ;;  %v4330_v0 = vadd.f32 %v10118_v61, %v4310_v55  ;;  %v4331_v39 = vadd.f32 %v10118_v61, %v4311_v29 }
0x16f8   :  { %v4340_v3 = vmax.f32 %v4324_v60, 0.0  ;;  %v4341_v1 = vmax.f32 %v4325_v30, 0.0  ;;  %v4342_v54 = vmax.f32 %v4326_v34, 0.0  ;;  %v4343_v31 = vmax.f32 %v4327_v12, 0.0 }
0x16f9   :  { %v4344_v48 = vmax.f32 %v4328_v35, 0.0  ;;  %v4345_v8 = vmax.f32 %v4329_v49, 0.0  ;;  %v4346_v10 = vmax.f32 %v4330_v0, 0.0  ;;  %v4347_v11 = vmax.f32 %v4331_v39, 0.0 }
0x16fa   :  { %v4356_v25 = vpack.c.bf16 %v4341_v1, %v4340_v3  ;;  %v4357_v56 = vpack.c.bf16 %v4343_v31, %v4342_v54  ;;  %v4312_v44 = vmul.f32 %v4303_v6, %v4290_v28  ;;  %v4313_v7 = vmul.f32 %v4303_v6, %v4291_v41 }
0x16fb   :  { %v4358_v47 = vpack.c.bf16 %v4345_v8, %v4344_v48  ;;  %v4359_v37 = vpack.c.bf16 %v4347_v11, %v4346_v10  ;;  %v4314_v59 = vmul.f32 %v4303_v6, %v4292_v36  ;;  %v4315_v53 = vmul.f32 %v4303_v6, %v4293_v50 }
0x16fc   :  { %7284 = vmatprep.mubr.bf16.mxu0 %v4356_v25  ;;  %v4332_v22 = vadd.f32 %v10118_v61, %v4312_v44  ;;  %v4333_v24 = vadd.f32 %v10118_v61, %v4313_v7  ;;  %v4316_v57 = vmul.f32 %v4303_v6, %v4294_v18  ;;  %v4317_v27 = vmul.f32 %v4303_v6, %v4295_v51 }
0x16fd   :  { %7285 = vmatmul.mubr.bf16.vlgmr.msra.gmra.mrb[240].mxu0 %v4357_v56  ;;  %v4334_v38 = vadd.f32 %v10118_v61, %v4314_v59  ;;  %v4335_v2 = vadd.f32 %v10118_v61, %v4315_v53  ;;  %v4318_v16 = vmul.f32 %v4303_v6, %v4296_v13  ;;  %v4319_v21 = vmul.f32 %v4303_v6, %v4297_v17 }
0x16fe   :  { %7288 = vmatprep.mubr.bf16.mxu0 %v4358_v47  ;;  %v4348_v23 = vmax.f32 %v4332_v22, 0.0  ;;  %v4349_v42 = vmax.f32 %v4333_v24, 0.0  ;;  %v4336_v52 = vadd.f32 %v10118_v61, %v4316_v57  ;;  %v4337_v5 = vadd.f32 %v10118_v61, %v4317_v27 }
0x16ff   :  { %v4350_v20 = vmax.f32 %v4334_v38, 0.0  ;;  %v4351_v28 = vmax.f32 %v4335_v2, 0.0  ;;  %v4338_v41 = vadd.f32 %v10118_v61, %v4318_v16  ;;  %v4339_v36 = vadd.f32 %v10118_v61, %v4319_v21 }
0x1700   :  { %v4360_v50 = vpack.c.bf16 %v4349_v42, %v4348_v23  ;;  %v4352_v18 = vmax.f32 %v4336_v52, 0.0  ;;  %v4353_v51 = vmax.f32 %v4337_v5, 0.0  ;;  %v10154_v62 = vrot.slane %v10008_v46, %v8836_v58 }
0x1701   :  { %v4361_v9 = vpack.c.bf16 %v4351_v28, %v4350_v20  ;;  %v4354_v15 = vmax.f32 %v4338_v41, 0.0  ;;  %v4355_v13 = vmax.f32 %v4339_v36, 0.0 }
0x1702   :  { %v4362_v6 = vpack.c.bf16 %v4353_v51, %v4352_v18 }
0x1703   :  { %v4363_v17 = vpack.c.bf16 %v4355_v13, %v4354_v15 }
0x1705   :  { %7289 = vmatmul.mubr.bf16.gmra.mrb[244].mxu0 %v4359_v37 }
0x1706   :  { %7292 = vmatprep.mubr.bf16.mxu0 %v4360_v50 }
0x170d   :  { %7293 = vmatmul.mubr.bf16.gmra.mrb[248].mxu0 %v4361_v9 }
0x170e   :  { %7296 = vmatprep.mubr.bf16.mxu0 %v4362_v6 }
0x1715   :  { %7297 = vmatmul.mubr.bf16.gmra.mrb[252].mxu0 %v4363_v17 }
0x1716   :  { %7316 = vmatprep.mubr.bf16.mxu0 %v8174_v14 }
0x17d0   :  { %v7286_v61 = vpop.f32.mrb[240].mxu0 }
0x17d1   :  { %v4467_v40 = vpop.f32.mrb[241].mxu0  ;;  %v10163_v30 = vadd.f32 %v7286_v61, %v10154_v62 }
0x17d2   :  { %v10157_v19 = vadd.f32 %v4467_v40, %v10154_v62  ;;  %v7287_v55 = vpop.f32.mrb[242].mxu0 }
0x17d3   :  { %v10160_v29 = vadd.f32 %v7287_v55, %v10154_v62  ;;  %v4470_v60 = vpop.f32.mrb[243].mxu0  ;;  %v4532_v0 = vmul.f32 %v10163_v30, %v10163_v30 }
0x17d4   :  { %v10166_v34 = vadd.f32 %v4470_v60, %v10154_v62  ;;  %v4530_v12 = vmul.f32 %v10157_v19, %v10157_v19 }
0x17d5   :  { %v4533_v35 = vmul.f32 %v10160_v29, %v10160_v29  ;;  %v7702_v44 = vpack.c.bf16 %v10160_v29, %v10163_v30 }
0x17d6   :  { %v4531_v49 = vmul.f32 %v10166_v34, %v10166_v34  ;;  %v7698_v1 = vpack.c.bf16 %v10166_v34, %v10157_v19 }
0x17d7   :  { %v7700_v8 = vpack.c.bf16 %v4533_v35, %v4532_v0 }
0x17d8   :  { %v7290_v39 = vpop.f32.mrb[244].mxu0  ;;  %v7696_v3 = vpack.c.bf16 %v4531_v49, %v4530_v12 }
0x17d9   :  { %v4483_v54 = vpop.f32.mrb[245].mxu0  ;;  %v10185_v25 = vadd.f32 %v7290_v39, %v10154_v62 }
0x17da   :  { %v10179_v31 = vadd.f32 %v4483_v54, %v10154_v62  ;;  %v7291_v48 = vpop.f32.mrb[246].mxu0  ;;  %7697 = vmatprep.subr.bf16.mxu1 %v7696_v3  ;;  %v8175_v3 = vld [vmem:[#allocation9 + $0x4] ss:$8 sps:$4 sm:$0xff]  }
0x17db   :  { %v10182_v10 = vadd.f32 %v7291_v48, %v10154_v62  ;;  %v4486_v11 = vpop.f32.mrb[247].mxu0  ;;  %7699 = vmatpush1.bf16.msra.mxu1 %v7698_v1  ;;  %v4536_v59 = vmul.f32 %v10185_v25, %v10185_v25 }
0x17dc   :  { %v10188_v56 = vadd.f32 %v4486_v11, %v10154_v62  ;;  %7701 = vmatprep.subr.bf16.mxu1 %v7700_v8  ;;  %v4534_v7 = vmul.f32 %v10179_v31, %v10179_v31 }
0x17dd   :  { %v4537_v47 = vmul.f32 %v10182_v10, %v10182_v10  ;;  %v7710_v52 = vpack.c.bf16 %v10182_v10, %v10185_v25 }
0x17de   :  { %v4535_v37 = vmul.f32 %v10188_v56, %v10188_v56  ;;  %v7706_v24 = vpack.c.bf16 %v10188_v56, %v10179_v31 }
0x17df   :  { %7703 = vmatpush1.bf16.msra.mxu1 %v7702_v44  ;;  %v7708_v2 = vpack.c.bf16 %v4537_v47, %v4536_v59  ;;  %v10254_v59 = vrot.slane %v10008_v46, %v8944_v45 }
0x17e0   :  { %v7294_v53 = vpop.f32.mrb[248].mxu0  ;;  %v7704_v22 = vpack.c.bf16 %v4535_v37, %v4534_v7  ;;  %v4643_v37 = vrot.slane %v10008_v46, %v8941_v43 }
0x17e1   :  { %v4499_v57 = vpop.f32.mrb[249].mxu0  ;;  %v10209_v23 = vadd.f32 %v7294_v53, %v10154_v62 }
0x17e2   :  { %v10203_v27 = vadd.f32 %v4499_v57, %v10154_v62  ;;  %v7295_v38 = vpop.f32.mrb[250].mxu0  ;;  %7705 = vmatprep.subr.bf16.mxu1 %v7704_v22 }
0x17e3   :  { %v10206_v16 = vadd.f32 %v7295_v38, %v10154_v62  ;;  %v4502_v21 = vpop.f32.mrb[251].mxu0  ;;  %7707 = vmatpush1.bf16.msra.mxu1 %v7706_v24  ;;  %v4540_v41 = vmul.f32 %v10209_v23, %v10209_v23 }
0x17e4   :  { %v10212_v42 = vadd.f32 %v4502_v21, %v10154_v62  ;;  %7709 = vmatprep.subr.bf16.mxu1 %v7708_v2  ;;  %v4538_v5 = vmul.f32 %v10203_v27, %v10203_v27 }
0x17e5   :  { %v4541_v20 = vmul.f32 %v10206_v16, %v10206_v16  ;;  %v7718_v40 = vpack.c.bf16 %v10206_v16, %v10209_v23 }
0x17e6   :  { %v4539_v28 = vmul.f32 %v10212_v42, %v10212_v42  ;;  %v7714_v18 = vpack.c.bf16 %v10212_v42, %v10203_v27 }
0x17e7   :  { %7711 = vmatpush1.bf16.msra.mxu1 %v7710_v52  ;;  %v7716_v13 = vpack.c.bf16 %v4541_v20, %v4540_v41 }
0x17e8   :  { %v7298_v36 = vpop.f32.mrb[252].mxu0  ;;  %v7712_v50 = vpack.c.bf16 %v4539_v28, %v4538_v5 }
0x17e9   :  { %v4515_v51 = vpop.f32.mrb[253].mxu0  ;;  %v10233_v14 = vadd.f32 %v7298_v36, %v10154_v62 }
0x17ea   :  { %v10227_v9 = vadd.f32 %v4515_v51, %v10154_v62  ;;  %v7299_v15 = vpop.f32.mrb[254].mxu0  ;;  %7713 = vmatprep.subr.bf16.mxu1 %v7712_v50 }
0x17eb   :  { %v10230_v6 = vadd.f32 %v7299_v15, %v10154_v62  ;;  %v4518_v17 = vpop.f32.mrb[255].mxu0  ;;  %7715 = vmatpush1.bf16.msra.mxu1 %v7714_v18  ;;  %v4544_v35 = vmul.f32 %v10233_v14, %v10233_v14 }
0x17ec   :  { %v4519_v61 = vadd.f32 %v4518_v17, %v10154_v62  ;;  %7717 = vmatprep.subr.bf16.mxu1 %v7716_v13  ;;  %v4542_v55 = vmul.f32 %v10227_v9, %v10227_v9 }
0x17ed   :  { %v4545_v60 = vmul.f32 %v10230_v6, %v10230_v6  ;;  %v7726_v39 = vpack.c.bf16 %v10230_v6, %v10233_v14 }
0x17ee   :  { %v4543_v12 = vmul.f32 %v4519_v61, %v4519_v61  ;;  %v7722_v0 = vpack.c.bf16 %v4519_v61, %v10227_v9 }
0x17ef   :  { %7719 = vmatpush1.bf16.msra.mxu1 %v7718_v40  ;;  %v7724_v62 = vpack.c.bf16 %v4545_v60, %v4544_v35 }
0x17f0   :  { %v7720_v49 = vpack.c.bf16 %v4543_v12, %v4542_v55 }
0x17f2   :  { %7721 = vmatprep.subr.bf16.mxu1 %v7720_v49 }
0x17f3   :  { %7723 = vmatpush1.bf16.msra.mxu1 %v7722_v0 }
0x17f4   :  { %7725 = vmatprep.subr.bf16.mxu1 %v7724_v62 }
0x17f7   :  { %7727 = vmatpush1.bf16.msra.mxu1 %v7726_v39 }
0x17fa   :  { %4611 = vmatmul.mubr.f32.vlgmr.msra.gmra.mrb[142].mxu1 %v10828_v26 }
0x17fb   :  { %4969 = vmatprep.mubr.bf16.mxu1 %v8175_v3 }
0x18cd   :  { %v4612_v1 = vpop.f32.mrb[142].mxu1 }
0x18ce   :  { %v4617_v54 = vmul.f32 %v4612_v1, %v4612_v1  ;;  %v4614_v48 = vpop.f32.mrb[143].mxu1  ;;  %v4623_v7 = vrot.slane %v4612_v1, %v8683_v4 }
0x18d0   :  { %v4618_v8 = vsub.f32 %v4614_v48, %v4617_v54  ;;  %v4624_v47 = vsub.f32 %v10157_v19, %v4623_v7  ;;  %v4625_v53 = vsub.f32 %v10166_v34, %v4623_v7  ;;  %v4626_v22 = vsub.f32 %v10163_v30, %v4623_v7 }
0x18d1   :  { %v4627_v24 = vsub.f32 %v10160_v29, %v4623_v7  ;;  %v4628_v57 = vsub.f32 %v10179_v31, %v4623_v7  ;;  %v4629_v38 = vsub.f32 %v10188_v56, %v4623_v7  ;;  %v4630_v2 = vsub.f32 %v10185_v25, %v4623_v7 }
0x18d2   :  { %v4619_v11 = vmax.f32 %v4618_v8, 0.0  ;;  %v4631_v19 = vsub.f32 %v10182_v10, %v4623_v7  ;;  %v4632_v21 = vsub.f32 %v10203_v27, %v4623_v7  ;;  %v4644_v52 = vmul.f32 %v4643_v37, %v4624_v47 }
0x18d3   :  { %v4633_v46 = vsub.f32 %v10212_v42, %v4623_v7  ;;  %v4634_v5 = vsub.f32 %v10209_v23, %v4623_v7  ;;  %v4635_v34 = vsub.f32 %v10206_v16, %v4623_v7  ;;  %v4636_v30 = vsub.f32 %v10227_v9, %v4623_v7 }
0x18d4   :  { %v4660_v44 = vadd.f32 1e-05, %v4619_v11  ;;  %v4637_v29 = vsub.f32 %v4519_v61, %v4623_v7  ;;  %v4638_v31 = vsub.f32 %v10233_v14, %v4623_v7  ;;  %v4639_v56 = vsub.f32 %v10230_v6, %v4623_v7 }
0x18d5   :  { %v4645_v20 = vmul.f32 %v4643_v37, %v4625_v53  ;;  %v4646_v25 = vmul.f32 %v4643_v37, %v4626_v22  ;;  %v4647_v28 = vmul.f32 %v4643_v37, %v4627_v24  ;;  %v4648_v10 = vmul.f32 %v4643_v37, %v4628_v57 }
0x18d6   :  { %7960 = vrsqrt.f32 %v4660_v44  ;;  %v4649_v27 = vmul.f32 %v4643_v37, %v4629_v38  ;;  %v4650_v36 = vmul.f32 %v4643_v37, %v4630_v2  ;;  %v4651_v50 = vmul.f32 %v4643_v37, %v4631_v19 }
0x18d7   :  { %v4652_v42 = vmul.f32 %v4643_v37, %v4632_v21  ;;  %v4653_v18 = vmul.f32 %v4643_v37, %v4633_v46  ;;  %v4654_v16 = vmul.f32 %v4643_v37, %v4634_v5  ;;  %v4655_v51 = vmul.f32 %v4643_v37, %v4635_v34 }
0x18d8   :  { %v4656_v9 = vmul.f32 %v4643_v37, %v4636_v30  ;;  %v4657_v15 = vmul.f32 %v4643_v37, %v4637_v29  ;;  %v4658_v13 = vmul.f32 %v4643_v37, %v4638_v31  ;;  %v4659_v17 = vmul.f32 %v4643_v37, %v4639_v56 }
0x18e0   :  { %v7961_v41 = vpop.eup %7960 }
0x18e1   :  { %v4665_v23 = vrot.slane %v7961_v41, %v8683_v4 }
0x18e3   :  { %v4666_v14 = vmul.f32 %v4665_v23, %v4644_v52  ;;  %v4667_v6 = vmul.f32 %v4665_v23, %v4645_v20  ;;  %v4668_v61 = vmul.f32 %v4665_v23, %v4646_v25  ;;  %v4669_v40 = vmul.f32 %v4665_v23, %v4647_v28 }
0x18e4   :  { %v4670_v55 = vmul.f32 %v4665_v23, %v4648_v10  ;;  %v4671_v60 = vmul.f32 %v4665_v23, %v4649_v27  ;;  %v4672_v12 = vmul.f32 %v4665_v23, %v4650_v36  ;;  %v4673_v35 = vmul.f32 %v4665_v23, %v4651_v50 }
0x18e5   :  { %v10272_v49 = vadd.f32 %v10254_v59, %v4666_v14  ;;  %v10275_v0 = vadd.f32 %v10254_v59, %v4667_v6  ;;  %v10278_v62 = vadd.f32 %v10254_v59, %v4668_v61  ;;  %v10281_v39 = vadd.f32 %v10254_v59, %v4669_v40  ;;  %v8176_v14 = vld [vmem:[#allocation8 + $0x8] sm:$0xff]   ;;  %v8177_v6 = vld [vmem:[#allocation8 + $0x10] sm:$0xff]   ;;  %v8178_v61 = vld [vmem:[#allocation8 + $0x18] sm:$0xff]  }
0x18e6   :  { %v10284_v3 = vadd.f32 %v10254_v59, %v4670_v55  ;;  %v10287_v1 = vadd.f32 %v10254_v59, %v4671_v60  ;;  %v10290_v54 = vadd.f32 %v10254_v59, %v4672_v12  ;;  %v10293_v48 = vadd.f32 %v10254_v59, %v4673_v35  ;;  %v8179_v40 = vld [vmem:[#allocation8 + $0x20] sm:$0xff]   ;;  %v8180_v55 = vld [vmem:[#allocation8 + $0x28] sm:$0xff]   ;;  %v8181_v60 = vld [vmem:[#allocation8 + $0x30] sm:$0xff]  }
0x18e7   :  { %v4702_v8 = vmax.f32 %v10272_v49, 0.0  ;;  %v4703_v11 = vmax.f32 %v10275_v0, 0.0  ;;  %v4704_v44 = vmax.f32 %v10278_v62, 0.0  ;;  %v4705_v7 = vmax.f32 %v10281_v39, 0.0  ;;  %v8182_v12 = vld [vmem:[#allocation8 + $0x38] sm:$0xff]   ;;  %v8183_v35 = vld [vmem:[#allocation8 + $0x40] sm:$0xff]  }
0x18e8   :  { %v4706_v47 = vmax.f32 %v10284_v3, 0.0  ;;  %v4707_v37 = vmax.f32 %v10287_v1, 0.0  ;;  %v4708_v53 = vmax.f32 %v10290_v54, 0.0  ;;  %v4709_v22 = vmax.f32 %v10293_v48, 0.0 }
0x18e9   :  { %v4720_v24 = vpack.c.bf16 %v4703_v11, %v4702_v8  ;;  %v4721_v57 = vpack.c.bf16 %v4705_v7, %v4704_v44  ;;  %v4674_v38 = vmul.f32 %v4665_v23, %v4652_v42  ;;  %v4675_v2 = vmul.f32 %v4665_v23, %v4653_v18 }
0x18ea   :  { %v4722_v19 = vpack.c.bf16 %v4707_v37, %v4706_v47  ;;  %v4723_v21 = vpack.c.bf16 %v4709_v22, %v4708_v53  ;;  %v4676_v52 = vmul.f32 %v4665_v23, %v4654_v16  ;;  %v4677_v46 = vmul.f32 %v4665_v23, %v4655_v51 }
0x18eb   :  { %7300 = vmatprep.subr.bf16.mxu0 %v4720_v24  ;;  %v10320_v5 = vadd.f32 %v10254_v59, %v4674_v38  ;;  %v10323_v34 = vadd.f32 %v10254_v59, %v4675_v2  ;;  %v4678_v30 = vmul.f32 %v4665_v23, %v4656_v9  ;;  %v4679_v29 = vmul.f32 %v4665_v23, %v4657_v15  ;;  %v8186_v38 = vld [vmem:[#allocation8 + $0x58] sm:$0xff]   ;;  %v8187_v2 = vld [vmem:[#allocation8 + $0x60] sm:$0xff]  }
0x18ec   :  { %7301 = vmatpush3.bf16.msra.mxu0 %v4720_v24  ;;  %v10326_v31 = vadd.f32 %v10254_v59, %v4676_v52  ;;  %v10329_v56 = vadd.f32 %v10254_v59, %v4677_v46  ;;  %v4680_v20 = vmul.f32 %v4665_v23, %v4658_v13  ;;  %v4681_v25 = vmul.f32 %v4665_v23, %v4659_v17  ;;  %v8184_v24 = vld [vmem:[#allocation8 + $0x48] sm:$0xff]   ;;  %v8190_v52 = vld [vmem:[#allocation8 + $0x78] sm:$0xff]  }
0x18ed   :  { %7302 = vmatprep.subr.bf16.mxu0 %v4721_v57  ;;  %v4710_v28 = vmax.f32 %v10320_v5, 0.0  ;;  %v10821_v10 = vmax.f32 %v10323_v34, 0.0  ;;  %v10334_v41 = vadd.f32 %v10254_v59, %v4678_v30  ;;  %v10337_v27 = vadd.f32 %v10254_v59, %v4679_v29  ;;  %v8191_v30 = vld [vmem:[#allocation6 + $0x10] sm:$0xff] }
0x18ee   :  { %v10820_v36 = vmax.f32 %v10326_v31, 0.0  ;;  %v10819_v50 = vmax.f32 %v10329_v56, 0.0  ;;  %v10342_v42 = vadd.f32 %v10254_v59, %v4680_v20  ;;  %v10345_v23 = vadd.f32 %v10254_v59, %v4681_v25  ;;  %v8192_v25 = vld [vmem:[#allocation6] sm:$0xff] }
0x18ef   :  { %v4724_v18 = vpack.c.bf16 %v10821_v10, %v4710_v28  ;;  %v10818_v16 = vmax.f32 %v10334_v41, 0.0  ;;  %v10817_v51 = vmax.f32 %v10337_v27, 0.0 }
0x18f0   :  { %7303 = vmatpush3.bf16.msra.mxu0 %v4721_v57  ;;  %v4725_v9 = vpack.c.bf16 %v10819_v50, %v10820_v36  ;;  %v10816_v15 = vmax.f32 %v10342_v42, 0.0  ;;  %v10815_v59 = vmax.f32 %v10345_v23, 0.0  ;;  %v8185_v57 = vld [vmem:[#allocation8 + $0x50] sm:$0xff]   ;;  %v8210_v50 = vld [vmem:[#allocation6 + $0x88] sm:$0xff] }
0x18f1   :  { %7304 = vmatprep.subr.bf16.mxu0 %v4722_v19  ;;  %v4726_v13 = vpack.c.bf16 %v10817_v51, %v10818_v16  ;;  %v8206_v51 = vld [vmem:[#allocation6 + $0x68] sm:$0xff]  ;;  %v8209_v16 = vld [vmem:[#allocation6 + $0x98] sm:$0xff] }
0x18f2   :  { %v4727_v17 = vpack.c.bf16 %v10815_v59, %v10816_v15  ;;  %v8204_v59 = vld [vmem:[#allocation6 + $0x60] sm:$0xff]  ;;  %v8205_v15 = vld [vmem:[#allocation6 + $0x78] sm:$0xff] }
0x18f4   :  { %7305 = vmatpush3.bf16.msra.mxu0 %v4722_v19  ;;  %v8188_v19 = vld [vmem:[#allocation8 + $0x68] sm:$0xff]  }
0x18f5   :  { %7306 = vmatprep.subr.bf16.mxu0 %v4723_v21 }
0x18f8   :  { %7307 = vmatpush3.bf16.msra.mxu0 %v4723_v21  ;;  %v8189_v21 = vld [vmem:[#allocation8 + $0x70] sm:$0xff]  }
0x18f9   :  { %7308 = vmatprep.subr.bf16.mxu0 %v4724_v18 }
0x18fc   :  { %7309 = vmatpush3.bf16.msra.mxu0 %v4724_v18 }
0x18fd   :  { %7310 = vmatprep.subr.bf16.mxu0 %v4725_v9 }
0x1900   :  { %7311 = vmatpush3.bf16.msra.mxu0 %v4725_v9 }
0x1901   :  { %7312 = vmatprep.subr.bf16.mxu0 %v4726_v13 }
0x1904   :  { %7313 = vmatpush3.bf16.msra.mxu0 %v4726_v13  ;;  %v7914_v13 = vld [vmem:[#allocation11 + $0x200] sm:$0xff]  }
0x1905   :  { %7314 = vmatprep.subr.bf16.mxu0 %v4727_v17 }
0x1908   :  { %7315 = vmatpush3.bf16.msra.mxu0 %v4727_v17  ;;  %v7915_v17 = vld [vmem:[#allocation11 + $0x208] sm:$0xff]  }
0x1909   :  { %7348 = vmatprep.subr.bf16.mxu0 %v7914_v13 }
0x190b   :  { %7317 = vmatmul.mubr.bf16.vlgmr.msra.gmra.mrb[0].mxu0 %v8176_v14  ;;  %v8193_v14 = vld [vmem:[#allocation6 + $0x18] sm:$0xff] }
0x190c   :  { %7320 = vmatprep.mubr.bf16.mxu0 %v8177_v6  ;;  %7349 = vmatpush3.bf16.msra.mxu0 %v7914_v13 }
0x190d   :  { %7350 = vmatprep.subr.bf16.mxu0 %v7915_v17 }
0x1910   :  { %7351 = vmatpush3.bf16.msra.mxu0 %v7915_v17 }
0x1913   :  { %7321 = vmatmul.mubr.bf16.gmra.mrb[4].mxu0 %v8178_v61 }
0x1914   :  { %7324 = vmatprep.mubr.bf16.mxu0 %v8179_v40  ;;  %v8194_v40 = vld [vmem:[#allocation6 + $0x8] sm:$0xff] }
0x191b   :  { %7325 = vmatmul.mubr.bf16.gmra.mrb[8].mxu0 %v8180_v55 }
0x191c   :  { %7328 = vmatprep.mubr.bf16.mxu0 %v8181_v60 }
0x1923   :  { %7329 = vmatmul.mubr.bf16.gmra.mrb[12].mxu0 %v8182_v12 }
0x1924   :  { %7332 = vmatprep.mubr.bf16.mxu0 %v8183_v35 }
0x192b   :  { %7333 = vmatmul.mubr.bf16.gmra.mrb[16].mxu0 %v8184_v24 }
0x192c   :  { %7336 = vmatprep.mubr.bf16.mxu0 %v8185_v57  ;;  %v7916_v57 = vld [vmem:[#allocation11 + $0x210] sm:$0xff]  }
0x192d   :  { %7352 = vmatprep.subr.bf16.mxu0 %v7916_v57 }
0x192e   :  { %7353 = vmatpush3.bf16.msra.mxu0 %v7916_v57 }
0x1933   :  { %7337 = vmatmul.mubr.bf16.gmra.mrb[20].mxu0 %v8186_v38 }
0x1934   :  { %7340 = vmatprep.mubr.bf16.mxu0 %v8187_v2 }
0x193b   :  { %7341 = vmatmul.mubr.bf16.gmra.mrb[24].mxu0 %v8188_v19 }
0x193c   :  { %7344 = vmatprep.mubr.bf16.mxu0 %v8189_v21  ;;  %v8195_v21 = vld [vmem:[#allocation6 + $0x30] sm:$0xff] }
0x1943   :  { %7345 = vmatmul.mubr.bf16.gmra.mrb[28].mxu0 %v8190_v52 }
0x19de   :  { %v7318_v46 = vpop.f32.mrb[0].mxu0 }
0x19df   :  { %v4771_v29 = vadd.f32 %v8191_v30, %v7318_v46  ;;  %v4762_v20 = vpop.f32.mrb[1].mxu0  ;;  %v8196_v30 = vld [vmem:[#allocation6 + $0x20] sm:$0xff] }
0x19e0   :  { %v4763_v18 = vadd.f32 %v8192_v25, %v4762_v20  ;;  %v7319_v9 = vpop.f32.mrb[2].mxu0 }
0x19e1   :  { %v4774_v6 = vadd.f32 %v8193_v14, %v7319_v9  ;;  %v4765_v61 = vpop.f32.mrb[3].mxu0  ;;  %v4891_v60 = vmax.f32 %v4771_v29, 0.0  ;;  %v7917_v29 = vld [vmem:[#allocation11 + $0x218] sm:$0xff]   ;;  %v8198_v14 = vld [vmem:[#allocation6 + $0x28] sm:$0xff] }
0x19e2   :  { %v4766_v55 = vadd.f32 %v8194_v40, %v4765_v61  ;;  %v4889_v35 = vmax.f32 %v4763_v18, 0.0  ;;  %v8197_v9 = vld [vmem:[#allocation6 + $0x38] sm:$0xff]  ;;  %7354 = vmatprep.subr.bf16.mxu0 %v7917_v29 }
0x19e3   :  { %v4892_v12 = vmax.f32 %v4774_v6, 0.0  ;;  %7355 = vmatpush3.bf16.msra.mxu0 %v7917_v29 }
0x19e4   :  { %v4890_v24 = vmax.f32 %v4766_v55, 0.0 }
0x19e5   :  { %v10367_v38 = vpack.c.bf16 %v4892_v12, %v4891_v60 }
0x19e6   :  { %v10369_v2 = vpack.c.bf16 %v4890_v24, %v4889_v35  ;;  %v7322_v19 = vpop.f32.mrb[4].mxu0  ;;  %v8199_v24 = vld [vmem:[#allocation6 + $0x50] sm:$0xff] }
0x19e7   :  { %v4787_v52 = vadd.f32 %v8195_v21, %v7322_v19  ;;  %v4778_v46 = vpop.f32.mrb[5].mxu0 }
0x19e8   :  { %v4779_v20 = vadd.f32 %v8196_v30, %v4778_v46  ;;  %v7323_v25 = vpop.f32.mrb[6].mxu0  ;;  %v8200_v46 = vld [vmem:[#allocation6 + $0x40] sm:$0xff] }
0x19e9   :  { %v4790_v13 = vadd.f32 %v8197_v9, %v7323_v25  ;;  %v4781_v18 = vpop.f32.mrb[7].mxu0  ;;  %v4895_v61 = vmax.f32 %v4787_v52, 0.0  ;;  %v8201_v9 = vld [vmem:[#allocation6 + $0x58] sm:$0xff] }
0x19ea   :  { %v4782_v6 = vadd.f32 %v8198_v14, %v4781_v18  ;;  %v4893_v55 = vmax.f32 %v4779_v20, 0.0 }
0x19eb   :  { %v4896_v40 = vmax.f32 %v4790_v13, 0.0  ;;  %v8202_v13 = vld [vmem:[#allocation6 + $0x48] sm:$0xff] }
0x19ec   :  { %v4894_v60 = vmax.f32 %v4782_v6, 0.0 }
0x19ed   :  { %v10371_v12 = vpack.c.bf16 %v4896_v40, %v4895_v61 }
0x19ee   :  { %v10373_v35 = vpack.c.bf16 %v4894_v60, %v4893_v55  ;;  %v7326_v17 = vpop.f32.mrb[8].mxu0 }
0x19ef   :  { %v4803_v19 = vadd.f32 %v8199_v24, %v7326_v17  ;;  %v4794_v21 = vpop.f32.mrb[9].mxu0  ;;  %v8203_v17 = vld [vmem:[#allocation6 + $0x70] sm:$0xff] }
0x19f0   :  { %v4795_v30 = vadd.f32 %v8200_v46, %v4794_v21  ;;  %v7327_v25 = vpop.f32.mrb[10].mxu0 }
0x19f1   :  { %v4806_v18 = vadd.f32 %v8201_v9, %v7327_v25  ;;  %v4797_v52 = vpop.f32.mrb[11].mxu0  ;;  %v4899_v20 = vmax.f32 %v4803_v19, 0.0 }
0x19f2   :  { %v4798_v57 = vadd.f32 %v8202_v13, %v4797_v52  ;;  %v4897_v6 = vmax.f32 %v4795_v30, 0.0 }
0x19f3   :  { %v4900_v14 = vmax.f32 %v4806_v18, 0.0 }
0x19f4   :  { %v4898_v61 = vmax.f32 %v4798_v57, 0.0 }
0x19f5   :  { %v10375_v40 = vpack.c.bf16 %v4900_v14, %v4899_v20 }
0x19f6   :  { %v10377_v55 = vpack.c.bf16 %v4898_v61, %v4897_v6  ;;  %v7330_v60 = vpop.f32.mrb[12].mxu0  ;;  %v8207_v6 = vld [vmem:[#allocation6 + $0x90] sm:$0xff] }
0x19f7   :  { %v4819_v24 = vadd.f32 %v8203_v17, %v7330_v60  ;;  %v4810_v29 = vpop.f32.mrb[13].mxu0  ;;  %v8208_v17 = vld [vmem:[#allocation6 + $0x80] sm:$0xff] }
0x19f8   :  { %v4811_v21 = vadd.f32 %v8204_v59, %v4810_v29  ;;  %v7331_v46 = vpop.f32.mrb[14].mxu0 }
0x19f9   :  { %v4822_v25 = vadd.f32 %v8205_v15, %v7331_v46  ;;  %v4813_v9 = vpop.f32.mrb[15].mxu0  ;;  %v4903_v19 = vmax.f32 %v4819_v24, 0.0 }
0x19fa   :  { %v4814_v52 = vadd.f32 %v8206_v51, %v4813_v9  ;;  %v4901_v30 = vmax.f32 %v4811_v21, 0.0 }
0x19fb   :  { %v4904_v18 = vmax.f32 %v4822_v25, 0.0 }
0x19fc   :  { %v4902_v13 = vmax.f32 %v4814_v52, 0.0 }
0x19fd   :  { %v10379_v57 = vpack.c.bf16 %v4904_v18, %v4903_v19 }
0x19fe   :  { %v10381_v20 = vpack.c.bf16 %v4902_v13, %v4901_v30  ;;  %v7334_v14 = vpop.f32.mrb[16].mxu0  ;;  %v8211_v30 = vld [vmem:[#allocation6 + $0xb0] sm:$0xff] }
0x19ff   :  { %v4835_v61 = vadd.f32 %v8207_v6, %v7334_v14  ;;  %v4826_v60 = vpop.f32.mrb[17].mxu0  ;;  %v8212_v14 = vld [vmem:[#allocation6 + $0xa0] sm:$0xff] }
0x1a00   :  { %v4827_v59 = vadd.f32 %v8208_v17, %v4826_v60  ;;  %v7335_v29 = vpop.f32.mrb[18].mxu0  ;;  %v8213_v60 = vld [vmem:[#allocation6 + $0xb8] sm:$0xff] }
0x1a01   :  { %v4838_v15 = vadd.f32 %v8209_v16, %v7335_v29  ;;  %v4829_v46 = vpop.f32.mrb[19].mxu0  ;;  %v4907_v24 = vmax.f32 %v4835_v61, 0.0 }
0x1a02   :  { %v4830_v51 = vadd.f32 %v8210_v50, %v4829_v46  ;;  %v4905_v21 = vmax.f32 %v4827_v59, 0.0  ;;  %v8214_v50 = vld [vmem:[#allocation6 + $0xa8] sm:$0xff] }
0x1a03   :  { %v4908_v25 = vmax.f32 %v4838_v15, 0.0 }
0x1a04   :  { %v4906_v9 = vmax.f32 %v4830_v51, 0.0 }
0x1a05   :  { %v4930_v52 = vpack.c.bf16 %v4908_v25, %v4907_v24 }
0x1a06   :  { %v4929_v19 = vpack.c.bf16 %v4906_v9, %v4905_v21  ;;  %v7338_v18 = vpop.f32.mrb[20].mxu0 }
0x1a07   :  { %v4851_v13 = vadd.f32 %v8211_v30, %v7338_v18  ;;  %v4842_v36 = vpop.f32.mrb[21].mxu0 }
0x1a08   :  { %v4843_v6 = vadd.f32 %v8212_v14, %v4842_v36  ;;  %v7339_v10 = vpop.f32.mrb[22].mxu0  ;;  %6729 = vmatprep.subr.bf16.mxu1 %v4929_v19  ;;  %v8215_v36 = vld [vmem:[#allocation6 + $0xd0] sm:$0xff]  ;;  %v8216_v19 = vld [vmem:[#allocation6 + $0xc0] sm:$0xff] }
0x1a09   :  { %v4854_v17 = vadd.f32 %v8213_v60, %v7339_v10  ;;  %v4845_v16 = vpop.f32.mrb[23].mxu0  ;;  %6730 = vmatpush3.bf16.msra.mxu1 %v10369_v2  ;;  %v4911_v59 = vmax.f32 %v4851_v13, 0.0  ;;  %v8217_v2 = vld [vmem:[#allocation6 + $0xd8] sm:$0xff] }
0x1a0a   :  { %v4846_v61 = vadd.f32 %v8214_v50, %v4845_v16  ;;  %6731 = vmatprep.subr.bf16.mxu1 %v4930_v52  ;;  %v4909_v15 = vmax.f32 %v4843_v6, 0.0  ;;  %v8218_v52 = vld [vmem:[#allocation6 + $0xc8] sm:$0xff] }
0x1a0b   :  { %v4912_v29 = vmax.f32 %v4854_v17, 0.0 }
0x1a0c   :  { %v4910_v46 = vmax.f32 %v4846_v61, 0.0 }
0x1a0d   :  { %v4932_v51 = vpack.c.bf16 %v4912_v29, %v4911_v59  ;;  %6732 = vmatpush3.bf16.msra.mxu1 %v10367_v38  ;;  %v8219_v59 = vld [vmem:[#allocation6 + $0xf0] sm:$0xff] }
0x1a0e   :  { %v4931_v24 = vpack.c.bf16 %v4910_v46, %v4909_v15  ;;  %v7342_v25 = vpop.f32.mrb[24].mxu0  ;;  %v8220_v46 = vld [vmem:[#allocation6 + $0xe0] sm:$0xff] }
0x1a0f   :  { %v4867_v21 = vadd.f32 %v8215_v36, %v7342_v25  ;;  %v4858_v9 = vpop.f32.mrb[25].mxu0 }
0x1a10   :  { %v4859_v10 = vadd.f32 %v8216_v19, %v4858_v9  ;;  %v7343_v18 = vpop.f32.mrb[26].mxu0  ;;  %6733 = vmatprep.subr.bf16.mxu1 %v4931_v24 }
0x1a11   :  { %v4870_v30 = vadd.f32 %v8217_v2, %v7343_v18  ;;  %v4861_v14 = vpop.f32.mrb[27].mxu0  ;;  %6734 = vmatpush3.bf16.msra.mxu1 %v10373_v35  ;;  %v4915_v6 = vmax.f32 %v4867_v21, 0.0  ;;  %v8221_v35 = vld [vmem:[#allocation6 + $0xf8] sm:$0xff] }
0x1a12   :  { %v4862_v13 = vadd.f32 %v8218_v52, %v4861_v14  ;;  %6735 = vmatprep.subr.bf16.mxu1 %v4932_v51  ;;  %v4913_v38 = vmax.f32 %v4859_v10, 0.0  ;;  %v8222_v51 = vld [vmem:[#allocation6 + $0xe8] sm:$0xff]  ;;  %v8225_v52 = vld [vmem:[#allocation9 + $0x10] ss:$8 sps:$4 sm:$0xff]  }
0x1a13   :  { %v4916_v60 = vmax.f32 %v4870_v30, 0.0  ;;  %v8223_v14 = vld [vmem:[#allocation9] ss:$8 sps:$4 sm:$0xff]  }
0x1a14   :  { %v4914_v17 = vmax.f32 %v4862_v13, 0.0  ;;  %v8226_v13 = vld [vmem:[#allocation9 + $0x24] ss:$8 sps:$4 sm:$0xff]  }
0x1a15   :  { %v4934_v16 = vpack.c.bf16 %v4916_v60, %v4915_v6  ;;  %6736 = vmatpush3.bf16.msra.mxu1 %v10371_v12  ;;  %v8227_v6 = vld [vmem:[#allocation9 + $0x20] ss:$8 sps:$4 sm:$0xff]   ;;  %v8228_v60 = vld [vmem:[#allocation9 + $0x34] ss:$8 sps:$4 sm:$0xff]  }
0x1a16   :  { %v4933_v50 = vpack.c.bf16 %v4914_v17, %v4913_v38  ;;  %v7346_v61 = vpop.f32.mrb[28].mxu0  ;;  %v8230_v38 = vld [vmem:[#allocation9 + $0x44] ss:$8 sps:$4 sm:$0xff]   ;;  %v8232_v17 = vld [vmem:[#allocation9 + $0x54] ss:$8 sps:$4 sm:$0xff]  }
0x1a17   :  { %v4883_v29 = vadd.f32 %v8219_v59, %v7346_v61  ;;  %v4874_v15 = vpop.f32.mrb[29].mxu0  ;;  %v8236_v61 = vld [vmem:[#allocation9 + $0x74] ss:$8 sps:$4 sm:$0xff]   ;;  %v8237_v59 = vld [vmem:[#allocation9 + $0x70] ss:$8 sps:$4 sm:$0xff]  }
0x1a18   :  { %v4875_v24 = vadd.f32 %v8220_v46, %v4874_v15  ;;  %v7347_v25 = vpop.f32.mrb[30].mxu0  ;;  %6737 = vmatprep.subr.bf16.mxu1 %v4933_v50  ;;  %v8235_v50 = vld [vmem:[#allocation9 + $0x60] ss:$8 sps:$4 sm:$0xff]   ;;  %v7920_v46 = vld [vmem:[#allocation11 + $0x230] sm:$0xff]  }
0x1a19   :  { %v4886_v36 = vadd.f32 %v8221_v35, %v7347_v25  ;;  %v4877_v9 = vpop.f32.mrb[31].mxu0  ;;  %6738 = vmatpush3.bf16.msra.mxu1 %v10377_v55  ;;  %v4919_v19 = vmax.f32 %v4883_v29, 0.0  ;;  %v8224_v55 = vld [vmem:[#allocation9 + $0x14] ss:$8 sps:$4 sm:$0xff]   ;;  %v7918_v29 = vld [vmem:[#allocation11 + $0x220] sm:$0xff]   ;;  %v7919_v15 = vld [vmem:[#allocation11 + $0x228] sm:$0xff]   ;;  %v10392_v25 = vstv %s5035_s2 }
0x1a1a   :  { %v4878_v21 = vadd.f32 %v8222_v51, %v4877_v9  ;;  %6739 = vmatprep.subr.bf16.mxu1 %v4934_v16  ;;  %v4917_v12 = vmax.f32 %v4875_v24, 0.0  ;;  %v8234_v16 = vld [vmem:[#allocation9 + $0x64] ss:$8 sps:$4 sm:$0xff]   ;;  %7356 = vmatprep.subr.bf16.mxu0 %v7918_v29  ;;  %v7921_v24 = vld [vmem:[#allocation11 + $0x238] sm:$0xff]   ;;  %v5037_v51 = vmul.f32 %v10392_v25, %v4702_v8  ;;  %v5040_v0 = vmul.f32 %v10392_v25, %v4705_v7 }
0x1a1b   :  { %v4920_v10 = vmax.f32 %v4886_v36, 0.0  ;;  %7357 = vmatpush3.bf16.msra.mxu0 %v7918_v29  ;;  %v5041_v62 = vmul.f32 %v10392_v25, %v4706_v47  ;;  %v5042_v39 = vmul.f32 %v10392_v25, %v4707_v37  ;;  %v5043_v3 = vmul.f32 %v10392_v25, %v4708_v53 }
0x1a1c   :  { %v4918_v18 = vmax.f32 %v4878_v21, 0.0  ;;  %7358 = vmatprep.subr.bf16.mxu0 %v7919_v15  ;;  %v5044_v1 = vmul.f32 %v10392_v25, %v4709_v22  ;;  %v5045_v54 = vmul.f32 %v10392_v25, %v4710_v28 }
0x1a1d   :  { %v4936_v2 = vpack.c.bf16 %v4920_v10, %v4919_v19  ;;  %6740 = vmatpush3.bf16.msra.mxu1 %v10375_v40  ;;  %v8229_v40 = vld [vmem:[#allocation9 + $0x30] ss:$8 sps:$4 sm:$0xff]  }
0x1a1e   :  { %v4935_v30 = vpack.c.bf16 %v4918_v18, %v4917_v12  ;;  %v5038_v18 = vmul.f32 %v10392_v25, %v4703_v11 }
0x1a1f   :  { %7359 = vmatpush3.bf16.msra.mxu0 %v7919_v15 }
0x1a20   :  { %6741 = vmatprep.subr.bf16.mxu1 %v4935_v30  ;;  %7360 = vmatprep.subr.bf16.mxu0 %v7920_v46 }
0x1a21   :  { %6742 = vmatpush3.bf16.msra.mxu1 %v10381_v20  ;;  %v8231_v20 = vld [vmem:[#allocation9 + $0x40] ss:$8 sps:$4 sm:$0xff]  }
0x1a22   :  { %6743 = vmatprep.subr.bf16.mxu1 %v4936_v2 }
0x1a23   :  { %7361 = vmatpush3.bf16.msra.mxu0 %v7920_v46 }
0x1a24   :  { %7362 = vmatprep.subr.bf16.mxu0 %v7921_v24 }
0x1a25   :  { %6744 = vmatpush3.bf16.msra.mxu1 %v10379_v57  ;;  %v8233_v57 = vld [vmem:[#allocation9 + $0x50] ss:$8 sps:$4 sm:$0xff]  }
0x1a27   :  { %7363 = vmatpush3.bf16.msra.mxu0 %v7921_v24 }
0x1a28   :  { %4970 = vmatmul.mubr.bf16.vlgmr.msra.gmra.mrb[144].mxu1 %v8223_v14 }
0x1a29   :  { %4977 = vmatprep.mubr.bf16.mxu1 %v8224_v55 }
0x1a30   :  { %4978 = vmatmul.mubr.bf16.gmra.mrb[148].mxu1 %v8225_v52 }
0x1a31   :  { %4985 = vmatprep.mubr.bf16.mxu1 %v8226_v13  ;;  %v5039_v13 = vmul.f32 %v10392_v25, %v4704_v44 }
0x1a38   :  { %4986 = vmatmul.mubr.bf16.gmra.mrb[152].mxu1 %v8227_v6 }
0x1a39   :  { %4993 = vmatprep.mubr.bf16.mxu1 %v8228_v60 }
0x1a40   :  { %4994 = vmatmul.mubr.bf16.gmra.mrb[156].mxu1 %v8229_v40 }
0x1a41   :  { %5001 = vmatprep.mubr.bf16.mxu1 %v8230_v38 }
0x1a48   :  { %5002 = vmatmul.mubr.bf16.gmra.mrb[160].mxu1 %v8231_v20 }
0x1a49   :  { %5009 = vmatprep.mubr.bf16.mxu1 %v8232_v17 }
0x1a50   :  { %5010 = vmatmul.mubr.bf16.gmra.mrb[164].mxu1 %v8233_v57 }
0x1a51   :  { %5017 = vmatprep.mubr.bf16.mxu1 %v8234_v16 }
0x1a58   :  { %5018 = vmatmul.mubr.bf16.gmra.mrb[168].mxu1 %v8235_v50 }
0x1a59   :  { %5025 = vmatprep.mubr.bf16.mxu1 %v8236_v61 }
0x1a60   :  { %5026 = vmatmul.mubr.bf16.gmra.mrb[172].mxu1 %v8237_v59 }
0x1a61   :  { %5323 = vmatprep.mubr.f32.mxu1 %v8450_v63 }
0x1afb   :  { %v6745_v35 = vpop.f32.mrb[144].mxu1 }
0x1afc   :  { %v6746_v36 = vpop.f32.mrb[145].mxu1 }
0x1afd   :  { %v6747_v9 = vadd.f32 %v6746_v36, %v6745_v35  ;;  %v6748_v21 = vpop.f32.mrb[146].mxu1 }
0x1afe   :  { %v6749_v19 = vpop.f32.mrb[147].mxu1 }
0x1aff   :  { %v5053_v10 = vadd.f32 %v6747_v9, %v5037_v51  ;;  %v6750_v12 = vadd.f32 %v6749_v19, %v6748_v21 }
0x1b01   :  { %v5054_v2 = vadd.f32 %v6750_v12, %v5038_v18  ;;  %v10843_v18 = vmax.f32 %v10323_v34, 0.0 }
0x1b03   :  { %v6751_v30 = vpop.f32.mrb[148].mxu1  ;;  %v5069_v14 = vpack.c.bf16 %v5054_v2, %v5053_v10  ;;  %v5046_v48 = vmul.f32 %v10392_v25, %v10843_v18 }
0x1b04   :  { %v6752_v55 = vpop.f32.mrb[149].mxu1 }
0x1b05   :  { %v6753_v52 = vadd.f32 %v6752_v55, %v6751_v30  ;;  %v6754_v49 = vpop.f32.mrb[150].mxu1  ;;  %7364 = vmatprep.mubr.bf16.mxu0 %v5069_v14 }
0x1b06   :  { %v6755_v8 = vpop.f32.mrb[151].mxu1 }
0x1b07   :  { %v5055_v6 = vadd.f32 %v6753_v52, %v5039_v13  ;;  %v6756_v60 = vadd.f32 %v6755_v8, %v6754_v49  ;;  %v10844_v52 = vmax.f32 %v10326_v31, 0.0 }
0x1b09   :  { %v5056_v40 = vadd.f32 %v6756_v60, %v5040_v0  ;;  %v5047_v5 = vmul.f32 %v10392_v25, %v10844_v52 }
0x1b0b   :  { %v5070_v11 = vpack.c.bf16 %v5056_v40, %v5055_v6  ;;  %v6757_v38 = vpop.f32.mrb[152].mxu1  ;;  %v10845_v6 = vmax.f32 %v10329_v56, 0.0 }
0x1b0c   :  { %v6758_v20 = vpop.f32.mrb[153].mxu1 }
0x1b0d   :  { %v6759_v17 = vadd.f32 %v6758_v20, %v6757_v38  ;;  %v6760_v57 = vpop.f32.mrb[154].mxu1  ;;  %7365 = vmatmul.mubr.bf16.vlgmr.msra.gmra.mrb[32].mxu0 %v5070_v11  ;;  %v5048_v34 = vmul.f32 %v10392_v25, %v10845_v6  ;;  %v10846_v20 = vmax.f32 %v10334_v41, 0.0 }
0x1b0e   :  { %v6761_v44 = vpop.f32.mrb[155].mxu1 }
0x1b0f   :  { %v5057_v16 = vadd.f32 %v6759_v17, %v5041_v62  ;;  %v6762_v50 = vadd.f32 %v6761_v44, %v6760_v57  ;;  %v5049_v31 = vmul.f32 %v10392_v25, %v10846_v20 }
0x1b11   :  { %v5058_v61 = vadd.f32 %v6762_v50, %v5042_v39 }
0x1b13   :  { %v6763_v7 = vpop.f32.mrb[156].mxu1  ;;  %v5071_v59 = vpack.c.bf16 %v5058_v61, %v5057_v16  ;;  %v10847_v16 = vmax.f32 %v10337_v27, 0.0 }
0x1b14   :  { %v6764_v29 = vpop.f32.mrb[157].mxu1 }
0x1b15   :  { %v6765_v15 = vadd.f32 %v6764_v29, %v6763_v7  ;;  %v6766_v46 = vpop.f32.mrb[158].mxu1  ;;  %7368 = vmatprep.mubr.bf16.mxu0 %v5071_v59  ;;  %v5050_v56 = vmul.f32 %v10392_v25, %v10847_v16  ;;  %v10848_v29 = vmax.f32 %v10342_v42, 0.0 }
0x1b16   :  { %v6767_v47 = vpop.f32.mrb[159].mxu1 }
0x1b17   :  { %v5059_v24 = vadd.f32 %v6765_v15, %v5043_v3  ;;  %v6768_v35 = vadd.f32 %v6767_v47, %v6766_v46  ;;  %v5051_v41 = vmul.f32 %v10392_v25, %v10848_v29 }
0x1b19   :  { %v5060_v36 = vadd.f32 %v6768_v35, %v5044_v1 }
0x1b1b   :  { %v5072_v37 = vpack.c.bf16 %v5060_v36, %v5059_v24  ;;  %v6769_v9 = vpop.f32.mrb[160].mxu1  ;;  %v10849_v24 = vmax.f32 %v10345_v23, 0.0  ;;  %v7922_v36 = vld [vmem:[#allocation11 + $0x240] sm:$0xff]  }
0x1b1c   :  { %v6770_v51 = vpop.f32.mrb[161].mxu1  ;;  %7380 = vmatprep.subr.bf16.mxu0 %v7922_v36 }
0x1b1d   :  { %v6771_v21 = vadd.f32 %v6770_v51, %v6769_v9  ;;  %v6772_v19 = vpop.f32.mrb[162].mxu1  ;;  %7369 = vmatmul.mubr.bf16.gmra.mrb[36].mxu0 %v5072_v37  ;;  %v5052_v27 = vmul.f32 %v10392_v25, %v10849_v24  ;;  %v10442_v37 = vld [vmem:[#allocation12 + $0x20] sm:$0xff] }
0x1b1e   :  { %v6773_v53 = vpop.f32.mrb[163].mxu1  ;;  %7381 = vmatpush3.bf16.msra.mxu0 %v7922_v36  ;;  %v10446_v42 = vrot.slane %v10442_v37, %v8683_v4 }
0x1b1f   :  { %v5061_v10 = vadd.f32 %v6771_v21, %v5045_v54  ;;  %v6774_v12 = vadd.f32 %v6773_v53, %v6772_v19 }
0x1b21   :  { %v5062_v2 = vadd.f32 %v6774_v12, %v5046_v48 }
0x1b23   :  { %v6775_v22 = vpop.f32.mrb[164].mxu1  ;;  %v5073_v30 = vpack.c.bf16 %v5062_v2, %v5061_v10 }
0x1b24   :  { %v6776_v14 = vpop.f32.mrb[165].mxu1 }
0x1b25   :  { %v6777_v55 = vadd.f32 %v6776_v14, %v6775_v22  ;;  %v6778_v13 = vpop.f32.mrb[166].mxu1  ;;  %7372 = vmatprep.mubr.bf16.mxu0 %v5073_v30 }
0x1b26   :  { %v6779_v28 = vpop.f32.mrb[167].mxu1 }
0x1b27   :  { %v5063_v49 = vadd.f32 %v6777_v55, %v5047_v5  ;;  %v6780_v8 = vadd.f32 %v6779_v28, %v6778_v13 }
0x1b29   :  { %v5064_v60 = vadd.f32 %v6780_v8, %v5048_v34 }
0x1b2b   :  { %v5074_v0 = vpack.c.bf16 %v5064_v60, %v5063_v49  ;;  %v6781_v40 = vpop.f32.mrb[168].mxu1 }
0x1b2c   :  { %v6782_v11 = vpop.f32.mrb[169].mxu1 }
0x1b2d   :  { %v6783_v38 = vadd.f32 %v6782_v11, %v6781_v40  ;;  %v6784_v17 = vpop.f32.mrb[170].mxu1  ;;  %7373 = vmatmul.mubr.bf16.gmra.mrb[40].mxu0 %v5074_v0 }
0x1b2e   :  { %v6785_v62 = vpop.f32.mrb[171].mxu1 }
0x1b2f   :  { %v5065_v57 = vadd.f32 %v6783_v38, %v5049_v31  ;;  %v6786_v44 = vadd.f32 %v6785_v62, %v6784_v17 }
0x1b31   :  { %v5066_v50 = vadd.f32 %v6786_v44, %v5050_v56 }
0x1b33   :  { %v6787_v39 = vpop.f32.mrb[172].mxu1  ;;  %v5075_v61 = vpack.c.bf16 %v5066_v50, %v5065_v57 }
0x1b34   :  { %v6788_v7 = vpop.f32.mrb[173].mxu1 }
0x1b35   :  { %v6789_v59 = vadd.f32 %v6788_v7, %v6787_v39  ;;  %v6790_v15 = vpop.f32.mrb[174].mxu1  ;;  %7376 = vmatprep.mubr.bf16.mxu0 %v5075_v61 }
0x1b36   :  { %v6791_v3 = vpop.f32.mrb[175].mxu1 }
0x1b37   :  { %v5067_v46 = vadd.f32 %v6789_v59, %v5051_v41  ;;  %v6792_v47 = vadd.f32 %v6791_v3, %v6790_v15 }
0x1b39   :  { %v5068_v35 = vadd.f32 %v6792_v47, %v5052_v27 }
0x1b3b   :  { %v5076_v1 = vpack.c.bf16 %v5068_v35, %v5067_v46 }
0x1b3d   :  { %7377 = vmatmul.mubr.bf16.gmra.mrb[44].mxu0 %v5076_v1 }
0x1be0   :  { %v7366_v9 = vpop.f32.mrb[32].mxu0 }
0x1be1   :  { %v5180_v51 = vpop.f32.mrb[33].mxu0  ;;  %v10455_v19 = vadd.f32 %v7366_v9, %v10446_v42 }
0x1be2   :  { %v10449_v21 = vadd.f32 %v5180_v51, %v10446_v42  ;;  %v7367_v23 = vpop.f32.mrb[34].mxu0 }
0x1be3   :  { %v10452_v25 = vadd.f32 %v7367_v23, %v10446_v42  ;;  %v5183_v54 = vpop.f32.mrb[35].mxu0  ;;  %v5245_v48 = vmul.f32 %v10455_v19, %v10455_v19 }
0x1be4   :  { %v10458_v53 = vadd.f32 %v5183_v54, %v10446_v42  ;;  %v5243_v10 = vmul.f32 %v10449_v21, %v10449_v21 }
0x1be5   :  { %v5246_v12 = vmul.f32 %v10452_v25, %v10452_v25  ;;  %v7734_v14 = vpack.c.bf16 %v10452_v25, %v10455_v19 }
0x1be6   :  { %v5244_v18 = vmul.f32 %v10458_v53, %v10458_v53  ;;  %v7730_v22 = vpack.c.bf16 %v10458_v53, %v10449_v21 }
0x1be7   :  { %v7732_v30 = vpack.c.bf16 %v5246_v12, %v5245_v48 }
0x1be8   :  { %v7728_v2 = vpack.c.bf16 %v5244_v18, %v5243_v10 }
0x1bea   :  { %7729 = vmatprep.subr.bf16.mxu1 %v7728_v2 }
0x1beb   :  { %7731 = vmatpush1.bf16.msra.mxu1 %v7730_v22  ;;  %v7923_v22 = vld [vmem:[#allocation11 + $0x248] sm:$0xff]  }
0x1bec   :  { %7733 = vmatprep.subr.bf16.mxu1 %v7732_v30  ;;  %7382 = vmatprep.subr.bf16.mxu0 %v7923_v22  ;;  %v7924_v30 = vld [vmem:[#allocation11 + $0x250] sm:$0xff]  }
0x1bed   :  { %7383 = vmatpush3.bf16.msra.mxu0 %v7923_v22 }
0x1bee   :  { %7384 = vmatprep.subr.bf16.mxu0 %v7924_v30 }
0x1bef   :  { %7735 = vmatpush1.bf16.msra.mxu1 %v7734_v14  ;;  %v7925_v14 = vld [vmem:[#allocation11 + $0x258] sm:$0xff]  }
0x1bf0   :  { %v7370_v55 = vpop.f32.mrb[36].mxu0 }
0x1bf1   :  { %v5196_v52 = vpop.f32.mrb[37].mxu0  ;;  %v10479_v8 = vadd.f32 %v7370_v55, %v10446_v42  ;;  %7385 = vmatpush3.bf16.msra.mxu0 %v7924_v30  ;;  %v7926_v55 = vld [vmem:[#allocation11 + $0x260] sm:$0xff]  }
0x1bf2   :  { %v10473_v5 = vadd.f32 %v5196_v52, %v10446_v42  ;;  %v7371_v13 = vpop.f32.mrb[38].mxu0  ;;  %7386 = vmatprep.subr.bf16.mxu0 %v7925_v14  ;;  %v7927_v52 = vld [vmem:[#allocation11 + $0x268] sm:$0xff]  }
0x1bf3   :  { %v10476_v28 = vadd.f32 %v7371_v13, %v10446_v42  ;;  %v5199_v49 = vpop.f32.mrb[39].mxu0  ;;  %v5249_v40 = vmul.f32 %v10479_v8, %v10479_v8  ;;  %v7928_v13 = vld [vmem:[#allocation11 + $0x270] sm:$0xff]  }
0x1bf4   :  { %v10482_v6 = vadd.f32 %v5199_v49, %v10446_v42  ;;  %v5247_v34 = vmul.f32 %v10473_v5, %v10473_v5  ;;  %v7929_v49 = vld [vmem:[#allocation11 + $0x278] sm:$0xff]  }
0x1bf5   :  { %v5250_v60 = vmul.f32 %v10476_v28, %v10476_v28  ;;  %v7742_v31 = vpack.c.bf16 %v10476_v28, %v10479_v8  ;;  %7387 = vmatpush3.bf16.msra.mxu0 %v7925_v14 }
0x1bf6   :  { %v5248_v0 = vmul.f32 %v10482_v6, %v10482_v6  ;;  %v7738_v38 = vpack.c.bf16 %v10482_v6, %v10473_v5  ;;  %7388 = vmatprep.subr.bf16.mxu0 %v7926_v55 }
0x1bf7   :  { %v7740_v20 = vpack.c.bf16 %v5250_v60, %v5249_v40 }
0x1bf8   :  { %v7736_v11 = vpack.c.bf16 %v5248_v0, %v5247_v34 }
0x1bf9   :  { %7389 = vmatpush3.bf16.msra.mxu0 %v7926_v55 }
0x1bfa   :  { %7737 = vmatprep.subr.bf16.mxu1 %v7736_v11  ;;  %7390 = vmatprep.subr.bf16.mxu0 %v7927_v52 }
0x1bfb   :  { %7739 = vmatpush1.bf16.msra.mxu1 %v7738_v38 }
0x1bfc   :  { %7741 = vmatprep.subr.bf16.mxu1 %v7740_v20 }
0x1bfd   :  { %7391 = vmatpush3.bf16.msra.mxu0 %v7927_v52 }
0x1bfe   :  { %7392 = vmatprep.subr.bf16.mxu0 %v7928_v13 }
0x1bff   :  { %7743 = vmatpush1.bf16.msra.mxu1 %v7742_v31 }
0x1c00   :  { %v7374_v17 = vpop.f32.mrb[40].mxu0 }
0x1c01   :  { %v5212_v62 = vpop.f32.mrb[41].mxu0  ;;  %v10503_v50 = vadd.f32 %v7374_v17, %v10446_v42  ;;  %7393 = vmatpush3.bf16.msra.mxu0 %v7928_v13  ;;  %v5356_v17 = vrot.slane %v10442_v37, %v8791_v32 }
0x1c02   :  { %v10497_v57 = vadd.f32 %v5212_v62, %v10446_v42  ;;  %v7375_v44 = vpop.f32.mrb[42].mxu0  ;;  %7394 = vmatprep.subr.bf16.mxu0 %v7929_v49  ;;  %v10553_v62 = vrot.slane %v10442_v37, %v8794_v33 }
0x1c03   :  { %v10500_v16 = vadd.f32 %v7375_v44, %v10446_v42  ;;  %v5215_v56 = vpop.f32.mrb[43].mxu0  ;;  %v5253_v29 = vmul.f32 %v10503_v50, %v10503_v50 }
0x1c04   :  { %v10506_v39 = vadd.f32 %v5215_v56, %v10446_v42  ;;  %v5251_v61 = vmul.f32 %v10497_v57, %v10497_v57 }
0x1c05   :  { %v5254_v7 = vmul.f32 %v10500_v16, %v10500_v16  ;;  %v7750_v46 = vpack.c.bf16 %v10500_v16, %v10503_v50  ;;  %7395 = vmatpush3.bf16.msra.mxu0 %v7929_v49 }
0x1c06   :  { %v5252_v59 = vmul.f32 %v10506_v39, %v10506_v39  ;;  %v7746_v15 = vpack.c.bf16 %v10506_v39, %v10497_v57  ;;  %7412 = vmatprep.subr.bf16.mxu0 %v8450_v63 }
0x1c07   :  { %v7748_v3 = vpack.c.bf16 %v5254_v7, %v5253_v29 }
0x1c08   :  { %v7744_v41 = vpack.c.bf16 %v5252_v59, %v5251_v61 }
0x1c0a   :  { %7745 = vmatprep.subr.bf16.mxu1 %v7744_v41 }
0x1c0b   :  { %7747 = vmatpush1.bf16.msra.mxu1 %v7746_v15 }
0x1c0c   :  { %7749 = vmatprep.subr.bf16.mxu1 %v7748_v3 }
0x1c0f   :  { %7751 = vmatpush1.bf16.msra.mxu1 %v7750_v46 }
0x1c10   :  { %v7378_v47 = vpop.f32.mrb[44].mxu0 }
0x1c11   :  { %v5228_v24 = vpop.f32.mrb[45].mxu0  ;;  %v10527_v9 = vadd.f32 %v7378_v47, %v10446_v42 }
0x1c12   :  { %v10521_v27 = vadd.f32 %v5228_v24, %v10446_v42  ;;  %v7379_v35 = vpop.f32.mrb[46].mxu0 }
0x1c13   :  { %v10524_v1 = vadd.f32 %v7379_v35, %v10446_v42  ;;  %v5231_v36 = vpop.f32.mrb[47].mxu0  ;;  %v5257_v12 = vmul.f32 %v10527_v9, %v10527_v9 }
0x1c14   :  { %v10530_v51 = vadd.f32 %v5231_v36, %v10446_v42  ;;  %v5255_v23 = vmul.f32 %v10521_v27, %v10521_v27 }
0x1c15   :  { %v5258_v54 = vmul.f32 %v10524_v1, %v10524_v1  ;;  %v7758_v42 = vpack.c.bf16 %v10524_v1, %v10527_v9 }
0x1c16   :  { %v5256_v10 = vmul.f32 %v10530_v51, %v10530_v51  ;;  %v7754_v48 = vpack.c.bf16 %v10530_v51, %v10521_v27 }
0x1c17   :  { %v7756_v2 = vpack.c.bf16 %v5258_v54, %v5257_v12 }
0x1c18   :  { %v7752_v18 = vpack.c.bf16 %v5256_v10, %v5255_v23 }
0x1c1a   :  { %7753 = vmatprep.subr.bf16.mxu1 %v7752_v18 }
0x1c1b   :  { %7755 = vmatpush1.bf16.msra.mxu1 %v7754_v48 }
0x1c1c   :  { %7757 = vmatprep.subr.bf16.mxu1 %v7756_v2 }
0x1c1f   :  { %7759 = vmatpush1.bf16.msra.mxu1 %v7758_v42 }
0x1c22   :  { %5324 = vmatmul.mubr.f32.vlgmr.msra.gmra.mrb[176].mxu1 %v10828_v26 }
0x1c23   :  { %5685 = vmatprep.mubr.f32.mxu1 %v8450_v63 }
0x1cf5   :  { %v5325_v34 = vpop.f32.mrb[176].mxu1 }
0x1cf6   :  { %v5330_v60 = vmul.f32 %v5325_v34, %v5325_v34  ;;  %v5327_v0 = vpop.f32.mrb[177].mxu1  ;;  %v5336_v20 = vrot.slane %v5325_v34, %v8683_v4 }
0x1cf8   :  { %v5331_v40 = vsub.f32 %v5327_v0, %v5330_v60  ;;  %v5337_v31 = vsub.f32 %v10449_v21, %v5336_v20  ;;  %v5338_v44 = vsub.f32 %v10458_v53, %v5336_v20  ;;  %v5339_v56 = vsub.f32 %v10455_v19, %v5336_v20 }
0x1cf9   :  { %v5340_v61 = vsub.f32 %v10452_v25, %v5336_v20  ;;  %v5341_v7 = vsub.f32 %v10473_v5, %v5336_v20  ;;  %v5342_v59 = vsub.f32 %v10482_v6, %v5336_v20  ;;  %v5343_v29 = vsub.f32 %v10479_v8, %v5336_v20 }
0x1cfa   :  { %v5332_v11 = vmax.f32 %v5331_v40, 0.0  ;;  %v5344_v21 = vsub.f32 %v10476_v28, %v5336_v20  ;;  %v5345_v32 = vsub.f32 %v10497_v57, %v5336_v20  ;;  %v5357_v41 = vmul.f32 %v5356_v17, %v5337_v31 }
0x1cfb   :  { %v5346_v33 = vsub.f32 %v10506_v39, %v5336_v20  ;;  %v5347_v15 = vsub.f32 %v10503_v50, %v5336_v20  ;;  %v5348_v53 = vsub.f32 %v10500_v16, %v5336_v20  ;;  %v5349_v19 = vsub.f32 %v10521_v27, %v5336_v20 }
0x1cfc   :  { %v5373_v38 = vadd.f32 1e-05, %v5332_v11  ;;  %v5350_v25 = vsub.f32 %v10530_v51, %v5336_v20  ;;  %v5351_v5 = vsub.f32 %v10527_v9, %v5336_v20  ;;  %v5352_v6 = vsub.f32 %v10524_v1, %v5336_v20 }
0x1cfd   :  { %v5358_v8 = vmul.f32 %v5356_v17, %v5338_v44  ;;  %v5359_v3 = vmul.f32 %v5356_v17, %v5339_v56  ;;  %v5360_v28 = vmul.f32 %v5356_v17, %v5340_v61  ;;  %v5361_v46 = vmul.f32 %v5356_v17, %v5341_v7 }
0x1cfe   :  { %7962 = vrsqrt.f32 %v5373_v38  ;;  %v5362_v47 = vmul.f32 %v5356_v17, %v5342_v59  ;;  %v5363_v24 = vmul.f32 %v5356_v17, %v5343_v29  ;;  %v5364_v39 = vmul.f32 %v5356_v17, %v5344_v21 }
0x1cff   :  { %v5365_v35 = vmul.f32 %v5356_v17, %v5345_v32  ;;  %v5366_v16 = vmul.f32 %v5356_v17, %v5346_v33  ;;  %v5367_v36 = vmul.f32 %v5356_v17, %v5347_v15  ;;  %v5368_v27 = vmul.f32 %v5356_v17, %v5348_v53 }
0x1d00   :  { %v5369_v23 = vmul.f32 %v5356_v17, %v5349_v19  ;;  %v5370_v51 = vmul.f32 %v5356_v17, %v5350_v25  ;;  %v5371_v54 = vmul.f32 %v5356_v17, %v5351_v5  ;;  %v5372_v9 = vmul.f32 %v5356_v17, %v5352_v6 }
0x1d08   :  { %v7963_v57 = vpop.eup %7962 }
0x1d09   :  { %v5378_v50 = vrot.slane %v7963_v57, %v8683_v4 }
0x1d0b   :  { %v5379_v10 = vmul.f32 %v5378_v50, %v5357_v41  ;;  %v5380_v1 = vmul.f32 %v5378_v50, %v5358_v8  ;;  %v5381_v12 = vmul.f32 %v5378_v50, %v5359_v3  ;;  %v5382_v18 = vmul.f32 %v5378_v50, %v5360_v28 }
0x1d0c   :  { %v5383_v48 = vmul.f32 %v5378_v50, %v5361_v46  ;;  %v5384_v2 = vmul.f32 %v5378_v50, %v5362_v47  ;;  %v5385_v42 = vmul.f32 %v5378_v50, %v5363_v24  ;;  %v5386_v22 = vmul.f32 %v5378_v50, %v5364_v39 }
0x1d0d   :  { %v5399_v30 = vadd.f32 %v10553_v62, %v5379_v10  ;;  %v5400_v14 = vadd.f32 %v10553_v62, %v5380_v1  ;;  %v5401_v55 = vadd.f32 %v10553_v62, %v5381_v12  ;;  %v5402_v52 = vadd.f32 %v10553_v62, %v5382_v18 }
0x1d0e   :  { %v5403_v13 = vadd.f32 %v10553_v62, %v5383_v48  ;;  %v5404_v49 = vadd.f32 %v10553_v62, %v5384_v2  ;;  %v5405_v34 = vadd.f32 %v10553_v62, %v5385_v42  ;;  %v5406_v60 = vadd.f32 %v10553_v62, %v5386_v22 }
0x1d0f   :  { %v5415_v0 = vmax.f32 %v5399_v30, 0.0  ;;  %v5416_v40 = vmax.f32 %v5400_v14, 0.0  ;;  %v5417_v11 = vmax.f32 %v5401_v55, 0.0  ;;  %v5418_v38 = vmax.f32 %v5402_v52, 0.0 }
0x1d10   :  { %v5419_v20 = vmax.f32 %v5403_v13, 0.0  ;;  %v5420_v31 = vmax.f32 %v5404_v49, 0.0  ;;  %v5421_v17 = vmax.f32 %v5405_v34, 0.0  ;;  %v5422_v44 = vmax.f32 %v5406_v60, 0.0 }
0x1d11   :  { %v5431_v56 = vpack.c.bf16 %v5416_v40, %v5415_v0  ;;  %v5432_v61 = vpack.c.bf16 %v5418_v38, %v5417_v11  ;;  %v5387_v7 = vmul.f32 %v5378_v50, %v5365_v35  ;;  %v5388_v59 = vmul.f32 %v5378_v50, %v5366_v16 }
0x1d12   :  { %v5433_v29 = vpack.c.bf16 %v5420_v31, %v5419_v20  ;;  %v5434_v21 = vpack.c.bf16 %v5422_v44, %v5421_v17  ;;  %v5389_v32 = vmul.f32 %v5378_v50, %v5367_v36  ;;  %v5390_v41 = vmul.f32 %v5378_v50, %v5368_v27 }
0x1d13   :  { %7396 = vmatprep.mubr.bf16.mxu0 %v5431_v56  ;;  %v5407_v33 = vadd.f32 %v10553_v62, %v5387_v7  ;;  %v5408_v15 = vadd.f32 %v10553_v62, %v5388_v59  ;;  %v5391_v53 = vmul.f32 %v5378_v50, %v5369_v23  ;;  %v5392_v19 = vmul.f32 %v5378_v50, %v5370_v51 }
0x1d14   :  { %7397 = vmatmul.mubr.bf16.vlgmr.msra.gmra.mrb[48].mxu0 %v5432_v61  ;;  %v5409_v25 = vadd.f32 %v10553_v62, %v5389_v32  ;;  %v5410_v5 = vadd.f32 %v10553_v62, %v5390_v41  ;;  %v5393_v6 = vmul.f32 %v5378_v50, %v5371_v54  ;;  %v5394_v8 = vmul.f32 %v5378_v50, %v5372_v9 }
0x1d15   :  { %7400 = vmatprep.mubr.bf16.mxu0 %v5433_v29  ;;  %v5423_v3 = vmax.f32 %v5407_v33, 0.0  ;;  %v5424_v28 = vmax.f32 %v5408_v15, 0.0  ;;  %v5411_v46 = vadd.f32 %v10553_v62, %v5391_v53  ;;  %v5412_v57 = vadd.f32 %v10553_v62, %v5392_v19 }
0x1d16   :  { %v5425_v47 = vmax.f32 %v5409_v25, 0.0  ;;  %v5426_v24 = vmax.f32 %v5410_v5, 0.0  ;;  %v5413_v39 = vadd.f32 %v10553_v62, %v5393_v6  ;;  %v5414_v35 = vadd.f32 %v10553_v62, %v5394_v8 }
0x1d17   :  { %v5435_v16 = vpack.c.bf16 %v5424_v28, %v5423_v3  ;;  %v5427_v36 = vmax.f32 %v5411_v46, 0.0  ;;  %v5428_v27 = vmax.f32 %v5412_v57, 0.0  ;;  %v10589_v10 = vrot.slane %v10442_v37, %v8836_v58 }
0x1d18   :  { %v5436_v23 = vpack.c.bf16 %v5426_v24, %v5425_v47  ;;  %v5429_v51 = vmax.f32 %v5413_v39, 0.0  ;;  %v5430_v54 = vmax.f32 %v5414_v35, 0.0 }
0x1d19   :  { %v5437_v50 = vpack.c.bf16 %v5428_v27, %v5427_v36 }
0x1d1a   :  { %v5438_v9 = vpack.c.bf16 %v5430_v54, %v5429_v51 }
0x1d1c   :  { %7401 = vmatmul.mubr.bf16.gmra.mrb[52].mxu0 %v5434_v21 }
0x1d1d   :  { %7404 = vmatprep.mubr.bf16.mxu0 %v5435_v16 }
0x1d24   :  { %7405 = vmatmul.mubr.bf16.gmra.mrb[56].mxu0 %v5436_v23 }
0x1d25   :  { %7408 = vmatprep.mubr.bf16.mxu0 %v5437_v50 }
0x1d2c   :  { %7409 = vmatmul.mubr.bf16.gmra.mrb[60].mxu0 %v5438_v9 }
0x1d2d   :  { %7428 = vmatprep.mubr.msk.bf16.mxu0 %vm8452_vm0, %v8450_v63 }
0x1de7   :  { %v7398_v1 = vpop.f32.mrb[48].mxu0 }
0x1de8   :  { %v5542_v12 = vpop.f32.mrb[49].mxu0  ;;  %v10598_v42 = vadd.f32 %v7398_v1, %v10589_v10 }
0x1de9   :  { %v10592_v62 = vadd.f32 %v5542_v12, %v10589_v10  ;;  %v7399_v18 = vpop.f32.mrb[50].mxu0 }
0x1dea   :  { %v10595_v48 = vadd.f32 %v7399_v18, %v10589_v10  ;;  %v5545_v2 = vpop.f32.mrb[51].mxu0  ;;  %v5607_v55 = vmul.f32 %v10598_v42, %v10598_v42 }
0x1deb   :  { %v10601_v22 = vadd.f32 %v5545_v2, %v10589_v10  ;;  %v5605_v58 = vmul.f32 %v10592_v62, %v10592_v62 }
0x1dec   :  { %v5608_v30 = vmul.f32 %v10595_v48, %v10595_v48  ;;  %v7766_v17 = vpack.c.bf16 %v10595_v48, %v10598_v42 }
0x1ded   :  { %v5606_v14 = vmul.f32 %v10601_v22, %v10601_v22  ;;  %v7762_v49 = vpack.c.bf16 %v10601_v22, %v10592_v62 }
0x1dee   :  { %v7764_v40 = vpack.c.bf16 %v5608_v30, %v5607_v55  ;;  %v7930_v55 = vld [vmem:[#allocation14] sm:$0xff]  }
0x1def   :  { %v7402_v52 = vpop.f32.mrb[52].mxu0  ;;  %v7760_v13 = vpack.c.bf16 %v5606_v14, %v5605_v58  ;;  %v5842_v14 = vld [vmem:[%s10786_s5] sm:$0xff] }
0x1df0   :  { %v5558_v34 = vpop.f32.mrb[53].mxu0  ;;  %v10620_v20 = vadd.f32 %v7402_v52, %v10589_v10  ;;  %v8453_v52 = vmov 0  }
0x1df1   :  { %v10614_v60 = vadd.f32 %v5558_v34, %v10589_v10  ;;  %v7403_v0 = vpop.f32.mrb[54].mxu0  ;;  %7761 = vmatprep.subr.bf16.mxu1 %v7760_v13  ;;  %7809 = vset.pattern.permute.xlu0 %v8453_v52  ;;  %v7931_v13 = vld [vmem:[#allocation14 + $0x8] sm:$0xff]   ;;  %v7934_v34 = vld [vmem:[#allocation14 + $0x20] sm:$0xff]  }
0x1df2   :  { %v10617_v11 = vadd.f32 %v7403_v0, %v10589_v10  ;;  %v5561_v38 = vpop.f32.mrb[55].mxu0  ;;  %7763 = vmatpush1.bf16.msra.mxu1 %v7762_v49  ;;  %v5611_v7 = vmul.f32 %v10620_v20, %v10620_v20  ;;  %5845 = vperm.xlu0 %7809, %v5842_v14   ;;  %v7933_v49 = vld [vmem:[#allocation14 + $0x18] sm:$0xff]   ;;  %v7935_v0 = vld [vmem:[#allocation14 + $0x28] sm:$0xff]  }
0x1df3   :  { %v10623_v31 = vadd.f32 %v5561_v38, %v10589_v10  ;;  %7765 = vmatprep.subr.bf16.mxu1 %v7764_v40  ;;  %v5609_v44 = vmul.f32 %v10614_v60, %v10614_v60  ;;  %v7936_v40 = vld [vmem:[#allocation14 + $0x30] sm:$0xff]  }
0x1df4   :  { %v5612_v56 = vmul.f32 %v10617_v11, %v10617_v11  ;;  %v7774_v6 = vpack.c.bf16 %v10617_v11, %v10620_v20 }
0x1df5   :  { %v5610_v61 = vmul.f32 %v10623_v31, %v10623_v31  ;;  %v7770_v21 = vpack.c.bf16 %v10623_v31, %v10614_v60 }
0x1df6   :  { %7767 = vmatpush1.bf16.msra.mxu1 %v7766_v17  ;;  %v7772_v15 = vpack.c.bf16 %v5612_v56, %v5611_v7 }
0x1df7   :  { %v7406_v59 = vpop.f32.mrb[56].mxu0  ;;  %v7768_v29 = vpack.c.bf16 %v5610_v61, %v5609_v44 }
0x1df8   :  { %v5574_v32 = vpop.f32.mrb[57].mxu0  ;;  %v10644_v25 = vadd.f32 %v7406_v59, %v10589_v10 }
0x1df9   :  { %v10638_v41 = vadd.f32 %v5574_v32, %v10589_v10  ;;  %v7407_v33 = vpop.f32.mrb[58].mxu0  ;;  %7769 = vmatprep.subr.bf16.mxu1 %v7768_v29  ;;  %v10709_v32 = vrot.slane %v10442_v37, %v8944_v45 }
0x1dfa   :  { %v10641_v53 = vadd.f32 %v7407_v33, %v10589_v10  ;;  %v5577_v19 = vpop.f32.mrb[59].mxu0  ;;  %7771 = vmatpush1.bf16.msra.mxu1 %v7770_v21  ;;  %v5615_v46 = vmul.f32 %v10644_v25, %v10644_v25  ;;  %v5718_v21 = vrot.slane %v10442_v37, %v8941_v43 }
0x1dfb   :  { %v10647_v5 = vadd.f32 %v5577_v19, %v10589_v10  ;;  %7773 = vmatprep.subr.bf16.mxu1 %v7772_v15  ;;  %v5613_v8 = vmul.f32 %v10638_v41, %v10638_v41 }
0x1dfc   :  { %v5616_v3 = vmul.f32 %v10641_v53, %v10641_v53  ;;  %v7782_v50 = vpack.c.bf16 %v10641_v53, %v10644_v25 }
0x1dfd   :  { %v5614_v28 = vmul.f32 %v10647_v5, %v10647_v5  ;;  %v7778_v24 = vpack.c.bf16 %v10647_v5, %v10638_v41 }
0x1dfe   :  { %7775 = vmatpush1.bf16.msra.mxu1 %v7774_v6  ;;  %v7780_v36 = vpack.c.bf16 %v5616_v3, %v5615_v46 }
0x1dff   :  { %v7410_v57 = vpop.f32.mrb[60].mxu0  ;;  %v7776_v47 = vpack.c.bf16 %v5614_v28, %v5613_v8 }
0x1e00   :  { %v5590_v39 = vpop.f32.mrb[61].mxu0  ;;  %v10668_v51 = vadd.f32 %v7410_v57, %v10589_v10 }
0x1e01   :  { %v10662_v35 = vadd.f32 %v5590_v39, %v10589_v10  ;;  %v7411_v16 = vpop.f32.mrb[62].mxu0  ;;  %7777 = vmatprep.subr.bf16.mxu1 %v7776_v47 }
0x1e02   :  { %v10665_v27 = vadd.f32 %v7411_v16, %v10589_v10  ;;  %v5593_v23 = vpop.f32.mrb[63].mxu0  ;;  %7779 = vmatpush1.bf16.msra.mxu1 %v7778_v24  ;;  %v5619_v18 = vmul.f32 %v10668_v51, %v10668_v51 }
0x1e03   :  { %v10671_v54 = vadd.f32 %v5593_v23, %v10589_v10  ;;  %7781 = vmatprep.subr.bf16.mxu1 %v7780_v36  ;;  %v5617_v9 = vmul.f32 %v10662_v35, %v10662_v35 }
0x1e04   :  { %v5620_v1 = vmul.f32 %v10665_v27, %v10665_v27  ;;  %v7790_v30 = vpack.c.bf16 %v10665_v27, %v10668_v51 }
0x1e05   :  { %v5618_v12 = vmul.f32 %v10671_v54, %v10671_v54  ;;  %v7786_v10 = vpack.c.bf16 %v10671_v54, %v10662_v35 }
0x1e06   :  { %7783 = vmatpush1.bf16.msra.mxu1 %v7782_v50  ;;  %v7788_v58 = vpack.c.bf16 %v5620_v1, %v5619_v18 }
0x1e07   :  { %v7784_v2 = vpack.c.bf16 %v5618_v12, %v5617_v9 }
0x1e09   :  { %7785 = vmatprep.subr.bf16.mxu1 %v7784_v2 }
0x1e0a   :  { %7787 = vmatpush1.bf16.msra.mxu1 %v7786_v10 }
0x1e0b   :  { %7789 = vmatprep.subr.bf16.mxu1 %v7788_v58 }
0x1e0e   :  { %7791 = vmatpush1.bf16.msra.mxu1 %v7790_v30 }
0x1e0f   :  { %7432 = vmatprep.subr.bf16.mxu1 %v8450_v63 }
0x1e11   :  { %5686 = vmatmul.mubr.f32.vlgmr.msra.gmra.mrb[178].mxu1 %v10828_v26  ;;  %v7932_v26 = vld [vmem:[#allocation14 + $0x10] sm:$0xff]  }
0x1e12   :  { %7448 = vmatprep.mubr.msk.bf16.mxu1 %vm8452_vm0, %v8450_v63  ;;  %7433 = vmatpush3.bf16.msra.mxu1 %v7930_v55 }
0x1e13   :  { %7434 = vmatprep.subr.bf16.mxu1 %v8450_v63 }
0x1e16   :  { %7435 = vmatpush3.bf16.msra.mxu1 %v7931_v13 }
0x1e17   :  { %7436 = vmatprep.subr.bf16.mxu1 %v8450_v63 }
0x1e1a   :  { %7437 = vmatpush3.bf16.msra.mxu1 %v7932_v26 }
0x1e1b   :  { %7438 = vmatprep.subr.bf16.mxu1 %v8450_v63 }
0x1e1e   :  { %7439 = vmatpush3.bf16.msra.mxu1 %v7933_v49 }
0x1e1f   :  { %7440 = vmatprep.subr.bf16.mxu1 %v8450_v63 }
0x1e22   :  { %7441 = vmatpush3.bf16.msra.mxu1 %v7934_v34 }
0x1e23   :  { %7442 = vmatprep.subr.bf16.mxu1 %v8450_v63 }
0x1e26   :  { %7443 = vmatpush3.bf16.msra.mxu1 %v7935_v0 }
0x1e27   :  { %7444 = vmatprep.subr.bf16.mxu1 %v8450_v63 }
0x1e2a   :  { %7445 = vmatpush3.bf16.msra.mxu1 %v7936_v40 }
0x1e2b   :  { %7446 = vmatprep.subr.bf16.mxu1 %v8450_v63 }
0x1ee4   :  { %v5687_v38 = vpop.f32.mrb[178].mxu1 }
0x1ee5   :  { %v5692_v17 = vmul.f32 %v5687_v38, %v5687_v38  ;;  %v5689_v44 = vpop.f32.mrb[179].mxu1  ;;  %v5698_v59 = vrot.slane %v5687_v38, %v8683_v4 }
0x1ee7   :  { %v5693_v56 = vsub.f32 %v5689_v44, %v5692_v17  ;;  %v5699_v29 = vsub.f32 %v10592_v62, %v5698_v59  ;;  %v5700_v33 = vsub.f32 %v10601_v22, %v5698_v59  ;;  %v5701_v15 = vsub.f32 %v10598_v42, %v5698_v59 }
0x1ee8   :  { %v5702_v19 = vsub.f32 %v10595_v48, %v5698_v59  ;;  %v5703_v6 = vsub.f32 %v10614_v60, %v5698_v59  ;;  %v5704_v8 = vsub.f32 %v10623_v31, %v5698_v59  ;;  %v5705_v3 = vsub.f32 %v10620_v20, %v5698_v59 }
0x1ee9   :  { %v5694_v61 = vmax.f32 %v5693_v56, 0.0  ;;  %v5706_v62 = vsub.f32 %v10617_v11, %v5698_v59  ;;  %v5707_v43 = vsub.f32 %v10638_v41, %v5698_v59  ;;  %v5719_v28 = vmul.f32 %v5718_v21, %v5699_v29 }
0x1eea   :  { %v5708_v45 = vsub.f32 %v10647_v5, %v5698_v59  ;;  %v5709_v37 = vsub.f32 %v10644_v25, %v5698_v59  ;;  %v5710_v22 = vsub.f32 %v10641_v53, %v5698_v59  ;;  %v5711_v42 = vsub.f32 %v10662_v35, %v5698_v59 }
0x1eeb   :  { %v5735_v7 = vadd.f32 1e-05, %v5694_v61  ;;  %v5712_v48 = vsub.f32 %v10671_v54, %v5698_v59  ;;  %v5713_v60 = vsub.f32 %v10668_v51, %v5698_v59  ;;  %v5714_v31 = vsub.f32 %v10665_v27, %v5698_v59 }
0x1eec   :  { %v5720_v20 = vmul.f32 %v5718_v21, %v5700_v33  ;;  %v5721_v46 = vmul.f32 %v5718_v21, %v5701_v15  ;;  %v5722_v11 = vmul.f32 %v5718_v21, %v5702_v19  ;;  %v5723_v57 = vmul.f32 %v5718_v21, %v5703_v6 }
0x1eed   :  { %7964 = vrsqrt.f32 %v5735_v7  ;;  %v5724_v47 = vmul.f32 %v5718_v21, %v5704_v8  ;;  %v5725_v24 = vmul.f32 %v5718_v21, %v5705_v3  ;;  %v5726_v5 = vmul.f32 %v5718_v21, %v5706_v62 }
0x1eee   :  { %v5727_v39 = vmul.f32 %v5718_v21, %v5707_v43  ;;  %v5728_v53 = vmul.f32 %v5718_v21, %v5708_v45  ;;  %v5729_v16 = vmul.f32 %v5718_v21, %v5709_v37  ;;  %v5730_v35 = vmul.f32 %v5718_v21, %v5710_v22 }
0x1eef   :  { %v5731_v36 = vmul.f32 %v5718_v21, %v5711_v42  ;;  %v5732_v23 = vmul.f32 %v5718_v21, %v5712_v48  ;;  %v5733_v54 = vmul.f32 %v5718_v21, %v5713_v60  ;;  %v5734_v51 = vmul.f32 %v5718_v21, %v5714_v31 }
0x1ef7   :  { %v7965_v41 = vpop.eup %7964 }
0x1ef8   :  { %v5740_v25 = vrot.slane %v7965_v41, %v8683_v4 }
0x1efa   :  { %v5741_v50 = vmul.f32 %v5740_v25, %v5719_v28  ;;  %v5742_v27 = vmul.f32 %v5740_v25, %v5720_v20  ;;  %v5743_v9 = vmul.f32 %v5740_v25, %v5721_v46  ;;  %v5744_v1 = vmul.f32 %v5740_v25, %v5722_v11 }
0x1efb   :  { %v5745_v12 = vmul.f32 %v5740_v25, %v5723_v57  ;;  %v5746_v18 = vmul.f32 %v5740_v25, %v5724_v47  ;;  %v5747_v2 = vmul.f32 %v5740_v25, %v5725_v24  ;;  %v5748_v10 = vmul.f32 %v5740_v25, %v5726_v5 }
0x1efc   :  { %v5761_v58 = vadd.f32 %v10709_v32, %v5741_v50  ;;  %v5762_v30 = vadd.f32 %v10709_v32, %v5742_v27  ;;  %v5763_v4 = vadd.f32 %v10709_v32, %v5743_v9  ;;  %v5764_v14 = vadd.f32 %v10709_v32, %v5744_v1  ;;  %v7943_v50 = vld [vmem:[#allocation14 + $0x68] sm:$0xff]   ;;  %v5846_v27 = vpop.permute.xlu0 %5845 }
0x1efd   :  { %v5765_v55 = vadd.f32 %v10709_v32, %v5745_v12  ;;  %v5766_v52 = vadd.f32 %v10709_v32, %v5746_v18  ;;  %v5767_v13 = vadd.f32 %v10709_v32, %v5747_v2  ;;  %v5768_v26 = vadd.f32 %v10709_v32, %v5748_v10 }
0x1efe   :  { %v5777_v49 = vmax.f32 %v5761_v58, 0.0  ;;  %v5778_v34 = vmax.f32 %v5762_v30, 0.0  ;;  %v5779_v0 = vmax.f32 %v5763_v4, 0.0  ;;  %v5780_v40 = vmax.f32 %v5764_v14, 0.0  ;;  %v7944_v58 = vld [vmem:[#allocation14 + $0x70] sm:$0xff]   ;;  %v7945_v30 = vld [vmem:[#allocation14 + $0x78] sm:$0xff]  }
0x1eff   :  { %v5781_v38 = vmax.f32 %v5765_v55, 0.0  ;;  %v5782_v17 = vmax.f32 %v5766_v52, 0.0  ;;  %v5783_v44 = vmax.f32 %v5767_v13, 0.0  ;;  %v5784_v56 = vmax.f32 %v5768_v26, 0.0  ;;  %v6207_v4 = vld [vmem:[%s10790_s9] ss:$0 sm:$0xff] }
0x1f00   :  { %v5794_v61 = vpack.c.bf16 %v5778_v34, %v5777_v49  ;;  %v5795_v7 = vpack.c.bf16 %v5780_v40, %v5779_v0  ;;  %v5749_v59 = vmul.f32 %v5740_v25, %v5727_v39  ;;  %v5750_v29 = vmul.f32 %v5740_v25, %v5728_v53  ;;  %v6216_v0 = vld [vmem:[%s10790_s9 + $0x1] ss:$0 sm:$0xff] }
0x1f01   :  { %v5796_v21 = vpack.c.bf16 %v5782_v17, %v5781_v38  ;;  %v5797_v33 = vpack.c.bf16 %v5784_v56, %v5783_v44  ;;  %v5751_v15 = vmul.f32 %v5740_v25, %v5729_v16  ;;  %v5752_v19 = vmul.f32 %v5740_v25, %v5730_v35  ;;  %v7937_v16 = vld [vmem:[#allocation14 + $0x38] sm:$0xff]   ;;  %v7938_v35 = vld [vmem:[#allocation14 + $0x40] sm:$0xff]  }
0x1f02   :  { %7413 = vmatpush3.bf16.msra.mxu0 %v5794_v61  ;;  %v5769_v6 = vadd.f32 %v10709_v32, %v5749_v59  ;;  %v5770_v8 = vadd.f32 %v10709_v32, %v5750_v29  ;;  %v5753_v3 = vmul.f32 %v5740_v25, %v5731_v36  ;;  %v5754_v62 = vmul.f32 %v5740_v25, %v5732_v23  ;;  %v7939_v36 = vld [vmem:[#allocation14 + $0x48] sm:$0xff]   ;;  %v7940_v23 = vld [vmem:[#allocation14 + $0x50] sm:$0xff]  }
0x1f03   :  { %7414 = vmatprep.subr.bf16.mxu0 %v8450_v63  ;;  %v5771_v43 = vadd.f32 %v10709_v32, %v5751_v15  ;;  %v5772_v28 = vadd.f32 %v10709_v32, %v5752_v19  ;;  %v5755_v45 = vmul.f32 %v5740_v25, %v5733_v54  ;;  %v5756_v37 = vmul.f32 %v5740_v25, %v5734_v51  ;;  %v7941_v54 = vld [vmem:[#allocation14 + $0x58] sm:$0xff]   ;;  %v7942_v51 = vld [vmem:[#allocation14 + $0x60] sm:$0xff]  }
0x1f04   :  { %v5785_v22 = vmax.f32 %v5769_v6, 0.0  ;;  %v5786_v42 = vmax.f32 %v5770_v8, 0.0  ;;  %v5773_v48 = vadd.f32 %v10709_v32, %v5753_v3  ;;  %v5774_v60 = vadd.f32 %v10709_v32, %v5754_v62  ;;  %7447 = vmatpush3.bf16.msra.mxu1 %v7937_v16 }
0x1f05   :  { %v5787_v31 = vmax.f32 %v5771_v43, 0.0  ;;  %v5788_v20 = vmax.f32 %v5772_v28, 0.0  ;;  %v5775_v46 = vadd.f32 %v10709_v32, %v5755_v45  ;;  %v5776_v11 = vadd.f32 %v10709_v32, %v5756_v37  ;;  %v5793_v32 = vld [vmem:[%s10785_s4] sm:$0xf] }
0x1f06   :  { %7415 = vmatpush3.bf16.msra.mxu0 %v5795_v7  ;;  %v5798_v57 = vpack.c.bf16 %v5786_v42, %v5785_v22  ;;  %v5789_v41 = vmax.f32 %v5773_v48, 0.0  ;;  %v5790_v47 = vmax.f32 %v5774_v60, 0.0 }
0x1f07   :  { %7416 = vmatprep.subr.bf16.mxu0 %v8450_v63  ;;  %v5799_v24 = vpack.c.bf16 %v5788_v20, %v5787_v31  ;;  %v5791_v5 = vmax.f32 %v5775_v46, 0.0  ;;  %v5792_v39 = vmax.f32 %v5776_v11, 0.0 }
0x1f08   :  { %v5800_v25 = vpack.c.bf16 %v5790_v47, %v5789_v41 }
0x1f09   :  { %v5801_v53 = vpack.c.bf16 %v5792_v39, %v5791_v5 }
0x1f0a   :  { %7417 = vmatpush3.bf16.msra.mxu0 %v5796_v21 }
0x1f0b   :  { %7418 = vmatprep.subr.bf16.mxu0 %v8450_v63 }
0x1f0e   :  { %7419 = vmatpush3.bf16.msra.mxu0 %v5797_v33 }
0x1f0f   :  { %7420 = vmatprep.subr.bf16.mxu0 %v8450_v63 }
0x1f12   :  { %7421 = vmatpush3.bf16.msra.mxu0 %v5798_v57 }
0x1f13   :  { %7422 = vmatprep.subr.bf16.mxu0 %v8450_v63 }
0x1f16   :  { %7423 = vmatpush3.bf16.msra.mxu0 %v5799_v24 }
0x1f17   :  { %7424 = vmatprep.subr.bf16.mxu0 %v8450_v63 }
0x1f1a   :  { %7425 = vmatpush3.bf16.msra.mxu0 %v5800_v25 }
0x1f1b   :  { %7426 = vmatprep.subr.bf16.mxu0 %v8450_v63 }
0x1f1e   :  { %7427 = vmatpush3.bf16.msra.mxu0 %v5801_v53 }
0x1f1f   :  { %7452 = vmatprep.subr.bf16.mxu0 %v8450_v63 }
0x1f21   :  { %7429 = vmatmul.mubr.bf16.vlgmr.msra.gmra.mrb[64].mxu0 %v5793_v32 }
0x1f22   :  { %7468 = vmatprep.mubr.msk.bf16.mxu0 %vm8452_vm0, %v8450_v63  ;;  %7453 = vmatpush3.bf16.msra.mxu0 %v7938_v35 }
0x1f23   :  { %7454 = vmatprep.subr.bf16.mxu0 %v8450_v63 }
0x1f26   :  { %7455 = vmatpush3.bf16.msra.mxu0 %v7939_v36 }
0x1f27   :  { %7456 = vmatprep.subr.bf16.mxu0 %v8450_v63 }
0x1f2a   :  { %7457 = vmatpush3.bf16.msra.mxu0 %v7940_v23 }
0x1f2b   :  { %7458 = vmatprep.subr.bf16.mxu0 %v8450_v63 }
0x1f2e   :  { %7459 = vmatpush3.bf16.msra.mxu0 %v7941_v54 }
0x1f2f   :  { %7460 = vmatprep.subr.bf16.mxu0 %v8450_v63 }
0x1f32   :  { %7461 = vmatpush3.bf16.msra.mxu0 %v7942_v51 }
0x1f33   :  { %7462 = vmatprep.subr.bf16.mxu0 %v8450_v63 }
0x1f36   :  { %7463 = vmatpush3.bf16.msra.mxu0 %v7943_v50 }
0x1f37   :  { %7464 = vmatprep.subr.bf16.mxu0 %v8450_v63 }
0x1f3a   :  { %7465 = vmatpush3.bf16.msra.mxu0 %v7944_v58 }
0x1f3b   :  { %7466 = vmatprep.subr.bf16.mxu0 %v8450_v63 }
0x1f3e   :  { %7467 = vmatpush3.bf16.msra.mxu0 %v7945_v30 }
0x1ff4   :  { %v5836_v9 = vpop.f32.mrb[64].mxu0 }
0x1ff5   :  { %v5848_v1 = vmul.f32 %v5846_v27, %v5836_v9  ;;  %v7430_v12 = vpop.f32.mrb[65].mxu0 }
0x1ff6   :  { %v5839_v18 = vpop.f32.mrb[66].mxu0 }
0x1ff7   :  { %v5849_v2 = vpack.c.bf16 %v5848_v1, %v5848_v1  ;;  %v7431_v10 = vpop.f32.mrb[67].mxu0 }
0x1ff9   :  { %7449 = vmatmul.mubr.bf16.vlgmr.msra.gmra.mrb[180].mxu1 %v5849_v2 }
0x20cc   :  { %v5953_v14 = vpop.f32.mrb[180].mxu1 }
0x20cd   :  { %v5954_v55 = vadd.f32 %v6207_v4, %v5953_v14  ;;  %v7450_v52 = vpop.f32.mrb[181].mxu1 }
0x20ce   :  { %v5956_v13 = vpop.f32.mrb[182].mxu1 }
0x20cf   :  { %v5959_v26 = vmax.f32 %v5954_v55, 0.0  ;;  %v7451_v49 = vpop.f32.mrb[183].mxu1 }
0x20d1   :  { %v5960_v34 = vpack.c.bf16 %v5959_v26, %v5959_v26 }
0x20d3   :  { %7469 = vmatmul.mubr.bf16.vlgmr.msra.gmra.mrb[68].mxu0 %v5960_v34 }
0x21a6   :  { %v6065_v63 = vpop.f32.mrb[68].mxu0 }
0x21a7   :  { %v6066_v40 = vadd.f32 %v6216_v0, %v6065_v63  ;;  %v7470_v38 = vpop.f32.mrb[69].mxu0 }
0x21a8   :  { %v6068_v17 = vpop.f32.mrb[70].mxu0 }
0x21a9   :  { %6071 = vst [vmem:[#allocation16] sm:$0xff] %v6066_v40  ;;  %v7471_v44 = vpop.f32.mrb[71].mxu0 }
0x21aa   :  { %8415 = shalt.err (!%p8412_p9)
}
0x21ab   :  { %s8416_s9 = scalar_lea.hbm %s10792_s11, 128 }
0x21ac   :  { %p8417_p10 = scmp.ne.s32.totalorder %s10792_s11, %s8416_s9  ;;  %p8420_p11 = scmp.lt.u32.totalorder %s8416_s9, %s10792_s11 }
0x21ae   :  { %p8422_p12 = pnand %p8420_p11, %p8417_p10 }
0x21b0   :  { %8425 = shalt.err (!%p8422_p12)
}
0x21b1   :  { %6081 = dma.vmem_to_hbm [thread:$0]  %s6079_s21, 128, %s10792_s11, [#allocation4]  }
0x21b2   :  { %8436 = dma.done.wait [#allocation4], 128  }
0x21b3   :  { %8437 = vsyncadd [#allocation4], 4294967168 }
0x21b4   :  { %6085 = vsyncpa [#allocation3], 1 }
0x21b5   :  { %6086 = vsyncpa [#allocation7], 1 }
0x21b6   :  { %6087 = vsyncpa [#allocation10], 1 }
0x21b7   :  { %6088 = vsyncpa [#allocation13], 1 }
0x21b8   :  { %6089 = vsyncpa [#allocation4], 1 }
0x21b9   :  { %6090 = vsyncpa [#allocation5], 1 }

</bundles_post_ra>
